<compile_context>
chip_gen: v7x
topology: tpu7x:2x2x1
jax: 0.10.0
libtpu: 0.0.40
codegen_flags: <defaults>
</compile_context>

<pallas_src>
import functools

import jax
import jax.numpy as jnp
from jax.experimental import pallas as pl
from jax.experimental.pallas import tpu as pltpu


# ---------------------------------------------------------------------------
# Fused kernel: conv1+ReLU+pool -> conv2+ReLU+pool -> fc   (one batch element)
# ---------------------------------------------------------------------------

def _cn_fused_kernel(x_ref, w1_ref, b1_ref, w2_ref, b2_ref, wfc_ref, bfc_ref,
                     out_ref, s1_ref, xp2_ref, s2_ref, *,
                     H, W, Cin, C1, C2P, OPAD, K):
    pad = K // 2
    H2, W2 = H // 2, W // 2
    H3, W3 = H // 4, W // 4

    # ---- conv1: 5x5 over the halo'd input, bf16 MXU operands, f32 acc ------
    acc1 = jnp.zeros((H * W, C1), jnp.float32)
    for kh in range(K):
        for kw in range(K):
            patch = x_ref[0, kh:kh + H, kw:kw + W, :].reshape(H * W, Cin)
            acc1 = acc1 + jnp.dot(patch, w1_ref[kh * K + kw],
                                  preferred_element_type=jnp.float32)
    y1 = jnp.maximum(acc1 + b1_ref[...], 0.0)          # (H*W, C1) f32, r = h*W + w
    s1_ref[...] = y1

    # ---- pool1 (2x2): width pairs via sublane-strided loads, height pairs
    # via static block slices; pooled rows land directly in the zero-padded
    # conv2 input scratch (no HBM round trip). ------------------------------
    wp1 = jnp.maximum(s1_ref[pl.ds(0, H * W2, 2), :],
                      s1_ref[pl.ds(1, H * W2, 2), :])   # (H*W2, C1), r = h*W2 + wo
    xp2_ref[...] = jnp.zeros((H2 + 2 * pad, W2 + 2 * pad, C1), jnp.float32)
    for ho in range(H2):
        a = wp1[(2 * ho) * W2:(2 * ho + 1) * W2, :]
        b = wp1[(2 * ho + 1) * W2:(2 * ho + 2) * W2, :]
        xp2_ref[pad + ho, pad:pad + W2, :] = jnp.maximum(a, b)

    # ---- conv2: 5x5 over the padded pooled map (C2 zero-padded to C2P) -----
    acc2 = jnp.zeros((H2 * W2, C2P), jnp.float32)
    for kh in range(K):
        for kw in range(K):
            patch = xp2_ref[kh:kh + H2, kw:kw + W2, :].reshape(H2 * W2, C1)
            acc2 = acc2 + jnp.dot(patch.astype(jnp.bfloat16),
                                  w2_ref[kh * K + kw],
                                  preferred_element_type=jnp.float32)
    y2 = jnp.maximum(acc2 + b2_ref[...], 0.0)           # (H2*W2, C2P) f32
    s2_ref[...] = y2

    # ---- pool2 (2x2) + fc: pooled (wo, c) rows are contracted immediately
    # against the pre-packed (row, c, OPAD) fc weight, accumulating logits. --
    wp2 = jnp.maximum(s2_ref[pl.ds(0, H2 * W3, 2), :],
                      s2_ref[pl.ds(1, H2 * W3, 2), :])  # (H2*W3, C2P)
    accfc = jnp.zeros((1, OPAD), jnp.float32)
    for ho in range(H3):
        a = wp2[(2 * ho) * W3:(2 * ho + 1) * W3, :]
        b = wp2[(2 * ho + 1) * W3:(2 * ho + 2) * W3, :]
        pooled = jnp.maximum(a, b).astype(jnp.bfloat16)  # (W3, C2P)
        for wo in range(W3):
            accfc = accfc + jnp.dot(pooled[wo:wo + 1, :],
                                    wfc_ref[ho * W3 + wo],
                                    preferred_element_type=jnp.float32)
    out_ref[0, :, :] = accfc + bfc_ref[...]


# ---------------------------------------------------------------------------
# Forward pass (single pallas_call, grid over batch)
# ---------------------------------------------------------------------------

def cn_forward(packed, x_nchw):
    # layout plumbing only: NCHW -> NHWC, add the 2-pixel zero halo, cast the
    # MXU operand to bf16 (halves HBM/VMEM bytes; accumulation stays f32).
    x = jnp.transpose(x_nchw, (0, 2, 3, 1)).astype(jnp.float32)
    N, H, W, Cin = x.shape
    K = 5
    pad = K // 2
    xp = jnp.pad(x, ((0, 0), (pad, pad), (pad, pad), (0, 0))).astype(jnp.bfloat16)
    Hp, Wp = H + 2 * pad, W + 2 * pad

    C1 = packed["w1"].shape[-1]
    C2P = packed["w2"].shape[-1]
    OPAD = packed["wfc"].shape[-1]
    H2, W2, H3, W3 = H // 2, W // 2, H // 4, W // 4

    kernel = functools.partial(_cn_fused_kernel, H=H, W=W, Cin=Cin, C1=C1,
                               C2P=C2P, OPAD=OPAD, K=K)

    out_pad = pl.pallas_call(
        kernel,
        out_shape=jax.ShapeDtypeStruct((N, 1, OPAD), jnp.float32),
        grid=(N,),
        in_specs=[
            pl.BlockSpec((1, Hp, Wp, Cin), lambda n: (n, 0, 0, 0)),
            pl.BlockSpec((K * K, Cin, C1), lambda n: (0, 0, 0)),
            pl.BlockSpec((1, C1), lambda n: (0, 0)),
            pl.BlockSpec((K * K, C1, C2P), lambda n: (0, 0, 0)),
            pl.BlockSpec((1, C2P), lambda n: (0, 0)),
            pl.BlockSpec((H3 * W3, C2P, OPAD), lambda n: (0, 0, 0)),
            pl.BlockSpec((1, OPAD), lambda n: (0, 0)),
        ],
        out_specs=pl.BlockSpec((1, 1, OPAD), lambda n: (n, 0, 0)),
        scratch_shapes=[
            pltpu.VMEM((H * W, C1), jnp.float32),                      # conv1 act
            pltpu.VMEM((H2 + 2 * pad, W2 + 2 * pad, C1), jnp.float32),  # padded conv2 in
            pltpu.VMEM((H2 * W2, C2P), jnp.float32),                   # conv2 act
        ],
        compiler_params=pltpu.CompilerParams(
            dimension_semantics=("parallel",)),   # shards batch across v7x's 2 TCs
    )(xp, packed["w1"], packed["b1"], packed["w2"], packed["b2"],
      packed["wfc"], packed["bfc"])

    return out_pad[:, 0, :packed["output_dim"]]


# ---------------------------------------------------------------------------
# One-time weight pre-packing (hoisted out of the forward path)
# ---------------------------------------------------------------------------

def prepack_params(params, input_dims, output_dim):
    H, W, _ = input_dims
    K = 5
    C1 = params["conv1_w"].shape[0]      # 16
    Cin = params["conv1_w"].shape[1]
    C2 = params["conv2_w"].shape[0]      # 6
    C2P = 8                              # pad conv2 channels so fc K = H3*W3*C2P = 128
    OPAD = ((output_dim + 127) // 128) * 128
    H3, W3 = H // 4, W // 4

    # conv weights: torch (O, I, kh, kw) -> (kh*K + kw, I, O), zero-pad conv2 O.
    w1 = jnp.transpose(params["conv1_w"], (2, 3, 1, 0)).reshape(K * K, Cin, C1)
    w2 = jnp.transpose(params["conv2_w"], (2, 3, 1, 0)).reshape(K * K, C1, C2)
    w2 = jnp.pad(w2, ((0, 0), (0, 0), (0, C2P - C2)))
    b1 = params["conv1_b"].reshape(1, C1)
    b2 = jnp.pad(params["conv2_b"], (0, C2P - C2)).reshape(1, C2P)

    # fc: torch flatten order is (c, h, w); kernel feature order is (h*W3+w, c).
    wfc = params["fc1_w"].reshape(output_dim, C2, H3, W3)
    wfc = jnp.transpose(wfc, (2, 3, 1, 0)).reshape(H3 * W3, C2, output_dim)
    wfc = jnp.pad(wfc, ((0, 0), (0, C2P - C2), (0, OPAD - output_dim)))
    bfc = jnp.pad(params["fc1_b"], (0, OPAD - output_dim)).reshape(1, OPAD)

    return {
        "w1": w1.astype(jnp.bfloat16), "b1": b1.astype(jnp.float32),
        "w2": w2.astype(jnp.bfloat16), "b2": b2.astype(jnp.float32),
        "wfc": wfc.astype(jnp.bfloat16), "bfc": bfc.astype(jnp.float32),
        "output_dim": output_dim,
    }


# ---------------------------------------------------------------------------
# Deterministic synthetic parameters (torch-shaped) and example run
# ---------------------------------------------------------------------------

def init_params(key, input_dims, output_dim):
    H, W, Cin = input_dims
    ch, cw = H // 4, W // 4
    k1, k2, k3, k4, k5, k6 = jax.random.split(key, 6)
    scale = 0.1
    return {
        "conv1_w": scale * jax.random.normal(k1, (16, Cin, 5, 5), jnp.float32),
        "conv1_b": scale * jax.random.normal(k2, (16,), jnp.float32),
        "conv2_w": scale * jax.random.normal(k3, (6, 16, 5, 5), jnp.float32),
        "conv2_b": scale * jax.random.normal(k4, (6,), jnp.float32),
        "fc1_w": scale * jax.random.normal(k5, (output_dim, 6 * ch * cw), jnp.float32),
        "fc1_b": scale * jax.random.normal(k6, (output_dim,), jnp.float32),
    }


if __name__ == "__main__":
    input_dims = (16, 16, 4)     # (H, W, C) as used by CN.__init__
    output_dim = 10
    batch = 2

    key = jax.random.PRNGKey(0)
    k_x, k_p = jax.random.split(key)
    x = jax.random.normal(k_x, (batch, input_dims[2], input_dims[0], input_dims[1]),
                          jnp.float32)              # NCHW, like PyTorch
    params = init_params(k_p, input_dims, output_dim)
    packed = prepack_params(params, input_dims, output_dim)

    out = cn_forward(packed, x)
    out = jax.block_until_ready(out)
    assert out.shape == (batch, output_dim), out.shape
    print("KERNEL_OK")
</pallas_src>

<mosaic_0001>
module attributes {stable_mosaic.version = 11 : i64} {
  func.func @_cn_fused_kernel(%arg0: i32, %arg1: memref<1x20x20x4xbf16, #tpu.memory_space<vmem>>, %arg2: memref<25x4x16xbf16, #tpu.memory_space<vmem>>, %arg3: memref<1x16xf32, #tpu.memory_space<vmem>>, %arg4: memref<25x16x8xbf16, #tpu.memory_space<vmem>>, %arg5: memref<1x8xf32, #tpu.memory_space<vmem>>, %arg6: memref<16x8x128xbf16, #tpu.memory_space<vmem>>, %arg7: memref<1x128xf32, #tpu.memory_space<vmem>>, %arg8: memref<1x1x128xf32, #tpu.memory_space<vmem>>, %arg9: memref<256x16xf32, #tpu.memory_space<vmem>>, %arg10: memref<12x12x16xf32, #tpu.memory_space<vmem>>, %arg11: memref<64x8xf32, #tpu.memory_space<vmem>>) attributes {dimension_semantics = [#tpu.dimension_semantics<parallel>], iteration_bounds = array<i64: 2>, scalar_prefetch = 0 : i64, scratch_operands = 3 : i64, tpu.core_type = #tpu.core_type<tc>, window_params = [{transform_indices = @transform_0, window_bounds = array<i64: 1, 20, 20, 4>}, {pipeline_mode = #tpu.pipeline_mode<synchronous>, transform_indices = @transform_1, window_bounds = array<i64: 25, 4, 16>}, {pipeline_mode = #tpu.pipeline_mode<synchronous>, transform_indices = @transform_2, window_bounds = array<i64: 1, 16>}, {pipeline_mode = #tpu.pipeline_mode<synchronous>, transform_indices = @transform_3, window_bounds = array<i64: 25, 16, 8>}, {pipeline_mode = #tpu.pipeline_mode<synchronous>, transform_indices = @transform_4, window_bounds = array<i64: 1, 8>}, {pipeline_mode = #tpu.pipeline_mode<synchronous>, transform_indices = @transform_5, window_bounds = array<i64: 16, 8, 128>}, {pipeline_mode = #tpu.pipeline_mode<synchronous>, transform_indices = @transform_6, window_bounds = array<i64: 1, 128>}, {transform_indices = @transform_7, window_bounds = array<i64: 1, 1, 128>}]} {
    %cst = arith.constant 0.000000e+00 : f32
    %0 = vector.broadcast %cst : f32 to vector<256x16xf32>
    %c0 = arith.constant 0 : index
    %c0_0 = arith.constant 0 : index
    %c0_1 = arith.constant 0 : index
    %c0_2 = arith.constant 0 : index
    %1 = vector.load %arg1[%c0, %c0_0, %c0_1, %c0_2] : memref<1x20x20x4xbf16, #tpu.memory_space<vmem>>, vector<1x16x16x4xbf16>
    %2 = vector.shape_cast %1 : vector<1x16x16x4xbf16> to vector<16x16x4xbf16>
    %3 = vector.shape_cast %2 : vector<16x16x4xbf16> to vector<256x4xbf16>
    %c0_3 = arith.constant 0 : index
    %c0_4 = arith.constant 0 : index
    %c0_5 = arith.constant 0 : index
    %4 = vector.load %arg2[%c0_3, %c0_4, %c0_5] : memref<25x4x16xbf16, #tpu.memory_space<vmem>>, vector<1x4x16xbf16>
    %5 = vector.shape_cast %4 : vector<1x4x16xbf16> to vector<4x16xbf16>
    %cst_6 = arith.constant dense<0.000000e+00> : vector<256x16xf32>
    %6 = tpu.matmul %3, %5, %cst_6 {dimension_numbers = #tpu.dot_dimension_numbers<[1], [0], [0], [1], [0, 0, 1, 1], [], []>} : vector<256x4xbf16>, vector<4x16xbf16>, vector<256x16xf32> -> vector<256x16xf32>
    %7 = arith.addf %0, %6 : vector<256x16xf32>
    %c0_7 = arith.constant 0 : index
    %c0_8 = arith.constant 0 : index
    %c1 = arith.constant 1 : index
    %c0_9 = arith.constant 0 : index
    %8 = vector.load %arg1[%c0_7, %c0_8, %c1, %c0_9] : memref<1x20x20x4xbf16, #tpu.memory_space<vmem>>, vector<1x16x16x4xbf16>
    %9 = vector.shape_cast %8 : vector<1x16x16x4xbf16> to vector<16x16x4xbf16>
    %10 = vector.shape_cast %9 : vector<16x16x4xbf16> to vector<256x4xbf16>
    %c1_10 = arith.constant 1 : index
    %c0_11 = arith.constant 0 : index
    %c0_12 = arith.constant 0 : index
    %11 = vector.load %arg2[%c1_10, %c0_11, %c0_12] : memref<25x4x16xbf16, #tpu.memory_space<vmem>>, vector<1x4x16xbf16>
    %12 = vector.shape_cast %11 : vector<1x4x16xbf16> to vector<4x16xbf16>
    %cst_13 = arith.constant dense<0.000000e+00> : vector<256x16xf32>
    %13 = tpu.matmul %10, %12, %cst_13 {dimension_numbers = #tpu.dot_dimension_numbers<[1], [0], [0], [1], [0, 0, 1, 1], [], []>} : vector<256x4xbf16>, vector<4x16xbf16>, vector<256x16xf32> -> vector<256x16xf32>
    %14 = arith.addf %7, %13 : vector<256x16xf32>
    %c0_14 = arith.constant 0 : index
    %c0_15 = arith.constant 0 : index
    %c2 = arith.constant 2 : index
    %c0_16 = arith.constant 0 : index
    %15 = vector.load %arg1[%c0_14, %c0_15, %c2, %c0_16] : memref<1x20x20x4xbf16, #tpu.memory_space<vmem>>, vector<1x16x16x4xbf16>
    %16 = vector.shape_cast %15 : vector<1x16x16x4xbf16> to vector<16x16x4xbf16>
    %17 = vector.shape_cast %16 : vector<16x16x4xbf16> to vector<256x4xbf16>
    %c2_17 = arith.constant 2 : index
    %c0_18 = arith.constant 0 : index
    %c0_19 = arith.constant 0 : index
    %18 = vector.load %arg2[%c2_17, %c0_18, %c0_19] : memref<25x4x16xbf16, #tpu.memory_space<vmem>>, vector<1x4x16xbf16>
    %19 = vector.shape_cast %18 : vector<1x4x16xbf16> to vector<4x16xbf16>
    %cst_20 = arith.constant dense<0.000000e+00> : vector<256x16xf32>
    %20 = tpu.matmul %17, %19, %cst_20 {dimension_numbers = #tpu.dot_dimension_numbers<[1], [0], [0], [1], [0, 0, 1, 1], [], []>} : vector<256x4xbf16>, vector<4x16xbf16>, vector<256x16xf32> -> vector<256x16xf32>
    %21 = arith.addf %14, %20 : vector<256x16xf32>
    %c0_21 = arith.constant 0 : index
    %c0_22 = arith.constant 0 : index
    %c3 = arith.constant 3 : index
    %c0_23 = arith.constant 0 : index
    %22 = vector.load %arg1[%c0_21, %c0_22, %c3, %c0_23] : memref<1x20x20x4xbf16, #tpu.memory_space<vmem>>, vector<1x16x16x4xbf16>
    %23 = vector.shape_cast %22 : vector<1x16x16x4xbf16> to vector<16x16x4xbf16>
    %24 = vector.shape_cast %23 : vector<16x16x4xbf16> to vector<256x4xbf16>
    %c3_24 = arith.constant 3 : index
    %c0_25 = arith.constant 0 : index
    %c0_26 = arith.constant 0 : index
    %25 = vector.load %arg2[%c3_24, %c0_25, %c0_26] : memref<25x4x16xbf16, #tpu.memory_space<vmem>>, vector<1x4x16xbf16>
    %26 = vector.shape_cast %25 : vector<1x4x16xbf16> to vector<4x16xbf16>
    %cst_27 = arith.constant dense<0.000000e+00> : vector<256x16xf32>
    %27 = tpu.matmul %24, %26, %cst_27 {dimension_numbers = #tpu.dot_dimension_numbers<[1], [0], [0], [1], [0, 0, 1, 1], [], []>} : vector<256x4xbf16>, vector<4x16xbf16>, vector<256x16xf32> -> vector<256x16xf32>
    %28 = arith.addf %21, %27 : vector<256x16xf32>
    %c0_28 = arith.constant 0 : index
    %c0_29 = arith.constant 0 : index
    %c4 = arith.constant 4 : index
    %c0_30 = arith.constant 0 : index
    %29 = vector.load %arg1[%c0_28, %c0_29, %c4, %c0_30] : memref<1x20x20x4xbf16, #tpu.memory_space<vmem>>, vector<1x16x16x4xbf16>
    %30 = vector.shape_cast %29 : vector<1x16x16x4xbf16> to vector<16x16x4xbf16>
    %31 = vector.shape_cast %30 : vector<16x16x4xbf16> to vector<256x4xbf16>
    %c4_31 = arith.constant 4 : index
    %c0_32 = arith.constant 0 : index
    %c0_33 = arith.constant 0 : index
    %32 = vector.load %arg2[%c4_31, %c0_32, %c0_33] : memref<25x4x16xbf16, #tpu.memory_space<vmem>>, vector<1x4x16xbf16>
    %33 = vector.shape_cast %32 : vector<1x4x16xbf16> to vector<4x16xbf16>
    %cst_34 = arith.constant dense<0.000000e+00> : vector<256x16xf32>
    %34 = tpu.matmul %31, %33, %cst_34 {dimension_numbers = #tpu.dot_dimension_numbers<[1], [0], [0], [1], [0, 0, 1, 1], [], []>} : vector<256x4xbf16>, vector<4x16xbf16>, vector<256x16xf32> -> vector<256x16xf32>
    %35 = arith.addf %28, %34 : vector<256x16xf32>
    %c0_35 = arith.constant 0 : index
    %c1_36 = arith.constant 1 : index
    %c0_37 = arith.constant 0 : index
    %c0_38 = arith.constant 0 : index
    %36 = vector.load %arg1[%c0_35, %c1_36, %c0_37, %c0_38] : memref<1x20x20x4xbf16, #tpu.memory_space<vmem>>, vector<1x16x16x4xbf16>
    %37 = vector.shape_cast %36 : vector<1x16x16x4xbf16> to vector<16x16x4xbf16>
    %38 = vector.shape_cast %37 : vector<16x16x4xbf16> to vector<256x4xbf16>
    %c5 = arith.constant 5 : index
    %c0_39 = arith.constant 0 : index
    %c0_40 = arith.constant 0 : index
    %39 = vector.load %arg2[%c5, %c0_39, %c0_40] : memref<25x4x16xbf16, #tpu.memory_space<vmem>>, vector<1x4x16xbf16>
    %40 = vector.shape_cast %39 : vector<1x4x16xbf16> to vector<4x16xbf16>
    %cst_41 = arith.constant dense<0.000000e+00> : vector<256x16xf32>
    %41 = tpu.matmul %38, %40, %cst_41 {dimension_numbers = #tpu.dot_dimension_numbers<[1], [0], [0], [1], [0, 0, 1, 1], [], []>} : vector<256x4xbf16>, vector<4x16xbf16>, vector<256x16xf32> -> vector<256x16xf32>
    %42 = arith.addf %35, %41 : vector<256x16xf32>
    %c0_42 = arith.constant 0 : index
    %c1_43 = arith.constant 1 : index
    %c1_44 = arith.constant 1 : index
    %c0_45 = arith.constant 0 : index
    %43 = vector.load %arg1[%c0_42, %c1_43, %c1_44, %c0_45] : memref<1x20x20x4xbf16, #tpu.memory_space<vmem>>, vector<1x16x16x4xbf16>
    %44 = vector.shape_cast %43 : vector<1x16x16x4xbf16> to vector<16x16x4xbf16>
    %45 = vector.shape_cast %44 : vector<16x16x4xbf16> to vector<256x4xbf16>
    %c6 = arith.constant 6 : index
    %c0_46 = arith.constant 0 : index
    %c0_47 = arith.constant 0 : index
    %46 = vector.load %arg2[%c6, %c0_46, %c0_47] : memref<25x4x16xbf16, #tpu.memory_space<vmem>>, vector<1x4x16xbf16>
    %47 = vector.shape_cast %46 : vector<1x4x16xbf16> to vector<4x16xbf16>
    %cst_48 = arith.constant dense<0.000000e+00> : vector<256x16xf32>
    %48 = tpu.matmul %45, %47, %cst_48 {dimension_numbers = #tpu.dot_dimension_numbers<[1], [0], [0], [1], [0, 0, 1, 1], [], []>} : vector<256x4xbf16>, vector<4x16xbf16>, vector<256x16xf32> -> vector<256x16xf32>
    %49 = arith.addf %42, %48 : vector<256x16xf32>
    %c0_49 = arith.constant 0 : index
    %c1_50 = arith.constant 1 : index
    %c2_51 = arith.constant 2 : index
    %c0_52 = arith.constant 0 : index
    %50 = vector.load %arg1[%c0_49, %c1_50, %c2_51, %c0_52] : memref<1x20x20x4xbf16, #tpu.memory_space<vmem>>, vector<1x16x16x4xbf16>
    %51 = vector.shape_cast %50 : vector<1x16x16x4xbf16> to vector<16x16x4xbf16>
    %52 = vector.shape_cast %51 : vector<16x16x4xbf16> to vector<256x4xbf16>
    %c7 = arith.constant 7 : index
    %c0_53 = arith.constant 0 : index
    %c0_54 = arith.constant 0 : index
    %53 = vector.load %arg2[%c7, %c0_53, %c0_54] : memref<25x4x16xbf16, #tpu.memory_space<vmem>>, vector<1x4x16xbf16>
    %54 = vector.shape_cast %53 : vector<1x4x16xbf16> to vector<4x16xbf16>
    %cst_55 = arith.constant dense<0.000000e+00> : vector<256x16xf32>
    %55 = tpu.matmul %52, %54, %cst_55 {dimension_numbers = #tpu.dot_dimension_numbers<[1], [0], [0], [1], [0, 0, 1, 1], [], []>} : vector<256x4xbf16>, vector<4x16xbf16>, vector<256x16xf32> -> vector<256x16xf32>
    %56 = arith.addf %49, %55 : vector<256x16xf32>
    %c0_56 = arith.constant 0 : index
    %c1_57 = arith.constant 1 : index
    %c3_58 = arith.constant 3 : index
    %c0_59 = arith.constant 0 : index
    %57 = vector.load %arg1[%c0_56, %c1_57, %c3_58, %c0_59] : memref<1x20x20x4xbf16, #tpu.memory_space<vmem>>, vector<1x16x16x4xbf16>
    %58 = vector.shape_cast %57 : vector<1x16x16x4xbf16> to vector<16x16x4xbf16>
    %59 = vector.shape_cast %58 : vector<16x16x4xbf16> to vector<256x4xbf16>
    %c8 = arith.constant 8 : index
    %c0_60 = arith.constant 0 : index
    %c0_61 = arith.constant 0 : index
    %60 = vector.load %arg2[%c8, %c0_60, %c0_61] : memref<25x4x16xbf16, #tpu.memory_space<vmem>>, vector<1x4x16xbf16>
    %61 = vector.shape_cast %60 : vector<1x4x16xbf16> to vector<4x16xbf16>
    %cst_62 = arith.constant dense<0.000000e+00> : vector<256x16xf32>
    %62 = tpu.matmul %59, %61, %cst_62 {dimension_numbers = #tpu.dot_dimension_numbers<[1], [0], [0], [1], [0, 0, 1, 1], [], []>} : vector<256x4xbf16>, vector<4x16xbf16>, vector<256x16xf32> -> vector<256x16xf32>
    %63 = arith.addf %56, %62 : vector<256x16xf32>
    %c0_63 = arith.constant 0 : index
    %c1_64 = arith.constant 1 : index
    %c4_65 = arith.constant 4 : index
    %c0_66 = arith.constant 0 : index
    %64 = vector.load %arg1[%c0_63, %c1_64, %c4_65, %c0_66] : memref<1x20x20x4xbf16, #tpu.memory_space<vmem>>, vector<1x16x16x4xbf16>
    %65 = vector.shape_cast %64 : vector<1x16x16x4xbf16> to vector<16x16x4xbf16>
    %66 = vector.shape_cast %65 : vector<16x16x4xbf16> to vector<256x4xbf16>
    %c9 = arith.constant 9 : index
    %c0_67 = arith.constant 0 : index
    %c0_68 = arith.constant 0 : index
    %67 = vector.load %arg2[%c9, %c0_67, %c0_68] : memref<25x4x16xbf16, #tpu.memory_space<vmem>>, vector<1x4x16xbf16>
    %68 = vector.shape_cast %67 : vector<1x4x16xbf16> to vector<4x16xbf16>
    %cst_69 = arith.constant dense<0.000000e+00> : vector<256x16xf32>
    %69 = tpu.matmul %66, %68, %cst_69 {dimension_numbers = #tpu.dot_dimension_numbers<[1], [0], [0], [1], [0, 0, 1, 1], [], []>} : vector<256x4xbf16>, vector<4x16xbf16>, vector<256x16xf32> -> vector<256x16xf32>
    %70 = arith.addf %63, %69 : vector<256x16xf32>
    %c0_70 = arith.constant 0 : index
    %c2_71 = arith.constant 2 : index
    %c0_72 = arith.constant 0 : index
    %c0_73 = arith.constant 0 : index
    %71 = vector.load %arg1[%c0_70, %c2_71, %c0_72, %c0_73] : memref<1x20x20x4xbf16, #tpu.memory_space<vmem>>, vector<1x16x16x4xbf16>
    %72 = vector.shape_cast %71 : vector<1x16x16x4xbf16> to vector<16x16x4xbf16>
    %73 = vector.shape_cast %72 : vector<16x16x4xbf16> to vector<256x4xbf16>
    %c10 = arith.constant 10 : index
    %c0_74 = arith.constant 0 : index
    %c0_75 = arith.constant 0 : index
    %74 = vector.load %arg2[%c10, %c0_74, %c0_75] : memref<25x4x16xbf16, #tpu.memory_space<vmem>>, vector<1x4x16xbf16>
    %75 = vector.shape_cast %74 : vector<1x4x16xbf16> to vector<4x16xbf16>
    %cst_76 = arith.constant dense<0.000000e+00> : vector<256x16xf32>
    %76 = tpu.matmul %73, %75, %cst_76 {dimension_numbers = #tpu.dot_dimension_numbers<[1], [0], [0], [1], [0, 0, 1, 1], [], []>} : vector<256x4xbf16>, vector<4x16xbf16>, vector<256x16xf32> -> vector<256x16xf32>
    %77 = arith.addf %70, %76 : vector<256x16xf32>
    %c0_77 = arith.constant 0 : index
    %c2_78 = arith.constant 2 : index
    %c1_79 = arith.constant 1 : index
    %c0_80 = arith.constant 0 : index
    %78 = vector.load %arg1[%c0_77, %c2_78, %c1_79, %c0_80] : memref<1x20x20x4xbf16, #tpu.memory_space<vmem>>, vector<1x16x16x4xbf16>
    %79 = vector.shape_cast %78 : vector<1x16x16x4xbf16> to vector<16x16x4xbf16>
    %80 = vector.shape_cast %79 : vector<16x16x4xbf16> to vector<256x4xbf16>
    %c11 = arith.constant 11 : index
    %c0_81 = arith.constant 0 : index
    %c0_82 = arith.constant 0 : index
    %81 = vector.load %arg2[%c11, %c0_81, %c0_82] : memref<25x4x16xbf16, #tpu.memory_space<vmem>>, vector<1x4x16xbf16>
    %82 = vector.shape_cast %81 : vector<1x4x16xbf16> to vector<4x16xbf16>
    %cst_83 = arith.constant dense<0.000000e+00> : vector<256x16xf32>
    %83 = tpu.matmul %80, %82, %cst_83 {dimension_numbers = #tpu.dot_dimension_numbers<[1], [0], [0], [1], [0, 0, 1, 1], [], []>} : vector<256x4xbf16>, vector<4x16xbf16>, vector<256x16xf32> -> vector<256x16xf32>
    %84 = arith.addf %77, %83 : vector<256x16xf32>
    %c0_84 = arith.constant 0 : index
    %c2_85 = arith.constant 2 : index
    %c2_86 = arith.constant 2 : index
    %c0_87 = arith.constant 0 : index
    %85 = vector.load %arg1[%c0_84, %c2_85, %c2_86, %c0_87] : memref<1x20x20x4xbf16, #tpu.memory_space<vmem>>, vector<1x16x16x4xbf16>
    %86 = vector.shape_cast %85 : vector<1x16x16x4xbf16> to vector<16x16x4xbf16>
    %87 = vector.shape_cast %86 : vector<16x16x4xbf16> to vector<256x4xbf16>
    %c12 = arith.constant 12 : index
    %c0_88 = arith.constant 0 : index
    %c0_89 = arith.constant 0 : index
    %88 = vector.load %arg2[%c12, %c0_88, %c0_89] : memref<25x4x16xbf16, #tpu.memory_space<vmem>>, vector<1x4x16xbf16>
    %89 = vector.shape_cast %88 : vector<1x4x16xbf16> to vector<4x16xbf16>
    %cst_90 = arith.constant dense<0.000000e+00> : vector<256x16xf32>
    %90 = tpu.matmul %87, %89, %cst_90 {dimension_numbers = #tpu.dot_dimension_numbers<[1], [0], [0], [1], [0, 0, 1, 1], [], []>} : vector<256x4xbf16>, vector<4x16xbf16>, vector<256x16xf32> -> vector<256x16xf32>
    %91 = arith.addf %84, %90 : vector<256x16xf32>
    %c0_91 = arith.constant 0 : index
    %c2_92 = arith.constant 2 : index
    %c3_93 = arith.constant 3 : index
    %c0_94 = arith.constant 0 : index
    %92 = vector.load %arg1[%c0_91, %c2_92, %c3_93, %c0_94] : memref<1x20x20x4xbf16, #tpu.memory_space<vmem>>, vector<1x16x16x4xbf16>
    %93 = vector.shape_cast %92 : vector<1x16x16x4xbf16> to vector<16x16x4xbf16>
    %94 = vector.shape_cast %93 : vector<16x16x4xbf16> to vector<256x4xbf16>
    %c13 = arith.constant 13 : index
    %c0_95 = arith.constant 0 : index
    %c0_96 = arith.constant 0 : index
    %95 = vector.load %arg2[%c13, %c0_95, %c0_96] : memref<25x4x16xbf16, #tpu.memory_space<vmem>>, vector<1x4x16xbf16>
    %96 = vector.shape_cast %95 : vector<1x4x16xbf16> to vector<4x16xbf16>
    %cst_97 = arith.constant dense<0.000000e+00> : vector<256x16xf32>
    %97 = tpu.matmul %94, %96, %cst_97 {dimension_numbers = #tpu.dot_dimension_numbers<[1], [0], [0], [1], [0, 0, 1, 1], [], []>} : vector<256x4xbf16>, vector<4x16xbf16>, vector<256x16xf32> -> vector<256x16xf32>
    %98 = arith.addf %91, %97 : vector<256x16xf32>
    %c0_98 = arith.constant 0 : index
    %c2_99 = arith.constant 2 : index
    %c4_100 = arith.constant 4 : index
    %c0_101 = arith.constant 0 : index
    %99 = vector.load %arg1[%c0_98, %c2_99, %c4_100, %c0_101] : memref<1x20x20x4xbf16, #tpu.memory_space<vmem>>, vector<1x16x16x4xbf16>
    %100 = vector.shape_cast %99 : vector<1x16x16x4xbf16> to vector<16x16x4xbf16>
    %101 = vector.shape_cast %100 : vector<16x16x4xbf16> to vector<256x4xbf16>
    %c14 = arith.constant 14 : index
    %c0_102 = arith.constant 0 : index
    %c0_103 = arith.constant 0 : index
    %102 = vector.load %arg2[%c14, %c0_102, %c0_103] : memref<25x4x16xbf16, #tpu.memory_space<vmem>>, vector<1x4x16xbf16>
    %103 = vector.shape_cast %102 : vector<1x4x16xbf16> to vector<4x16xbf16>
    %cst_104 = arith.constant dense<0.000000e+00> : vector<256x16xf32>
    %104 = tpu.matmul %101, %103, %cst_104 {dimension_numbers = #tpu.dot_dimension_numbers<[1], [0], [0], [1], [0, 0, 1, 1], [], []>} : vector<256x4xbf16>, vector<4x16xbf16>, vector<256x16xf32> -> vector<256x16xf32>
    %105 = arith.addf %98, %104 : vector<256x16xf32>
    %c0_105 = arith.constant 0 : index
    %c3_106 = arith.constant 3 : index
    %c0_107 = arith.constant 0 : index
    %c0_108 = arith.constant 0 : index
    %106 = vector.load %arg1[%c0_105, %c3_106, %c0_107, %c0_108] : memref<1x20x20x4xbf16, #tpu.memory_space<vmem>>, vector<1x16x16x4xbf16>
    %107 = vector.shape_cast %106 : vector<1x16x16x4xbf16> to vector<16x16x4xbf16>
    %108 = vector.shape_cast %107 : vector<16x16x4xbf16> to vector<256x4xbf16>
    %c15 = arith.constant 15 : index
    %c0_109 = arith.constant 0 : index
    %c0_110 = arith.constant 0 : index
    %109 = vector.load %arg2[%c15, %c0_109, %c0_110] : memref<25x4x16xbf16, #tpu.memory_space<vmem>>, vector<1x4x16xbf16>
    %110 = vector.shape_cast %109 : vector<1x4x16xbf16> to vector<4x16xbf16>
    %cst_111 = arith.constant dense<0.000000e+00> : vector<256x16xf32>
    %111 = tpu.matmul %108, %110, %cst_111 {dimension_numbers = #tpu.dot_dimension_numbers<[1], [0], [0], [1], [0, 0, 1, 1], [], []>} : vector<256x4xbf16>, vector<4x16xbf16>, vector<256x16xf32> -> vector<256x16xf32>
    %112 = arith.addf %105, %111 : vector<256x16xf32>
    %c0_112 = arith.constant 0 : index
    %c3_113 = arith.constant 3 : index
    %c1_114 = arith.constant 1 : index
    %c0_115 = arith.constant 0 : index
    %113 = vector.load %arg1[%c0_112, %c3_113, %c1_114, %c0_115] : memref<1x20x20x4xbf16, #tpu.memory_space<vmem>>, vector<1x16x16x4xbf16>
    %114 = vector.shape_cast %113 : vector<1x16x16x4xbf16> to vector<16x16x4xbf16>
    %115 = vector.shape_cast %114 : vector<16x16x4xbf16> to vector<256x4xbf16>
    %c16 = arith.constant 16 : index
    %c0_116 = arith.constant 0 : index
    %c0_117 = arith.constant 0 : index
    %116 = vector.load %arg2[%c16, %c0_116, %c0_117] : memref<25x4x16xbf16, #tpu.memory_space<vmem>>, vector<1x4x16xbf16>
    %117 = vector.shape_cast %116 : vector<1x4x16xbf16> to vector<4x16xbf16>
    %cst_118 = arith.constant dense<0.000000e+00> : vector<256x16xf32>
    %118 = tpu.matmul %115, %117, %cst_118 {dimension_numbers = #tpu.dot_dimension_numbers<[1], [0], [0], [1], [0, 0, 1, 1], [], []>} : vector<256x4xbf16>, vector<4x16xbf16>, vector<256x16xf32> -> vector<256x16xf32>
    %119 = arith.addf %112, %118 : vector<256x16xf32>
    %c0_119 = arith.constant 0 : index
    %c3_120 = arith.constant 3 : index
    %c2_121 = arith.constant 2 : index
    %c0_122 = arith.constant 0 : index
    %120 = vector.load %arg1[%c0_119, %c3_120, %c2_121, %c0_122] : memref<1x20x20x4xbf16, #tpu.memory_space<vmem>>, vector<1x16x16x4xbf16>
    %121 = vector.shape_cast %120 : vector<1x16x16x4xbf16> to vector<16x16x4xbf16>
    %122 = vector.shape_cast %121 : vector<16x16x4xbf16> to vector<256x4xbf16>
    %c17 = arith.constant 17 : index
    %c0_123 = arith.constant 0 : index
    %c0_124 = arith.constant 0 : index
    %123 = vector.load %arg2[%c17, %c0_123, %c0_124] : memref<25x4x16xbf16, #tpu.memory_space<vmem>>, vector<1x4x16xbf16>
    %124 = vector.shape_cast %123 : vector<1x4x16xbf16> to vector<4x16xbf16>
    %cst_125 = arith.constant dense<0.000000e+00> : vector<256x16xf32>
    %125 = tpu.matmul %122, %124, %cst_125 {dimension_numbers = #tpu.dot_dimension_numbers<[1], [0], [0], [1], [0, 0, 1, 1], [], []>} : vector<256x4xbf16>, vector<4x16xbf16>, vector<256x16xf32> -> vector<256x16xf32>
    %126 = arith.addf %119, %125 : vector<256x16xf32>
    %c0_126 = arith.constant 0 : index
    %c3_127 = arith.constant 3 : index
    %c3_128 = arith.constant 3 : index
    %c0_129 = arith.constant 0 : index
    %127 = vector.load %arg1[%c0_126, %c3_127, %c3_128, %c0_129] : memref<1x20x20x4xbf16, #tpu.memory_space<vmem>>, vector<1x16x16x4xbf16>
    %128 = vector.shape_cast %127 : vector<1x16x16x4xbf16> to vector<16x16x4xbf16>
    %129 = vector.shape_cast %128 : vector<16x16x4xbf16> to vector<256x4xbf16>
    %c18 = arith.constant 18 : index
    %c0_130 = arith.constant 0 : index
    %c0_131 = arith.constant 0 : index
    %130 = vector.load %arg2[%c18, %c0_130, %c0_131] : memref<25x4x16xbf16, #tpu.memory_space<vmem>>, vector<1x4x16xbf16>
    %131 = vector.shape_cast %130 : vector<1x4x16xbf16> to vector<4x16xbf16>
    %cst_132 = arith.constant dense<0.000000e+00> : vector<256x16xf32>
    %132 = tpu.matmul %129, %131, %cst_132 {dimension_numbers = #tpu.dot_dimension_numbers<[1], [0], [0], [1], [0, 0, 1, 1], [], []>} : vector<256x4xbf16>, vector<4x16xbf16>, vector<256x16xf32> -> vector<256x16xf32>
    %133 = arith.addf %126, %132 : vector<256x16xf32>
    %c0_133 = arith.constant 0 : index
    %c3_134 = arith.constant 3 : index
    %c4_135 = arith.constant 4 : index
    %c0_136 = arith.constant 0 : index
    %134 = vector.load %arg1[%c0_133, %c3_134, %c4_135, %c0_136] : memref<1x20x20x4xbf16, #tpu.memory_space<vmem>>, vector<1x16x16x4xbf16>
    %135 = vector.shape_cast %134 : vector<1x16x16x4xbf16> to vector<16x16x4xbf16>
    %136 = vector.shape_cast %135 : vector<16x16x4xbf16> to vector<256x4xbf16>
    %c19 = arith.constant 19 : index
    %c0_137 = arith.constant 0 : index
    %c0_138 = arith.constant 0 : index
    %137 = vector.load %arg2[%c19, %c0_137, %c0_138] : memref<25x4x16xbf16, #tpu.memory_space<vmem>>, vector<1x4x16xbf16>
    %138 = vector.shape_cast %137 : vector<1x4x16xbf16> to vector<4x16xbf16>
    %cst_139 = arith.constant dense<0.000000e+00> : vector<256x16xf32>
    %139 = tpu.matmul %136, %138, %cst_139 {dimension_numbers = #tpu.dot_dimension_numbers<[1], [0], [0], [1], [0, 0, 1, 1], [], []>} : vector<256x4xbf16>, vector<4x16xbf16>, vector<256x16xf32> -> vector<256x16xf32>
    %140 = arith.addf %133, %139 : vector<256x16xf32>
    %c0_140 = arith.constant 0 : index
    %c4_141 = arith.constant 4 : index
    %c0_142 = arith.constant 0 : index
    %c0_143 = arith.constant 0 : index
    %141 = vector.load %arg1[%c0_140, %c4_141, %c0_142, %c0_143] : memref<1x20x20x4xbf16, #tpu.memory_space<vmem>>, vector<1x16x16x4xbf16>
    %142 = vector.shape_cast %141 : vector<1x16x16x4xbf16> to vector<16x16x4xbf16>
    %143 = vector.shape_cast %142 : vector<16x16x4xbf16> to vector<256x4xbf16>
    %c20 = arith.constant 20 : index
    %c0_144 = arith.constant 0 : index
    %c0_145 = arith.constant 0 : index
    %144 = vector.load %arg2[%c20, %c0_144, %c0_145] : memref<25x4x16xbf16, #tpu.memory_space<vmem>>, vector<1x4x16xbf16>
    %145 = vector.shape_cast %144 : vector<1x4x16xbf16> to vector<4x16xbf16>
    %cst_146 = arith.constant dense<0.000000e+00> : vector<256x16xf32>
    %146 = tpu.matmul %143, %145, %cst_146 {dimension_numbers = #tpu.dot_dimension_numbers<[1], [0], [0], [1], [0, 0, 1, 1], [], []>} : vector<256x4xbf16>, vector<4x16xbf16>, vector<256x16xf32> -> vector<256x16xf32>
    %147 = arith.addf %140, %146 : vector<256x16xf32>
    %c0_147 = arith.constant 0 : index
    %c4_148 = arith.constant 4 : index
    %c1_149 = arith.constant 1 : index
    %c0_150 = arith.constant 0 : index
    %148 = vector.load %arg1[%c0_147, %c4_148, %c1_149, %c0_150] : memref<1x20x20x4xbf16, #tpu.memory_space<vmem>>, vector<1x16x16x4xbf16>
    %149 = vector.shape_cast %148 : vector<1x16x16x4xbf16> to vector<16x16x4xbf16>
    %150 = vector.shape_cast %149 : vector<16x16x4xbf16> to vector<256x4xbf16>
    %c21 = arith.constant 21 : index
    %c0_151 = arith.constant 0 : index
    %c0_152 = arith.constant 0 : index
    %151 = vector.load %arg2[%c21, %c0_151, %c0_152] : memref<25x4x16xbf16, #tpu.memory_space<vmem>>, vector<1x4x16xbf16>
    %152 = vector.shape_cast %151 : vector<1x4x16xbf16> to vector<4x16xbf16>
    %cst_153 = arith.constant dense<0.000000e+00> : vector<256x16xf32>
    %153 = tpu.matmul %150, %152, %cst_153 {dimension_numbers = #tpu.dot_dimension_numbers<[1], [0], [0], [1], [0, 0, 1, 1], [], []>} : vector<256x4xbf16>, vector<4x16xbf16>, vector<256x16xf32> -> vector<256x16xf32>
    %154 = arith.addf %147, %153 : vector<256x16xf32>
    %c0_154 = arith.constant 0 : index
    %c4_155 = arith.constant 4 : index
    %c2_156 = arith.constant 2 : index
    %c0_157 = arith.constant 0 : index
    %155 = vector.load %arg1[%c0_154, %c4_155, %c2_156, %c0_157] : memref<1x20x20x4xbf16, #tpu.memory_space<vmem>>, vector<1x16x16x4xbf16>
    %156 = vector.shape_cast %155 : vector<1x16x16x4xbf16> to vector<16x16x4xbf16>
    %157 = vector.shape_cast %156 : vector<16x16x4xbf16> to vector<256x4xbf16>
    %c22 = arith.constant 22 : index
    %c0_158 = arith.constant 0 : index
    %c0_159 = arith.constant 0 : index
    %158 = vector.load %arg2[%c22, %c0_158, %c0_159] : memref<25x4x16xbf16, #tpu.memory_space<vmem>>, vector<1x4x16xbf16>
    %159 = vector.shape_cast %158 : vector<1x4x16xbf16> to vector<4x16xbf16>
    %cst_160 = arith.constant dense<0.000000e+00> : vector<256x16xf32>
    %160 = tpu.matmul %157, %159, %cst_160 {dimension_numbers = #tpu.dot_dimension_numbers<[1], [0], [0], [1], [0, 0, 1, 1], [], []>} : vector<256x4xbf16>, vector<4x16xbf16>, vector<256x16xf32> -> vector<256x16xf32>
    %161 = arith.addf %154, %160 : vector<256x16xf32>
    %c0_161 = arith.constant 0 : index
    %c4_162 = arith.constant 4 : index
    %c3_163 = arith.constant 3 : index
    %c0_164 = arith.constant 0 : index
    %162 = vector.load %arg1[%c0_161, %c4_162, %c3_163, %c0_164] : memref<1x20x20x4xbf16, #tpu.memory_space<vmem>>, vector<1x16x16x4xbf16>
    %163 = vector.shape_cast %162 : vector<1x16x16x4xbf16> to vector<16x16x4xbf16>
    %164 = vector.shape_cast %163 : vector<16x16x4xbf16> to vector<256x4xbf16>
    %c23 = arith.constant 23 : index
    %c0_165 = arith.constant 0 : index
    %c0_166 = arith.constant 0 : index
    %165 = vector.load %arg2[%c23, %c0_165, %c0_166] : memref<25x4x16xbf16, #tpu.memory_space<vmem>>, vector<1x4x16xbf16>
    %166 = vector.shape_cast %165 : vector<1x4x16xbf16> to vector<4x16xbf16>
    %cst_167 = arith.constant dense<0.000000e+00> : vector<256x16xf32>
    %167 = tpu.matmul %164, %166, %cst_167 {dimension_numbers = #tpu.dot_dimension_numbers<[1], [0], [0], [1], [0, 0, 1, 1], [], []>} : vector<256x4xbf16>, vector<4x16xbf16>, vector<256x16xf32> -> vector<256x16xf32>
    %168 = arith.addf %161, %167 : vector<256x16xf32>
    %c0_168 = arith.constant 0 : index
    %c4_169 = arith.constant 4 : index
    %c4_170 = arith.constant 4 : index
    %c0_171 = arith.constant 0 : index
    %169 = vector.load %arg1[%c0_168, %c4_169, %c4_170, %c0_171] : memref<1x20x20x4xbf16, #tpu.memory_space<vmem>>, vector<1x16x16x4xbf16>
    %170 = vector.shape_cast %169 : vector<1x16x16x4xbf16> to vector<16x16x4xbf16>
    %171 = vector.shape_cast %170 : vector<16x16x4xbf16> to vector<256x4xbf16>
    %c24 = arith.constant 24 : index
    %c0_172 = arith.constant 0 : index
    %c0_173 = arith.constant 0 : index
    %172 = vector.load %arg2[%c24, %c0_172, %c0_173] : memref<25x4x16xbf16, #tpu.memory_space<vmem>>, vector<1x4x16xbf16>
    %173 = vector.shape_cast %172 : vector<1x4x16xbf16> to vector<4x16xbf16>
    %cst_174 = arith.constant dense<0.000000e+00> : vector<256x16xf32>
    %174 = tpu.matmul %171, %173, %cst_174 {dimension_numbers = #tpu.dot_dimension_numbers<[1], [0], [0], [1], [0, 0, 1, 1], [], []>} : vector<256x4xbf16>, vector<4x16xbf16>, vector<256x16xf32> -> vector<256x16xf32>
    %175 = arith.addf %168, %174 : vector<256x16xf32>
    %c0_175 = arith.constant 0 : index
    %c0_176 = arith.constant 0 : index
    %176 = vector.load %arg3[%c0_175, %c0_176] : memref<1x16xf32, #tpu.memory_space<vmem>>, vector<1x16xf32>
    %177 = vector.broadcast %176 : vector<1x16xf32> to vector<256x16xf32>
    %178 = arith.addf %175, %177 : vector<256x16xf32>
    %cst_177 = arith.constant 0.000000e+00 : f32
    %179 = vector.broadcast %cst_177 : f32 to vector<256x16xf32>
    %180 = arith.maximumf %178, %179 : vector<256x16xf32>
    %c0_178 = arith.constant 0 : index
    %c0_179 = arith.constant 0 : index
    %181 = vector.load %arg9[%c0_178, %c0_179] : memref<256x16xf32, #tpu.memory_space<vmem>>, vector<256x16xf32>
    tpu.vector_store %arg9[%c0_178, %c0_179], %180 {strides = array<i32>} : memref<256x16xf32, #tpu.memory_space<vmem>>, vector<256x16xf32>,
    %c0_180 = arith.constant 0 : index
    %c0_181 = arith.constant 0 : index
    %182 = tpu.strided_load %arg9[%c0_180, %c0_181] {strides = array<i32: 2, 1>} : memref<256x16xf32, #tpu.memory_space<vmem>>, vector<128x16xf32>
    %c1_182 = arith.constant 1 : index
    %c0_183 = arith.constant 0 : index
    %183 = tpu.strided_load %arg9[%c1_182, %c0_183] {strides = array<i32: 2, 1>} : memref<256x16xf32, #tpu.memory_space<vmem>>, vector<128x16xf32>
    %184 = arith.maximumf %182, %183 : vector<128x16xf32>
    %cst_184 = arith.constant 0.000000e+00 : f32
    %185 = vector.broadcast %cst_184 : f32 to vector<12x12x16xf32>
    %c0_185 = arith.constant 0 : index
    %c0_186 = arith.constant 0 : index
    %c0_187 = arith.constant 0 : index
    %186 = vector.load %arg10[%c0_185, %c0_186, %c0_187] : memref<12x12x16xf32, #tpu.memory_space<vmem>>, vector<12x12x16xf32>
    tpu.vector_store %arg10[%c0_185, %c0_186, %c0_187], %185 {strides = array<i32>} : memref<12x12x16xf32, #tpu.memory_space<vmem>>, vector<12x12x16xf32>,
    %187 = vector.extract_strided_slice %184 {offsets = [0, 0], sizes = [8, 16], strides = [1, 1]} : vector<128x16xf32> to vector<8x16xf32>
    %188 = vector.extract_strided_slice %184 {offsets = [8, 0], sizes = [8, 16], strides = [1, 1]} : vector<128x16xf32> to vector<8x16xf32>
    %189 = arith.maximumf %187, %188 : vector<8x16xf32>
    %c2_188 = arith.constant 2 : index
    %c2_189 = arith.constant 2 : index
    %c0_190 = arith.constant 0 : index
    %190 = vector.load %arg10[%c2_188, %c2_189, %c0_190] : memref<12x12x16xf32, #tpu.memory_space<vmem>>, vector<1x8x16xf32>
    %191 = vector.shape_cast %190 : vector<1x8x16xf32> to vector<8x16xf32>
    %192 = vector.shape_cast %189 : vector<8x16xf32> to vector<1x8x16xf32>
    tpu.vector_store %arg10[%c2_188, %c2_189, %c0_190], %192 {strides = array<i32>} : memref<12x12x16xf32, #tpu.memory_space<vmem>>, vector<1x8x16xf32>,
    %193 = vector.extract_strided_slice %184 {offsets = [16, 0], sizes = [8, 16], strides = [1, 1]} : vector<128x16xf32> to vector<8x16xf32>
    %194 = vector.extract_strided_slice %184 {offsets = [24, 0], sizes = [8, 16], strides = [1, 1]} : vector<128x16xf32> to vector<8x16xf32>
    %195 = arith.maximumf %193, %194 : vector<8x16xf32>
    %c3_191 = arith.constant 3 : index
    %c2_192 = arith.constant 2 : index
    %c0_193 = arith.constant 0 : index
    %196 = vector.load %arg10[%c3_191, %c2_192, %c0_193] : memref<12x12x16xf32, #tpu.memory_space<vmem>>, vector<1x8x16xf32>
    %197 = vector.shape_cast %196 : vector<1x8x16xf32> to vector<8x16xf32>
    %198 = vector.shape_cast %195 : vector<8x16xf32> to vector<1x8x16xf32>
    tpu.vector_store %arg10[%c3_191, %c2_192, %c0_193], %198 {strides = array<i32>} : memref<12x12x16xf32, #tpu.memory_space<vmem>>, vector<1x8x16xf32>,
    %199 = vector.extract_strided_slice %184 {offsets = [32, 0], sizes = [8, 16], strides = [1, 1]} : vector<128x16xf32> to vector<8x16xf32>
    %200 = vector.extract_strided_slice %184 {offsets = [40, 0], sizes = [8, 16], strides = [1, 1]} : vector<128x16xf32> to vector<8x16xf32>
    %201 = arith.maximumf %199, %200 : vector<8x16xf32>
    %c4_194 = arith.constant 4 : index
    %c2_195 = arith.constant 2 : index
    %c0_196 = arith.constant 0 : index
    %202 = vector.load %arg10[%c4_194, %c2_195, %c0_196] : memref<12x12x16xf32, #tpu.memory_space<vmem>>, vector<1x8x16xf32>
    %203 = vector.shape_cast %202 : vector<1x8x16xf32> to vector<8x16xf32>
    %204 = vector.shape_cast %201 : vector<8x16xf32> to vector<1x8x16xf32>
    tpu.vector_store %arg10[%c4_194, %c2_195, %c0_196], %204 {strides = array<i32>} : memref<12x12x16xf32, #tpu.memory_space<vmem>>, vector<1x8x16xf32>,
    %205 = vector.extract_strided_slice %184 {offsets = [48, 0], sizes = [8, 16], strides = [1, 1]} : vector<128x16xf32> to vector<8x16xf32>
    %206 = vector.extract_strided_slice %184 {offsets = [56, 0], sizes = [8, 16], strides = [1, 1]} : vector<128x16xf32> to vector<8x16xf32>
    %207 = arith.maximumf %205, %206 : vector<8x16xf32>
    %c5_197 = arith.constant 5 : index
    %c2_198 = arith.constant 2 : index
    %c0_199 = arith.constant 0 : index
    %208 = vector.load %arg10[%c5_197, %c2_198, %c0_199] : memref<12x12x16xf32, #tpu.memory_space<vmem>>, vector<1x8x16xf32>
    %209 = vector.shape_cast %208 : vector<1x8x16xf32> to vector<8x16xf32>
    %210 = vector.shape_cast %207 : vector<8x16xf32> to vector<1x8x16xf32>
    tpu.vector_store %arg10[%c5_197, %c2_198, %c0_199], %210 {strides = array<i32>} : memref<12x12x16xf32, #tpu.memory_space<vmem>>, vector<1x8x16xf32>,
    %211 = vector.extract_strided_slice %184 {offsets = [64, 0], sizes = [8, 16], strides = [1, 1]} : vector<128x16xf32> to vector<8x16xf32>
    %212 = vector.extract_strided_slice %184 {offsets = [72, 0], sizes = [8, 16], strides = [1, 1]} : vector<128x16xf32> to vector<8x16xf32>
    %213 = arith.maximumf %211, %212 : vector<8x16xf32>
    %c6_200 = arith.constant 6 : index
    %c2_201 = arith.constant 2 : index
    %c0_202 = arith.constant 0 : index
    %214 = vector.load %arg10[%c6_200, %c2_201, %c0_202] : memref<12x12x16xf32, #tpu.memory_space<vmem>>, vector<1x8x16xf32>
    %215 = vector.shape_cast %214 : vector<1x8x16xf32> to vector<8x16xf32>
    %216 = vector.shape_cast %213 : vector<8x16xf32> to vector<1x8x16xf32>
    tpu.vector_store %arg10[%c6_200, %c2_201, %c0_202], %216 {strides = array<i32>} : memref<12x12x16xf32, #tpu.memory_space<vmem>>, vector<1x8x16xf32>,
    %217 = vector.extract_strided_slice %184 {offsets = [80, 0], sizes = [8, 16], strides = [1, 1]} : vector<128x16xf32> to vector<8x16xf32>
    %218 = vector.extract_strided_slice %184 {offsets = [88, 0], sizes = [8, 16], strides = [1, 1]} : vector<128x16xf32> to vector<8x16xf32>
    %219 = arith.maximumf %217, %218 : vector<8x16xf32>
    %c7_203 = arith.constant 7 : index
    %c2_204 = arith.constant 2 : index
    %c0_205 = arith.constant 0 : index
    %220 = vector.load %arg10[%c7_203, %c2_204, %c0_205] : memref<12x12x16xf32, #tpu.memory_space<vmem>>, vector<1x8x16xf32>
    %221 = vector.shape_cast %220 : vector<1x8x16xf32> to vector<8x16xf32>
    %222 = vector.shape_cast %219 : vector<8x16xf32> to vector<1x8x16xf32>
    tpu.vector_store %arg10[%c7_203, %c2_204, %c0_205], %222 {strides = array<i32>} : memref<12x12x16xf32, #tpu.memory_space<vmem>>, vector<1x8x16xf32>,
    %223 = vector.extract_strided_slice %184 {offsets = [96, 0], sizes = [8, 16], strides = [1, 1]} : vector<128x16xf32> to vector<8x16xf32>
    %224 = vector.extract_strided_slice %184 {offsets = [104, 0], sizes = [8, 16], strides = [1, 1]} : vector<128x16xf32> to vector<8x16xf32>
    %225 = arith.maximumf %223, %224 : vector<8x16xf32>
    %c8_206 = arith.constant 8 : index
    %c2_207 = arith.constant 2 : index
    %c0_208 = arith.constant 0 : index
    %226 = vector.load %arg10[%c8_206, %c2_207, %c0_208] : memref<12x12x16xf32, #tpu.memory_space<vmem>>, vector<1x8x16xf32>
    %227 = vector.shape_cast %226 : vector<1x8x16xf32> to vector<8x16xf32>
    %228 = vector.shape_cast %225 : vector<8x16xf32> to vector<1x8x16xf32>
    tpu.vector_store %arg10[%c8_206, %c2_207, %c0_208], %228 {strides = array<i32>} : memref<12x12x16xf32, #tpu.memory_space<vmem>>, vector<1x8x16xf32>,
    %229 = vector.extract_strided_slice %184 {offsets = [112, 0], sizes = [8, 16], strides = [1, 1]} : vector<128x16xf32> to vector<8x16xf32>
    %230 = vector.extract_strided_slice %184 {offsets = [120, 0], sizes = [8, 16], strides = [1, 1]} : vector<128x16xf32> to vector<8x16xf32>
    %231 = arith.maximumf %229, %230 : vector<8x16xf32>
    %c9_209 = arith.constant 9 : index
    %c2_210 = arith.constant 2 : index
    %c0_211 = arith.constant 0 : index
    %232 = vector.load %arg10[%c9_209, %c2_210, %c0_211] : memref<12x12x16xf32, #tpu.memory_space<vmem>>, vector<1x8x16xf32>
    %233 = vector.shape_cast %232 : vector<1x8x16xf32> to vector<8x16xf32>
    %234 = vector.shape_cast %231 : vector<8x16xf32> to vector<1x8x16xf32>
    tpu.vector_store %arg10[%c9_209, %c2_210, %c0_211], %234 {strides = array<i32>} : memref<12x12x16xf32, #tpu.memory_space<vmem>>, vector<1x8x16xf32>,
    %cst_212 = arith.constant 0.000000e+00 : f32
    %235 = vector.broadcast %cst_212 : f32 to vector<64x8xf32>
    %c0_213 = arith.constant 0 : index
    %c0_214 = arith.constant 0 : index
    %c0_215 = arith.constant 0 : index
    %236 = vector.load %arg10[%c0_213, %c0_214, %c0_215] : memref<12x12x16xf32, #tpu.memory_space<vmem>>, vector<8x8x16xf32>
    %237 = vector.shape_cast %236 : vector<8x8x16xf32> to vector<64x16xf32>
    %238 = arith.truncf %237 : vector<64x16xf32> to vector<64x16xbf16>
    %c0_216 = arith.constant 0 : index
    %c0_217 = arith.constant 0 : index
    %c0_218 = arith.constant 0 : index
    %239 = vector.load %arg4[%c0_216, %c0_217, %c0_218] : memref<25x16x8xbf16, #tpu.memory_space<vmem>>, vector<1x16x8xbf16>
    %240 = vector.shape_cast %239 : vector<1x16x8xbf16> to vector<16x8xbf16>
    %cst_219 = arith.constant dense<0.000000e+00> : vector<64x8xf32>
    %241 = tpu.matmul %238, %240, %cst_219 {dimension_numbers = #tpu.dot_dimension_numbers<[1], [0], [0], [1], [0, 0, 1, 1], [], []>} : vector<64x16xbf16>, vector<16x8xbf16>, vector<64x8xf32> -> vector<64x8xf32>
    %242 = arith.addf %235, %241 : vector<64x8xf32>
    %c0_220 = arith.constant 0 : index
    %c1_221 = arith.constant 1 : index
    %c0_222 = arith.constant 0 : index
    %243 = vector.load %arg10[%c0_220, %c1_221, %c0_222] : memref<12x12x16xf32, #tpu.memory_space<vmem>>, vector<8x8x16xf32>
    %244 = vector.shape_cast %243 : vector<8x8x16xf32> to vector<64x16xf32>
    %245 = arith.truncf %244 : vector<64x16xf32> to vector<64x16xbf16>
    %c1_223 = arith.constant 1 : index
    %c0_224 = arith.constant 0 : index
    %c0_225 = arith.constant 0 : index
    %246 = vector.load %arg4[%c1_223, %c0_224, %c0_225] : memref<25x16x8xbf16, #tpu.memory_space<vmem>>, vector<1x16x8xbf16>
    %247 = vector.shape_cast %246 : vector<1x16x8xbf16> to vector<16x8xbf16>
    %cst_226 = arith.constant dense<0.000000e+00> : vector<64x8xf32>
    %248 = tpu.matmul %245, %247, %cst_226 {dimension_numbers = #tpu.dot_dimension_numbers<[1], [0], [0], [1], [0, 0, 1, 1], [], []>} : vector<64x16xbf16>, vector<16x8xbf16>, vector<64x8xf32> -> vector<64x8xf32>
    %249 = arith.addf %242, %248 : vector<64x8xf32>
    %c0_227 = arith.constant 0 : index
    %c2_228 = arith.constant 2 : index
    %c0_229 = arith.constant 0 : index
    %250 = vector.load %arg10[%c0_227, %c2_228, %c0_229] : memref<12x12x16xf32, #tpu.memory_space<vmem>>, vector<8x8x16xf32>
    %251 = vector.shape_cast %250 : vector<8x8x16xf32> to vector<64x16xf32>
    %252 = arith.truncf %251 : vector<64x16xf32> to vector<64x16xbf16>
    %c2_230 = arith.constant 2 : index
    %c0_231 = arith.constant 0 : index
    %c0_232 = arith.constant 0 : index
    %253 = vector.load %arg4[%c2_230, %c0_231, %c0_232] : memref<25x16x8xbf16, #tpu.memory_space<vmem>>, vector<1x16x8xbf16>
    %254 = vector.shape_cast %253 : vector<1x16x8xbf16> to vector<16x8xbf16>
    %cst_233 = arith.constant dense<0.000000e+00> : vector<64x8xf32>
    %255 = tpu.matmul %252, %254, %cst_233 {dimension_numbers = #tpu.dot_dimension_numbers<[1], [0], [0], [1], [0, 0, 1, 1], [], []>} : vector<64x16xbf16>, vector<16x8xbf16>, vector<64x8xf32> -> vector<64x8xf32>
    %256 = arith.addf %249, %255 : vector<64x8xf32>
    %c0_234 = arith.constant 0 : index
    %c3_235 = arith.constant 3 : index
    %c0_236 = arith.constant 0 : index
    %257 = vector.load %arg10[%c0_234, %c3_235, %c0_236] : memref<12x12x16xf32, #tpu.memory_space<vmem>>, vector<8x8x16xf32>
    %258 = vector.shape_cast %257 : vector<8x8x16xf32> to vector<64x16xf32>
    %259 = arith.truncf %258 : vector<64x16xf32> to vector<64x16xbf16>
    %c3_237 = arith.constant 3 : index
    %c0_238 = arith.constant 0 : index
    %c0_239 = arith.constant 0 : index
    %260 = vector.load %arg4[%c3_237, %c0_238, %c0_239] : memref<25x16x8xbf16, #tpu.memory_space<vmem>>, vector<1x16x8xbf16>
    %261 = vector.shape_cast %260 : vector<1x16x8xbf16> to vector<16x8xbf16>
    %cst_240 = arith.constant dense<0.000000e+00> : vector<64x8xf32>
    %262 = tpu.matmul %259, %261, %cst_240 {dimension_numbers = #tpu.dot_dimension_numbers<[1], [0], [0], [1], [0, 0, 1, 1], [], []>} : vector<64x16xbf16>, vector<16x8xbf16>, vector<64x8xf32> -> vector<64x8xf32>
    %263 = arith.addf %256, %262 : vector<64x8xf32>
    %c0_241 = arith.constant 0 : index
    %c4_242 = arith.constant 4 : index
    %c0_243 = arith.constant 0 : index
    %264 = vector.load %arg10[%c0_241, %c4_242, %c0_243] : memref<12x12x16xf32, #tpu.memory_space<vmem>>, vector<8x8x16xf32>
    %265 = vector.shape_cast %264 : vector<8x8x16xf32> to vector<64x16xf32>
    %266 = arith.truncf %265 : vector<64x16xf32> to vector<64x16xbf16>
    %c4_244 = arith.constant 4 : index
    %c0_245 = arith.constant 0 : index
    %c0_246 = arith.constant 0 : index
    %267 = vector.load %arg4[%c4_244, %c0_245, %c0_246] : memref<25x16x8xbf16, #tpu.memory_space<vmem>>, vector<1x16x8xbf16>
    %268 = vector.shape_cast %267 : vector<1x16x8xbf16> to vector<16x8xbf16>
    %cst_247 = arith.constant dense<0.000000e+00> : vector<64x8xf32>
    %269 = tpu.matmul %266, %268, %cst_247 {dimension_numbers = #tpu.dot_dimension_numbers<[1], [0], [0], [1], [0, 0, 1, 1], [], []>} : vector<64x16xbf16>, vector<16x8xbf16>, vector<64x8xf32> -> vector<64x8xf32>
    %270 = arith.addf %263, %269 : vector<64x8xf32>
    %c1_248 = arith.constant 1 : index
    %c0_249 = arith.constant 0 : index
    %c0_250 = arith.constant 0 : index
    %271 = vector.load %arg10[%c1_248, %c0_249, %c0_250] : memref<12x12x16xf32, #tpu.memory_space<vmem>>, vector<8x8x16xf32>
    %272 = vector.shape_cast %271 : vector<8x8x16xf32> to vector<64x16xf32>
    %273 = arith.truncf %272 : vector<64x16xf32> to vector<64x16xbf16>
    %c5_251 = arith.constant 5 : index
    %c0_252 = arith.constant 0 : index
    %c0_253 = arith.constant 0 : index
    %274 = vector.load %arg4[%c5_251, %c0_252, %c0_253] : memref<25x16x8xbf16, #tpu.memory_space<vmem>>, vector<1x16x8xbf16>
    %275 = vector.shape_cast %274 : vector<1x16x8xbf16> to vector<16x8xbf16>
    %cst_254 = arith.constant dense<0.000000e+00> : vector<64x8xf32>
    %276 = tpu.matmul %273, %275, %cst_254 {dimension_numbers = #tpu.dot_dimension_numbers<[1], [0], [0], [1], [0, 0, 1, 1], [], []>} : vector<64x16xbf16>, vector<16x8xbf16>, vector<64x8xf32> -> vector<64x8xf32>
    %277 = arith.addf %270, %276 : vector<64x8xf32>
    %c1_255 = arith.constant 1 : index
    %c1_256 = arith.constant 1 : index
    %c0_257 = arith.constant 0 : index
    %278 = vector.load %arg10[%c1_255, %c1_256, %c0_257] : memref<12x12x16xf32, #tpu.memory_space<vmem>>, vector<8x8x16xf32>
    %279 = vector.shape_cast %278 : vector<8x8x16xf32> to vector<64x16xf32>
    %280 = arith.truncf %279 : vector<64x16xf32> to vector<64x16xbf16>
    %c6_258 = arith.constant 6 : index
    %c0_259 = arith.constant 0 : index
    %c0_260 = arith.constant 0 : index
    %281 = vector.load %arg4[%c6_258, %c0_259, %c0_260] : memref<25x16x8xbf16, #tpu.memory_space<vmem>>, vector<1x16x8xbf16>
    %282 = vector.shape_cast %281 : vector<1x16x8xbf16> to vector<16x8xbf16>
    %cst_261 = arith.constant dense<0.000000e+00> : vector<64x8xf32>
    %283 = tpu.matmul %280, %282, %cst_261 {dimension_numbers = #tpu.dot_dimension_numbers<[1], [0], [0], [1], [0, 0, 1, 1], [], []>} : vector<64x16xbf16>, vector<16x8xbf16>, vector<64x8xf32> -> vector<64x8xf32>
    %284 = arith.addf %277, %283 : vector<64x8xf32>
    %c1_262 = arith.constant 1 : index
    %c2_263 = arith.constant 2 : index
    %c0_264 = arith.constant 0 : index
    %285 = vector.load %arg10[%c1_262, %c2_263, %c0_264] : memref<12x12x16xf32, #tpu.memory_space<vmem>>, vector<8x8x16xf32>
    %286 = vector.shape_cast %285 : vector<8x8x16xf32> to vector<64x16xf32>
    %287 = arith.truncf %286 : vector<64x16xf32> to vector<64x16xbf16>
    %c7_265 = arith.constant 7 : index
    %c0_266 = arith.constant 0 : index
    %c0_267 = arith.constant 0 : index
    %288 = vector.load %arg4[%c7_265, %c0_266, %c0_267] : memref<25x16x8xbf16, #tpu.memory_space<vmem>>, vector<1x16x8xbf16>
    %289 = vector.shape_cast %288 : vector<1x16x8xbf16> to vector<16x8xbf16>
    %cst_268 = arith.constant dense<0.000000e+00> : vector<64x8xf32>
    %290 = tpu.matmul %287, %289, %cst_268 {dimension_numbers = #tpu.dot_dimension_numbers<[1], [0], [0], [1], [0, 0, 1, 1], [], []>} : vector<64x16xbf16>, vector<16x8xbf16>, vector<64x8xf32> -> vector<64x8xf32>
    %291 = arith.addf %284, %290 : vector<64x8xf32>
    %c1_269 = arith.constant 1 : index
    %c3_270 = arith.constant 3 : index
    %c0_271 = arith.constant 0 : index
    %292 = vector.load %arg10[%c1_269, %c3_270, %c0_271] : memref<12x12x16xf32, #tpu.memory_space<vmem>>, vector<8x8x16xf32>
    %293 = vector.shape_cast %292 : vector<8x8x16xf32> to vector<64x16xf32>
    %294 = arith.truncf %293 : vector<64x16xf32> to vector<64x16xbf16>
    %c8_272 = arith.constant 8 : index
    %c0_273 = arith.constant 0 : index
    %c0_274 = arith.constant 0 : index
    %295 = vector.load %arg4[%c8_272, %c0_273, %c0_274] : memref<25x16x8xbf16, #tpu.memory_space<vmem>>, vector<1x16x8xbf16>
    %296 = vector.shape_cast %295 : vector<1x16x8xbf16> to vector<16x8xbf16>
    %cst_275 = arith.constant dense<0.000000e+00> : vector<64x8xf32>
    %297 = tpu.matmul %294, %296, %cst_275 {dimension_numbers = #tpu.dot_dimension_numbers<[1], [0], [0], [1], [0, 0, 1, 1], [], []>} : vector<64x16xbf16>, vector<16x8xbf16>, vector<64x8xf32> -> vector<64x8xf32>
    %298 = arith.addf %291, %297 : vector<64x8xf32>
    %c1_276 = arith.constant 1 : index
    %c4_277 = arith.constant 4 : index
    %c0_278 = arith.constant 0 : index
    %299 = vector.load %arg10[%c1_276, %c4_277, %c0_278] : memref<12x12x16xf32, #tpu.memory_space<vmem>>, vector<8x8x16xf32>
    %300 = vector.shape_cast %299 : vector<8x8x16xf32> to vector<64x16xf32>
    %301 = arith.truncf %300 : vector<64x16xf32> to vector<64x16xbf16>
    %c9_279 = arith.constant 9 : index
    %c0_280 = arith.constant 0 : index
    %c0_281 = arith.constant 0 : index
    %302 = vector.load %arg4[%c9_279, %c0_280, %c0_281] : memref<25x16x8xbf16, #tpu.memory_space<vmem>>, vector<1x16x8xbf16>
    %303 = vector.shape_cast %302 : vector<1x16x8xbf16> to vector<16x8xbf16>
    %cst_282 = arith.constant dense<0.000000e+00> : vector<64x8xf32>
    %304 = tpu.matmul %301, %303, %cst_282 {dimension_numbers = #tpu.dot_dimension_numbers<[1], [0], [0], [1], [0, 0, 1, 1], [], []>} : vector<64x16xbf16>, vector<16x8xbf16>, vector<64x8xf32> -> vector<64x8xf32>
    %305 = arith.addf %298, %304 : vector<64x8xf32>
    %c2_283 = arith.constant 2 : index
    %c0_284 = arith.constant 0 : index
    %c0_285 = arith.constant 0 : index
    %306 = vector.load %arg10[%c2_283, %c0_284, %c0_285] : memref<12x12x16xf32, #tpu.memory_space<vmem>>, vector<8x8x16xf32>
    %307 = vector.shape_cast %306 : vector<8x8x16xf32> to vector<64x16xf32>
    %308 = arith.truncf %307 : vector<64x16xf32> to vector<64x16xbf16>
    %c10_286 = arith.constant 10 : index
    %c0_287 = arith.constant 0 : index
    %c0_288 = arith.constant 0 : index
    %309 = vector.load %arg4[%c10_286, %c0_287, %c0_288] : memref<25x16x8xbf16, #tpu.memory_space<vmem>>, vector<1x16x8xbf16>
    %310 = vector.shape_cast %309 : vector<1x16x8xbf16> to vector<16x8xbf16>
    %cst_289 = arith.constant dense<0.000000e+00> : vector<64x8xf32>
    %311 = tpu.matmul %308, %310, %cst_289 {dimension_numbers = #tpu.dot_dimension_numbers<[1], [0], [0], [1], [0, 0, 1, 1], [], []>} : vector<64x16xbf16>, vector<16x8xbf16>, vector<64x8xf32> -> vector<64x8xf32>
    %312 = arith.addf %305, %311 : vector<64x8xf32>
    %c2_290 = arith.constant 2 : index
    %c1_291 = arith.constant 1 : index
    %c0_292 = arith.constant 0 : index
    %313 = vector.load %arg10[%c2_290, %c1_291, %c0_292] : memref<12x12x16xf32, #tpu.memory_space<vmem>>, vector<8x8x16xf32>
    %314 = vector.shape_cast %313 : vector<8x8x16xf32> to vector<64x16xf32>
    %315 = arith.truncf %314 : vector<64x16xf32> to vector<64x16xbf16>
    %c11_293 = arith.constant 11 : index
    %c0_294 = arith.constant 0 : index
    %c0_295 = arith.constant 0 : index
    %316 = vector.load %arg4[%c11_293, %c0_294, %c0_295] : memref<25x16x8xbf16, #tpu.memory_space<vmem>>, vector<1x16x8xbf16>
    %317 = vector.shape_cast %316 : vector<1x16x8xbf16> to vector<16x8xbf16>
    %cst_296 = arith.constant dense<0.000000e+00> : vector<64x8xf32>
    %318 = tpu.matmul %315, %317, %cst_296 {dimension_numbers = #tpu.dot_dimension_numbers<[1], [0], [0], [1], [0, 0, 1, 1], [], []>} : vector<64x16xbf16>, vector<16x8xbf16>, vector<64x8xf32> -> vector<64x8xf32>
    %319 = arith.addf %312, %318 : vector<64x8xf32>
    %c2_297 = arith.constant 2 : index
    %c2_298 = arith.constant 2 : index
    %c0_299 = arith.constant 0 : index
    %320 = vector.load %arg10[%c2_297, %c2_298, %c0_299] : memref<12x12x16xf32, #tpu.memory_space<vmem>>, vector<8x8x16xf32>
    %321 = vector.shape_cast %320 : vector<8x8x16xf32> to vector<64x16xf32>
    %322 = arith.truncf %321 : vector<64x16xf32> to vector<64x16xbf16>
    %c12_300 = arith.constant 12 : index
    %c0_301 = arith.constant 0 : index
    %c0_302 = arith.constant 0 : index
    %323 = vector.load %arg4[%c12_300, %c0_301, %c0_302] : memref<25x16x8xbf16, #tpu.memory_space<vmem>>, vector<1x16x8xbf16>
    %324 = vector.shape_cast %323 : vector<1x16x8xbf16> to vector<16x8xbf16>
    %cst_303 = arith.constant dense<0.000000e+00> : vector<64x8xf32>
    %325 = tpu.matmul %322, %324, %cst_303 {dimension_numbers = #tpu.dot_dimension_numbers<[1], [0], [0], [1], [0, 0, 1, 1], [], []>} : vector<64x16xbf16>, vector<16x8xbf16>, vector<64x8xf32> -> vector<64x8xf32>
    %326 = arith.addf %319, %325 : vector<64x8xf32>
    %c2_304 = arith.constant 2 : index
    %c3_305 = arith.constant 3 : index
    %c0_306 = arith.constant 0 : index
    %327 = vector.load %arg10[%c2_304, %c3_305, %c0_306] : memref<12x12x16xf32, #tpu.memory_space<vmem>>, vector<8x8x16xf32>
    %328 = vector.shape_cast %327 : vector<8x8x16xf32> to vector<64x16xf32>
    %329 = arith.truncf %328 : vector<64x16xf32> to vector<64x16xbf16>
    %c13_307 = arith.constant 13 : index
    %c0_308 = arith.constant 0 : index
    %c0_309 = arith.constant 0 : index
    %330 = vector.load %arg4[%c13_307, %c0_308, %c0_309] : memref<25x16x8xbf16, #tpu.memory_space<vmem>>, vector<1x16x8xbf16>
    %331 = vector.shape_cast %330 : vector<1x16x8xbf16> to vector<16x8xbf16>
    %cst_310 = arith.constant dense<0.000000e+00> : vector<64x8xf32>
    %332 = tpu.matmul %329, %331, %cst_310 {dimension_numbers = #tpu.dot_dimension_numbers<[1], [0], [0], [1], [0, 0, 1, 1], [], []>} : vector<64x16xbf16>, vector<16x8xbf16>, vector<64x8xf32> -> vector<64x8xf32>
    %333 = arith.addf %326, %332 : vector<64x8xf32>
    %c2_311 = arith.constant 2 : index
    %c4_312 = arith.constant 4 : index
    %c0_313 = arith.constant 0 : index
    %334 = vector.load %arg10[%c2_311, %c4_312, %c0_313] : memref<12x12x16xf32, #tpu.memory_space<vmem>>, vector<8x8x16xf32>
    %335 = vector.shape_cast %334 : vector<8x8x16xf32> to vector<64x16xf32>
    %336 = arith.truncf %335 : vector<64x16xf32> to vector<64x16xbf16>
    %c14_314 = arith.constant 14 : index
    %c0_315 = arith.constant 0 : index
    %c0_316 = arith.constant 0 : index
    %337 = vector.load %arg4[%c14_314, %c0_315, %c0_316] : memref<25x16x8xbf16, #tpu.memory_space<vmem>>, vector<1x16x8xbf16>
    %338 = vector.shape_cast %337 : vector<1x16x8xbf16> to vector<16x8xbf16>
    %cst_317 = arith.constant dense<0.000000e+00> : vector<64x8xf32>
    %339 = tpu.matmul %336, %338, %cst_317 {dimension_numbers = #tpu.dot_dimension_numbers<[1], [0], [0], [1], [0, 0, 1, 1], [], []>} : vector<64x16xbf16>, vector<16x8xbf16>, vector<64x8xf32> -> vector<64x8xf32>
    %340 = arith.addf %333, %339 : vector<64x8xf32>
    %c3_318 = arith.constant 3 : index
    %c0_319 = arith.constant 0 : index
    %c0_320 = arith.constant 0 : index
    %341 = vector.load %arg10[%c3_318, %c0_319, %c0_320] : memref<12x12x16xf32, #tpu.memory_space<vmem>>, vector<8x8x16xf32>
    %342 = vector.shape_cast %341 : vector<8x8x16xf32> to vector<64x16xf32>
    %343 = arith.truncf %342 : vector<64x16xf32> to vector<64x16xbf16>
    %c15_321 = arith.constant 15 : index
    %c0_322 = arith.constant 0 : index
    %c0_323 = arith.constant 0 : index
    %344 = vector.load %arg4[%c15_321, %c0_322, %c0_323] : memref<25x16x8xbf16, #tpu.memory_space<vmem>>, vector<1x16x8xbf16>
    %345 = vector.shape_cast %344 : vector<1x16x8xbf16> to vector<16x8xbf16>
    %cst_324 = arith.constant dense<0.000000e+00> : vector<64x8xf32>
    %346 = tpu.matmul %343, %345, %cst_324 {dimension_numbers = #tpu.dot_dimension_numbers<[1], [0], [0], [1], [0, 0, 1, 1], [], []>} : vector<64x16xbf16>, vector<16x8xbf16>, vector<64x8xf32> -> vector<64x8xf32>
    %347 = arith.addf %340, %346 : vector<64x8xf32>
    %c3_325 = arith.constant 3 : index
    %c1_326 = arith.constant 1 : index
    %c0_327 = arith.constant 0 : index
    %348 = vector.load %arg10[%c3_325, %c1_326, %c0_327] : memref<12x12x16xf32, #tpu.memory_space<vmem>>, vector<8x8x16xf32>
    %349 = vector.shape_cast %348 : vector<8x8x16xf32> to vector<64x16xf32>
    %350 = arith.truncf %349 : vector<64x16xf32> to vector<64x16xbf16>
    %c16_328 = arith.constant 16 : index
    %c0_329 = arith.constant 0 : index
    %c0_330 = arith.constant 0 : index
    %351 = vector.load %arg4[%c16_328, %c0_329, %c0_330] : memref<25x16x8xbf16, #tpu.memory_space<vmem>>, vector<1x16x8xbf16>
    %352 = vector.shape_cast %351 : vector<1x16x8xbf16> to vector<16x8xbf16>
    %cst_331 = arith.constant dense<0.000000e+00> : vector<64x8xf32>
    %353 = tpu.matmul %350, %352, %cst_331 {dimension_numbers = #tpu.dot_dimension_numbers<[1], [0], [0], [1], [0, 0, 1, 1], [], []>} : vector<64x16xbf16>, vector<16x8xbf16>, vector<64x8xf32> -> vector<64x8xf32>
    %354 = arith.addf %347, %353 : vector<64x8xf32>
    %c3_332 = arith.constant 3 : index
    %c2_333 = arith.constant 2 : index
    %c0_334 = arith.constant 0 : index
    %355 = vector.load %arg10[%c3_332, %c2_333, %c0_334] : memref<12x12x16xf32, #tpu.memory_space<vmem>>, vector<8x8x16xf32>
    %356 = vector.shape_cast %355 : vector<8x8x16xf32> to vector<64x16xf32>
    %357 = arith.truncf %356 : vector<64x16xf32> to vector<64x16xbf16>
    %c17_335 = arith.constant 17 : index
    %c0_336 = arith.constant 0 : index
    %c0_337 = arith.constant 0 : index
    %358 = vector.load %arg4[%c17_335, %c0_336, %c0_337] : memref<25x16x8xbf16, #tpu.memory_space<vmem>>, vector<1x16x8xbf16>
    %359 = vector.shape_cast %358 : vector<1x16x8xbf16> to vector<16x8xbf16>
    %cst_338 = arith.constant dense<0.000000e+00> : vector<64x8xf32>
    %360 = tpu.matmul %357, %359, %cst_338 {dimension_numbers = #tpu.dot_dimension_numbers<[1], [0], [0], [1], [0, 0, 1, 1], [], []>} : vector<64x16xbf16>, vector<16x8xbf16>, vector<64x8xf32> -> vector<64x8xf32>
    %361 = arith.addf %354, %360 : vector<64x8xf32>
    %c3_339 = arith.constant 3 : index
    %c3_340 = arith.constant 3 : index
    %c0_341 = arith.constant 0 : index
    %362 = vector.load %arg10[%c3_339, %c3_340, %c0_341] : memref<12x12x16xf32, #tpu.memory_space<vmem>>, vector<8x8x16xf32>
    %363 = vector.shape_cast %362 : vector<8x8x16xf32> to vector<64x16xf32>
    %364 = arith.truncf %363 : vector<64x16xf32> to vector<64x16xbf16>
    %c18_342 = arith.constant 18 : index
    %c0_343 = arith.constant 0 : index
    %c0_344 = arith.constant 0 : index
    %365 = vector.load %arg4[%c18_342, %c0_343, %c0_344] : memref<25x16x8xbf16, #tpu.memory_space<vmem>>, vector<1x16x8xbf16>
    %366 = vector.shape_cast %365 : vector<1x16x8xbf16> to vector<16x8xbf16>
    %cst_345 = arith.constant dense<0.000000e+00> : vector<64x8xf32>
    %367 = tpu.matmul %364, %366, %cst_345 {dimension_numbers = #tpu.dot_dimension_numbers<[1], [0], [0], [1], [0, 0, 1, 1], [], []>} : vector<64x16xbf16>, vector<16x8xbf16>, vector<64x8xf32> -> vector<64x8xf32>
    %368 = arith.addf %361, %367 : vector<64x8xf32>
    %c3_346 = arith.constant 3 : index
    %c4_347 = arith.constant 4 : index
    %c0_348 = arith.constant 0 : index
    %369 = vector.load %arg10[%c3_346, %c4_347, %c0_348] : memref<12x12x16xf32, #tpu.memory_space<vmem>>, vector<8x8x16xf32>
    %370 = vector.shape_cast %369 : vector<8x8x16xf32> to vector<64x16xf32>
    %371 = arith.truncf %370 : vector<64x16xf32> to vector<64x16xbf16>
    %c19_349 = arith.constant 19 : index
    %c0_350 = arith.constant 0 : index
    %c0_351 = arith.constant 0 : index
    %372 = vector.load %arg4[%c19_349, %c0_350, %c0_351] : memref<25x16x8xbf16, #tpu.memory_space<vmem>>, vector<1x16x8xbf16>
    %373 = vector.shape_cast %372 : vector<1x16x8xbf16> to vector<16x8xbf16>
    %cst_352 = arith.constant dense<0.000000e+00> : vector<64x8xf32>
    %374 = tpu.matmul %371, %373, %cst_352 {dimension_numbers = #tpu.dot_dimension_numbers<[1], [0], [0], [1], [0, 0, 1, 1], [], []>} : vector<64x16xbf16>, vector<16x8xbf16>, vector<64x8xf32> -> vector<64x8xf32>
    %375 = arith.addf %368, %374 : vector<64x8xf32>
    %c4_353 = arith.constant 4 : index
    %c0_354 = arith.constant 0 : index
    %c0_355 = arith.constant 0 : index
    %376 = vector.load %arg10[%c4_353, %c0_354, %c0_355] : memref<12x12x16xf32, #tpu.memory_space<vmem>>, vector<8x8x16xf32>
    %377 = vector.shape_cast %376 : vector<8x8x16xf32> to vector<64x16xf32>
    %378 = arith.truncf %377 : vector<64x16xf32> to vector<64x16xbf16>
    %c20_356 = arith.constant 20 : index
    %c0_357 = arith.constant 0 : index
    %c0_358 = arith.constant 0 : index
    %379 = vector.load %arg4[%c20_356, %c0_357, %c0_358] : memref<25x16x8xbf16, #tpu.memory_space<vmem>>, vector<1x16x8xbf16>
    %380 = vector.shape_cast %379 : vector<1x16x8xbf16> to vector<16x8xbf16>
    %cst_359 = arith.constant dense<0.000000e+00> : vector<64x8xf32>
    %381 = tpu.matmul %378, %380, %cst_359 {dimension_numbers = #tpu.dot_dimension_numbers<[1], [0], [0], [1], [0, 0, 1, 1], [], []>} : vector<64x16xbf16>, vector<16x8xbf16>, vector<64x8xf32> -> vector<64x8xf32>
    %382 = arith.addf %375, %381 : vector<64x8xf32>
    %c4_360 = arith.constant 4 : index
    %c1_361 = arith.constant 1 : index
    %c0_362 = arith.constant 0 : index
    %383 = vector.load %arg10[%c4_360, %c1_361, %c0_362] : memref<12x12x16xf32, #tpu.memory_space<vmem>>, vector<8x8x16xf32>
    %384 = vector.shape_cast %383 : vector<8x8x16xf32> to vector<64x16xf32>
    %385 = arith.truncf %384 : vector<64x16xf32> to vector<64x16xbf16>
    %c21_363 = arith.constant 21 : index
    %c0_364 = arith.constant 0 : index
    %c0_365 = arith.constant 0 : index
    %386 = vector.load %arg4[%c21_363, %c0_364, %c0_365] : memref<25x16x8xbf16, #tpu.memory_space<vmem>>, vector<1x16x8xbf16>
    %387 = vector.shape_cast %386 : vector<1x16x8xbf16> to vector<16x8xbf16>
    %cst_366 = arith.constant dense<0.000000e+00> : vector<64x8xf32>
    %388 = tpu.matmul %385, %387, %cst_366 {dimension_numbers = #tpu.dot_dimension_numbers<[1], [0], [0], [1], [0, 0, 1, 1], [], []>} : vector<64x16xbf16>, vector<16x8xbf16>, vector<64x8xf32> -> vector<64x8xf32>
    %389 = arith.addf %382, %388 : vector<64x8xf32>
    %c4_367 = arith.constant 4 : index
    %c2_368 = arith.constant 2 : index
    %c0_369 = arith.constant 0 : index
    %390 = vector.load %arg10[%c4_367, %c2_368, %c0_369] : memref<12x12x16xf32, #tpu.memory_space<vmem>>, vector<8x8x16xf32>
    %391 = vector.shape_cast %390 : vector<8x8x16xf32> to vector<64x16xf32>
    %392 = arith.truncf %391 : vector<64x16xf32> to vector<64x16xbf16>
    %c22_370 = arith.constant 22 : index
    %c0_371 = arith.constant 0 : index
    %c0_372 = arith.constant 0 : index
    %393 = vector.load %arg4[%c22_370, %c0_371, %c0_372] : memref<25x16x8xbf16, #tpu.memory_space<vmem>>, vector<1x16x8xbf16>
    %394 = vector.shape_cast %393 : vector<1x16x8xbf16> to vector<16x8xbf16>
    %cst_373 = arith.constant dense<0.000000e+00> : vector<64x8xf32>
    %395 = tpu.matmul %392, %394, %cst_373 {dimension_numbers = #tpu.dot_dimension_numbers<[1], [0], [0], [1], [0, 0, 1, 1], [], []>} : vector<64x16xbf16>, vector<16x8xbf16>, vector<64x8xf32> -> vector<64x8xf32>
    %396 = arith.addf %389, %395 : vector<64x8xf32>
    %c4_374 = arith.constant 4 : index
    %c3_375 = arith.constant 3 : index
    %c0_376 = arith.constant 0 : index
    %397 = vector.load %arg10[%c4_374, %c3_375, %c0_376] : memref<12x12x16xf32, #tpu.memory_space<vmem>>, vector<8x8x16xf32>
    %398 = vector.shape_cast %397 : vector<8x8x16xf32> to vector<64x16xf32>
    %399 = arith.truncf %398 : vector<64x16xf32> to vector<64x16xbf16>
    %c23_377 = arith.constant 23 : index
    %c0_378 = arith.constant 0 : index
    %c0_379 = arith.constant 0 : index
    %400 = vector.load %arg4[%c23_377, %c0_378, %c0_379] : memref<25x16x8xbf16, #tpu.memory_space<vmem>>, vector<1x16x8xbf16>
    %401 = vector.shape_cast %400 : vector<1x16x8xbf16> to vector<16x8xbf16>
    %cst_380 = arith.constant dense<0.000000e+00> : vector<64x8xf32>
    %402 = tpu.matmul %399, %401, %cst_380 {dimension_numbers = #tpu.dot_dimension_numbers<[1], [0], [0], [1], [0, 0, 1, 1], [], []>} : vector<64x16xbf16>, vector<16x8xbf16>, vector<64x8xf32> -> vector<64x8xf32>
    %403 = arith.addf %396, %402 : vector<64x8xf32>
    %c4_381 = arith.constant 4 : index
    %c4_382 = arith.constant 4 : index
    %c0_383 = arith.constant 0 : index
    %404 = vector.load %arg10[%c4_381, %c4_382, %c0_383] : memref<12x12x16xf32, #tpu.memory_space<vmem>>, vector<8x8x16xf32>
    %405 = vector.shape_cast %404 : vector<8x8x16xf32> to vector<64x16xf32>
    %406 = arith.truncf %405 : vector<64x16xf32> to vector<64x16xbf16>
    %c24_384 = arith.constant 24 : index
    %c0_385 = arith.constant 0 : index
    %c0_386 = arith.constant 0 : index
    %407 = vector.load %arg4[%c24_384, %c0_385, %c0_386] : memref<25x16x8xbf16, #tpu.memory_space<vmem>>, vector<1x16x8xbf16>
    %408 = vector.shape_cast %407 : vector<1x16x8xbf16> to vector<16x8xbf16>
    %cst_387 = arith.constant dense<0.000000e+00> : vector<64x8xf32>
    %409 = tpu.matmul %406, %408, %cst_387 {dimension_numbers = #tpu.dot_dimension_numbers<[1], [0], [0], [1], [0, 0, 1, 1], [], []>} : vector<64x16xbf16>, vector<16x8xbf16>, vector<64x8xf32> -> vector<64x8xf32>
    %410 = arith.addf %403, %409 : vector<64x8xf32>
    %c0_388 = arith.constant 0 : index
    %c0_389 = arith.constant 0 : index
    %411 = vector.load %arg5[%c0_388, %c0_389] : memref<1x8xf32, #tpu.memory_space<vmem>>, vector<1x8xf32>
    %412 = vector.broadcast %411 : vector<1x8xf32> to vector<64x8xf32>
    %413 = arith.addf %410, %412 : vector<64x8xf32>
    %cst_390 = arith.constant 0.000000e+00 : f32
    %414 = vector.broadcast %cst_390 : f32 to vector<64x8xf32>
    %415 = arith.maximumf %413, %414 : vector<64x8xf32>
    %c0_391 = arith.constant 0 : index
    %c0_392 = arith.constant 0 : index
    %416 = vector.load %arg11[%c0_391, %c0_392] : memref<64x8xf32, #tpu.memory_space<vmem>>, vector<64x8xf32>
    tpu.vector_store %arg11[%c0_391, %c0_392], %415 {strides = array<i32>} : memref<64x8xf32, #tpu.memory_space<vmem>>, vector<64x8xf32>,
    %c0_393 = arith.constant 0 : index
    %c0_394 = arith.constant 0 : index
    %417 = tpu.strided_load %arg11[%c0_393, %c0_394] {strides = array<i32: 2, 1>} : memref<64x8xf32, #tpu.memory_space<vmem>>, vector<32x8xf32>
    %c1_395 = arith.constant 1 : index
    %c0_396 = arith.constant 0 : index
    %418 = tpu.strided_load %arg11[%c1_395, %c0_396] {strides = array<i32: 2, 1>} : memref<64x8xf32, #tpu.memory_space<vmem>>, vector<32x8xf32>
    %419 = arith.maximumf %417, %418 : vector<32x8xf32>
    %cst_397 = arith.constant 0.000000e+00 : f32
    %420 = vector.broadcast %cst_397 : f32 to vector<1x128xf32>
    %421 = vector.extract_strided_slice %419 {offsets = [0, 0], sizes = [4, 8], strides = [1, 1]} : vector<32x8xf32> to vector<4x8xf32>
    %422 = vector.extract_strided_slice %419 {offsets = [4, 0], sizes = [4, 8], strides = [1, 1]} : vector<32x8xf32> to vector<4x8xf32>
    %423 = arith.maximumf %421, %422 : vector<4x8xf32>
    %424 = arith.truncf %423 : vector<4x8xf32> to vector<4x8xbf16>
    %425 = vector.extract_strided_slice %424 {offsets = [0, 0], sizes = [1, 8], strides = [1, 1]} : vector<4x8xbf16> to vector<1x8xbf16>
    %c0_398 = arith.constant 0 : index
    %c0_399 = arith.constant 0 : index
    %c0_400 = arith.constant 0 : index
    %426 = vector.load %arg6[%c0_398, %c0_399, %c0_400] : memref<16x8x128xbf16, #tpu.memory_space<vmem>>, vector<1x8x128xbf16>
    %427 = vector.shape_cast %426 : vector<1x8x128xbf16> to vector<8x128xbf16>
    %cst_401 = arith.constant dense<0.000000e+00> : vector<1x128xf32>
    %428 = tpu.matmul %425, %427, %cst_401 {dimension_numbers = #tpu.dot_dimension_numbers<[1], [0], [0], [1], [0, 0, 1, 1], [], []>} : vector<1x8xbf16>, vector<8x128xbf16>, vector<1x128xf32> -> vector<1x128xf32>
    %429 = arith.addf %420, %428 : vector<1x128xf32>
    %430 = vector.extract_strided_slice %424 {offsets = [1, 0], sizes = [1, 8], strides = [1, 1]} : vector<4x8xbf16> to vector<1x8xbf16>
    %c1_402 = arith.constant 1 : index
    %c0_403 = arith.constant 0 : index
    %c0_404 = arith.constant 0 : index
    %431 = vector.load %arg6[%c1_402, %c0_403, %c0_404] : memref<16x8x128xbf16, #tpu.memory_space<vmem>>, vector<1x8x128xbf16>
    %432 = vector.shape_cast %431 : vector<1x8x128xbf16> to vector<8x128xbf16>
    %cst_405 = arith.constant dense<0.000000e+00> : vector<1x128xf32>
    %433 = tpu.matmul %430, %432, %cst_405 {dimension_numbers = #tpu.dot_dimension_numbers<[1], [0], [0], [1], [0, 0, 1, 1], [], []>} : vector<1x8xbf16>, vector<8x128xbf16>, vector<1x128xf32> -> vector<1x128xf32>
    %434 = arith.addf %429, %433 : vector<1x128xf32>
    %435 = vector.extract_strided_slice %424 {offsets = [2, 0], sizes = [1, 8], strides = [1, 1]} : vector<4x8xbf16> to vector<1x8xbf16>
    %c2_406 = arith.constant 2 : index
    %c0_407 = arith.constant 0 : index
    %c0_408 = arith.constant 0 : index
    %436 = vector.load %arg6[%c2_406, %c0_407, %c0_408] : memref<16x8x128xbf16, #tpu.memory_space<vmem>>, vector<1x8x128xbf16>
    %437 = vector.shape_cast %436 : vector<1x8x128xbf16> to vector<8x128xbf16>
    %cst_409 = arith.constant dense<0.000000e+00> : vector<1x128xf32>
    %438 = tpu.matmul %435, %437, %cst_409 {dimension_numbers = #tpu.dot_dimension_numbers<[1], [0], [0], [1], [0, 0, 1, 1], [], []>} : vector<1x8xbf16>, vector<8x128xbf16>, vector<1x128xf32> -> vector<1x128xf32>
    %439 = arith.addf %434, %438 : vector<1x128xf32>
    %440 = vector.extract_strided_slice %424 {offsets = [3, 0], sizes = [1, 8], strides = [1, 1]} : vector<4x8xbf16> to vector<1x8xbf16>
    %c3_410 = arith.constant 3 : index
    %c0_411 = arith.constant 0 : index
    %c0_412 = arith.constant 0 : index
    %441 = vector.load %arg6[%c3_410, %c0_411, %c0_412] : memref<16x8x128xbf16, #tpu.memory_space<vmem>>, vector<1x8x128xbf16>
    %442 = vector.shape_cast %441 : vector<1x8x128xbf16> to vector<8x128xbf16>
    %cst_413 = arith.constant dense<0.000000e+00> : vector<1x128xf32>
    %443 = tpu.matmul %440, %442, %cst_413 {dimension_numbers = #tpu.dot_dimension_numbers<[1], [0], [0], [1], [0, 0, 1, 1], [], []>} : vector<1x8xbf16>, vector<8x128xbf16>, vector<1x128xf32> -> vector<1x128xf32>
    %444 = arith.addf %439, %443 : vector<1x128xf32>
    %445 = vector.extract_strided_slice %419 {offsets = [8, 0], sizes = [4, 8], strides = [1, 1]} : vector<32x8xf32> to vector<4x8xf32>
    %446 = vector.extract_strided_slice %419 {offsets = [12, 0], sizes = [4, 8], strides = [1, 1]} : vector<32x8xf32> to vector<4x8xf32>
    %447 = arith.maximumf %445, %446 : vector<4x8xf32>
    %448 = arith.truncf %447 : vector<4x8xf32> to vector<4x8xbf16>
    %449 = vector.extract_strided_slice %448 {offsets = [0, 0], sizes = [1, 8], strides = [1, 1]} : vector<4x8xbf16> to vector<1x8xbf16>
    %c4_414 = arith.constant 4 : index
    %c0_415 = arith.constant 0 : index
    %c0_416 = arith.constant 0 : index
    %450 = vector.load %arg6[%c4_414, %c0_415, %c0_416] : memref<16x8x128xbf16, #tpu.memory_space<vmem>>, vector<1x8x128xbf16>
    %451 = vector.shape_cast %450 : vector<1x8x128xbf16> to vector<8x128xbf16>
    %cst_417 = arith.constant dense<0.000000e+00> : vector<1x128xf32>
    %452 = tpu.matmul %449, %451, %cst_417 {dimension_numbers = #tpu.dot_dimension_numbers<[1], [0], [0], [1], [0, 0, 1, 1], [], []>} : vector<1x8xbf16>, vector<8x128xbf16>, vector<1x128xf32> -> vector<1x128xf32>
    %453 = arith.addf %444, %452 : vector<1x128xf32>
    %454 = vector.extract_strided_slice %448 {offsets = [1, 0], sizes = [1, 8], strides = [1, 1]} : vector<4x8xbf16> to vector<1x8xbf16>
    %c5_418 = arith.constant 5 : index
    %c0_419 = arith.constant 0 : index
    %c0_420 = arith.constant 0 : index
    %455 = vector.load %arg6[%c5_418, %c0_419, %c0_420] : memref<16x8x128xbf16, #tpu.memory_space<vmem>>, vector<1x8x128xbf16>
    %456 = vector.shape_cast %455 : vector<1x8x128xbf16> to vector<8x128xbf16>
    %cst_421 = arith.constant dense<0.000000e+00> : vector<1x128xf32>
    %457 = tpu.matmul %454, %456, %cst_421 {dimension_numbers = #tpu.dot_dimension_numbers<[1], [0], [0], [1], [0, 0, 1, 1], [], []>} : vector<1x8xbf16>, vector<8x128xbf16>, vector<1x128xf32> -> vector<1x128xf32>
    %458 = arith.addf %453, %457 : vector<1x128xf32>
    %459 = vector.extract_strided_slice %448 {offsets = [2, 0], sizes = [1, 8], strides = [1, 1]} : vector<4x8xbf16> to vector<1x8xbf16>
    %c6_422 = arith.constant 6 : index
    %c0_423 = arith.constant 0 : index
    %c0_424 = arith.constant 0 : index
    %460 = vector.load %arg6[%c6_422, %c0_423, %c0_424] : memref<16x8x128xbf16, #tpu.memory_space<vmem>>, vector<1x8x128xbf16>
    %461 = vector.shape_cast %460 : vector<1x8x128xbf16> to vector<8x128xbf16>
    %cst_425 = arith.constant dense<0.000000e+00> : vector<1x128xf32>
    %462 = tpu.matmul %459, %461, %cst_425 {dimension_numbers = #tpu.dot_dimension_numbers<[1], [0], [0], [1], [0, 0, 1, 1], [], []>} : vector<1x8xbf16>, vector<8x128xbf16>, vector<1x128xf32> -> vector<1x128xf32>
    %463 = arith.addf %458, %462 : vector<1x128xf32>
    %464 = vector.extract_strided_slice %448 {offsets = [3, 0], sizes = [1, 8], strides = [1, 1]} : vector<4x8xbf16> to vector<1x8xbf16>
    %c7_426 = arith.constant 7 : index
    %c0_427 = arith.constant 0 : index
    %c0_428 = arith.constant 0 : index
    %465 = vector.load %arg6[%c7_426, %c0_427, %c0_428] : memref<16x8x128xbf16, #tpu.memory_space<vmem>>, vector<1x8x128xbf16>
    %466 = vector.shape_cast %465 : vector<1x8x128xbf16> to vector<8x128xbf16>
    %cst_429 = arith.constant dense<0.000000e+00> : vector<1x128xf32>
    %467 = tpu.matmul %464, %466, %cst_429 {dimension_numbers = #tpu.dot_dimension_numbers<[1], [0], [0], [1], [0, 0, 1, 1], [], []>} : vector<1x8xbf16>, vector<8x128xbf16>, vector<1x128xf32> -> vector<1x128xf32>
    %468 = arith.addf %463, %467 : vector<1x128xf32>
    %469 = vector.extract_strided_slice %419 {offsets = [16, 0], sizes = [4, 8], strides = [1, 1]} : vector<32x8xf32> to vector<4x8xf32>
    %470 = vector.extract_strided_slice %419 {offsets = [20, 0], sizes = [4, 8], strides = [1, 1]} : vector<32x8xf32> to vector<4x8xf32>
    %471 = arith.maximumf %469, %470 : vector<4x8xf32>
    %472 = arith.truncf %471 : vector<4x8xf32> to vector<4x8xbf16>
    %473 = vector.extract_strided_slice %472 {offsets = [0, 0], sizes = [1, 8], strides = [1, 1]} : vector<4x8xbf16> to vector<1x8xbf16>
    %c8_430 = arith.constant 8 : index
    %c0_431 = arith.constant 0 : index
    %c0_432 = arith.constant 0 : index
    %474 = vector.load %arg6[%c8_430, %c0_431, %c0_432] : memref<16x8x128xbf16, #tpu.memory_space<vmem>>, vector<1x8x128xbf16>
    %475 = vector.shape_cast %474 : vector<1x8x128xbf16> to vector<8x128xbf16>
    %cst_433 = arith.constant dense<0.000000e+00> : vector<1x128xf32>
    %476 = tpu.matmul %473, %475, %cst_433 {dimension_numbers = #tpu.dot_dimension_numbers<[1], [0], [0], [1], [0, 0, 1, 1], [], []>} : vector<1x8xbf16>, vector<8x128xbf16>, vector<1x128xf32> -> vector<1x128xf32>
    %477 = arith.addf %468, %476 : vector<1x128xf32>
    %478 = vector.extract_strided_slice %472 {offsets = [1, 0], sizes = [1, 8], strides = [1, 1]} : vector<4x8xbf16> to vector<1x8xbf16>
    %c9_434 = arith.constant 9 : index
    %c0_435 = arith.constant 0 : index
    %c0_436 = arith.constant 0 : index
    %479 = vector.load %arg6[%c9_434, %c0_435, %c0_436] : memref<16x8x128xbf16, #tpu.memory_space<vmem>>, vector<1x8x128xbf16>
    %480 = vector.shape_cast %479 : vector<1x8x128xbf16> to vector<8x128xbf16>
    %cst_437 = arith.constant dense<0.000000e+00> : vector<1x128xf32>
    %481 = tpu.matmul %478, %480, %cst_437 {dimension_numbers = #tpu.dot_dimension_numbers<[1], [0], [0], [1], [0, 0, 1, 1], [], []>} : vector<1x8xbf16>, vector<8x128xbf16>, vector<1x128xf32> -> vector<1x128xf32>
    %482 = arith.addf %477, %481 : vector<1x128xf32>
    %483 = vector.extract_strided_slice %472 {offsets = [2, 0], sizes = [1, 8], strides = [1, 1]} : vector<4x8xbf16> to vector<1x8xbf16>
    %c10_438 = arith.constant 10 : index
    %c0_439 = arith.constant 0 : index
    %c0_440 = arith.constant 0 : index
    %484 = vector.load %arg6[%c10_438, %c0_439, %c0_440] : memref<16x8x128xbf16, #tpu.memory_space<vmem>>, vector<1x8x128xbf16>
    %485 = vector.shape_cast %484 : vector<1x8x128xbf16> to vector<8x128xbf16>
    %cst_441 = arith.constant dense<0.000000e+00> : vector<1x128xf32>
    %486 = tpu.matmul %483, %485, %cst_441 {dimension_numbers = #tpu.dot_dimension_numbers<[1], [0], [0], [1], [0, 0, 1, 1], [], []>} : vector<1x8xbf16>, vector<8x128xbf16>, vector<1x128xf32> -> vector<1x128xf32>
    %487 = arith.addf %482, %486 : vector<1x128xf32>
    %488 = vector.extract_strided_slice %472 {offsets = [3, 0], sizes = [1, 8], strides = [1, 1]} : vector<4x8xbf16> to vector<1x8xbf16>
    %c11_442 = arith.constant 11 : index
    %c0_443 = arith.constant 0 : index
    %c0_444 = arith.constant 0 : index
    %489 = vector.load %arg6[%c11_442, %c0_443, %c0_444] : memref<16x8x128xbf16, #tpu.memory_space<vmem>>, vector<1x8x128xbf16>
    %490 = vector.shape_cast %489 : vector<1x8x128xbf16> to vector<8x128xbf16>
    %cst_445 = arith.constant dense<0.000000e+00> : vector<1x128xf32>
    %491 = tpu.matmul %488, %490, %cst_445 {dimension_numbers = #tpu.dot_dimension_numbers<[1], [0], [0], [1], [0, 0, 1, 1], [], []>} : vector<1x8xbf16>, vector<8x128xbf16>, vector<1x128xf32> -> vector<1x128xf32>
    %492 = arith.addf %487, %491 : vector<1x128xf32>
    %493 = vector.extract_strided_slice %419 {offsets = [24, 0], sizes = [4, 8], strides = [1, 1]} : vector<32x8xf32> to vector<4x8xf32>
    %494 = vector.extract_strided_slice %419 {offsets = [28, 0], sizes = [4, 8], strides = [1, 1]} : vector<32x8xf32> to vector<4x8xf32>
    %495 = arith.maximumf %493, %494 : vector<4x8xf32>
    %496 = arith.truncf %495 : vector<4x8xf32> to vector<4x8xbf16>
    %497 = vector.extract_strided_slice %496 {offsets = [0, 0], sizes = [1, 8], strides = [1, 1]} : vector<4x8xbf16> to vector<1x8xbf16>
    %c12_446 = arith.constant 12 : index
    %c0_447 = arith.constant 0 : index
    %c0_448 = arith.constant 0 : index
    %498 = vector.load %arg6[%c12_446, %c0_447, %c0_448] : memref<16x8x128xbf16, #tpu.memory_space<vmem>>, vector<1x8x128xbf16>
    %499 = vector.shape_cast %498 : vector<1x8x128xbf16> to vector<8x128xbf16>
    %cst_449 = arith.constant dense<0.000000e+00> : vector<1x128xf32>
    %500 = tpu.matmul %497, %499, %cst_449 {dimension_numbers = #tpu.dot_dimension_numbers<[1], [0], [0], [1], [0, 0, 1, 1], [], []>} : vector<1x8xbf16>, vector<8x128xbf16>, vector<1x128xf32> -> vector<1x128xf32>
    %501 = arith.addf %492, %500 : vector<1x128xf32>
    %502 = vector.extract_strided_slice %496 {offsets = [1, 0], sizes = [1, 8], strides = [1, 1]} : vector<4x8xbf16> to vector<1x8xbf16>
    %c13_450 = arith.constant 13 : index
    %c0_451 = arith.constant 0 : index
    %c0_452 = arith.constant 0 : index
    %503 = vector.load %arg6[%c13_450, %c0_451, %c0_452] : memref<16x8x128xbf16, #tpu.memory_space<vmem>>, vector<1x8x128xbf16>
    %504 = vector.shape_cast %503 : vector<1x8x128xbf16> to vector<8x128xbf16>
    %cst_453 = arith.constant dense<0.000000e+00> : vector<1x128xf32>
    %505 = tpu.matmul %502, %504, %cst_453 {dimension_numbers = #tpu.dot_dimension_numbers<[1], [0], [0], [1], [0, 0, 1, 1], [], []>} : vector<1x8xbf16>, vector<8x128xbf16>, vector<1x128xf32> -> vector<1x128xf32>
    %506 = arith.addf %501, %505 : vector<1x128xf32>
    %507 = vector.extract_strided_slice %496 {offsets = [2, 0], sizes = [1, 8], strides = [1, 1]} : vector<4x8xbf16> to vector<1x8xbf16>
    %c14_454 = arith.constant 14 : index
    %c0_455 = arith.constant 0 : index
    %c0_456 = arith.constant 0 : index
    %508 = vector.load %arg6[%c14_454, %c0_455, %c0_456] : memref<16x8x128xbf16, #tpu.memory_space<vmem>>, vector<1x8x128xbf16>
    %509 = vector.shape_cast %508 : vector<1x8x128xbf16> to vector<8x128xbf16>
    %cst_457 = arith.constant dense<0.000000e+00> : vector<1x128xf32>
    %510 = tpu.matmul %507, %509, %cst_457 {dimension_numbers = #tpu.dot_dimension_numbers<[1], [0], [0], [1], [0, 0, 1, 1], [], []>} : vector<1x8xbf16>, vector<8x128xbf16>, vector<1x128xf32> -> vector<1x128xf32>
    %511 = arith.addf %506, %510 : vector<1x128xf32>
    %512 = vector.extract_strided_slice %496 {offsets = [3, 0], sizes = [1, 8], strides = [1, 1]} : vector<4x8xbf16> to vector<1x8xbf16>
    %c15_458 = arith.constant 15 : index
    %c0_459 = arith.constant 0 : index
    %c0_460 = arith.constant 0 : index
    %513 = vector.load %arg6[%c15_458, %c0_459, %c0_460] : memref<16x8x128xbf16, #tpu.memory_space<vmem>>, vector<1x8x128xbf16>
    %514 = vector.shape_cast %513 : vector<1x8x128xbf16> to vector<8x128xbf16>
    %cst_461 = arith.constant dense<0.000000e+00> : vector<1x128xf32>
    %515 = tpu.matmul %512, %514, %cst_461 {dimension_numbers = #tpu.dot_dimension_numbers<[1], [0], [0], [1], [0, 0, 1, 1], [], []>} : vector<1x8xbf16>, vector<8x128xbf16>, vector<1x128xf32> -> vector<1x128xf32>
    %516 = arith.addf %511, %515 : vector<1x128xf32>
    %c0_462 = arith.constant 0 : index
    %c0_463 = arith.constant 0 : index
    %517 = vector.load %arg7[%c0_462, %c0_463] : memref<1x128xf32, #tpu.memory_space<vmem>>, vector<1x128xf32>
    %518 = arith.addf %516, %517 : vector<1x128xf32>
    %c0_464 = arith.constant 0 : index
    %c0_465 = arith.constant 0 : index
    %c0_466 = arith.constant 0 : index
    %519 = vector.load %arg8[%c0_464, %c0_465, %c0_466] : memref<1x1x128xf32, #tpu.memory_space<vmem>>, vector<1x1x128xf32>
    %520 = vector.shape_cast %519 : vector<1x1x128xf32> to vector<1x128xf32>
    %521 = vector.shape_cast %518 : vector<1x128xf32> to vector<1x1x128xf32>
    tpu.vector_store %arg8[%c0_464, %c0_465, %c0_466], %521 {strides = array<i32>} : memref<1x1x128xf32, #tpu.memory_space<vmem>>, vector<1x1x128xf32>,
    return
  }
  func.func @transform_0(%arg0: i32) -> (i32, i32, i32, i32) {
    %c0_i32 = arith.constant 0 : i32
    %c0_i32_0 = arith.constant 0 : i32
    %c0_i32_1 = arith.constant 0 : i32
    %c0_i32_2 = arith.constant 0 : i32
    return %arg0, %c0_i32, %c0_i32_0, %c0_i32_1 : i32, i32, i32, i32
  }
  func.func @transform_1(%arg0: i32) -> (i32, i32, i32) {
    %c0_i32 = arith.constant 0 : i32
    %c0_i32_0 = arith.constant 0 : i32
    %c0_i32_1 = arith.constant 0 : i32
    %c0_i32_2 = arith.constant 0 : i32
    return %c0_i32, %c0_i32_0, %c0_i32_1 : i32, i32, i32
  }
  func.func @transform_2(%arg0: i32) -> (i32, i32) {
    %c0_i32 = arith.constant 0 : i32
    %c0_i32_0 = arith.constant 0 : i32
    %c0_i32_1 = arith.constant 0 : i32
    return %c0_i32, %c0_i32_0 : i32, i32
  }
  func.func @transform_3(%arg0: i32) -> (i32, i32, i32) {
    %c0_i32 = arith.constant 0 : i32
    %c0_i32_0 = arith.constant 0 : i32
    %c0_i32_1 = arith.constant 0 : i32
    %c0_i32_2 = arith.constant 0 : i32
    return %c0_i32, %c0_i32_0, %c0_i32_1 : i32, i32, i32
  }
  func.func @transform_4(%arg0: i32) -> (i32, i32) {
    %c0_i32 = arith.constant 0 : i32
    %c0_i32_0 = arith.constant 0 : i32
    %c0_i32_1 = arith.constant 0 : i32
    return %c0_i32, %c0_i32_0 : i32, i32
  }
  func.func @transform_5(%arg0: i32) -> (i32, i32, i32) {
    %c0_i32 = arith.constant 0 : i32
    %c0_i32_0 = arith.constant 0 : i32
    %c0_i32_1 = arith.constant 0 : i32
    %c0_i32_2 = arith.constant 0 : i32
    return %c0_i32, %c0_i32_0, %c0_i32_1 : i32, i32, i32
  }
  func.func @transform_6(%arg0: i32) -> (i32, i32) {
    %c0_i32 = arith.constant 0 : i32
    %c0_i32_0 = arith.constant 0 : i32
    %c0_i32_1 = arith.constant 0 : i32
    return %c0_i32, %c0_i32_0 : i32, i32
  }
  func.func @transform_7(%arg0: i32) -> (i32, i32, i32) {
    %c0_i32 = arith.constant 0 : i32
    %c0_i32_0 = arith.constant 0 : i32
    %c0_i32_1 = arith.constant 0 : i32
    return %arg0, %c0_i32, %c0_i32_0 : i32, i32, i32
  }
}

</mosaic_0001>

<bundles_post_ra>
// kernel: tpu_custom_call.1
= control target key start
LH: loop header
LB: loop body
LE: loop exit
PB: predicated region body
PF: predicated region fallthrough
CT: control target
= control target key end

     0   :  { %12 = vsyncpa [#allocation6], 0  ;;  %s28425_s0 = inlined_call_operand.vmem [shape: bf16[2,20,20,4], index: 0, kind: input, shape index: {}]   ;;  %s28426_s1 = inlined_call_operand.vmem [shape: bf16[25,4,16], index: 1, kind: input, shape index: {}]   ;;  %s28427_s2 = inlined_call_operand.vmem [shape: f32[1,16], index: 2, kind: input, shape index: {}]   ;;  %s28428_s3 = inlined_call_operand.vmem [shape: bf16[25,16,8], index: 3, kind: input, shape index: {}]   ;;  %s28429_s4 = inlined_call_operand.vmem [shape: f32[1,8], index: 4, kind: input, shape index: {}]   ;;  %s28430_s5 = inlined_call_operand.vmem [shape: bf16[16,8,128], index: 5, kind: input, shape index: {}]   ;;  %s28431_s6 = inlined_call_operand.vmem [shape: f32[1,128], index: 6, kind: input, shape index: {}]   ;;  %s28432_s7 = inlined_call_operand.hbm [shape: f32[2,1,128], index: 7, kind: output, shape index: {}]  }
   0x1   :  { %14 = vsyncpa [#allocation6 + $0x1], 0  ;;  %s22373_s24 = smov 0   ;;  %s22375_s25 = smov 0  }
   0x2   :  { %s22377_s26 = smov 0   ;;  %s22379_s27 = smov 0  }
   0x3 LB: > { %s22394_s28 = sadd.s32 4294967295, %s22328_s27   ;;  %s17422_s29 = sadd.s32 4294967294, %s22328_s27   ;;  %s22328_s27 = sphi %s22379_s27, %s29037_s27   ;;  %s22324_s26 = sphi %s22377_s26, %s29036_s26   ;;  %s22320_s25 = sphi %s22375_s25, %s29035_s25   ;;  %s22316_s24 = sphi %s22373_s24, %s29034_s24  }
   0x4   : > { %s22398_s30 = sadd.s32 1, %s22328_s27   ;;  %s179_s8 = sadd.s32 1, %s22324_s26 }
   0x5   : > { %s176_s9 = ssub.s32 %s22328_s27, %s22398_s30  ;;  %p189_p0 = scmp.ne.s32.totalorder %s22324_s26, %s22320_s25 }
   0x6   : > { %p177_p1 = scmp.eq.s32.totalorder %s176_s9, 0  ;;  %p190_p2 = scmp.eq.s32.totalorder %s22394_s28, 1 }
   0x7   : > { %p195_p3 = scmp.ne.s32.totalorder %s22320_s25, %s22316_s24  ;;  %p196_p4 = scmp.eq.s32.totalorder %s17422_s29, 1 }
   0x8   : > { %s22409_s10 = scalar_select %p177_p1, %s22324_s26, %s179_s8  }
   0x9   : > { %p22411_p5 = por %p190_p2, %p189_p0  ;;  %p22415_p6 = por %p196_p4, %p195_p3 }
   0xa   : > { %p17425_p7 = scmp.ge.s32.totalorder %s22328_s27, 1  ;;  %p240_p8 = scmp.lt.s32.totalorder %s22328_s27, 3 }
   0xc   : > { %p241_p9 = pnand %p17425_p7, %p240_p8 }
   0xe   : > { %244 = sbr.rel (%p241_p9) target bundleno = 2408 (0x968), region = 48 }
  0x15   : > { %vm812_vm0 = vcmask 1041408   ;;  %v17850_v0 = vld [vmem:[%s28426_s1 + $0x10] sm:$0x3]  ;;  %p271_p10 = scmp.lt.s32.totalorder %s22394_s28, 1  ;;  %v17915_v2 = vld [vmem:[%s28426_s1 + $0x12] sm:$0x3] }
  0x16   : > { %21880 = vmatprep.subr.msk.bf16.mxu0 %vm812_vm0, %v17850_v0  ;;  %v22427_v1 = vsel %vm812_vm0, %v17850_v0, 0  ;;  %v22437_v3 = vld [vmem:[%s28426_s1 + $0x14] sm:$0x3]  ;;  %vm1742_vm1 = vsmask.f32 2304  ;;  %v22446_v6 = vsel %vm812_vm0, %v17915_v2, 0 }
  0x17   : > { %28649 = vst [vmem:[#allocation8_spill] sm:$0xff] %v22427_v1  ;;  %19987 = vmatpush3.bf16.msra.mxu0 %v22427_v1  ;;  %s272_s15 = scalar_select %p271_p10, %s22394_s28, 1  ;;  %v17427_v4 = vld [vmem:[%s28426_s1 + $0x2] sm:$0x3]  ;;  %vm1743_vm2 = vsmask.f32 6416 }
  0x18   : > { %21882 = vmatprep.subr.msk.bf16.mxu0 %vm812_vm0, %v17915_v2  ;;  %21872 = vmatprep.subr.msk.bf16.mxu1 %vm812_vm0, %v17427_v4  ;;  %v814_v5 = vsel %vm812_vm0, %v17427_v4, 0  ;;  %v22450_v7 = vsel %vm812_vm0, %v22437_v3, 0  ;;  %vm763_vm3 = vcmask 31744   ;;  %vm22489_vm4 = vmor %vm1742_vm1, %vm1743_vm2  ;;  %v28654_v34 = vmov 0  ;;  %s19129_s9 = sshll.u32 %s22394_s28, 4  ;;  %s22332_s19 = smov [#allocation5]  }
  0x19   : > { %s21898_s22 = smul.u32 240, %s272_s15  ;;  %19715 = vmatpush3.bf16.msra.mxu1 %v814_v5  ;;  %v28655_v34 = vsel %vm22489_vm4, 4294967295, %v28654_v34  ;;  %vm2456_vm5 = vcmask 1045508   ;;  %vm326_vm7 = vsmask.f32 3328  ;;  %vm1317_vm10 = vcmask 1042432   ;;  %s28383_s17 = scalar_lea.hbm %s28432_s7, %s19129_s9 }
  0x1a   : > { %28656 = vst [vmem:[#allocation13_spill] sm:$0xff] %v28655_v34  ;;  %vm22671_vm6 = vmor %vm812_vm0, %vm2456_vm5  ;;  %vm327_vm8 = vsmask.f32 7440  ;;  %vm1318_vm11 = vcmask 1046532   ;;  %vm13683_vm13 = vcmask 130048   ;;  %vm13796_vm14 = vcmask 125952  }
  0x1b   : > { %s22455_s8 = scalar_lea.vmem %s28425_s0, %s21898_s22  ;;  %vm22737_vm9 = vmor %vm326_vm7, %vm327_vm8  ;;  %vm16543_vm15 = vcmask 1043456   ;;  %vm16501_vm1 = vcmask 64512   ;;  %s269_s22 = sand.u32 1, %s22320_s25  }
  0x1c   : > { %v22458_v8 = vld [vmem:[%s22455_s8 + $0x10] sm:$0xf]  ;;  %v17769_v9 = vld [vmem:[%s22455_s8 + $0xc] sm:$0xe]  ;;  %v22462_v10 = vld [vmem:[%s22455_s8 + $0x14] sm:$0x3] }
  0x1d   : > { %28650 = vst [vmem:[#allocation9_spill] sm:$0xff] %v22458_v8  ;;  %v28449_v11 = vshll.u32 %v22458_v8, 16  ;;  %v3285_v12 = vshrl.u32 %v22458_v8, 16  ;;  %v4436_v13 = vshrl.u32 %v17769_v9, 16  ;;  %v4439_v14 = vshll.u32 %v17769_v9, 16  ;;  %vm23312_vm12 = vmor %vm1317_vm10, %vm1318_vm11  ;;  %s270_s13 = scalar_lea.vmem [#allocation5], %s269_s22 }
  0x1e   : > { %v22467_v15 = vld [vmem:[%s22455_s8 + $0x1c] sm:$0xf]  ;;  %v4450_v16 = vshrl.u32 %v22462_v10, 16  ;;  %v4453_v17 = vshll.u32 %v22462_v10, 16  ;;  %v22474_v20 = vld [vmem:[%s22455_s8 + $0x18] sm:$0xe] }
  0x1f   : > { %v3305_v18 = vshll.u32 %v22467_v15, 16  ;;  %v3309_v19 = vshrl.u32 %v22467_v15, 16  ;;  %28651 = vst [vmem:[#allocation10_spill] sm:$0xff] %v22474_v20  ;;  %v22476_v21 = vrot.slane %v3285_v12, 4  ;;  %v4438_v22 = vrot.slane %v4436_v13, 5  ;;  %s17367_s14 = sshll.u32 %s270_s13, 4  ;;  %s28385_s14 = int_to_ptr.vmem [resolvable:$true] %s17367_s14 }
  0x20   : > { %v4441_v23 = vrot.slane %v4439_v14, 6  ;;  %v4444_v24 = vrot.slane %v3285_v12, 5  ;;  %v4445_v25 = vrot.slane %v28449_v11, 6  ;;  %v4452_v26 = vrot.slane %v4450_v16, 5  ;;  %v22484_v32 = vld [vmem:[%s22455_s8 + $0x20] sm:$0x3] }
  0x21   : > { %28652 = vst [vmem:[#allocation11_spill] sm:$0xff] %v22476_v21  ;;  %v4455_v27 = vrot.slane %v4453_v17, 6  ;;  %v22480_v28 = vrot.slane %v3305_v18, 5  ;;  %v3311_v30 = vrot.slane %v3309_v19, 4  ;;  %v4459_v33 = vshrl.u32 %v22474_v20, 16  ;;  %s17355_s18 = scalar_lea.sflag [#allocation6], %s269_s22 }
  0x22   : > { %v4442_v29 = vor.u32 %v4441_v23, %v4438_v22  ;;  %v4446_v35 = vor.u32 %v4445_v25, %v4444_v24  ;;  %v4462_v37 = vshll.u32 %v22474_v20, 16  ;;  %v4467_v38 = vrot.slane %v3309_v19, 5  ;;  %v22498_v47 = vld [vmem:[%s22455_s8 + $0x28] sm:$0xf]  ;;  %v17771_v52 = vld [vmem:[%s22455_s8 + $0x24] sm:$0xe] }
  0x23   : > { %28653 = vst [vmem:[#allocation12_spill] sm:$0xff] %v22480_v28  ;;  %v4456_v36 = vor.u32 %v4455_v27, %v4452_v26  ;;  %v3312_v40 = vor.u32 %v3311_v30, %v22480_v28  ;;  %v4461_v41 = vrot.slane %v4459_v33, 5  ;;  %v4468_v42 = vrot.slane %v3305_v18, 6  ;;  %28657 = vst [vmem:[#allocation14_spill] sm:$0xff] %v22498_v47  ;;  %v22509_v57 = vld [vmem:[%s22455_s8 + $0x2c] sm:$0x3] }
  0x24   : > { %v4443_v39 = vrot.slane %v4442_v29, 4  ;;  %v4448_v43 = vrot.slane %v4446_v35, 4  ;;  %v4464_v44 = vrot.slane %v4462_v37, 6  ;;  %v4473_v45 = vshrl.u32 %v22484_v32, 16  ;;  %v22514_v4 = vld [vmem:[%s22455_s8 + $0x34] sm:$0xf] }
  0x25   : > { %v4476_v46 = vshll.u32 %v22484_v32, 16  ;;  %v22502_v49 = vrot.slane %v3312_v40, 4  ;;  %v4469_v50 = vor.u32 %v4468_v42, %v4467_v38  ;;  %v5157_v51 = vrot.slane %v22484_v32, 6  ;;  %28659 = vst [vmem:[#allocation16_spill] sm:$0xff] %v22514_v4  ;;  %v17772_v14 = vld [vmem:[%s22455_s8 + $0x30] sm:$0xe] }
  0x26   : > { %v4447_v48 = vsel %vm22489_vm4, %v4443_v39, %v4446_v35  ;;  %v4457_v53 = vsel %vm22489_vm4, %v4448_v43, %v4456_v36  ;;  %v4465_v54 = vor.u32 %v4464_v44, %v4461_v41  ;;  %v4475_v55 = vrot.slane %v4473_v45, 5  ;;  %v22529_v22 = vld [vmem:[%s22455_s8 + $0x38] sm:$0x3]  ;;  %v22536_v39 = vld [vmem:[%s22455_s8 + $0x40] sm:$0xf]  ;;  %s22266_s28 = scalar_lea.vmem %s28385_s14, 16 }
  0x27   : > { %28658 = vst [vmem:[#allocation15_spill] sm:$0xff] %v22502_v49  ;;  %v4478_v56 = vrot.slane %v4476_v46, 6  ;;  %v17851_v58 = vcombine.low %v4447_v48, %v4457_v53  ;;  %v4471_v59 = vrot.slane %v4469_v50, 4  ;;  %v28448_v60 = vshll.u32 %v22498_v47, 16  ;;  %28660 = vst [vmem:[#allocation17_spill] sm:$0xff] %v22536_v39  ;;  %p22267_p11 = scmp.ne.s32.totalorder %s28385_s14, %s22266_s28  ;;  %s22270_s20 = sshll.u32 %s22332_s19, 4  ;;  %s22271_s20 = int_to_ptr.vmem [resolvable:$false] %s22270_s20 }
  0x28   : > { %v28447_v61 = vshrl.u32 %v22498_v47, 16  ;;  %v4466_v62 = vrot.slane %v4465_v54, 4  ;;  %v4482_v0 = vshrl.u32 %v17771_v52, 16  ;;  %v4485_v2 = vshll.u32 %v17771_v52, 16  ;;  %v17773_v44 = vld [vmem:[%s22455_s8 + $0x3c] sm:$0xe]  ;;  %p22273_p0 = scmp.lt.s32.totalorder %s28385_s14, %s22271_s20 }
  0x29   : > { %v4479_v63 = vor.u32 %v4478_v56, %v4475_v55  ;;  %19988 = vmatprep.mubr.msk.bf16.mxu0 %vm763_vm3, %v17851_v58  ;;  %v4491_v9 = vrot.slane %v28448_v60, 6  ;;  %v4496_v12 = vshrl.u32 %v22509_v57, 16  ;;  %v4499_v13 = vshll.u32 %v22509_v57, 16  ;;  %v22554_v55 = vld [vmem:[%s22455_s8 + $0x44] sm:$0x3]  ;;  %p22268_p12 = pnand %p22267_p11, %p22411_p5 }
  0x2a   : > { %v4490_v5 = vrot.slane %v28447_v61, 5  ;;  %v4470_v16 = vsel %vm22489_vm4, %v4466_v62, %v4469_v50  ;;  %v4484_v18 = vrot.slane %v4482_v0, 5  ;;  %v4487_v19 = vrot.slane %v4485_v2, 6  ;;  %v22826_v61 = vld [vmem:[%s22455_s8 + $0x34] sm:$0xf] }
  0x2b   : > { %v4480_v17 = vsel %vm22489_vm4, %v4471_v59, %v4479_v63  ;;  %v4498_v25 = vrot.slane %v4496_v12, 5  ;;  %v4501_v26 = vrot.slane %v4499_v13, 6  ;;  %v28446_v29 = vshll.u32 %v22514_v4, 16  ;;  %v22557_v63 = vld [vmem:[%s22455_s8 + $0x4c] sm:$0xf]  ;;  %p22269_p13 = pneg %p22268_p12 }
  0x2c   : > { %v17852_v23 = vcombine.low %v4470_v16, %v4480_v17  ;;  %v4492_v24 = vor.u32 %v4491_v9, %v4490_v5  ;;  %v4488_v27 = vor.u32 %v4487_v19, %v4484_v18  ;;  %v28445_v30 = vshrl.u32 %v22514_v4, 16  ;;  %28661 = vst [vmem:[#allocation18_spill] sm:$0xff] %v22557_v63  ;;  %v17728_v1 = vld [vmem:[%s22455_s8 + $0xac] sm:$0xf]  ;;  %v23136_v49 = vld [vmem:[%s22455_s8 + $0xb8] sm:$0xf] }
  0x2d   : > { %v4505_v33 = vshrl.u32 %v17772_v14, 16  ;;  %v4502_v36 = vor.u32 %v4501_v26, %v4498_v25  ;;  %v4508_v37 = vshll.u32 %v17772_v14, 16  ;;  %v4519_v38 = vshrl.u32 %v22529_v22, 16 }
  0x2e   : > { %19989 = vmatmul.mubr.msk.bf16.vlgmr.msra.gmra.mrb[0].mxu0 %vm763_vm3, %v17852_v23  ;;  %v4494_v35 = vrot.slane %v4492_v24, 4  ;;  %v4489_v40 = vrot.slane %v4488_v27, 4  ;;  %v4513_v42 = vrot.slane %v28445_v30, 5  ;;  %v4514_v43 = vrot.slane %v28446_v29, 6  ;;  %v17774_v23 = vld [vmem:[%s22455_s8 + $0x48] sm:$0xe] }
  0x2f   : > { %20021 = vmatpush3.bf16.msra.mxu0 %v22446_v6  ;;  %v4507_v41 = vrot.slane %v4505_v33, 5  ;;  %v4510_v46 = vrot.slane %v4508_v37, 6  ;;  %v4521_v48 = vrot.slane %v4519_v38, 5  ;;  %v4522_v50 = vshll.u32 %v22529_v22, 16  ;;  %v22574_v33 = vld [vmem:[%s22455_s8 + $0x50] sm:$0x3] }
  0x30   : > { %v4503_v45 = vsel %vm22489_vm4, %v4494_v35, %v4502_v36  ;;  %21883 = vmatprep.subr.msk.bf16.mxu0 %vm812_vm0, %v22437_v3  ;;  %v4493_v6 = vsel %vm22489_vm4, %v4489_v40, %v4492_v24  ;;  %v4515_v52 = vor.u32 %v4514_v43, %v4513_v42  ;;  %v28444_v53 = vshll.u32 %v22536_v39, 16  ;;  %v22577_v40 = vld [vmem:[%s22455_s8 + $0x58] sm:$0xf] }
  0x31   : > { %v28443_v54 = vshrl.u32 %v22536_v39, 16  ;;  %v17853_v56 = vcombine.low %v4493_v6, %v4503_v45  ;;  %v4511_v58 = vor.u32 %v4510_v46, %v4507_v41  ;;  %v4524_v59 = vrot.slane %v4522_v50, 6  ;;  %28662 = vst [vmem:[#allocation19_spill] sm:$0xff] %v22577_v40 }
  0x32   : > { %v4528_v62 = vshrl.u32 %v17773_v44, 16  ;;  %v4517_v0 = vrot.slane %v4515_v52, 4  ;;  %v4531_v2 = vshll.u32 %v17773_v44, 16  ;;  %v4537_v5 = vrot.slane %v28444_v53, 6 }
  0x33   : > { %v4536_v3 = vrot.slane %v28443_v54, 5  ;;  %19992 = vmatprep.mubr.msk.bf16.mxu0 %vm763_vm3, %v17853_v56  ;;  %v4512_v9 = vrot.slane %v4511_v58, 4  ;;  %v4525_v12 = vor.u32 %v4524_v59, %v4521_v48  ;;  %v4542_v14 = vshrl.u32 %v22554_v55, 16  ;;  %v17775_v59 = vld [vmem:[%s22455_s8 + $0x54] sm:$0xe] }
  0x34   : > { %v4530_v13 = vrot.slane %v4528_v62, 5  ;;  %v4533_v16 = vrot.slane %v4531_v2, 6  ;;  %v4545_v18 = vshll.u32 %v22554_v55, 16  ;;  %v28442_v19 = vshll.u32 %v22557_v63, 16 }
  0x35   : > { %v4538_v17 = vor.u32 %v4537_v5, %v4536_v3  ;;  %v4516_v24 = vsel %vm22489_vm4, %v4512_v9, %v4515_v52  ;;  %v4526_v25 = vsel %vm22489_vm4, %v4517_v0, %v4525_v12  ;;  %v4544_v26 = vrot.slane %v4542_v14, 5  ;;  %v22593_v5 = vld [vmem:[%s22455_s8 + $0x5c] sm:$0x3] }
  0x36   : > { %v28441_v27 = vshrl.u32 %v22557_v63, 16  ;;  %v17854_v35 = vcombine.low %v4516_v24, %v4526_v25  ;;  %v4534_v36 = vor.u32 %v4533_v16, %v4530_v13  ;;  %v4547_v38 = vrot.slane %v4545_v18, 6  ;;  %v22597_v16 = vld [vmem:[%s22455_s8 + $0x64] sm:$0xf] }
  0x37   : > { %v4540_v37 = vrot.slane %v4538_v17, 4  ;;  %v4551_v41 = vshrl.u32 %v17774_v23, 16  ;;  %v4554_v42 = vshll.u32 %v17774_v23, 16  ;;  %v4560_v44 = vrot.slane %v28442_v19, 6  ;;  %28663 = vst [vmem:[#allocation20_spill] sm:$0xff] %v22597_v16 }
  0x38   : > { %v4559_v43 = vrot.slane %v28441_v27, 5  ;;  %19993 = vmatmul.mubr.msk.bf16.gmra.mrb[4].mxu0 %vm763_vm3, %v17854_v35  ;;  %v4535_v45 = vrot.slane %v4534_v36, 4  ;;  %v4548_v46 = vor.u32 %v4547_v38, %v4544_v26  ;;  %v4565_v48 = vshrl.u32 %v22574_v33, 16 }
  0x39   : > { %v4568_v50 = vshll.u32 %v22574_v33, 16  ;;  %v4553_v6 = vrot.slane %v4551_v41, 5  ;;  %v4556_v52 = vrot.slane %v4554_v42, 6  ;;  %v28440_v58 = vshll.u32 %v22577_v40, 16 }
  0x3a   : > { %v4561_v56 = vor.u32 %v4560_v44, %v4559_v43  ;;  %v4539_v62 = vsel %vm22489_vm4, %v4535_v45, %v4538_v17  ;;  %v4549_v0 = vsel %vm22489_vm4, %v4540_v37, %v4548_v46  ;;  %v4567_v2 = vrot.slane %v4565_v48, 5  ;;  %v17776_v37 = vld [vmem:[%s22455_s8 + $0x60] sm:$0xe] }
  0x3b   : > { %v4570_v3 = vrot.slane %v4568_v50, 6  ;;  %v17855_v9 = vcombine.low %v4539_v62, %v4549_v0  ;;  %v4557_v12 = vor.u32 %v4556_v52, %v4553_v6  ;;  %v28439_v14 = vshrl.u32 %v22577_v40, 16  ;;  %v22613_v50 = vld [vmem:[%s22455_s8 + $0x68] sm:$0x3]  ;;  %v22617_v0 = vld [vmem:[%s22455_s8 + $0x70] sm:$0xf] }
  0x3c   : > { %v4563_v13 = vrot.slane %v4561_v56, 4  ;;  %v4574_v23 = vshrl.u32 %v17775_v59, 16  ;;  %v4577_v24 = vshll.u32 %v17775_v59, 16  ;;  %v4583_v17 = vrot.slane %v28440_v58, 6  ;;  %28664 = vst [vmem:[#allocation21_spill] sm:$0xff] %v22617_v0 }
  0x3d   : > { %v4571_v18 = vor.u32 %v4570_v3, %v4567_v2  ;;  %19996 = vmatprep.mubr.msk.bf16.mxu0 %vm763_vm3, %v17855_v9  ;;  %v4558_v25 = vrot.slane %v4557_v12, 4  ;;  %v4582_v26 = vrot.slane %v28439_v14, 5  ;;  %v4588_v35 = vshrl.u32 %v22593_v5, 16  ;;  %v17888_v14 = vld [vmem:[%s22455_s8 + $0x48] sm:$0xc] }
  0x3e   : > { %v4591_v36 = vshll.u32 %v22593_v5, 16  ;;  %v4576_v41 = vrot.slane %v4574_v23, 5  ;;  %v4579_v42 = vrot.slane %v4577_v24, 6  ;;  %v28438_v43 = vshll.u32 %v22597_v16, 16  ;;  %v17777_v24 = vld [vmem:[%s22455_s8 + $0x6c] sm:$0xe] }
  0x3f   : > { %v4572_v38 = vsel %vm22489_vm4, %v4563_v13, %v4571_v18  ;;  %v4562_v44 = vsel %vm22489_vm4, %v4558_v25, %v4561_v56  ;;  %v4584_v45 = vor.u32 %v4583_v17, %v4582_v26  ;;  %v4590_v46 = vrot.slane %v4588_v35, 5 }
  0x40   : > { %v4593_v48 = vrot.slane %v4591_v36, 6  ;;  %v17856_v6 = vcombine.low %v4562_v44, %v4572_v38  ;;  %v4580_v52 = vor.u32 %v4579_v42, %v4576_v41  ;;  %v28437_v59 = vshrl.u32 %v22597_v16, 16  ;;  %v22634_v42 = vld [vmem:[%s22455_s8 + $0x74] sm:$0x3] }
  0x41   : > { %v4597_v62 = vshrl.u32 %v17776_v37, 16  ;;  %v4586_v2 = vrot.slane %v4584_v45, 4  ;;  %v4600_v9 = vshll.u32 %v17776_v37, 16  ;;  %v4606_v12 = vrot.slane %v28438_v43, 6 }
  0x42   : > { %v4594_v3 = vor.u32 %v4593_v48, %v4590_v46  ;;  %19997 = vmatmul.mubr.msk.bf16.gmra.mrb[8].mxu0 %vm763_vm3, %v17856_v6  ;;  %v4581_v56 = vrot.slane %v4580_v52, 4  ;;  %v4605_v18 = vrot.slane %v28437_v59, 5  ;;  %v4611_v23 = vshrl.u32 %v22613_v50, 16  ;;  %v22637_v52 = vld [vmem:[%s22455_s8 + $0x7c] sm:$0xf] }
  0x43   : > { %v4599_v13 = vrot.slane %v4597_v62, 5  ;;  %v4602_v25 = vrot.slane %v4600_v9, 6  ;;  %v4614_v26 = vshll.u32 %v22613_v50, 16  ;;  %v28434_v35 = vshll.u32 %v22617_v0, 16  ;;  %28665 = vst [vmem:[#allocation22_spill] sm:$0xff] %v22637_v52 }
  0x44   : > { %v4595_v17 = vsel %vm22489_vm4, %v4586_v2, %v4594_v3  ;;  %v4585_v36 = vsel %vm22489_vm4, %v4581_v56, %v4584_v45  ;;  %v4607_v37 = vor.u32 %v4606_v12, %v4605_v18  ;;  %v4613_v38 = vrot.slane %v4611_v23, 5 }
  0x45   : > { %v28433_v41 = vshrl.u32 %v22617_v0, 16  ;;  %v17857_v44 = vcombine.low %v4585_v36, %v4595_v17  ;;  %v4603_v46 = vor.u32 %v4602_v25, %v4599_v13  ;;  %v4616_v48 = vrot.slane %v4614_v26, 6  ;;  %v17778_v25 = vld [vmem:[%s22455_s8 + $0x78] sm:$0xe] }
  0x46   : > { %v4620_v6 = vshrl.u32 %v17777_v24, 16  ;;  %v4609_v62 = vrot.slane %v4607_v37, 4  ;;  %v4623_v2 = vshll.u32 %v17777_v24, 16  ;;  %v4629_v45 = vrot.slane %v28434_v35, 6 }
  0x47   : > { %v4628_v3 = vrot.slane %v28433_v41, 5  ;;  %20000 = vmatprep.mubr.msk.bf16.mxu0 %vm763_vm3, %v17857_v44  ;;  %v4604_v9 = vrot.slane %v4603_v46, 4  ;;  %v4617_v12 = vor.u32 %v4616_v48, %v4613_v38  ;;  %v4634_v13 = vshrl.u32 %v22634_v42, 16  ;;  %v22654_v46 = vld [vmem:[%s22455_s8 + $0x80] sm:$0x3] }
  0x48   : > { %v4622_v56 = vrot.slane %v4620_v6, 5  ;;  %v4625_v18 = vrot.slane %v4623_v2, 6  ;;  %v4637_v17 = vshll.u32 %v22634_v42, 16  ;;  %v28436_v24 = vshll.u32 %v22637_v52, 16 }
  0x49   : > { %v4630_v23 = vor.u32 %v4629_v45, %v4628_v3  ;;  %v4608_v26 = vsel %vm22489_vm4, %v4604_v9, %v4607_v37  ;;  %v4618_v36 = vsel %vm22489_vm4, %v4609_v62, %v4617_v12  ;;  %v4636_v44 = vrot.slane %v4634_v13, 5  ;;  %v17883_v45 = vld [vmem:[%s22455_s8 + $0xc] sm:$0xc] }
  0x4a   : > { %v28435_v38 = vshrl.u32 %v22637_v52, 16  ;;  %v17858_v48 = vcombine.low %v4608_v26, %v4618_v36  ;;  %v4626_v6 = vor.u32 %v4625_v18, %v4622_v56  ;;  %v4639_v3 = vrot.slane %v4637_v17, 6 }
  0x4b   : > { %v4632_v2 = vrot.slane %v4630_v23, 4  ;;  %v4643_v31 = vshrl.u32 %v17778_v25, 16  ;;  %v4646_v41 = vshll.u32 %v17778_v25, 16  ;;  %v4652_v37 = vrot.slane %v28436_v24, 6  ;;  %v17884_v25 = vld [vmem:[%s22455_s8 + $0x18] sm:$0xc] }
  0x4c   : > { %v4651_v35 = vrot.slane %v28435_v38, 5  ;;  %20001 = vmatmul.mubr.msk.bf16.gmra.mrb[12].mxu0 %vm763_vm3, %v17858_v48  ;;  %v4627_v62 = vrot.slane %v4626_v6, 4  ;;  %v4640_v9 = vor.u32 %v4639_v3, %v4636_v44  ;;  %v4657_v12 = vshrl.u32 %v22654_v46, 16 }
  0x4d   : > { %v4660_v56 = vshll.u32 %v22654_v46, 16  ;;  %v4645_v13 = vrot.slane %v4643_v31, 5  ;;  %v4648_v18 = vrot.slane %v4646_v41, 6  ;;  %v17899_v26 = vrot.slane %v17883_v45, 10  ;;  %v17885_v31 = vld [vmem:[%s22455_s8 + $0x24] sm:$0xc] }
  0x4e   : > { %v4653_v17 = vor.u32 %v4652_v37, %v4651_v35  ;;  %v4631_v36 = vsel %vm22489_vm4, %v4627_v62, %v4630_v23  ;;  %v4641_v38 = vsel %vm22489_vm4, %v4632_v2, %v4640_v9  ;;  %v4659_v24 = vrot.slane %v4657_v12, 5  ;;  %v17886_v62 = vld [vmem:[%s22455_s8 + $0x30] sm:$0xc] }
  0x4f   : > { %v4662_v48 = vrot.slane %v4660_v56, 6  ;;  %v28666_v44 = vmov 0  ;;  %v17859_v41 = vcombine.low %v4631_v36, %v4641_v38  ;;  %v4649_v35 = vor.u32 %v4648_v18, %v4645_v13 }
  0x50   : > { %v28667_v44 = vsel %vm22671_vm6, 4294967295, %v28666_v44  ;;  %v4655_v6 = vrot.slane %v4653_v17, 4  ;;  %v5147_v3 = vrot.slane %v22458_v8, 6  ;;  %v5150_v23 = vrot.slane %v22462_v10, 6 }
  0x51   : > { %28668 = vst [vmem:[#allocation23_spill] sm:$0xff] %v28667_v44  ;;  %v4663_v45 = vor.u32 %v4662_v48, %v4659_v24  ;;  %v17900_v37 = vrot.slane %v17884_v25, 10  ;;  %v5154_v2 = vrot.slane %v22467_v15, 6  ;;  %20004 = vmatprep.mubr.msk.bf16.mxu0 %vm763_vm3, %v17859_v41  ;;  %v4650_v9 = vrot.slane %v4649_v35, 4  ;;  %v277_v48 = vld [vmem:[%s22455_s8] sm:$0xf] }
  0x52   : > { %v5148_v38 = vsel %vm22671_vm6, %v17899_v26, %v5147_v3  ;;  %v5149_v12 = vrot.slane %v5147_v3, 4  ;;  %v17901_v56 = vrot.slane %v17885_v31, 10  ;;  %v5161_v13 = vrot.slane %v22498_v47, 6  ;;  %v278_v31 = vld [vmem:[%s22455_s8 + $0x4] sm:$0xf]  ;;  %v21942_v47 = vld [vmem:[%s22455_s8 + $0x30] sm:$0xff]  }
  0x53   : > { %v4664_v10 = vsel %vm22489_vm4, %v4655_v6, %v4663_v45  ;;  %v5155_v15 = vsel %vm22671_vm6, %v17900_v37, %v5154_v2  ;;  %v5156_v24 = vrot.slane %v5154_v2, 4  ;;  %v4654_v18 = vsel %vm22489_vm4, %v4650_v9, %v4653_v17  ;;  %v22702_v17 = vld [vmem:[%s22455_s8 + $0x8] sm:$0x1]  ;;  %v325_v44 = vld [vmem:[%s22455_s8 + $0xbc] sm:$0x1] }
  0x54   : > { %v5151_v25 = vsel %vm22671_vm6, %v5149_v12, %v5150_v23  ;;  %v5164_v26 = vrot.slane %v22509_v57, 6  ;;  %v17902_v36 = vrot.slane %v17886_v62, 10  ;;  %v17860_v41 = vcombine.low %v4654_v18, %v4664_v10  ;;  %v22719_v18 = vld [vmem:[%s22455_s8 + $0x10] sm:$0xf] }
  0x55   : > { %v17916_v35 = vcombine.low %v5148_v38, %v5151_v25  ;;  %v5158_v6 = vsel %vm22671_vm6, %v5156_v24, %v5157_v51  ;;  %v5162_v3 = vsel %vm22671_vm6, %v17901_v56, %v5161_v13  ;;  %v5163_v23 = vrot.slane %v5161_v13, 4  ;;  %v22716_v56 = vld [vmem:[%s22455_s8 + $0xc] sm:$0xf] }
  0x56   : > { %v17917_v45 = vcombine.low %v5155_v15, %v5158_v6  ;;  %v5168_v57 = vrot.slane %v22514_v4, 6  ;;  %v5171_v37 = vrot.slane %v22529_v22, 6  ;;  %20005 = vmatmul.mubr.msk.bf16.gmra.mrb[16].mxu0 %vm763_vm3, %v17860_v41  ;;  %v330_v2 = vshrl.u32 %v277_v48, 16 }
  0x57   : > { %v333_v32 = vshll.u32 %v277_v48, 16  ;;  %v339_v62 = vshll.u32 %v278_v31, 16  ;;  %v343_v9 = vshrl.u32 %v278_v31, 16  ;;  %20022 = vmatprep.mubr.msk.bf16.mxu0 %vm763_vm3, %v17916_v35  ;;  %v5165_v51 = vsel %vm22671_vm6, %v5163_v23, %v5164_v26  ;;  %v22727_v31 = vld [vmem:[%s22455_s8 + $0x14] sm:$0x1] }
  0x58   : > { %v22712_v38 = vsel %vm22671_vm6, %v17902_v36, %v5168_v57  ;;  %v5170_v12 = vrot.slane %v5168_v57, 4  ;;  %v349_v22 = vshll.u32 %v22702_v17, 16  ;;  %v17918_v10 = vcombine.low %v5162_v3, %v5165_v51 }
  0x59   : > { %v332_v15 = vrot.slane %v330_v2, 4  ;;  %v335_v24 = vrot.slane %v333_v32, 5  ;;  %v341_v13 = vrot.slane %v339_v62, 5  ;;  %v345_v26 = vrot.slane %v343_v9, 4 }
  0x5a   : > { %v22723_v25 = vsel %vm22671_vm6, %v5170_v12, %v5171_v37  ;;  %v351_v48 = vrot.slane %v349_v22, 5  ;;  %v22731_v6 = vrot.slane %v343_v9, 5  ;;  %v22733_v3 = vrot.slane %v339_v62, 6  ;;  %v17887_v12 = vld [vmem:[%s22455_s8 + $0x3c] sm:$0xc] }
  0x5b   : > { %v17919_v41 = vcombine.low %v22712_v38, %v22723_v25  ;;  %v336_v35 = vor.u32 %v335_v24, %v332_v15  ;;  %v28669_v23 = vmov 0  ;;  %v346_v57 = vor.u32 %v345_v26, %v341_v13 }
  0x5c   : > { %v28670_v23 = vsel %vm22737_vm9, 4294967295, %v28669_v23  ;;  %v354_v37 = vshrl.u32 %v22716_v56, 16  ;;  %v357_v2 = vshll.u32 %v22716_v56, 16  ;;  %v363_v32 = vshll.u32 %v22719_v18, 16 }
  0x5d   : > { %28671 = vst [vmem:[#allocation24_spill] sm:$0xff] %v28670_v23  ;;  %v337_v51 = vrot.slane %v336_v35, 4  ;;  %v367_v9 = vshrl.u32 %v22719_v18, 16  ;;  %v373_v62 = vshll.u32 %v22727_v31, 16  ;;  %v347_v22 = vrot.slane %v346_v57, 4 }
  0x5e   : > { %v356_v15 = vrot.slane %v354_v37, 4  ;;  %v359_v24 = vrot.slane %v357_v2, 5  ;;  %v365_v25 = vrot.slane %v363_v32, 5  ;;  %20023 = vmatmul.mubr.msk.bf16.vlgmr.msra.gmra.mrb[0].mxu0 %vm763_vm3, %v17917_v45  ;;  %v1778_v2 = vrot.slane %v363_v32, 6  ;;  %v22087_v23 = vld [vmem:[%s22455_s8 + $0x4c] sm:$0xf] }
  0x5f   : > { %v342_v26 = vsel %vm22737_vm9, %v337_v51, %v341_v13  ;;  %v369_v59 = vrot.slane %v367_v9, 4  ;;  %v375_v43 = vrot.slane %v373_v62, 5  ;;  %v1777_v35 = vrot.slane %v367_v9, 5  ;;  %20055 = vmatpush3.bf16.msra.mxu0 %v22450_v7  ;;  %20026 = vmatprep.mubr.msk.bf16.mxu0 %vm763_vm3, %v17918_v10  ;;  %v22759_v9 = vld [vmem:[%s22455_s8 + $0x18] sm:$0xf] }
  0x60   : > { %v352_v57 = vsel %vm22737_vm9, %v347_v22, %v351_v48  ;;  %v360_v37 = vor.u32 %v359_v24, %v356_v15  ;;  %v17903_v58 = vrot.slane %v17887_v12, 10  ;;  %v5175_v13 = vrot.slane %v22536_v39, 6  ;;  %v22765_v48 = vld [vmem:[%s22455_s8 + $0x1c] sm:$0xf]  ;;  %v22773_v15 = vld [vmem:[%s22455_s8 + $0x24] sm:$0xf] }
  0x61   : > { %v17428_v45 = vcombine.low %v342_v26, %v352_v57  ;;  %v370_v27 = vor.u32 %v369_v59, %v365_v25  ;;  %v5178_v51 = vrot.slane %v22554_v55, 6  ;;  %v22761_v7 = vor.u32 %v1778_v2, %v1777_v35  ;;  %v312_v55 = vld [vmem:[%s22455_s8 + $0x20] sm:$0x1] }
  0x62   : > { %v361_v62 = vrot.slane %v360_v37, 4  ;;  %v17904_v10 = vrot.slane %v17888_v14, 10  ;;  %v5182_v19 = vrot.slane %v22557_v63, 6  ;;  %v5176_v59 = vsel %vm22671_vm6, %v17903_v58, %v5175_v13 }
  0x63   : > { %28672 = vst [vmem:[#allocation25_spill] sm:$0xff] %v22761_v7  ;;  %19716 = vmatprep.mubr.msk.bf16.mxu1 %vm763_vm3, %v17428_v45  ;;  %v371_v32 = vrot.slane %v370_v27, 4  ;;  %v5177_v12 = vrot.slane %v5175_v13, 4  ;;  %v5185_v22 = vrot.slane %v22574_v33, 6  ;;  %v378_v58 = vshrl.u32 %v22759_v9, 16 }
  0x64   : > { %v366_v14 = vsel %vm22737_vm9, %v361_v62, %v365_v25  ;;  %v5183_v26 = vsel %vm22671_vm6, %v17904_v10, %v5182_v19  ;;  %v5184_v35 = vrot.slane %v5182_v19, 4  ;;  %v381_v57 = vshll.u32 %v22759_v9, 16  ;;  %v22789_v25 = vld [vmem:[%s28426_s1 + $0x16] sm:$0x3]  ;;  %v22795_v45 = vld [vmem:[%s22455_s8 + $0x28] sm:$0xf] }
  0x65   : > { %v376_v27 = vsel %vm22737_vm9, %v371_v32, %v375_v43  ;;  %v5179_v33 = vsel %vm22671_vm6, %v5177_v12, %v5178_v51  ;;  %v28456_v43 = vshll.u32 %v22765_v48, 16  ;;  %21884 = vmatprep.subr.msk.bf16.mxu0 %vm812_vm0, %v22789_v25  ;;  %v380_v51 = vrot.slane %v378_v58, 4  ;;  %v313_v32 = vld [vmem:[%s22455_s8 + $0x2c] sm:$0x1] }
  0x66   : > { %v17429_v37 = vcombine.low %v366_v14, %v376_v27  ;;  %v17920_v2 = vcombine.low %v5176_v59, %v5179_v33  ;;  %v5186_v19 = vsel %vm22671_vm6, %v5184_v35, %v5185_v22  ;;  %20027 = vmatmul.mubr.msk.bf16.gmra.mrb[4].mxu0 %vm763_vm3, %v17919_v41  ;;  %v383_v62 = vrot.slane %v381_v57, 5  ;;  %v17889_v33 = vld [vmem:[%s22455_s8 + $0x54] sm:$0xc] }
  0x67   : > { %v17921_v13 = vcombine.low %v5183_v26, %v5186_v19  ;;  %v28457_v10 = vshrl.u32 %v22765_v48, 16  ;;  %v389_v59 = vrot.slane %v28456_v43, 5  ;;  %v397_v12 = vshll.u32 %v312_v55, 16  ;;  %v17890_v55 = vld [vmem:[%s22455_s8 + $0x60] sm:$0xc] }
  0x68   : > { %19717 = vmatmul.mubr.msk.bf16.vlgmr.msra.gmra.mrb[0].mxu1 %vm763_vm3, %v17429_v37  ;;  %20030 = vmatprep.mubr.msk.bf16.mxu0 %vm763_vm3, %v17920_v2  ;;  %v402_v22 = vshrl.u32 %v22773_v15, 16  ;;  %v405_v41 = vshll.u32 %v22773_v15, 16  ;;  %v384_v14 = vor.u32 %v383_v62, %v380_v51  ;;  %v28450_v35 = vshll.u32 %v22795_v45, 16  ;;  %v22819_v62 = vld [vmem:[%s22455_s8 + $0x30] sm:$0xf] }
  0x69   : > { %v393_v26 = vrot.slane %v28457_v10, 4  ;;  %v28453_v27 = vshrl.u32 %v22795_v45, 16  ;;  %v399_v58 = vrot.slane %v397_v12, 5  ;;  %v421_v2 = vshll.u32 %v313_v32, 16 }
  0x6a   : > { %v404_v57 = vrot.slane %v402_v22, 4  ;;  %v407_v37 = vrot.slane %v405_v41, 5  ;;  %v385_v19 = vrot.slane %v384_v14, 4  ;;  %v413_v53 = vrot.slane %v28450_v35, 5 }
  0x6b   : > { %v394_v54 = vor.u32 %v393_v26, %v389_v59  ;;  %v417_v51 = vrot.slane %v28453_v27, 4  ;;  %v423_v29 = vrot.slane %v421_v2, 5  ;;  %v17905_v12 = vrot.slane %v17889_v33, 10  ;;  %v22832_v33 = vld [vmem:[%s22455_s8 + $0x3c] sm:$0xf] }
  0x6c   : > { %v408_v30 = vor.u32 %v407_v37, %v404_v57  ;;  %v5189_v22 = vrot.slane %v22577_v40, 6  ;;  %v390_v32 = vsel %vm22737_vm9, %v385_v19, %v389_v59  ;;  %v5192_v26 = vrot.slane %v22593_v5, 6  ;;  %v314_v37 = vld [vmem:[%s22455_s8 + $0x38] sm:$0x1]  ;;  %v22842_v2 = vld [vmem:[%s28426_s1] sm:$0x3] }
  0x6d   : > { %v395_v41 = vrot.slane %v394_v54, 4  ;;  %v418_v14 = vor.u32 %v417_v51, %v413_v53  ;;  %v17906_v57 = vrot.slane %v17890_v55, 10  ;;  %v5196_v5 = vrot.slane %v22597_v16, 6  ;;  %v22850_v51 = vld [vmem:[%s22455_s8 + $0x40] sm:$0xf]  ;;  %21873 = vmatprep.subr.msk.bf16.mxu1 %vm812_vm0, %v22842_v2 }
  0x6e   : > { %v409_v60 = vrot.slane %v408_v30, 4  ;;  %v5190_v11 = vsel %vm22671_vm6, %v17905_v12, %v5189_v22  ;;  %v5191_v35 = vrot.slane %v5189_v22, 4  ;;  %20031 = vmatmul.mubr.msk.bf16.gmra.mrb[8].mxu0 %vm763_vm3, %v17921_v13  ;;  %v5199_v30 = vrot.slane %v22613_v50, 6  ;;  %28673 = vst [vmem:[#allocation26_spill] sm:$0xff] %v22850_v51 }
  0x6f   : > { %v400_v54 = vsel %vm22737_vm9, %v395_v41, %v399_v58  ;;  %v419_v59 = vrot.slane %v418_v14, 4  ;;  %v426_v58 = vshrl.u32 %v22819_v62, 16  ;;  %v5197_v22 = vsel %vm22671_vm6, %v17906_v57, %v5196_v5  ;;  %v315_v41 = vld [vmem:[%s22455_s8 + $0x44] sm:$0x1] }
  0x70   : > { %v17430_v55 = vcombine.low %v390_v32, %v400_v54  ;;  %v414_v19 = vsel %vm22737_vm9, %v409_v60, %v413_v53  ;;  %v5193_v13 = vsel %vm22671_vm6, %v5191_v35, %v5192_v26  ;;  %v5198_v32 = vrot.slane %v5196_v5, 4  ;;  %v17891_v26 = vld [vmem:[%s22455_s8 + $0x6c] sm:$0xc] }
  0x71   : > { %v424_v50 = vsel %vm22737_vm9, %v419_v59, %v423_v29  ;;  %v17922_v12 = vcombine.low %v5190_v11, %v5193_v13  ;;  %v428_v53 = vrot.slane %v426_v58, 4  ;;  %v429_v35 = vshll.u32 %v22819_v62, 16 }
  0x72   : > { %19720 = vmatprep.mubr.msk.bf16.mxu1 %vm763_vm3, %v17430_v55  ;;  %v17431_v60 = vcombine.low %v414_v19, %v424_v50  ;;  %v28451_v14 = vshll.u32 %v22826_v61, 16  ;;  %v5200_v11 = vsel %vm22671_vm6, %v5198_v32, %v5199_v30  ;;  %v28452_v29 = vshrl.u32 %v22826_v61, 16 }
  0x73   : > { %20034 = vmatprep.mubr.msk.bf16.mxu0 %vm763_vm3, %v17922_v12  ;;  %v445_v57 = vshll.u32 %v314_v37, 16  ;;  %v450_v54 = vshrl.u32 %v22832_v33, 16  ;;  %v17923_v59 = vcombine.low %v5197_v22, %v5200_v11  ;;  %v431_v5 = vrot.slane %v429_v35, 5  ;;  %v17892_v37 = vld [vmem:[%s22455_s8 + $0x78] sm:$0xc] }
  0x74   : > { %19721 = vmatmul.mubr.msk.bf16.gmra.mrb[4].mxu1 %vm763_vm3, %v17431_v60  ;;  %v437_v55 = vrot.slane %v28451_v14, 5  ;;  %v453_v19 = vshll.u32 %v22832_v33, 16  ;;  %v441_v13 = vrot.slane %v28452_v29, 4  ;;  %v28454_v30 = vshll.u32 %v22850_v51, 16 }
  0x75   : > { %v447_v58 = vrot.slane %v445_v57, 5  ;;  %v452_v50 = vrot.slane %v450_v54, 4  ;;  %v432_v12 = vor.u32 %v431_v5, %v428_v53  ;;  %v28455_v60 = vshrl.u32 %v22850_v51, 16 }
  0x76   : > { %v455_v32 = vrot.slane %v453_v19, 5  ;;  %v469_v22 = vshll.u32 %v315_v41, 16  ;;  %20035 = vmatmul.mubr.msk.bf16.gmra.mrb[12].mxu0 %vm763_vm3, %v17923_v59  ;;  %v442_v35 = vor.u32 %v441_v13, %v437_v55  ;;  %v461_v11 = vrot.slane %v28454_v30, 5  ;;  %v22884_v19 = vld [vmem:[%s22455_s8 + $0x48] sm:$0xf] }
  0x77   : > { %v17907_v14 = vrot.slane %v17891_v26, 10  ;;  %v5203_v57 = vrot.slane %v22617_v0, 6  ;;  %v433_v54 = vrot.slane %v432_v12, 4  ;;  %v465_v53 = vrot.slane %v28455_v60, 4  ;;  %v22890_v26 = vld [vmem:[%s22455_s8 + $0x4c] sm:$0xf] }
  0x78   : > { %v456_v29 = vor.u32 %v455_v32, %v452_v50  ;;  %v471_v5 = vrot.slane %v469_v22, 5  ;;  %v443_v27 = vrot.slane %v442_v35, 4  ;;  %v5206_v13 = vrot.slane %v22634_v42, 6  ;;  %v316_v30 = vld [vmem:[%s22455_s8 + $0x50] sm:$0x1] }
  0x79   : > { %v5204_v41 = vsel %vm22671_vm6, %v17907_v14, %v5203_v57  ;;  %v5205_v59 = vrot.slane %v5203_v57, 4  ;;  %v438_v50 = vsel %vm22737_vm9, %v433_v54, %v437_v55  ;;  %v466_v32 = vor.u32 %v465_v53, %v461_v11  ;;  %v22904_v54 = vld [vmem:[%s22455_s8 + $0x54] sm:$0xf] }
  0x7a   : > { %v457_v12 = vrot.slane %v456_v29, 4  ;;  %v17908_v22 = vrot.slane %v17892_v37, 10  ;;  %v448_v35 = vsel %vm22737_vm9, %v443_v27, %v447_v58  ;;  %v5210_v42 = vrot.slane %v22637_v52, 6  ;;  %v22907_v37 = vld [vmem:[%s22455_s8 + $0x58] sm:$0xf] }
  0x7b   : > { %v5207_v14 = vsel %vm22671_vm6, %v5205_v59, %v5206_v13  ;;  %v5213_v57 = vrot.slane %v22654_v46, 6  ;;  %v17432_v60 = vcombine.low %v438_v50, %v448_v35  ;;  %v467_v55 = vrot.slane %v466_v32, 4  ;;  %28674 = vst [vmem:[#allocation27_spill] sm:$0xff] %v22907_v37  ;;  %v317_v46 = vld [vmem:[%s22455_s8 + $0x5c] sm:$0x1] }
  0x7c   : > { %v462_v43 = vsel %vm22737_vm9, %v457_v12, %v461_v11  ;;  %v17924_v29 = vcombine.low %v5204_v41, %v5207_v14  ;;  %v5211_v27 = vsel %vm22671_vm6, %v17908_v22, %v5210_v42  ;;  %v5212_v58 = vrot.slane %v5210_v42, 4  ;;  %v17893_v13 = vld [vmem:[%s22455_s8 + $0x84] sm:$0xc]  ;;  %v17719_v42 = vld [vmem:[%s22455_s8 + $0x88] sm:$0xf] }
  0x7d   : > { %v474_v53 = vshrl.u32 %v22884_v19, 16  ;;  %v477_v59 = vshll.u32 %v22884_v19, 16  ;;  %19724 = vmatprep.mubr.msk.bf16.mxu1 %vm763_vm3, %v17432_v60  ;;  %v472_v11 = vsel %vm22737_vm9, %v467_v55, %v471_v5  ;;  %v28458_v41 = vshll.u32 %v22890_v26, 16 }
  0x7e   : > { %20038 = vmatprep.mubr.msk.bf16.mxu0 %vm763_vm3, %v17924_v29  ;;  %v28459_v50 = vshrl.u32 %v22890_v26, 16  ;;  %v493_v12 = vshll.u32 %v316_v30, 16  ;;  %v17433_v32 = vcombine.low %v462_v43, %v472_v11  ;;  %v5214_v22 = vsel %vm22671_vm6, %v5212_v58, %v5213_v57 }
  0x7f   : > { %v476_v35 = vrot.slane %v474_v53, 4  ;;  %v479_v14 = vrot.slane %v477_v59, 5  ;;  %v17925_v10 = vcombine.low %v5211_v27, %v5214_v22  ;;  %v485_v60 = vrot.slane %v28458_v41, 5  ;;  %v17844_v59 = vld [vmem:[%s22455_s8 + $0x8c] sm:$0x3] }
  0x80   : > { %v489_v5 = vrot.slane %v28459_v50, 4  ;;  %v495_v55 = vrot.slane %v493_v12, 5  ;;  %19725 = vmatmul.mubr.msk.bf16.gmra.mrb[8].mxu1 %vm763_vm3, %v17433_v32  ;;  %v498_v43 = vshrl.u32 %v22904_v54, 16  ;;  %v501_v30 = vshll.u32 %v22904_v54, 16 }
  0x81   : > { %v480_v29 = vor.u32 %v479_v14, %v476_v35  ;;  %v28460_v57 = vshll.u32 %v22907_v37, 16  ;;  %20039 = vmatmul.mubr.msk.bf16.gmra.mrb[16].mxu0 %vm763_vm3, %v17925_v10  ;;  %v28461_v58 = vshrl.u32 %v22907_v37, 16  ;;  %v517_v53 = vshll.u32 %v317_v46, 16 }
  0x82   : > { %v490_v27 = vor.u32 %v489_v5, %v485_v60  ;;  %v17909_v11 = vrot.slane %v17893_v13, 10  ;;  %v500_v32 = vrot.slane %v498_v43, 4  ;;  %v503_v22 = vrot.slane %v501_v30, 5  ;;  %v17845_v5 = vld [vmem:[%s22455_s8 + $0x98] sm:$0x3] }
  0x83   : > { %v481_v12 = vrot.slane %v480_v29, 4  ;;  %v509_v35 = vrot.slane %v28460_v57, 5  ;;  %v513_v41 = vrot.slane %v28461_v58, 4  ;;  %v519_v50 = vrot.slane %v517_v53, 5  ;;  %v17722_v13 = vld [vmem:[%s22455_s8 + $0x94] sm:$0xf] }
  0x84   : > { %v491_v14 = vrot.slane %v490_v27, 4  ;;  %v5217_v10 = vrot.slane %v17719_v42, 6  ;;  %v504_v24 = vor.u32 %v503_v22, %v500_v32  ;;  %v5220_v38 = vrot.slane %v17844_v59, 6  ;;  %v17894_v43 = vld [vmem:[%s22455_s8 + $0x90] sm:$0xc] }
  0x85   : > { %v486_v46 = vsel %vm22737_vm9, %v481_v12, %v485_v60  ;;  %v4703_v29 = vshrl.u32 %v17845_v5, 16  ;;  %v514_v27 = vor.u32 %v513_v41, %v509_v35  ;;  %v4706_v60 = vshll.u32 %v17845_v5, 16  ;;  %v22951_v12 = vld [vmem:[%s22455_s8 + $0x60] sm:$0xf]  ;;  %v22956_v41 = vld [vmem:[%s22455_s8 + $0x64] sm:$0xf] }
  0x86   : > { %v496_v30 = vsel %vm22737_vm9, %v491_v14, %v495_v55  ;;  %v5218_v57 = vsel %vm22671_vm6, %v17909_v11, %v5217_v10  ;;  %v5219_v53 = vrot.slane %v5217_v10, 4  ;;  %v505_v58 = vrot.slane %v504_v24, 4 }
  0x87   : > { %v17434_v42 = vcombine.low %v486_v46, %v496_v30  ;;  %v22948_v36 = vrot.slane %v4703_v29, 5  ;;  %v515_v59 = vrot.slane %v514_v27, 4  ;;  %v17910_v22 = vrot.slane %v17894_v43, 10  ;;  %v318_v46 = vld [vmem:[%s22455_s8 + $0x68] sm:$0x1] }
  0x88   : > { %v5221_v32 = vsel %vm22671_vm6, %v5219_v53, %v5220_v38  ;;  %v5224_v55 = vrot.slane %v17722_v13, 6  ;;  %v510_v24 = vsel %vm22737_vm9, %v505_v58, %v509_v35  ;;  %v22961_v14 = vrot.slane %v4706_v60, 6  ;;  %v22970_v30 = vld [vmem:[%s22455_s8 + $0x6c] sm:$0xf]  ;;  %v22978_v35 = vld [vmem:[%s22455_s8 + $0x70] sm:$0xf] }
  0x89   : > { %28675 = vst [vmem:[#allocation28_spill] sm:$0xff] %v22948_v36  ;;  %19728 = vmatprep.mubr.msk.bf16.mxu1 %vm763_vm3, %v17434_v42  ;;  %v17926_v11 = vcombine.low %v5218_v57, %v5221_v32  ;;  %v5227_v10 = vrot.slane %v17845_v5, 6  ;;  %v520_v29 = vsel %vm22737_vm9, %v515_v59, %v519_v50  ;;  %v522_v43 = vshrl.u32 %v22951_v12, 16  ;;  %28677 = vst [vmem:[#allocation30_spill] sm:$0xff] %v22978_v35  ;;  %v319_v5 = vld [vmem:[%s22455_s8 + $0x74] sm:$0x1] }
  0x8a   : > { %28676 = vst [vmem:[#allocation29_spill] sm:$0xff] %v22961_v14  ;;  %v5225_v38 = vsel %vm22671_vm6, %v17910_v22, %v5224_v55  ;;  %v5226_v13 = vrot.slane %v5224_v55, 4  ;;  %v17435_v27 = vcombine.low %v510_v24, %v520_v29  ;;  %v525_v58 = vshll.u32 %v22951_v12, 16  ;;  %v17725_v32 = vld [vmem:[%s22455_s8 + $0xa0] sm:$0xf] }
  0x8b   : > { %20042 = vmatprep.mubr.msk.bf16.mxu0 %vm763_vm3, %v17926_v11  ;;  %v28462_v50 = vshll.u32 %v22956_v41, 16  ;;  %v524_v42 = vrot.slane %v522_v43, 4  ;;  %v28465_v60 = vshrl.u32 %v22956_v41, 16  ;;  %v541_v59 = vshll.u32 %v318_v46, 16  ;;  %v17895_v29 = vld [vmem:[%s22455_s8 + $0x9c] sm:$0xc] }
  0x8c   : > { %v5228_v53 = vsel %vm22671_vm6, %v5226_v13, %v5227_v10  ;;  %19729 = vmatmul.mubr.msk.bf16.gmra.mrb[12].mxu1 %vm763_vm3, %v17435_v27  ;;  %v527_v55 = vrot.slane %v525_v58, 5  ;;  %v546_v11 = vshrl.u32 %v22970_v30, 16  ;;  %v549_v43 = vshll.u32 %v22970_v30, 16  ;;  %v17846_v57 = vld [vmem:[%s22455_s8 + $0xa4] sm:$0x3] }
  0x8d   : > { %v17927_v22 = vcombine.low %v5225_v38, %v5228_v53  ;;  %v533_v24 = vrot.slane %v28462_v50, 5  ;;  %v537_v10 = vrot.slane %v28465_v60, 4  ;;  %v543_v13 = vrot.slane %v541_v59, 5  ;;  %v17896_v50 = vld [vmem:[%s22455_s8 + $0xa8] sm:$0xc] }
  0x8e   : > { %v28474_v46 = vshll.u32 %v22978_v35, 16  ;;  %v528_v38 = vor.u32 %v527_v55, %v524_v42  ;;  %v548_v27 = vrot.slane %v546_v11, 4  ;;  %v28477_v58 = vshrl.u32 %v22978_v35, 16 }
  0x8f   : > { %20043 = vmatmul.mubr.msk.bf16.gmra.mrb[20].mxu0 %vm763_vm3, %v17927_v22  ;;  %v565_v53 = vshll.u32 %v319_v5, 16  ;;  %v538_v36 = vor.u32 %v537_v10, %v533_v24  ;;  %v551_v14 = vrot.slane %v549_v43, 5  ;;  %v17911_v60 = vrot.slane %v17895_v29, 10  ;;  %v17847_v22 = vld [vmem:[%s22455_s8 + $0xb0] sm:$0x3] }
  0x90   : > { %v557_v59 = vrot.slane %v28474_v46, 5  ;;  %v529_v20 = vrot.slane %v528_v38, 4  ;;  %v561_v52 = vrot.slane %v28477_v58, 4  ;;  %v5231_v42 = vrot.slane %v17725_v32, 6  ;;  %v23005_v10 = vld [vmem:[%s22455_s8 + $0x78] sm:$0xf] }
  0x91   : > { %v567_v0 = vrot.slane %v565_v53, 5  ;;  %v539_v55 = vrot.slane %v538_v36, 4  ;;  %v552_v11 = vor.u32 %v551_v14, %v548_v27  ;;  %v5234_v5 = vrot.slane %v17846_v57, 6  ;;  %v23014_v27 = vld [vmem:[%s22455_s8 + $0x7c] sm:$0xf] }
  0x92   : > { %v17912_v16 = vrot.slane %v17896_v50, 10  ;;  %v534_v43 = vsel %vm22737_vm9, %v529_v20, %v533_v24  ;;  %v562_v29 = vor.u32 %v561_v52, %v557_v59  ;;  %v5232_v38 = vsel %vm22671_vm6, %v17911_v60, %v5231_v42  ;;  %28678 = vst [vmem:[#allocation31_spill] sm:$0xff] %v23014_v27  ;;  %v320_v52 = vld [vmem:[%s22455_s8 + $0x80] sm:$0x1]  ;;  %v17734_v58 = vld [vmem:[%s22455_s8 + $0xc4] sm:$0xf] }
  0x93   : > { %v5233_v46 = vrot.slane %v5231_v42, 4  ;;  %v544_v32 = vsel %vm22737_vm9, %v539_v55, %v543_v13  ;;  %v553_v53 = vrot.slane %v552_v11, 4  ;;  %v5238_v36 = vrot.slane %v17728_v1, 6 }
  0x94   : > { %v5241_v14 = vrot.slane %v17847_v22, 6  ;;  %v17436_v57 = vcombine.low %v534_v43, %v544_v32  ;;  %v563_v50 = vrot.slane %v562_v29, 4  ;;  %v570_v24 = vshrl.u32 %v23005_v10, 16  ;;  %v23025_v22 = vld [vmem:[%s22455_s8 + $0x84] sm:$0xf] }
  0x95   : > { %v5235_v20 = vsel %vm22671_vm6, %v5233_v46, %v5234_v5  ;;  %v558_v60 = vsel %vm22737_vm9, %v553_v53, %v557_v59  ;;  %v5239_v1 = vsel %vm22671_vm6, %v17912_v16, %v5238_v36  ;;  %v5240_v13 = vrot.slane %v5238_v36, 4  ;;  %v23033_v5 = vld [vmem:[%s22455_s8 + $0x88] sm:$0xf]  ;;  %v321_v32 = vld [vmem:[%s22455_s8 + $0x8c] sm:$0x1] }
  0x96   : > { %v17928_v42 = vcombine.low %v5232_v38, %v5235_v20  ;;  %19732 = vmatprep.mubr.msk.bf16.mxu1 %vm763_vm3, %v17436_v57  ;;  %v568_v46 = vsel %vm22737_vm9, %v563_v50, %v567_v0  ;;  %v572_v55 = vrot.slane %v570_v24, 4  ;;  %v573_v11 = vshll.u32 %v23005_v10, 16  ;;  %v17731_v0 = vld [vmem:[%s22455_s8 + $0xb8] sm:$0xf]  ;;  %v17897_v20 = vld [vmem:[%s22455_s8 + $0xb4] sm:$0xc] }
  0x97   : > { %v28475_v59 = vshll.u32 %v23014_v27, 16  ;;  %v17437_v43 = vcombine.low %v558_v60, %v568_v46  ;;  %v5242_v16 = vsel %vm22671_vm6, %v5240_v13, %v5241_v14  ;;  %v28476_v29 = vshrl.u32 %v23014_v27, 16 }
  0x98   : > { %20046 = vmatprep.mubr.msk.bf16.mxu0 %vm763_vm3, %v17928_v42  ;;  %v589_v38 = vshll.u32 %v320_v52, 16  ;;  %v17929_v53 = vcombine.low %v5239_v1, %v5242_v16  ;;  %v575_v36 = vrot.slane %v573_v11, 5  ;;  %v594_v50 = vshrl.u32 %v23025_v22, 16  ;;  %v17848_v42 = vld [vmem:[%s22455_s8 + $0xbc] sm:$0x3] }
  0x99   : > { %v581_v57 = vrot.slane %v28475_v59, 5  ;;  %19733 = vmatmul.mubr.msk.bf16.gmra.mrb[16].mxu1 %vm763_vm3, %v17437_v43  ;;  %v585_v14 = vrot.slane %v28476_v29, 4  ;;  %v597_v52 = vshll.u32 %v23025_v22, 16  ;;  %v28485_v60 = vshll.u32 %v23033_v5, 16  ;;  %v17898_v43 = vld [vmem:[%s22455_s8 + $0xc0] sm:$0xc] }
  0x9a   : > { %v591_v24 = vrot.slane %v589_v38, 5  ;;  %20047 = vmatmul.mubr.msk.bf16.gmra.mrb[24].mxu0 %vm763_vm3, %v17929_v53  ;;  %v576_v1 = vor.u32 %v575_v36, %v572_v55  ;;  %v596_v13 = vrot.slane %v594_v50, 4  ;;  %v28489_v46 = vshrl.u32 %v23033_v5, 16  ;;  %v17849_v53 = vld [vmem:[%s22455_s8 + $0xc8] sm:$0x3] }
  0x9b   : > { %v613_v11 = vshll.u32 %v321_v32, 16  ;;  %v586_v16 = vor.u32 %v585_v14, %v581_v57  ;;  %v599_v59 = vrot.slane %v597_v52, 5  ;;  %v605_v38 = vrot.slane %v28485_v60, 5  ;;  %v23061_v14 = vld [vmem:[%s22455_s8 + $0x90] sm:$0xf] }
  0x9c   : > { %v17913_v29 = vrot.slane %v17897_v20, 10  ;;  %v577_v40 = vrot.slane %v576_v1, 4  ;;  %v609_v63 = vrot.slane %v28489_v46, 4  ;;  %v5245_v55 = vrot.slane %v17731_v0, 6 }
  0x9d   : > { %v615_v39 = vrot.slane %v613_v11, 5  ;;  %v587_v36 = vrot.slane %v586_v16, 4  ;;  %v600_v50 = vor.u32 %v599_v59, %v596_v13  ;;  %v5248_v32 = vrot.slane %v17848_v42, 6  ;;  %v23070_v13 = vld [vmem:[%s22455_s8 + $0x94] sm:$0xf] }
  0x9e   : > { %v17914_v28 = vrot.slane %v17898_v43, 10  ;;  %v582_v52 = vsel %vm22737_vm9, %v577_v40, %v581_v57  ;;  %v610_v20 = vor.u32 %v609_v63, %v605_v38  ;;  %v5246_v1 = vsel %vm22671_vm6, %v17913_v29, %v5245_v55  ;;  %v322_v63 = vld [vmem:[%s22455_s8 + $0x98] sm:$0x1] }
  0x9f   : > { %v5247_v60 = vrot.slane %v5245_v55, 4  ;;  %v592_v0 = vsel %vm22737_vm9, %v587_v36, %v591_v24  ;;  %v601_v11 = vrot.slane %v600_v50, 4  ;;  %v5252_v16 = vrot.slane %v17734_v58, 6 }
  0xa0   : > { %v5255_v59 = vrot.slane %v17849_v53, 6  ;;  %v17438_v42 = vcombine.low %v582_v52, %v592_v0  ;;  %v611_v43 = vrot.slane %v610_v20, 4  ;;  %v618_v57 = vshrl.u32 %v23061_v14, 16  ;;  %v23081_v53 = vld [vmem:[%s22455_s8 + $0x9c] sm:$0xf] }
  0xa1   : > { %v5249_v40 = vsel %vm22671_vm6, %v5247_v60, %v5248_v32  ;;  %v606_v29 = vsel %vm22737_vm9, %v601_v11, %v605_v38  ;;  %v5253_v58 = vsel %vm22671_vm6, %v17914_v28, %v5252_v16  ;;  %v5254_v24 = vrot.slane %v5252_v16, 4  ;;  %v23089_v38 = vld [vmem:[%s22455_s8 + $0xa0] sm:$0xf]  ;;  %v323_v0 = vld [vmem:[%s22455_s8 + $0xa4] sm:$0x1]  ;;  %v21940_v11 = vld [vmem:[%s22455_s8 + $0x18] sm:$0xff]  }
  0xa2   : > { %v17930_v55 = vcombine.low %v5246_v1, %v5249_v40  ;;  %19736 = vmatprep.mubr.msk.bf16.mxu1 %vm763_vm3, %v17438_v42  ;;  %v616_v60 = vsel %vm22737_vm9, %v611_v43, %v615_v39  ;;  %v620_v36 = vrot.slane %v618_v57, 4  ;;  %v621_v50 = vshll.u32 %v23061_v14, 16 }
  0xa3   : > { %v28486_v32 = vshll.u32 %v23070_v13, 16  ;;  %v17439_v52 = vcombine.low %v606_v29, %v616_v60  ;;  %v5256_v28 = vsel %vm22671_vm6, %v5254_v24, %v5255_v59  ;;  %v28488_v20 = vshrl.u32 %v23070_v13, 16  ;;  %v23106_v29 = vld [vmem:[%s22455_s8 + $0xa8] sm:$0xf] }
  0xa4   : > { %20050 = vmatprep.mubr.msk.bf16.mxu0 %vm763_vm3, %v17930_v55  ;;  %v637_v1 = vshll.u32 %v322_v63, 16  ;;  %v17931_v39 = vcombine.low %v5253_v58, %v5256_v28  ;;  %v623_v16 = vrot.slane %v621_v50, 5  ;;  %v642_v43 = vshrl.u32 %v23081_v53, 16  ;;  %v23111_v50 = vld [vmem:[%s22455_s8 + $0xac] sm:$0xf] }
  0xa5   : > { %v629_v42 = vrot.slane %v28486_v32, 5  ;;  %19737 = vmatmul.mubr.msk.bf16.gmra.mrb[20].mxu1 %vm763_vm3, %v17439_v52  ;;  %v633_v40 = vrot.slane %v28488_v20, 4  ;;  %v645_v59 = vshll.u32 %v23081_v53, 16  ;;  %v28487_v63 = vshll.u32 %v23089_v38, 16  ;;  %v324_v32 = vld [vmem:[%s22455_s8 + $0xb0] sm:$0x1] }
  0xa6   : > { %v639_v57 = vrot.slane %v637_v1, 5  ;;  %20051 = vmatmul.mubr.msk.bf16.gmra.mrb[28].mxu0 %vm763_vm3, %v17931_v39  ;;  %v624_v55 = vor.u32 %v623_v16, %v620_v36  ;;  %v644_v58 = vrot.slane %v642_v43, 4  ;;  %v28490_v24 = vshrl.u32 %v23089_v38, 16 }
  0xa7   : > { %v661_v60 = vshll.u32 %v323_v0, 16  ;;  %v634_v52 = vor.u32 %v633_v40, %v629_v42  ;;  %v647_v28 = vrot.slane %v645_v59, 5  ;;  %v653_v1 = vrot.slane %v28487_v63, 5  ;;  %20056 = vmatprep.mubr.msk.bf16.mxu0 %vm763_vm3, %v21940_v11 }
  0xa8   : > { %v6441_v39 = vsel %vm812_vm0, %v22789_v25, 0  ;;  %v625_v36 = vrot.slane %v624_v55, 4  ;;  %v657_v16 = vrot.slane %v28490_v24, 4  ;;  %v666_v0 = vshrl.u32 %v23106_v29, 16  ;;  %v21941_v55 = vld [vmem:[%s22455_s8 + $0x24] sm:$0xff]  }
  0xa9   : > { %v663_v43 = vrot.slane %v661_v60, 5  ;;  %v635_v40 = vrot.slane %v634_v52, 4  ;;  %v648_v59 = vor.u32 %v647_v28, %v644_v58  ;;  %v669_v63 = vshll.u32 %v23106_v29, 16  ;;  %v23129_v24 = vld [vmem:[%s22455_s8 + $0xb4] sm:$0xf] }
  0xaa   : > { %v28500_v11 = vshll.u32 %v23111_v50, 16  ;;  %v630_v20 = vsel %vm22737_vm9, %v625_v36, %v629_v42  ;;  %v658_v25 = vor.u32 %v657_v16, %v653_v1  ;;  %v668_v46 = vrot.slane %v666_v0, 4 }
  0xab   : > { %v28501_v60 = vshrl.u32 %v23111_v50, 16  ;;  %v640_v52 = vsel %vm22737_vm9, %v635_v40, %v639_v57  ;;  %v649_v58 = vrot.slane %v648_v59, 4  ;;  %v671_v28 = vrot.slane %v669_v63, 5  ;;  %v23149_v40 = vld [vmem:[%s28426_s1 + $0x18] sm:$0x3] }
  0xac   : > { %v677_v4 = vrot.slane %v28500_v11, 5  ;;  %v17440_v42 = vcombine.low %v630_v20, %v640_v52  ;;  %v659_v36 = vrot.slane %v658_v25, 4  ;;  %v685_v0 = vshll.u32 %v324_v32, 16 }
  0xad   : > { %v681_v16 = vrot.slane %v28501_v60, 4  ;;  %v654_v21 = vsel %vm22737_vm9, %v649_v58, %v653_v1  ;;  %v672_v8 = vor.u32 %v671_v28, %v668_v46  ;;  %v690_v57 = vshrl.u32 %v23129_v24, 16 }
  0xae   : > { %v693_v63 = vshll.u32 %v23129_v24, 16  ;;  %19740 = vmatprep.mubr.msk.bf16.mxu1 %vm763_vm3, %v17440_v42  ;;  %v664_v20 = vsel %vm22737_vm9, %v659_v36, %v663_v43  ;;  %20057 = vmatmul.mubr.msk.bf16.vlgmr.msra.gmra.mrb[0].mxu0 %vm763_vm3, %v21941_v55  ;;  %v687_v1 = vrot.slane %v685_v0, 5  ;;  %v28498_v46 = vshll.u32 %v23136_v49, 16  ;;  %v22045_v36 = vld [vmem:[%s22455_s8] sm:$0xf] }
  0xaf   : > { %v682_v32 = vor.u32 %v681_v16, %v677_v4  ;;  %v17441_v59 = vcombine.low %v654_v21, %v664_v20  ;;  %20089 = vmatpush3.bf16.msra.mxu0 %v6441_v39  ;;  %v673_v25 = vrot.slane %v672_v8, 4  ;;  %v692_v52 = vrot.slane %v690_v57, 4  ;;  %20060 = vmatprep.mubr.msk.bf16.mxu0 %vm763_vm3, %v21942_v47  ;;  %v23165_v8 = vld [vmem:[%s28426_s1 + $0x4] sm:$0x3]  ;;  %v21943_v39 = vld [vmem:[%s22455_s8 + $0x3c] sm:$0xff]  }
  0xb0   : > { %v695_v58 = vrot.slane %v693_v63, 5  ;;  %v701_v43 = vrot.slane %v28498_v46, 5  ;;  %v28499_v55 = vshrl.u32 %v23136_v49, 16  ;;  %v709_v42 = vshll.u32 %v325_v44, 16  ;;  %21885 = vmatprep.subr.msk.bf16.mxu0 %vm812_vm0, %v23149_v40  ;;  %v23175_v16 = vld [vmem:[%s22455_s8 + $0x4] sm:$0xf] }
  0xb1   : > { %v683_v28 = vrot.slane %v682_v32, 4  ;;  %19741 = vmatmul.mubr.msk.bf16.gmra.mrb[24].mxu1 %vm763_vm3, %v17441_v59  ;;  %v678_v21 = vsel %vm22737_vm9, %v673_v25, %v677_v4  ;;  %v1106_v44 = vsel %vm812_vm0, %v22842_v2, 0  ;;  %v17460_v0 = vcombine.low %v22045_v36, %v23175_v16  ;;  %v18013_v32 = vld [vmem:[%s22455_s8 + $0x18] sm:$0xf]  ;;  %v21946_v25 = vld [vmem:[%s22455_s8 + $0x48] sm:$0xff]  }
  0xb2   : > { %v696_v47 = vor.u32 %v695_v58, %v692_v52  ;;  %v705_v63 = vrot.slane %v28499_v55, 4  ;;  %v711_v20 = vrot.slane %v709_v42, 5  ;;  %19749 = vmatpush3.bf16.msra.mxu1 %v1106_v44  ;;  %v18016_v36 = vld [vmem:[%s22455_s8 + $0x24] sm:$0xf]  ;;  %v5962_v55 = vshll.u32 %v18013_v32, 16 }
  0xb3   : > { %v688_v57 = vsel %vm22737_vm9, %v683_v28, %v687_v1  ;;  %v23191_v1 = vld [vmem:[%s22455_s8 + $0x1c] sm:$0xf]  ;;  %v18015_v28 = vld [vmem:[%s22455_s8 + $0x20] sm:$0x1]  ;;  %21874 = vmatprep.subr.msk.bf16.mxu1 %vm812_vm0, %v23165_v8 }
  0xb4   : > { %v17442_v2 = vcombine.low %v678_v21, %v688_v57  ;;  %v697_v59 = vrot.slane %v696_v47, 4  ;;  %28679 = vst [vmem:[#allocation32_spill] sm:$0xff] %v23191_v1  ;;  %v706_v42 = vor.u32 %v705_v63, %v701_v43  ;;  %v5959_v63 = vshrl.u32 %v18013_v32, 16  ;;  %v21947_v21 = vld [vmem:[%s22455_s8 + $0x54] sm:$0xff]  }
  0xb5   : > { %v5978_v46 = vshll.u32 %v18015_v28, 16  ;;  %v5983_v47 = vshrl.u32 %v18016_v36, 16  ;;  %v5964_v44 = vrot.slane %v5962_v55, 5  ;;  %v21950_v28 = vld [vmem:[%s22455_s8 + $0x60] sm:$0xff]  }
  0xb6   : > { %19744 = vmatprep.mubr.msk.bf16.mxu1 %vm763_vm3, %v17442_v2  ;;  %v702_v57 = vsel %vm22737_vm9, %v697_v59, %v701_v43  ;;  %v707_v11 = vrot.slane %v706_v42, 4  ;;  %20061 = vmatmul.mubr.msk.bf16.gmra.mrb[4].mxu0 %vm763_vm3, %v21943_v39  ;;  %v28504_v42 = vshll.u32 %v23191_v1, 16  ;;  %v23224_v39 = vld [vmem:[%s22455_s8 + $0x28] sm:$0xf]  ;;  %v28505_v43 = vshrl.u32 %v23191_v1, 16 }
  0xb7   : > { %20064 = vmatprep.mubr.msk.bf16.mxu0 %vm763_vm3, %v21946_v25  ;;  %28680 = vst [vmem:[#allocation33_spill] sm:$0xff] %v23224_v39  ;;  %v18018_v59 = vld [vmem:[%s22455_s8 + $0x2c] sm:$0x1]  ;;  %v5961_v60 = vrot.slane %v5959_v63, 4  ;;  %v5980_v52 = vrot.slane %v5978_v46, 5  ;;  %v5985_v4 = vrot.slane %v5983_v47, 4 }
  0xb8   : > { %v712_v2 = vsel %vm22737_vm9, %v707_v11, %v711_v20  ;;  %v5970_v32 = vrot.slane %v28504_v42, 5  ;;  %v5974_v58 = vrot.slane %v28505_v43, 4  ;;  %v5986_v11 = vshll.u32 %v18016_v36, 16  ;;  %v18019_v20 = vld [vmem:[%s22455_s8 + $0x30] sm:$0xf] }
  0xb9   : > { %v17443_v25 = vcombine.low %v702_v57, %v712_v2  ;;  %v5965_v7 = vor.u32 %v5964_v44, %v5961_v60  ;;  %v28506_v57 = vshll.u32 %v23224_v39, 16  ;;  %v28507_v63 = vshrl.u32 %v23224_v39, 16  ;;  %v23241_v2 = vld [vmem:[%s22455_s8 + $0x34] sm:$0xf]  ;;  %v18022_v47 = vld [vmem:[%s22455_s8 + $0x3c] sm:$0xf] }
  0xba   : > { %v6002_v55 = vshll.u32 %v18018_v59, 16  ;;  %28681 = vst [vmem:[#allocation34_spill] sm:$0xff] %v23241_v2  ;;  %v5975_v42 = vor.u32 %v5974_v58, %v5970_v32  ;;  %v5988_v43 = vrot.slane %v5986_v11, 5  ;;  %v23246_v46 = vsel %vm812_vm0, %v23149_v40, 0  ;;  %v23267_v58 = vld [vmem:[%s22455_s8 + $0x40] sm:$0xf] }
  0xbb   : > { %19745 = vmatmul.mubr.msk.bf16.gmra.mrb[28].mxu1 %vm763_vm3, %v17443_v25  ;;  %v5966_v60 = vrot.slane %v5965_v7, 4  ;;  %v5994_v44 = vrot.slane %v28506_v57, 5  ;;  %v5998_v36 = vrot.slane %v28507_v63, 4  ;;  %v18021_v25 = vld [vmem:[%s22455_s8 + $0x38] sm:$0x1]  ;;  %v6007_v11 = vshrl.u32 %v18019_v20, 16 }
  0xbc   : > { %19750 = vmatprep.mubr.msk.bf16.mxu1 %vm763_vm3, %v17460_v0  ;;  %v6004_v59 = vrot.slane %v6002_v55, 5  ;;  %v5976_v0 = vrot.slane %v5975_v42, 4  ;;  %v5989_v40 = vor.u32 %v5988_v43, %v5985_v4  ;;  %v6010_v63 = vshll.u32 %v18019_v20, 16  ;;  %28682 = vst [vmem:[#allocation35_spill] sm:$0xff] %v23267_v58 }
  0xbd   : > { %v5971_v7 = vsel %vm22737_vm9, %v5966_v60, %v5970_v32  ;;  %v5999_v57 = vor.u32 %v5998_v36, %v5994_v44  ;;  %v28512_v55 = vshll.u32 %v23241_v2, 16  ;;  %v6009_v43 = vrot.slane %v6007_v11, 4  ;;  %v21954_v36 = vld [vmem:[%s22455_s8 + $0x78] sm:$0xff]  }
  0xbe   : > { %20065 = vmatmul.mubr.msk.bf16.gmra.mrb[8].mxu0 %vm763_vm3, %v21947_v21  ;;  %v5981_v21 = vsel %vm22737_vm9, %v5976_v0, %v5980_v52  ;;  %v5990_v4 = vrot.slane %v5989_v40, 4  ;;  %v28513_v42 = vshrl.u32 %v23241_v2, 16  ;;  %v6012_v60 = vrot.slane %v6010_v63, 5  ;;  %v18024_v40 = vld [vmem:[%s22455_s8 + $0x44] sm:$0x1] }
  0xbf   : > { %20068 = vmatprep.mubr.msk.bf16.mxu0 %vm763_vm3, %v21950_v28  ;;  %v21951_v28 = vld [vmem:[%s22455_s8 + $0x6c] sm:$0xff]   ;;  %v23270_v39 = vcombine.low %v5971_v7, %v5981_v21  ;;  %v6000_v32 = vrot.slane %v5999_v57, 4  ;;  %v6018_v20 = vrot.slane %v28512_v55, 5  ;;  %v6026_v0 = vshll.u32 %v18021_v25, 16 }
  0xc0   : > { %v5995_v1 = vsel %vm22737_vm9, %v5990_v4, %v5994_v44  ;;  %v6022_v52 = vrot.slane %v28513_v42, 4  ;;  %v6031_v11 = vshrl.u32 %v18022_v47, 16  ;;  %v28683_v7 = vcombine.low %v22716_v56, %v22719_v18  ;;  %v1269_v44 = vld [vmem:[%s22455_s8] sm:$0xe]  ;;  %v17541_v4 = vld [vmem:[%s28426_s1 + $0x6] sm:$0x3] }
  0xc1   : > { %v6005_v57 = vsel %vm22737_vm9, %v6000_v32, %v6004_v59  ;;  %v6013_v63 = vor.u32 %v6012_v60, %v6009_v43  ;;  %v6034_v21 = vshll.u32 %v18022_v47, 16  ;;  %v28517_v55 = vshll.u32 %v23267_v58, 16  ;;  %v1270_v59 = vld [vmem:[%s22455_s8 + $0xc] sm:$0xe] }
  0xc2   : > { %v28684_v25 = vcombine.low %v22759_v9, %v22765_v48  ;;  %v23295_v56 = vcombine.low %v5995_v1, %v6005_v57  ;;  %v6023_v18 = vor.u32 %v6022_v52, %v6018_v20  ;;  %v6033_v42 = vrot.slane %v6031_v11, 4 }
  0xc3   : > { %19751 = vmatmul.mubr.msk.bf16.vlgmr.msra.gmra.mrb[0].mxu1 %vm763_vm3, %v28683_v7  ;;  %v6028_v7 = vrot.slane %v6026_v0, 5  ;;  %v6014_v47 = vrot.slane %v6013_v63, 4  ;;  %v6036_v43 = vrot.slane %v6034_v21, 5  ;;  %v6042_v32 = vrot.slane %v28517_v55, 5 }
  0xc4   : > { %19754 = vmatprep.mubr.msk.bf16.mxu1 %vm763_vm3, %v28684_v25  ;;  %v28518_v60 = vshrl.u32 %v23267_v58, 16  ;;  %v6024_v2 = vrot.slane %v6023_v18, 4  ;;  %v6050_v9 = vshll.u32 %v18024_v40, 16  ;;  %v1531_v1 = vsel %vm812_vm0, %v23165_v8, 0  ;;  %v18027_v18 = vld [vmem:[%s22455_s8 + $0x50] sm:$0x1] }
  0xc5   : > { %v6019_v52 = vsel %vm22737_vm9, %v6014_v47, %v6018_v20  ;;  %v6037_v0 = vor.u32 %v6036_v43, %v6033_v42  ;;  %19783 = vmatpush3.bf16.msra.mxu1 %v1531_v1  ;;  %v17492_v20 = vrot.slane %v1269_v44, 9  ;;  %v1322_v42 = vrot.slane %v23175_v16, 5  ;;  %v22047_v43 = vld [vmem:[%s22455_s8 + $0x10] sm:$0xf]  ;;  %v18028_v1 = vld [vmem:[%s22455_s8 + $0x54] sm:$0xf] }
  0xc6   : > { %20069 = vmatmul.mubr.msk.bf16.gmra.mrb[12].mxu0 %vm763_vm3, %v21951_v28  ;;  %v6046_v11 = vrot.slane %v28518_v60, 4  ;;  %v18025_v28 = vld [vmem:[%s22455_s8 + $0x48] sm:$0xf]  ;;  %v6029_v40 = vsel %vm22737_vm9, %v6024_v2, %v6028_v7  ;;  %v6052_v8 = vrot.slane %v6050_v9, 5  ;;  %21875 = vmatprep.subr.msk.bf16.mxu1 %vm812_vm0, %v17541_v4  ;;  %v17493_v2 = vrot.slane %v1270_v59, 9 }
  0xc7   : > { %20072 = vmatprep.mubr.msk.bf16.mxu0 %vm763_vm3, %v21954_v36  ;;  %v23318_v36 = vld [vmem:[%s22455_s8 + $0x4c] sm:$0xf]  ;;  %v23321_v63 = vcombine.low %v6019_v52, %v6029_v40  ;;  %v6038_v21 = vrot.slane %v6037_v0, 4  ;;  %v21955_v7 = vld [vmem:[%s22455_s8 + $0x84] sm:$0xff]   ;;  %v23327_v47 = vsel %vm23312_vm12, %v17492_v20, %v1322_v42  ;;  %v1324_v44 = vrot.slane %v1322_v42, 4  ;;  %v21958_v52 = vld [vmem:[%s22455_s8 + $0x90] sm:$0xff]  }
  0xc8   : > { %28687 = vst [vmem:[#allocation36_spill] sm:$0xff] %v23318_v36  ;;  %v6047_v25 = vor.u32 %v6046_v11, %v6042_v32  ;;  %v1329_v16 = vrot.slane %v22047_v43, 5  ;;  %v6055_v9 = vshrl.u32 %v18025_v28, 16  ;;  %v28688_v4 = vcombine.low %v22773_v15, %v22795_v45  ;;  %v23340_v20 = vld [vmem:[%s22455_s8 + $0x58] sm:$0xf] }
  0xc9   : > { %v6043_v59 = vsel %vm22737_vm9, %v6038_v21, %v6042_v32  ;;  %v6058_v11 = vshll.u32 %v18025_v28, 16  ;;  %v28516_v40 = vshll.u32 %v23318_v36, 16  ;;  %28689 = vst [vmem:[#allocation37_spill] sm:$0xff] %v23340_v20  ;;  %v28690_v42 = vcombine.low %v22819_v62, %v22826_v61  ;;  %v23402_v58 = vld [vmem:[%s22455_s8 + $0x64] sm:$0xf] }
  0xca   : > { %v6048_v0 = vrot.slane %v6047_v25, 4  ;;  %v28691_v43 = vrot.slane %v22702_v17, 5  ;;  %v23354_v32 = vsel %vm23312_vm12, %v17493_v2, %v1329_v16  ;;  %v1331_v28 = vrot.slane %v1329_v16, 4  ;;  %v18030_v25 = vld [vmem:[%s22455_s8 + $0x5c] sm:$0x1]  ;;  %28695 = vst [vmem:[#allocation38_spill] sm:$0xff] %v23402_v58 }
  0xcb   : > { %19755 = vmatmul.mubr.msk.bf16.gmra.mrb[4].mxu1 %vm763_vm3, %v28688_v4  ;;  %v6057_v21 = vrot.slane %v6055_v9, 4  ;;  %v6060_v17 = vrot.slane %v6058_v11, 5  ;;  %v28692_v2 = vrot.slane %v22727_v31, 5  ;;  %v28519_v9 = vshrl.u32 %v23318_v36, 16  ;;  %v21959_v31 = vld [vmem:[%s22455_s8 + $0x9c] sm:$0xff]  }
  0xcc   : > { %19758 = vmatprep.mubr.msk.bf16.mxu1 %vm763_vm3, %v28690_v42  ;;  %v23350_v15 = vsel %vm23312_vm12, %v1324_v44, %v28691_v43  ;;  %v6053_v62 = vsel %vm22737_vm9, %v6048_v0, %v6052_v8  ;;  %v6066_v44 = vrot.slane %v28516_v40, 5  ;;  %v6074_v8 = vshll.u32 %v18027_v18, 16  ;;  %v1271_v43 = vld [vmem:[%s22455_s8 + $0x18] sm:$0xe]  ;;  %v1272_v0 = vld [vmem:[%s22455_s8 + $0x24] sm:$0xe] }
  0xcd   : > { %v23364_v42 = vcombine.low %v6043_v59, %v6053_v62  ;;  %v23370_v16 = vsel %vm23312_vm12, %v1331_v28, %v28692_v2  ;;  %v6061_v11 = vor.u32 %v6060_v17, %v6057_v21  ;;  %v6082_v59 = vshll.u32 %v18028_v1, 16  ;;  %v21962_v21 = vld [vmem:[%s22455_s8 + $0xa8] sm:$0xff]   ;;  %v18031_v4 = vld [vmem:[%s22455_s8 + $0x60] sm:$0xf] }
  0xce   : > { %20073 = vmatmul.mubr.msk.bf16.gmra.mrb[16].mxu0 %vm763_vm3, %v21955_v7  ;;  %v6079_v7 = vshrl.u32 %v18028_v1, 16  ;;  %v6070_v28 = vrot.slane %v28519_v9, 4  ;;  %v6076_v62 = vrot.slane %v6074_v8, 5  ;;  %v28522_v2 = vshll.u32 %v23340_v20, 16 }
  0xcf   : > { %20076 = vmatprep.mubr.msk.bf16.mxu0 %vm763_vm3, %v21958_v52  ;;  %v28523_v18 = vshrl.u32 %v23340_v20, 16  ;;  %v6062_v52 = vrot.slane %v6061_v11, 4  ;;  %v6084_v55 = vrot.slane %v6082_v59, 5  ;;  %v6098_v60 = vshll.u32 %v18030_v25, 16  ;;  %v22048_v59 = vld [vmem:[%s22455_s8 + $0x1c] sm:$0xf] }
  0xd0   : > { %v6081_v40 = vrot.slane %v6079_v7, 4  ;;  %v6071_v1 = vor.u32 %v6070_v28, %v6066_v44  ;;  %v6090_v17 = vrot.slane %v28522_v2, 5  ;;  %v17494_v9 = vrot.slane %v1271_v43, 9 }
  0xd1   : > { %v6094_v8 = vrot.slane %v28523_v18, 4  ;;  %v28693_v36 = vcombine.low %v22832_v33, %v22850_v51  ;;  %v6067_v25 = vsel %vm22737_vm9, %v6062_v52, %v6066_v44  ;;  %v6100_v7 = vrot.slane %v6098_v60, 5  ;;  %v22049_v33 = vld [vmem:[%s22455_s8 + $0x20] sm:$0x1]  ;;  %v22051_v52 = vld [vmem:[%s22455_s8 + $0x2c] sm:$0x1] }
  0xd2   : > { %v6085_v11 = vor.u32 %v6084_v55, %v6081_v40  ;;  %v1336_v28 = vrot.slane %v22048_v59, 5  ;;  %v28694_v2 = vcombine.low %v22884_v19, %v22890_v26  ;;  %v6072_v43 = vrot.slane %v6071_v1, 4  ;;  %v22050_v40 = vld [vmem:[%s22455_s8 + $0x28] sm:$0xf] }
  0xd3   : > { %19759 = vmatmul.mubr.msk.bf16.gmra.mrb[8].mxu1 %vm763_vm3, %v28693_v36  ;;  %v6095_v18 = vor.u32 %v6094_v8, %v6090_v17  ;;  %v1339_v20 = vrot.slane %v22049_v33, 5  ;;  %v17495_v36 = vrot.slane %v1272_v0, 9  ;;  %v1343_v44 = vrot.slane %v22050_v40, 5  ;;  %v18033_v19 = vld [vmem:[%s22455_s8 + $0x68] sm:$0x1]  ;;  %v21963_v40 = vld [vmem:[%s22455_s8 + $0xb4] sm:$0xff]  }
  0xd4   : > { %19762 = vmatprep.mubr.msk.bf16.mxu1 %vm763_vm3, %v28694_v2  ;;  %v6086_v51 = vrot.slane %v6085_v11, 4  ;;  %v23406_v55 = vsel %vm23312_vm12, %v17494_v9, %v1336_v28  ;;  %v1338_v60 = vrot.slane %v1336_v28, 4  ;;  %v6077_v2 = vsel %vm22737_vm9, %v6072_v43, %v6076_v62  ;;  %v23433_v43 = vld [vmem:[%s22455_s8 + $0x70] sm:$0xf] }
  0xd5   : > { %v6096_v0 = vrot.slane %v6095_v18, 4  ;;  %v1346_v1 = vrot.slane %v22051_v52, 5  ;;  %v6103_v8 = vshrl.u32 %v18031_v4, 16  ;;  %v23415_v9 = vcombine.low %v6067_v25, %v6077_v2  ;;  %v18034_v18 = vld [vmem:[%s22455_s8 + $0x6c] sm:$0xf]  ;;  %28696 = vst [vmem:[#allocation39_spill] sm:$0xff] %v23433_v43 }
  0xd6   : > { %20077 = vmatmul.mubr.msk.bf16.gmra.mrb[20].mxu0 %vm763_vm3, %v21959_v31  ;;  %v6091_v11 = vsel %vm22737_vm9, %v6086_v51, %v6090_v17  ;;  %v23421_v31 = vsel %vm23312_vm12, %v1338_v60, %v1339_v20  ;;  %v23425_v62 = vsel %vm23312_vm12, %v17495_v36, %v1343_v44  ;;  %v1345_v25 = vrot.slane %v1343_v44, 4  ;;  %v18036_v51 = vld [vmem:[%s22455_s8 + $0x74] sm:$0x1]  ;;  %v1273_v60 = vld [vmem:[%s22455_s8 + $0x30] sm:$0xe] }
  0xd7   : > { %20080 = vmatprep.mubr.msk.bf16.mxu0 %vm763_vm3, %v21962_v21  ;;  %v6101_v59 = vsel %vm22737_vm9, %v6096_v0, %v6100_v7  ;;  %v6105_v28 = vrot.slane %v6103_v8, 4  ;;  %v6106_v20 = vshll.u32 %v18031_v4, 16  ;;  %v28532_v33 = vshll.u32 %v23402_v58, 16  ;;  %v21966_v4 = vld [vmem:[%s22455_s8 + $0xc0] sm:$0xff]   ;;  %v1274_v21 = vld [vmem:[%s22455_s8 + $0x3c] sm:$0xe] }
  0xd8   : > { %v23436_v17 = vcombine.low %v6091_v11, %v6101_v59  ;;  %v28533_v36 = vshrl.u32 %v23402_v58, 16  ;;  %v23444_v7 = vsel %vm23312_vm12, %v1345_v25, %v1346_v1  ;;  %v6122_v2 = vshll.u32 %v18033_v19, 16 }
  0xd9   : > { %v6127_v44 = vshrl.u32 %v18034_v18, 16  ;;  %v6130_v0 = vshll.u32 %v18034_v18, 16  ;;  %v28697_v52 = vcombine.low %v22904_v54, %v22907_v37  ;;  %v6108_v11 = vrot.slane %v6106_v20, 5 }
  0xda   : > { %v6114_v59 = vrot.slane %v28532_v33, 5  ;;  %v6118_v1 = vrot.slane %v28533_v36, 4  ;;  %v28698_v19 = vcombine.low %v22951_v12, %v22956_v41  ;;  %v6124_v54 = vrot.slane %v6122_v2, 5  ;;  %v22052_v2 = vld [vmem:[%s22455_s8 + $0x34] sm:$0xf] }
  0xdb   : > { %19763 = vmatmul.mubr.msk.bf16.gmra.mrb[12].mxu1 %vm763_vm3, %v28697_v52  ;;  %v6129_v18 = vrot.slane %v6127_v44, 4  ;;  %v6132_v25 = vrot.slane %v6130_v0, 5  ;;  %v28534_v52 = vshll.u32 %v23433_v43, 16  ;;  %v6109_v8 = vor.u32 %v6108_v11, %v6105_v28 }
  0xdc   : > { %19766 = vmatprep.mubr.msk.bf16.mxu1 %vm763_vm3, %v28698_v19  ;;  %v6119_v20 = vor.u32 %v6118_v1, %v6114_v59  ;;  %v28535_v37 = vshrl.u32 %v23433_v43, 16  ;;  %v6146_v33 = vshll.u32 %v18036_v51, 16  ;;  %v17496_v19 = vrot.slane %v1273_v60, 9 }
  0xdd   : > { %v6133_v36 = vor.u32 %v6132_v25, %v6129_v18  ;;  %v6138_v12 = vrot.slane %v28534_v52, 5  ;;  %v1350_v44 = vrot.slane %v22052_v2, 5  ;;  %v6110_v28 = vrot.slane %v6109_v8, 4  ;;  %v22053_v18 = vld [vmem:[%s22455_s8 + $0x38] sm:$0x1] }
  0xde   : > { %20081 = vmatmul.mubr.msk.bf16.gmra.mrb[24].mxu0 %vm763_vm3, %v21963_v40  ;;  %v6120_v0 = vrot.slane %v6119_v20, 4  ;;  %v6142_v51 = vrot.slane %v28535_v37, 4  ;;  %v6148_v11 = vrot.slane %v6146_v33, 5  ;;  %v1353_v25 = vrot.slane %v22053_v18, 5  ;;  %v18037_v2 = vld [vmem:[%s22455_s8 + $0x78] sm:$0xf] }
  0xdf   : > { %20084 = vmatprep.mubr.msk.bf16.mxu0 %vm763_vm3, %v21966_v4  ;;  %v6134_v40 = vrot.slane %v6133_v36, 4  ;;  %v23473_v1 = vsel %vm23312_vm12, %v17496_v19, %v1350_v44  ;;  %v1352_v60 = vrot.slane %v1350_v44, 4  ;;  %v6115_v4 = vsel %vm22737_vm9, %v6110_v28, %v6114_v59  ;;  %v23482_v36 = vld [vmem:[%s22455_s8 + $0x7c] sm:$0xf]  ;;  %v18039_v52 = vld [vmem:[%s22455_s8 + $0x80] sm:$0x1] }
  0xe0   : > { %v6125_v8 = vsel %vm22737_vm9, %v6120_v0, %v6124_v54  ;;  %v6143_v20 = vor.u32 %v6142_v51, %v6138_v12  ;;  %v17497_v33 = vrot.slane %v1274_v21, 9  ;;  %28699 = vst [vmem:[#allocation40_spill] sm:$0xff] %v23482_v36  ;;  %v21967_v19 = vld [vmem:[%s22455_s8 + $0xcc] sm:$0xff]   ;;  %v22054_v59 = vld [vmem:[%s22455_s8 + $0x40] sm:$0xf]  ;;  %v28700_v21 = vcombine.low %v22970_v30, %v22978_v35 }
  0xe1   : > { %v23486_v37 = vcombine.low %v6115_v4, %v6125_v8  ;;  %v6139_v44 = vsel %vm22737_vm9, %v6134_v40, %v6138_v12  ;;  %v23492_v18 = vsel %vm23312_vm12, %v1352_v60, %v1353_v25  ;;  %v1357_v54 = vrot.slane %v22054_v59, 5  ;;  %v18040_v28 = vld [vmem:[%s22455_s8 + $0x84] sm:$0xf]  ;;  %v23504_v8 = vld [vmem:[%s22455_s8 + $0x88] sm:$0xf] }
  0xe2   : > { %v6144_v0 = vrot.slane %v6143_v20, 4  ;;  %v22055_v4 = vld [vmem:[%s22455_s8 + $0x44] sm:$0x1]  ;;  %v6151_v40 = vshrl.u32 %v18037_v2, 16  ;;  %28701 = vst [vmem:[#allocation41_spill] sm:$0xff] %v23504_v8  ;;  %v28702_v60 = vcombine.low %v23005_v10, %v23014_v27  ;;  %v6154_v59 = vshll.u32 %v18037_v2, 16 }
  0xe3   : > { %19767 = vmatmul.mubr.msk.bf16.gmra.mrb[16].mxu1 %vm763_vm3, %v28700_v21  ;;  %v1360_v12 = vrot.slane %v22055_v4, 5  ;;  %v23512_v25 = vsel %vm23312_vm12, %v17497_v33, %v1357_v54  ;;  %v1359_v30 = vrot.slane %v1357_v54, 4  ;;  %v28542_v20 = vshll.u32 %v23482_v36, 16  ;;  %v18042_v21 = vld [vmem:[%s22455_s8 + $0x8c] sm:$0x1] }
  0xe4   : > { %19770 = vmatprep.mubr.msk.bf16.mxu1 %vm763_vm3, %v28702_v60  ;;  %v1275_v51 = vld [vmem:[%s22455_s8 + $0x48] sm:$0xe]  ;;  %v6149_v4 = vsel %vm22737_vm9, %v6144_v0, %v6148_v11  ;;  %v6153_v43 = vrot.slane %v6151_v40, 4  ;;  %v28545_v58 = vshrl.u32 %v23482_v36, 16  ;;  %v6170_v35 = vshll.u32 %v18039_v52, 16 }
  0xe5   : > { %v23521_v10 = vcombine.low %v6139_v44, %v6149_v4  ;;  %v23525_v33 = vsel %vm23312_vm12, %v1359_v30, %v1360_v12  ;;  %v6156_v2 = vrot.slane %v6154_v59, 5  ;;  %v6162_v54 = vrot.slane %v28542_v20, 5  ;;  %v1276_v20 = vld [vmem:[%s22455_s8 + $0x54] sm:$0xe]  ;;  %v18045_v36 = vld [vmem:[%s22455_s8 + $0x98] sm:$0x1] }
  0xe6   : > { %20085 = vmatmul.mubr.msk.bf16.gmra.mrb[28].mxu0 %vm763_vm3, %v21967_v19  ;;  %v6166_v52 = vrot.slane %v28545_v58, 4  ;;  %v6172_v19 = vrot.slane %v6170_v35, 5  ;;  %v6175_v44 = vshrl.u32 %v18040_v28, 16  ;;  %v6178_v12 = vshll.u32 %v18040_v28, 16 }
  0xe7   : > { %20090 = vmatprep.mubr.msk.bf16.mxu0 %vm763_vm3, %v23270_v39  ;;  %v6157_v0 = vor.u32 %v6156_v2, %v6153_v43  ;;  %v28546_v40 = vshll.u32 %v23504_v8, 16  ;;  %v28547_v60 = vshrl.u32 %v23504_v8, 16  ;;  %v6194_v39 = vshll.u32 %v18042_v21, 16  ;;  %v18043_v43 = vld [vmem:[%s22455_s8 + $0x90] sm:$0xf] }
  0xe8   : > { %v6167_v30 = vor.u32 %v6166_v52, %v6162_v54  ;;  %v6177_v59 = vrot.slane %v6175_v44, 4  ;;  %v17498_v4 = vrot.slane %v1275_v51, 9  ;;  %v6180_v27 = vrot.slane %v6178_v12, 5  ;;  %v22056_v51 = vld [vmem:[%s22455_s8 + $0x4c] sm:$0xf] }
  0xe9   : > { %v6158_v11 = vrot.slane %v6157_v0, 4  ;;  %v6186_v58 = vrot.slane %v28546_v40, 5  ;;  %v6190_v35 = vrot.slane %v28547_v60, 4  ;;  %v28703_v28 = vcombine.low %v23025_v22, %v23033_v5  ;;  %v22057_v44 = vld [vmem:[%s22455_s8 + $0x50] sm:$0x1] }
  0xea   : > { %v6168_v2 = vrot.slane %v6167_v30, 4  ;;  %v6196_v21 = vrot.slane %v6194_v39, 5  ;;  %v1364_v52 = vrot.slane %v22056_v51, 5  ;;  %v1367_v0 = vrot.slane %v22057_v44, 5  ;;  %v23552_v12 = vld [vmem:[%s28426_s1 + $0x1a] sm:$0x3] }
  0xeb   : > { %19771 = vmatmul.mubr.msk.bf16.gmra.mrb[20].mxu1 %vm763_vm3, %v28703_v28  ;;  %v28704_v40 = vcombine.low %v23061_v14, %v23070_v13  ;;  %v6163_v22 = vsel %vm22737_vm9, %v6158_v11, %v6162_v54  ;;  %v6181_v30 = vor.u32 %v6180_v27, %v6177_v59  ;;  %v6191_v39 = vor.u32 %v6190_v35, %v6186_v58  ;;  %v23561_v51 = vld [vmem:[%s22455_s8 + $0x94] sm:$0xf]  ;;  %v22059_v11 = vld [vmem:[%s22455_s8 + $0x5c] sm:$0x1] }
  0xec   : > { %v17499_v28 = vrot.slane %v1276_v20, 9  ;;  %28705 = vst [vmem:[#allocation42_spill] sm:$0xff] %v23561_v51  ;;  %v6173_v44 = vsel %vm22737_vm9, %v6168_v2, %v6172_v19  ;;  %v23567_v60 = vsel %vm23312_vm12, %v17498_v4, %v1364_v52  ;;  %v1366_v14 = vrot.slane %v1364_v52, 4  ;;  %v18046_v35 = vld [vmem:[%s22455_s8 + $0x9c] sm:$0xf] }
  0xed   : > { %19774 = vmatprep.mubr.msk.bf16.mxu1 %vm763_vm3, %v28704_v40  ;;  %v22058_v40 = vld [vmem:[%s22455_s8 + $0x58] sm:$0xf]  ;;  %v23573_v27 = vcombine.low %v6163_v22, %v6173_v44  ;;  %v6182_v54 = vrot.slane %v6181_v30, 4  ;;  %v6192_v20 = vrot.slane %v6191_v39, 4  ;;  %v1374_v59 = vrot.slane %v22059_v11, 5 }
  0xee   : > { %v1371_v8 = vrot.slane %v22058_v40, 5  ;;  %20091 = vmatmul.mubr.msk.bf16.vlgmr.msra.gmra.mrb[0].mxu0 %vm763_vm3, %v23295_v56  ;;  %v23578_v19 = vld [vmem:[%s22455_s8 + $0xa0] sm:$0xf]  ;;  %v23585_v4 = vsel %vm23312_vm12, %v1366_v14, %v1367_v0  ;;  %v6199_v52 = vshrl.u32 %v18043_v43, 16  ;;  %v18048_v39 = vld [vmem:[%s22455_s8 + $0xa4] sm:$0x1] }
  0xef   : > { %28706 = vst [vmem:[#allocation43_spill] sm:$0xff] %v23578_v19  ;;  %20123 = vmatpush3.bf16.msra.mxu0 %v23246_v46  ;;  %20094 = vmatprep.mubr.msk.bf16.mxu0 %vm763_vm3, %v23321_v63  ;;  %v6187_v22 = vsel %vm22737_vm9, %v6182_v54, %v6186_v58  ;;  %v6197_v46 = vsel %vm22737_vm9, %v6192_v20, %v6196_v21  ;;  %v6202_v63 = vshll.u32 %v18043_v43, 16  ;;  %v28552_v58 = vshll.u32 %v23561_v51, 16  ;;  %v1277_v44 = vld [vmem:[%s22455_s8 + $0x60] sm:$0xe] }
  0xf0   : > { %v23589_v56 = vsel %vm23312_vm12, %v17499_v28, %v1371_v8  ;;  %v1373_v2 = vrot.slane %v1371_v8, 4  ;;  %21886 = vmatprep.subr.msk.bf16.mxu0 %vm812_vm0, %v23552_v12  ;;  %v23600_v0 = vcombine.low %v6187_v22, %v6197_v46  ;;  %v6201_v28 = vrot.slane %v6199_v52, 4  ;;  %v18049_v30 = vld [vmem:[%s22455_s8 + $0xa8] sm:$0xf] }
  0xf1   : > { %v6204_v14 = vrot.slane %v6202_v63, 5  ;;  %v28554_v43 = vshrl.u32 %v23561_v51, 16  ;;  %v6218_v40 = vshll.u32 %v18045_v36, 16  ;;  %v28707_v54 = vcombine.low %v23081_v53, %v23089_v38  ;;  %v1278_v63 = vld [vmem:[%s22455_s8 + $0x6c] sm:$0xe] }
  0xf2   : > { %v23604_v8 = vsel %vm23312_vm12, %v1373_v2, %v1374_v59  ;;  %v6210_v20 = vrot.slane %v28552_v58, 5  ;;  %v6223_v11 = vshrl.u32 %v18046_v35, 16  ;;  %v6226_v59 = vshll.u32 %v18046_v35, 16  ;;  %v18052_v51 = vld [vmem:[%s22455_s8 + $0xb4] sm:$0xf] }
  0xf3   : > { %19775 = vmatmul.mubr.msk.bf16.gmra.mrb[24].mxu1 %vm763_vm3, %v28707_v54  ;;  %v28553_v2 = vshll.u32 %v23578_v19, 16  ;;  %v28708_v52 = vcombine.low %v23106_v29, %v23111_v50  ;;  %v6205_v22 = vor.u32 %v6204_v14, %v6201_v28  ;;  %v6214_v36 = vrot.slane %v28554_v43, 4 }
  0xf4   : > { %v6220_v53 = vrot.slane %v6218_v40, 5  ;;  %v28555_v46 = vshrl.u32 %v23578_v19, 16  ;;  %v6225_v54 = vrot.slane %v6223_v11, 4  ;;  %v6228_v58 = vrot.slane %v6226_v59, 5 }
  0xf5   : > { %19778 = vmatprep.mubr.msk.bf16.mxu1 %vm763_vm3, %v28708_v52  ;;  %v6234_v35 = vrot.slane %v28553_v2, 5  ;;  %v6242_v21 = vshll.u32 %v18048_v39, 16  ;;  %v6206_v29 = vrot.slane %v6205_v22, 4  ;;  %v6215_v28 = vor.u32 %v6214_v36, %v6210_v20  ;;  %v22060_v39 = vld [vmem:[%s22455_s8 + $0x64] sm:$0xf] }
  0xf6   : > { %20095 = vmatmul.mubr.msk.bf16.gmra.mrb[4].mxu0 %vm763_vm3, %v23364_v42  ;;  %v6238_v14 = vrot.slane %v28555_v46, 4  ;;  %v17500_v40 = vrot.slane %v1277_v44, 9  ;;  %v6229_v11 = vor.u32 %v6228_v58, %v6225_v54  ;;  %v1378_v52 = vrot.slane %v22060_v39, 5  ;;  %v22061_v2 = vld [vmem:[%s22455_s8 + $0x68] sm:$0x1] }
  0xf7   : > { %20098 = vmatprep.mubr.msk.bf16.mxu0 %vm763_vm3, %v23415_v9  ;;  %v6244_v59 = vrot.slane %v6242_v21, 5  ;;  %v1381_v42 = vrot.slane %v22061_v2, 5  ;;  %v6211_v22 = vsel %vm22737_vm9, %v6206_v29, %v6210_v20  ;;  %v6216_v36 = vrot.slane %v6215_v28, 4  ;;  %v23640_v44 = vld [vmem:[%s22455_s8 + $0xac] sm:$0xf] }
  0xf8   : > { %v6239_v43 = vor.u32 %v6238_v14, %v6234_v35  ;;  %v17501_v46 = vrot.slane %v1278_v63, 9  ;;  %v6230_v19 = vrot.slane %v6229_v11, 4  ;;  %v23644_v9 = vsel %vm23312_vm12, %v17500_v40, %v1378_v52  ;;  %v22062_v21 = vld [vmem:[%s22455_s8 + $0x70] sm:$0xf]  ;;  %v22063_v29 = vld [vmem:[%s22455_s8 + $0x74] sm:$0x1] }
  0xf9   : > { %v1380_v58 = vrot.slane %v1378_v52, 4  ;;  %v1385_v54 = vrot.slane %v22062_v21, 5  ;;  %v18051_v39 = vld [vmem:[%s22455_s8 + $0xb0] sm:$0x1]  ;;  %v6221_v2 = vsel %vm22737_vm9, %v6216_v36, %v6220_v53  ;;  %v1388_v28 = vrot.slane %v22063_v29, 5 }
  0xfa   : > { %v6240_v20 = vrot.slane %v6239_v43, 4  ;;  %v6247_v63 = vshrl.u32 %v18049_v30, 16  ;;  %v28709_v14 = vcombine.low %v23129_v24, %v23136_v49  ;;  %v23656_v40 = vcombine.low %v6211_v22, %v6221_v2  ;;  %v23669_v53 = vld [vmem:[%s22455_s8 + $0xb8] sm:$0xf]  ;;  %v18054_v2 = vld [vmem:[%s22455_s8 + $0xbc] sm:$0x1] }
  0xfb   : > { %v6235_v11 = vsel %vm22737_vm9, %v6230_v19, %v6234_v35  ;;  %v23662_v52 = vsel %vm23312_vm12, %v1380_v58, %v1381_v42  ;;  %v23666_v43 = vsel %vm23312_vm12, %v17501_v46, %v1385_v54  ;;  %v28710_v24 = vcombine.low %v23327_v47, %v23350_v15 }
  0xfc   : > { %19779 = vmatmul.mubr.msk.bf16.gmra.mrb[28].mxu1 %vm763_vm3, %v28709_v14  ;;  %v6245_v22 = vsel %vm22737_vm9, %v6240_v20, %v6244_v59  ;;  %v17517_v19 = vcombine.low %v23644_v9, %v23662_v52  ;;  %v1387_v35 = vrot.slane %v1385_v54, 4  ;;  %v6249_v42 = vrot.slane %v6247_v63, 4  ;;  %v1279_v20 = vld [vmem:[%s22455_s8 + $0x78] sm:$0xe]  ;;  %v22083_v52 = vld [vmem:[%s22455_s8 + $0x44] sm:$0x1] }
  0xfd   : > { %19784 = vmatprep.mubr.msk.bf16.mxu1 %vm763_vm3, %v28710_v24  ;;  %v23679_v36 = vcombine.low %v6235_v11, %v6245_v22  ;;  %v6250_v46 = vshll.u32 %v18049_v30, 16  ;;  %v28560_v58 = vshll.u32 %v23640_v44, 16  ;;  %v28561_v21 = vshrl.u32 %v23640_v44, 16  ;;  %v1280_v11 = vld [vmem:[%s22455_s8 + $0x84] sm:$0xe] }
  0xfe   : > { %20099 = vmatmul.mubr.msk.bf16.gmra.mrb[8].mxu0 %vm763_vm3, %v23436_v17  ;;  %v23688_v47 = vsel %vm23312_vm12, %v1387_v35, %v1388_v28  ;;  %v6266_v15 = vshll.u32 %v18051_v39, 16  ;;  %v6271_v59 = vshrl.u32 %v18052_v51, 16  ;;  %v6274_v54 = vshll.u32 %v18052_v51, 16 }
  0xff   : > { %20102 = vmatprep.mubr.msk.bf16.mxu0 %vm763_vm3, %v23486_v37  ;;  %v6252_v29 = vrot.slane %v6250_v46, 5  ;;  %v6258_v63 = vrot.slane %v28560_v58, 5  ;;  %v6262_v17 = vrot.slane %v28561_v21, 4  ;;  %v28562_v51 = vshll.u32 %v23669_v53, 16  ;;  %v22064_v21 = vld [vmem:[%s22455_s8 + $0x7c] sm:$0xf] }
 0x100   : > { %v6268_v28 = vrot.slane %v6266_v15, 5  ;;  %v6273_v39 = vrot.slane %v6271_v59, 4  ;;  %v6276_v14 = vrot.slane %v6274_v54, 5  ;;  %v28563_v22 = vshrl.u32 %v23669_v53, 16  ;;  %v18055_v59 = vld [vmem:[%s22455_s8 + $0xc0] sm:$0xf] }
 0x101   : > { %v6253_v37 = vor.u32 %v6252_v29, %v6249_v42  ;;  %v6263_v24 = vor.u32 %v6262_v17, %v6258_v63  ;;  %v6290_v35 = vshll.u32 %v18054_v2, 16  ;;  %v6282_v58 = vrot.slane %v28562_v51, 5 }
 0x102   : > { %v6277_v46 = vor.u32 %v6276_v14, %v6273_v39  ;;  %v17502_v30 = vrot.slane %v1279_v20, 9  ;;  %v1392_v15 = vrot.slane %v22064_v21, 5  ;;  %v28711_v54 = vcombine.low %v23354_v32, %v23370_v16  ;;  %v23713_v39 = vld [vmem:[%s22455_s8 + $0xc4] sm:$0xf]  ;;  %v22065_v14 = vld [vmem:[%s22455_s8 + $0x80] sm:$0x1] }
 0x103   : > { %v6254_v42 = vrot.slane %v6253_v37, 4  ;;  %v6264_v29 = vrot.slane %v6263_v24, 4  ;;  %v6286_v2 = vrot.slane %v28563_v22, 4  ;;  %v6292_v17 = vrot.slane %v6290_v35, 5  ;;  %v18057_v24 = vld [vmem:[%s22455_s8 + $0xc8] sm:$0x1] }
 0x104   : > { %19785 = vmatmul.mubr.msk.bf16.vlgmr.msra.gmra.mrb[0].mxu1 %vm763_vm3, %v28711_v54  ;;  %v28712_v20 = vcombine.low %v23406_v55, %v23421_v31  ;;  %v6278_v21 = vrot.slane %v6277_v46, 4  ;;  %v23721_v32 = vsel %vm23312_vm12, %v17502_v30, %v1392_v15  ;;  %v1394_v16 = vrot.slane %v1392_v15, 4 }
 0x105   : > { %v1395_v37 = vrot.slane %v22065_v14, 5  ;;  %v6259_v35 = vsel %vm22737_vm9, %v6254_v42, %v6258_v63  ;;  %v6269_v55 = vsel %vm22737_vm9, %v6264_v29, %v6268_v28  ;;  %v6287_v31 = vor.u32 %v6286_v2, %v6282_v58  ;;  %v22066_v63 = vld [vmem:[%s22455_s8 + $0x88] sm:$0xf]  ;;  %v18058_v28 = vld [vmem:[%s22455_s8 + $0xcc] sm:$0xf] }
 0x106   : > { %19788 = vmatprep.mubr.msk.bf16.mxu1 %vm763_vm3, %v28712_v20  ;;  %v17503_v54 = vrot.slane %v1280_v11, 9  ;;  %20103 = vmatmul.mubr.msk.bf16.gmra.mrb[12].mxu0 %vm763_vm3, %v23521_v10  ;;  %v23731_v46 = vcombine.low %v6259_v35, %v6269_v55  ;;  %v6283_v30 = vsel %vm22737_vm9, %v6278_v21, %v6282_v58  ;;  %v1399_v42 = vrot.slane %v22066_v63, 5  ;;  %v22067_v29 = vld [vmem:[%s22455_s8 + $0x8c] sm:$0x1]  ;;  %v23747_v58 = vld [vmem:[%s22455_s8 + $0xd0] sm:$0xf] }
 0x107   : > { %v23737_v15 = vsel %vm23312_vm12, %v1394_v16, %v1395_v37  ;;  %20106 = vmatprep.mubr.msk.bf16.mxu0 %vm763_vm3, %v23573_v27  ;;  %v6288_v11 = vrot.slane %v6287_v31, 4  ;;  %v1402_v2 = vrot.slane %v22067_v29, 5  ;;  %v6295_v20 = vshrl.u32 %v18055_v59, 16  ;;  %v18060_v35 = vld [vmem:[%s22455_s8 + $0xd4] sm:$0x1] }
 0x108   : > { %v17519_v10 = vcombine.low %v23721_v32, %v23737_v15  ;;  %v23751_v21 = vsel %vm23312_vm12, %v17503_v54, %v1399_v42  ;;  %v1401_v16 = vrot.slane %v1399_v42, 4  ;;  %v6298_v14 = vshll.u32 %v18055_v59, 16  ;;  %v1281_v27 = vld [vmem:[%s22455_s8 + $0x90] sm:$0xe] }
 0x109   : > { %v28564_v37 = vshll.u32 %v23713_v39, 16  ;;  %v6293_v55 = vsel %vm22737_vm9, %v6288_v11, %v6292_v17  ;;  %v6297_v31 = vrot.slane %v6295_v20, 4  ;;  %v28565_v63 = vshrl.u32 %v23713_v39, 16  ;;  %v1282_v20 = vld [vmem:[%s22455_s8 + $0x9c] sm:$0xe] }
 0x10a   : > { %v6314_v29 = vshll.u32 %v18057_v24, 16  ;;  %v23759_v51 = vcombine.low %v6283_v30, %v6293_v55  ;;  %v23763_v54 = vsel %vm23312_vm12, %v1401_v16, %v1402_v2  ;;  %v6300_v42 = vrot.slane %v6298_v14, 5 }
 0x10b   : > { %v6306_v59 = vrot.slane %v28564_v37, 5  ;;  %v28713_v22 = vcombine.low %v23425_v62, %v23444_v7  ;;  %v6310_v24 = vrot.slane %v28565_v63, 4  ;;  %v6319_v11 = vshrl.u32 %v18058_v28, 16 }
 0x10c   : > { %v6316_v30 = vrot.slane %v6314_v29, 5  ;;  %v28714_v2 = vcombine.low %v23473_v1, %v23492_v18  ;;  %v6301_v16 = vor.u32 %v6300_v42, %v6297_v31  ;;  %v6322_v14 = vshll.u32 %v18058_v28, 16 }
 0x10d   : > { %19789 = vmatmul.mubr.msk.bf16.gmra.mrb[4].mxu1 %vm763_vm3, %v28713_v22  ;;  %v28566_v62 = vshll.u32 %v23747_v58, 16  ;;  %v28567_v7 = vshrl.u32 %v23747_v58, 16  ;;  %v6311_v22 = vor.u32 %v6310_v24, %v6306_v59  ;;  %v6321_v55 = vrot.slane %v6319_v11, 4  ;;  %v22069_v24 = vld [vmem:[%s22455_s8 + $0x98] sm:$0x1] }
 0x10e   : > { %19792 = vmatprep.mubr.msk.bf16.mxu1 %vm763_vm3, %v28714_v2  ;;  %v6338_v37 = vshll.u32 %v18060_v35, 16  ;;  %v17504_v63 = vrot.slane %v1281_v27, 9  ;;  %20107 = vmatmul.mubr.msk.bf16.gmra.mrb[16].mxu0 %vm763_vm3, %v23600_v0  ;;  %v6302_v29 = vrot.slane %v6301_v16, 4  ;;  %v6324_v1 = vrot.slane %v6322_v14, 5  ;;  %v22068_v35 = vld [vmem:[%s22455_s8 + $0x94] sm:$0xf] }
 0x10f   : > { %v6330_v18 = vrot.slane %v28566_v62, 5  ;;  %v6334_v28 = vrot.slane %v28567_v7, 4  ;;  %20110 = vmatprep.mubr.msk.bf16.mxu0 %vm763_vm3, %v23656_v40  ;;  %v6312_v31 = vrot.slane %v6311_v22, 4  ;;  %v1406_v27 = vrot.slane %v22068_v35, 5  ;;  %v23795_v62 = vld [vmem:[%s22455_s8 + $0x18] sm:$0xe] }
 0x110   : > { %v6340_v42 = vrot.slane %v6338_v37, 5  ;;  %v1409_v0 = vrot.slane %v22069_v24, 5  ;;  %v6307_v11 = vsel %vm22737_vm9, %v6302_v29, %v6306_v59  ;;  %v6325_v2 = vor.u32 %v6324_v1, %v6321_v55  ;;  %v22070_v22 = vld [vmem:[%s22455_s8 + $0xa0] sm:$0xf]  ;;  %v18095_v1 = vld [vmem:[%s22455_s8 + $0x24] sm:$0xe] }
 0x111   : > { %v6335_v16 = vor.u32 %v6334_v28, %v6330_v18  ;;  %v17505_v14 = vrot.slane %v1282_v20, 9  ;;  %v6317_v7 = vsel %vm22737_vm9, %v6312_v31, %v6316_v30  ;;  %v23801_v40 = vsel %vm23312_vm12, %v17504_v63, %v1406_v27  ;;  %v22071_v20 = vld [vmem:[%s22455_s8 + $0xa4] sm:$0x1] }
 0x112   : > { %v1408_v37 = vrot.slane %v1406_v27, 4  ;;  %v1413_v35 = vrot.slane %v22070_v22, 5  ;;  %v23804_v24 = vcombine.low %v6307_v11, %v6317_v7  ;;  %v6326_v59 = vrot.slane %v6325_v2, 4  ;;  %v1283_v27 = vld [vmem:[%s22455_s8 + $0xa8] sm:$0xe] }
 0x113   : > { %v6336_v55 = vrot.slane %v6335_v16, 4  ;;  %v1416_v29 = vrot.slane %v22071_v20, 5  ;;  %v28715_v30 = vcombine.low %v23512_v25, %v23525_v33  ;;  %v18110_v31 = vrot.slane %v23795_v62, 9  ;;  %v22072_v2 = vld [vmem:[%s22455_s8 + $0x1c] sm:$0xf] }
 0x114   : > { %v23814_v63 = vsel %vm23312_vm12, %v1408_v37, %v1409_v0  ;;  %v23818_v7 = vsel %vm23312_vm12, %v17505_v14, %v1413_v35  ;;  %v1415_v28 = vrot.slane %v1413_v35, 4  ;;  %v28716_v11 = vcombine.low %v23567_v60, %v23585_v4  ;;  %v1284_v14 = vld [vmem:[%s22455_s8 + $0xb4] sm:$0xe]  ;;  %v22073_v4 = vld [vmem:[%s22455_s8 + $0x20] sm:$0x1] }
 0x115   : > { %19793 = vmatmul.mubr.msk.bf16.gmra.mrb[8].mxu1 %vm763_vm3, %v28715_v30  ;;  %v6331_v25 = vsel %vm22737_vm9, %v6326_v59, %v6330_v18  ;;  %v6341_v33 = vsel %vm22737_vm9, %v6336_v55, %v6340_v42  ;;  %v6702_v16 = vrot.slane %v22072_v2, 5  ;;  %v6705_v18 = vrot.slane %v22073_v4, 5  ;;  %v18096_v35 = vld [vmem:[%s22455_s8 + $0x30] sm:$0xe]  ;;  %v22074_v20 = vld [vmem:[%s22455_s8 + $0x28] sm:$0xf] }
 0x116   : > { %19796 = vmatprep.mubr.msk.bf16.mxu1 %vm763_vm3, %v28716_v11  ;;  %v23834_v37 = vcombine.low %v6331_v25, %v6341_v33  ;;  %v23838_v60 = vsel %vm23312_vm12, %v1415_v28, %v1416_v29  ;;  %v18111_v22 = vrot.slane %v18095_v1, 9  ;;  %20111 = vmatmul.mubr.msk.bf16.gmra.mrb[20].mxu0 %vm763_vm3, %v23679_v36  ;;  %v6709_v29 = vrot.slane %v22074_v20, 5  ;;  %v22075_v30 = vld [vmem:[%s22455_s8 + $0x2c] sm:$0x1]  ;;  %v18097_v33 = vld [vmem:[%s22455_s8 + $0x3c] sm:$0xe] }
 0x117   : > { %v23848_v59 = vsel %vm23312_vm12, %v18110_v31, %v6702_v16  ;;  %v6704_v55 = vrot.slane %v6702_v16, 4  ;;  %20114 = vmatprep.mubr.msk.bf16.mxu0 %vm763_vm3, %v23731_v46  ;;  %v6712_v1 = vrot.slane %v22075_v30, 5  ;;  %v23856_v36 = vsel %vm812_vm0, %v23552_v12, 0  ;;  %v22076_v11 = vld [vmem:[%s22455_s8 + $0xac] sm:$0xf] }
 0x118   : > { %v17506_v28 = vrot.slane %v1283_v27, 9  ;;  %v1420_v25 = vrot.slane %v22076_v11, 5  ;;  %v23866_v2 = vsel %vm23312_vm12, %v18111_v22, %v6709_v29  ;;  %v6711_v46 = vrot.slane %v6709_v29, 4  ;;  %v22077_v16 = vld [vmem:[%s22455_s8 + $0xb0] sm:$0x1] }
 0x119   : > { %v23862_v31 = vsel %vm23312_vm12, %v6704_v55, %v6705_v18  ;;  %v1423_v4 = vrot.slane %v22077_v16, 5  ;;  %v17507_v30 = vrot.slane %v1284_v14, 9  ;;  %v22078_v22 = vld [vmem:[%s22455_s8 + $0xb8] sm:$0xf]  ;;  %v22079_v29 = vld [vmem:[%s22455_s8 + $0xbc] sm:$0x1]  ;;  %v28717_v42 = vcombine.low %v23589_v56, %v23604_v8 }
 0x11a   : > { %v23873_v27 = vsel %vm23312_vm12, %v17506_v28, %v1420_v25  ;;  %v1422_v20 = vrot.slane %v1420_v25, 4  ;;  %v23877_v18 = vsel %vm23312_vm12, %v6711_v46, %v6712_v1  ;;  %v1427_v55 = vrot.slane %v22078_v22, 5  ;;  %v22080_v1 = vld [vmem:[%s22455_s8 + $0x34] sm:$0xf]  ;;  %v22081_v46 = vld [vmem:[%s22455_s8 + $0x38] sm:$0x1] }
 0x11b   : > { %v1430_v11 = vrot.slane %v22079_v29, 5  ;;  %v18112_v16 = vrot.slane %v18096_v35, 9  ;;  %v6716_v25 = vrot.slane %v22080_v1, 5  ;;  %v6719_v22 = vrot.slane %v22081_v46, 5  ;;  %v22082_v29 = vld [vmem:[%s22455_s8 + $0x40] sm:$0xf] }
 0x11c   : > { %v23889_v14 = vsel %vm23312_vm12, %v1422_v20, %v1423_v4  ;;  %v23901_v8 = vsel %vm23312_vm12, %v17507_v30, %v1427_v55  ;;  %v1429_v35 = vrot.slane %v1427_v55, 4  ;;  %v6723_v9 = vrot.slane %v22082_v29, 5  ;;  %v17590_v1 = vld [vmem:[%s28426_s1 + $0x8] sm:$0x3]  ;;  %v22084_v30 = vld [vmem:[%s28426_s1 + $0x6] sm:$0x3] }
 0x11d   : > { %19797 = vmatmul.mubr.msk.bf16.gmra.mrb[12].mxu1 %vm763_vm3, %v28717_v42  ;;  %v18113_v42 = vrot.slane %v18097_v33, 9  ;;  %v23905_v4 = vsel %vm23312_vm12, %v18112_v16, %v6716_v25  ;;  %v6718_v20 = vrot.slane %v6716_v25, 4  ;;  %v2212_v55 = vsel %vm812_vm0, %v22084_v30, 0  ;;  %v1726_v16 = vld [vmem:[%s22455_s8 + $0x8] sm:$0x3] }
 0x11e   : > { %19800 = vmatprep.mubr.msk.bf16.mxu1 %vm763_vm3, %v17517_v19  ;;  %v6726_v19 = vrot.slane %v22083_v52, 5  ;;  %20115 = vmatmul.mubr.msk.bf16.gmra.mrb[24].mxu0 %vm763_vm3, %v23759_v51  ;;  %v23916_v33 = vsel %vm23312_vm12, %v1429_v35, %v1430_v11  ;;  %v22085_v25 = vld [vmem:[%s22455_s8] sm:$0xe]  ;;  %v6725_v52 = vrot.slane %v6723_v9, 4  ;;  %v1727_v30 = vld [vmem:[%s22455_s8 + $0x14] sm:$0x3]  ;;  %v1756_v51 = vor.u32 %v22733_v3, %v22731_v6 }
 0x11f   : > { %v1746_v46 = vshrl.u32 %v22085_v25, 16  ;;  %v1749_v29 = vshll.u32 %v22085_v25, 16  ;;  %20118 = vmatprep.mubr.msk.bf16.mxu0 %vm763_vm3, %v23804_v24  ;;  %v23930_v11 = vsel %vm23312_vm12, %v6718_v20, %v6719_v22  ;;  %v23934_v35 = vsel %vm23312_vm12, %v18113_v42, %v6723_v9  ;;  %19817 = vmatpush3.bf16.msra.mxu1 %v2212_v55  ;;  %v18098_v25 = vld [vmem:[%s22455_s8 + $0x48] sm:$0xe]  ;;  %v22086_v9 = vld [vmem:[%s22455_s8 + $0xc] sm:$0xe] }
 0x120   : > { %21876 = vmatprep.subr.msk.bf16.mxu1 %vm812_vm0, %v17590_v1  ;;  %v23945_v22 = vsel %vm23312_vm12, %v6725_v52, %v6726_v19  ;;  %v1760_v42 = vshrl.u32 %v1726_v16, 16  ;;  %v1763_v20 = vshll.u32 %v1726_v16, 16  ;;  %v1769_v55 = vshrl.u32 %v22086_v9, 16  ;;  %v18099_v0 = vld [vmem:[%s22455_s8 + $0x54] sm:$0xe] }
 0x121   : > { %v1748_v56 = vrot.slane %v1746_v46, 5  ;;  %v1751_v28 = vrot.slane %v1749_v29, 6  ;;  %v1758_v29 = vrot.slane %v1756_v51, 4  ;;  %v1772_v24 = vshll.u32 %v22086_v9, 16 }
 0x122   : > { %v28718_v6 = vcombine.low %v23666_v43, %v23688_v47  ;;  %v1762_v3 = vrot.slane %v1760_v42, 5  ;;  %v1765_v19 = vrot.slane %v1763_v20, 6  ;;  %v1771_v1 = vrot.slane %v1769_v55, 5  ;;  %v22088_v47 = vld [vmem:[%s22455_s8 + $0x50] sm:$0x1] }
 0x123   : > { %v1752_v46 = vor.u32 %v1751_v28, %v1748_v56  ;;  %v1783_v16 = vshrl.u32 %v1727_v30, 16  ;;  %v1774_v17 = vrot.slane %v1772_v24, 6  ;;  %v1786_v28 = vshll.u32 %v1727_v30, 16  ;;  %v22089_v20 = vld [vmem:[%s22455_s8 + $0x58] sm:$0xf] }
 0x124   : > { %v18114_v56 = vrot.slane %v18098_v25, 9  ;;  %v1766_v9 = vor.u32 %v1765_v19, %v1762_v3  ;;  %v6730_v43 = vrot.slane %v22087_v23, 5  ;;  %v6733_v42 = vrot.slane %v22088_v47, 5  ;;  %v1728_v3 = vld [vmem:[%s22455_s8 + $0x20] sm:$0x3] }
 0x125   : > { %19801 = vmatmul.mubr.msk.bf16.gmra.mrb[16].mxu1 %vm763_vm3, %v28718_v6  ;;  %v1753_v52 = vrot.slane %v1752_v46, 4  ;;  %v1785_v12 = vrot.slane %v1783_v16, 5  ;;  %v1775_v15 = vor.u32 %v1774_v17, %v1771_v1  ;;  %v18115_v24 = vrot.slane %v18099_v0, 9  ;;  %v22090_v46 = vld [vmem:[%s22455_s8 + $0x5c] sm:$0x1]  ;;  %v28720_v16 = vld [vmem:[#allocation25_spill] sm:$0xff] }
 0x126   : > { %19804 = vmatprep.mubr.msk.bf16.mxu1 %vm763_vm3, %v17519_v10  ;;  %20119 = vmatmul.mubr.msk.bf16.gmra.mrb[28].mxu0 %vm763_vm3, %v23834_v37  ;;  %v1788_v10 = vrot.slane %v1786_v28, 6  ;;  %v28719_v30 = vcombine.low %v23848_v59, %v23862_v31  ;;  %v1767_v23 = vsel %vm22489_vm4, %v1758_v29, %v1766_v9  ;;  %v23973_v25 = vsel %vm23312_vm12, %v18114_v56, %v6730_v43  ;;  %v22091_v19 = vld [vmem:[%s22455_s8 + $0x18] sm:$0xe] }
 0x127   : > { %v1757_v32 = vsel %vm22489_vm4, %v1753_v52, %v1756_v51  ;;  %v6732_v37 = vrot.slane %v6730_v43, 4  ;;  %v6737_v51 = vrot.slane %v22089_v20, 5  ;;  %v1776_v55 = vrot.slane %v1775_v15, 4 }
 0x128   : > { %20124 = vmatprep.mubr.msk.bf16.mxu0 %vm763_vm3, %v28719_v30  ;;  %v23976_v17 = vcombine.low %v1757_v32, %v1767_v23  ;;  %v1789_v0 = vor.u32 %v1788_v10, %v1785_v12  ;;  %v6740_v6 = vrot.slane %v22090_v46, 5  ;;  %v1792_v1 = vshrl.u32 %v22091_v19, 16  ;;  %v22092_v46 = vld [vmem:[%s22455_s8 + $0x24] sm:$0xe] }
 0x129   : > { %v23981_v59 = vsel %vm23312_vm12, %v6732_v37, %v6733_v42  ;;  %v23985_v31 = vsel %vm23312_vm12, %v18115_v24, %v6737_v51  ;;  %v6739_v29 = vrot.slane %v6737_v51, 4  ;;  %v1780_v12 = vsel %vm22489_vm4, %v1776_v55, %v28720_v16  ;;  %v1729_v24 = vld [vmem:[%s22455_s8 + $0x2c] sm:$0x3]  ;;  %v18100_v51 = vld [vmem:[%s22455_s8 + $0x60] sm:$0xe] }
 0x12a   : > { %v28721_v52 = vrot.slane %v28720_v16, 4  ;;  %v18131_v56 = vcombine.low %v23973_v25, %v23981_v59  ;;  %v1795_v9 = vshll.u32 %v22091_v19, 16  ;;  %v28722_v43 = vcombine.low %v23751_v21, %v23763_v54  ;;  %v24023_v55 = vld [vmem:[%s28426_s1 + $0x1c] sm:$0x3] }
 0x12b   : > { %v24006_v42 = vsel %vm23312_vm12, %v6739_v29, %v6740_v6  ;;  %v1794_v32 = vrot.slane %v1792_v1, 5  ;;  %v28723_v15 = vshrl.u32 %v22765_v48, 16  ;;  %v28724_v30 = vcombine.low %v23801_v40, %v23814_v63 }
 0x12c   : > { %v1790_v28 = vsel %vm22489_vm4, %v28721_v52, %v1789_v0  ;;  %v18132_v21 = vcombine.low %v23985_v31, %v24006_v42  ;;  %v1797_v54 = vrot.slane %v1795_v9, 6  ;;  %v28725_v23 = vshll.u32 %v22765_v48, 16  ;;  %v22100_v42 = vld [vmem:[%s22455_s8 + $0x80] sm:$0x1] }
 0x12d   : > { %19805 = vmatmul.mubr.msk.bf16.gmra.mrb[20].mxu1 %vm763_vm3, %v28722_v43  ;;  %v24002_v47 = vcombine.low %v1780_v12, %v1790_v28  ;;  %v1800_v10 = vrot.slane %v28723_v15, 5  ;;  %v1806_v20 = vshrl.u32 %v1728_v3, 16  ;;  %v1809_v0 = vshll.u32 %v1728_v3, 16  ;;  %v18101_v28 = vld [vmem:[%s22455_s8 + $0x6c] sm:$0xe] }
 0x12e   : > { %19808 = vmatprep.mubr.msk.bf16.mxu1 %vm763_vm3, %v28724_v30  ;;  %v1801_v37 = vrot.slane %v28725_v23, 6  ;;  %v1815_v40 = vshrl.u32 %v22092_v46, 16  ;;  %v1818_v63 = vshll.u32 %v22092_v46, 16  ;;  %v28726_v6 = vshrl.u32 %v22795_v45, 16 }
 0x12f   : > { %v28727_v19 = vcombine.low %v23866_v2, %v23877_v18  ;;  %v1798_v48 = vor.u32 %v1797_v54, %v1794_v32  ;;  %v1808_v16 = vrot.slane %v1806_v20, 5  ;;  %v28728_v12 = vshll.u32 %v22795_v45, 16  ;;  %v22093_v20 = vld [vmem:[%s22455_s8 + $0x64] sm:$0xf] }
 0x130   : > { %v1823_v29 = vrot.slane %v28726_v6, 5  ;;  %v1802_v1 = vor.u32 %v1801_v37, %v1800_v10  ;;  %v28729_v3 = vcombine.low %v23905_v4, %v23930_v11  ;;  %v1811_v9 = vrot.slane %v1809_v0, 6 }
 0x131   : > { %20125 = vmatmul.mubr.msk.bf16.vlgmr.msra.gmra.mrb[0].mxu0 %vm763_vm3, %v28727_v19  ;;  %v1824_v52 = vrot.slane %v28728_v12, 6  ;;  %v1817_v43 = vrot.slane %v1815_v40, 5  ;;  %v1820_v2 = vrot.slane %v1818_v63, 6  ;;  %v1829_v18 = vshrl.u32 %v1729_v24, 16  ;;  %v22094_v40 = vld [vmem:[%s22455_s8 + $0x68] sm:$0x1] }
 0x132   : > { %20157 = vmatpush3.bf16.msra.mxu0 %v23856_v36  ;;  %20128 = vmatprep.mubr.msk.bf16.mxu0 %vm763_vm3, %v28729_v3  ;;  %v1799_v15 = vrot.slane %v1798_v48, 4  ;;  %v1804_v32 = vrot.slane %v1802_v1, 4  ;;  %v1832_v30 = vshll.u32 %v1729_v24, 16  ;;  %v1812_v45 = vor.u32 %v1811_v9, %v1808_v16  ;;  %v22095_v16 = vld [vmem:[%s22455_s8 + $0x70] sm:$0xf] }
 0x133   : > { %v1825_v10 = vor.u32 %v1824_v52, %v1823_v29  ;;  %21887 = vmatprep.subr.msk.bf16.mxu0 %vm812_vm0, %v24023_v55  ;;  %v1821_v36 = vor.u32 %v1820_v2, %v1817_v43  ;;  %v1831_v54 = vrot.slane %v1829_v18, 5  ;;  %v18116_v23 = vrot.slane %v18100_v51, 9  ;;  %v22096_v52 = vld [vmem:[%s22455_s8 + $0x74] sm:$0x1]  ;;  %v22097_v9 = vld [vmem:[%s22455_s8 + $0x30] sm:$0xe] }
 0x134   : > { %v1803_v4 = vsel %vm22489_vm4, %v1799_v15, %v1802_v1  ;;  %v1834_v37 = vrot.slane %v1832_v30, 6  ;;  %v6744_v0 = vrot.slane %v22093_v20, 5  ;;  %v28730_v46 = vcombine.low %v23818_v7, %v23838_v60 }
 0x135   : > { %v1827_v11 = vrot.slane %v1825_v10, 4  ;;  %v1813_v24 = vsel %vm22489_vm4, %v1804_v32, %v1812_v45  ;;  %v1822_v51 = vrot.slane %v1821_v36, 4  ;;  %v6747_v63 = vrot.slane %v22094_v40, 5  ;;  %v18102_v40 = vld [vmem:[%s22455_s8 + $0x78] sm:$0xe] }
 0x136   : > { %19809 = vmatmul.mubr.msk.bf16.gmra.mrb[24].mxu1 %vm763_vm3, %v28730_v46  ;;  %v18117_v6 = vrot.slane %v18101_v28, 9  ;;  %v28731_v29 = vcombine.low %v23873_v27, %v23889_v14  ;;  %v24056_v19 = vcombine.low %v1803_v4, %v1813_v24  ;;  %v1835_v48 = vor.u32 %v1834_v37, %v1831_v54  ;;  %v1730_v28 = vld [vmem:[%s22455_s8 + $0x38] sm:$0x3] }
 0x137   : > { %v6745_v7 = vsel %vm23312_vm12, %v18116_v23, %v6744_v0  ;;  %v6746_v60 = vrot.slane %v6744_v0, 4  ;;  %v1826_v1 = vsel %vm22489_vm4, %v1822_v51, %v1825_v10  ;;  %v6751_v12 = vrot.slane %v22095_v16, 5 }
 0x138   : > { %19812 = vmatprep.mubr.msk.bf16.mxu1 %vm763_vm3, %v28731_v29  ;;  %v6754_v3 = vrot.slane %v22096_v52, 5  ;;  %v1838_v43 = vshrl.u32 %v22097_v9, 16  ;;  %v28732_v27 = vcombine.low %v23934_v35, %v23945_v22  ;;  %v1836_v14 = vsel %vm22489_vm4, %v1827_v11, %v1835_v48  ;;  %v22098_v11 = vld [vmem:[%s22455_s8 + $0x3c] sm:$0xe]  ;;  %v28736_v48 = vld [vmem:[#allocation26_spill] sm:$0xff] }
 0x139   : > { %v6748_v2 = vsel %vm23312_vm12, %v6746_v60, %v6747_v63  ;;  %v1841_v18 = vshll.u32 %v22097_v9, 16  ;;  %v28733_v15 = vshrl.u32 %v22826_v61, 16  ;;  %v24080_v35 = vcombine.low %v1826_v1, %v1836_v14  ;;  %v22099_v14 = vld [vmem:[%s22455_s8 + $0x7c] sm:$0xf] }
 0x13a   : > { %20129 = vmatmul.mubr.msk.bf16.gmra.mrb[4].mxu0 %vm763_vm3, %v28732_v27  ;;  %v18133_v22 = vcombine.low %v6745_v7, %v6748_v2  ;;  %v24084_v10 = vsel %vm23312_vm12, %v18117_v6, %v6751_v12  ;;  %v6753_v30 = vrot.slane %v6751_v12, 4  ;;  %v1840_v45 = vrot.slane %v1838_v43, 5 }
 0x13b   : > { %v1846_v32 = vrot.slane %v28733_v15, 5  ;;  %20132 = vmatprep.mubr.msk.bf16.mxu0 %vm763_vm3, %v18131_v56  ;;  %v1843_v36 = vrot.slane %v1841_v18, 6  ;;  %v28734_v54 = vshll.u32 %v22826_v61, 16  ;;  %v1852_v4 = vshrl.u32 %v1730_v28, 16  ;;  %v1731_v56 = vld [vmem:[%s22455_s8 + $0x44] sm:$0x3] }
 0x13c   : > { %v24090_v25 = vsel %vm23312_vm12, %v6753_v30, %v6754_v3  ;;  %v1855_v59 = vshll.u32 %v1730_v28, 16  ;;  %v1861_v37 = vshrl.u32 %v22098_v11, 16  ;;  %v1864_v20 = vshll.u32 %v22098_v11, 16  ;;  %v18103_v18 = vld [vmem:[%s22455_s8 + $0x84] sm:$0xe] }
 0x13d   : > { %v1847_v23 = vrot.slane %v28734_v54, 6  ;;  %v18134_v0 = vcombine.low %v24084_v10, %v24090_v25  ;;  %v1844_v46 = vor.u32 %v1843_v36, %v1840_v45  ;;  %v1854_v51 = vrot.slane %v1852_v4, 5  ;;  %v22101_v4 = vld [vmem:[%s22455_s8 + $0x88] sm:$0xf] }
 0x13e   : > { %v28735_v61 = vcombine.low %v23901_v8, %v23916_v33  ;;  %v1857_v63 = vrot.slane %v1855_v59, 6  ;;  %v1863_v6 = vrot.slane %v1861_v37, 5  ;;  %v1866_v29 = vrot.slane %v1864_v20, 6  ;;  %v1732_v37 = vld [vmem:[%s22455_s8 + $0x50] sm:$0x3] }
 0x13f   : > { %v1848_v24 = vor.u32 %v1847_v23, %v1846_v32  ;;  %v28737_v7 = vshrl.u32 %v28736_v48, 16  ;;  %v1845_v1 = vrot.slane %v1844_v46, 4  ;;  %v28738_v12 = vshll.u32 %v28736_v48, 16  ;;  %v22103_v20 = vld [vmem:[%s22455_s8 + $0x48] sm:$0xe] }
 0x140   : > { %19813 = vmatmul.mubr.msk.bf16.gmra.mrb[28].mxu1 %vm763_vm3, %v28735_v61  ;;  %v1875_v3 = vshrl.u32 %v1731_v56, 16  ;;  %v1858_v8 = vor.u32 %v1857_v63, %v1854_v51  ;;  %v1867_v33 = vor.u32 %v1866_v29, %v1863_v6  ;;  %v1878_v28 = vshll.u32 %v1731_v56, 16  ;;  %v22102_v56 = vld [vmem:[%s22455_s8 + $0x8c] sm:$0x1] }
 0x141   : > { %v1869_v60 = vrot.slane %v28737_v7, 5  ;;  %19818 = vmatprep.mubr.msk.bf16.mxu1 %vm763_vm3, %v23976_v17  ;;  %v1850_v16 = vrot.slane %v1848_v24, 4  ;;  %v1870_v52 = vrot.slane %v28738_v12, 6  ;;  %v18118_v9 = vrot.slane %v18102_v40, 9 }
 0x142   : > { %20133 = vmatmul.mubr.msk.bf16.gmra.mrb[8].mxu0 %vm763_vm3, %v18132_v21  ;;  %v1849_v43 = vsel %vm22489_vm4, %v1845_v1, %v1848_v24  ;;  %v1877_v27 = vrot.slane %v1875_v3, 5  ;;  %v6758_v2 = vrot.slane %v22099_v14, 5  ;;  %v1868_v32 = vrot.slane %v1867_v33, 4  ;;  %v22104_v33 = vld [vmem:[%s22455_s8 + $0x54] sm:$0xe]  ;;  %v28741_v14 = vld [vmem:[#allocation27_spill] sm:$0xff] }
 0x143   : > { %v1871_v17 = vor.u32 %v1870_v52, %v1869_v60  ;;  %20136 = vmatprep.mubr.msk.bf16.mxu0 %vm763_vm3, %v18133_v22  ;;  %v1859_v15 = vsel %vm22489_vm4, %v1850_v16, %v1858_v8  ;;  %v1880_v31 = vrot.slane %v1878_v28, 6  ;;  %v6761_v21 = vrot.slane %v22100_v42, 5  ;;  %v1733_v8 = vld [vmem:[%s22455_s8 + $0x5c] sm:$0x3] }
 0x144   : > { %v17546_v10 = vcombine.low %v1849_v43, %v1859_v15  ;;  %v6759_v45 = vsel %vm23312_vm12, %v18118_v9, %v6758_v2  ;;  %v6760_v36 = vrot.slane %v6758_v2, 4  ;;  %v18119_v23 = vrot.slane %v18103_v18, 9  ;;  %v18104_v18 = vld [vmem:[%s22455_s8 + $0x90] sm:$0xe] }
 0x145   : > { %v1873_v30 = vrot.slane %v1871_v17, 4  ;;  %v1872_v54 = vsel %vm22489_vm4, %v1868_v32, %v1871_v17  ;;  %v1881_v22 = vor.u32 %v1880_v31, %v1877_v27  ;;  %v6765_v25 = vrot.slane %v22101_v4, 5 }
 0x146   : > { %v6762_v59 = vsel %vm23312_vm12, %v6760_v36, %v6761_v21  ;;  %v6768_v11 = vrot.slane %v22102_v56, 5  ;;  %v1884_v46 = vshrl.u32 %v22103_v20, 16  ;;  %v1887_v24 = vshll.u32 %v22103_v20, 16 }
 0x147   : > { %v1882_v51 = vsel %vm22489_vm4, %v1873_v30, %v1881_v22  ;;  %v18135_v40 = vcombine.low %v6759_v45, %v6762_v59  ;;  %v6766_v61 = vsel %vm23312_vm12, %v18119_v23, %v6765_v25  ;;  %v6767_v63 = vrot.slane %v6765_v25, 4  ;;  %v18105_v25 = vld [vmem:[%s22455_s8 + $0x9c] sm:$0xe] }
 0x148   : > { %19819 = vmatmul.mubr.msk.bf16.vlgmr.msra.gmra.mrb[0].mxu1 %vm763_vm3, %v24002_v47  ;;  %v24137_v6 = vcombine.low %v1872_v54, %v1882_v51  ;;  %v1886_v29 = vrot.slane %v1884_v46, 5  ;;  %v1889_v48 = vrot.slane %v1887_v24, 6  ;;  %v28739_v7 = vshrl.u32 %v22890_v26, 16 }
 0x149   : > { %19822 = vmatprep.mubr.msk.bf16.mxu1 %vm763_vm3, %v24056_v19  ;;  %v6769_v60 = vsel %vm23312_vm12, %v6767_v63, %v6768_v11  ;;  %v28740_v1 = vshll.u32 %v22890_v26, 16  ;;  %v1898_v12 = vshrl.u32 %v1732_v37, 16  ;;  %v1901_v52 = vshll.u32 %v1732_v37, 16  ;;  %v22105_v37 = vld [vmem:[%s22455_s8 + $0x94] sm:$0xf] }
 0x14a   : > { %v1892_v47 = vrot.slane %v28739_v7, 5  ;;  %20137 = vmatmul.mubr.msk.bf16.gmra.mrb[12].mxu0 %vm763_vm3, %v18134_v0  ;;  %v18136_v3 = vcombine.low %v6766_v61, %v6769_v60  ;;  %v1890_v19 = vor.u32 %v1889_v48, %v1886_v29  ;;  %v1907_v28 = vshrl.u32 %v22104_v33, 16  ;;  %v22108_v60 = vld [vmem:[%s22455_s8 + $0xa4] sm:$0x1] }
 0x14b   : > { %v1893_v16 = vrot.slane %v28740_v1, 6  ;;  %v1910_v9 = vshll.u32 %v22104_v33, 16  ;;  %20140 = vmatprep.mubr.msk.bf16.mxu0 %vm763_vm3, %v18135_v40  ;;  %v1900_v17 = vrot.slane %v1898_v12, 5  ;;  %v1903_v27 = vrot.slane %v1901_v52, 6  ;;  %v22106_v40 = vld [vmem:[%s22455_s8 + $0x98] sm:$0x1] }
 0x14c   : > { %v28742_v26 = vshrl.u32 %v28741_v14, 16  ;;  %v1891_v15 = vrot.slane %v1890_v19, 4  ;;  %v1909_v32 = vrot.slane %v1907_v28, 5  ;;  %v28743_v31 = vshll.u32 %v28741_v14, 16  ;;  %v22109_v12 = vld [vmem:[%s22455_s8 + $0x60] sm:$0xe] }
 0x14d   : > { %v1894_v43 = vor.u32 %v1893_v16, %v1892_v47  ;;  %v1912_v0 = vrot.slane %v1910_v9, 6  ;;  %v1904_v30 = vor.u32 %v1903_v27, %v1900_v17  ;;  %v1921_v45 = vshrl.u32 %v1733_v8, 16  ;;  %v22107_v47 = vld [vmem:[%s22455_s8 + $0xa0] sm:$0xf]  ;;  %v1734_v16 = vld [vmem:[%s22455_s8 + $0x68] sm:$0x3] }
 0x14e   : > { %v1915_v2 = vrot.slane %v28742_v26, 5  ;;  %v1916_v42 = vrot.slane %v28743_v31, 6  ;;  %v1924_v36 = vshll.u32 %v1733_v8, 16  ;;  %v18120_v4 = vrot.slane %v18104_v18, 9  ;;  %v1735_v31 = vld [vmem:[%s22455_s8 + $0x74] sm:$0x3] }
 0x14f   : > { %v1896_v21 = vrot.slane %v1894_v43, 4  ;;  %v1895_v54 = vsel %vm22489_vm4, %v1891_v15, %v1894_v43  ;;  %v1913_v22 = vor.u32 %v1912_v0, %v1909_v32  ;;  %v1923_v56 = vrot.slane %v1921_v45, 5 }
 0x150   : > { %v1917_v23 = vor.u32 %v1916_v42, %v1915_v2  ;;  %19823 = vmatmul.mubr.msk.bf16.gmra.mrb[4].mxu1 %vm763_vm3, %v24080_v35  ;;  %v1926_v11 = vrot.slane %v1924_v36, 6  ;;  %v6772_v20 = vrot.slane %v22105_v37, 5  ;;  %v6775_v61 = vrot.slane %v22106_v40, 5  ;;  %v22110_v42 = vld [vmem:[%s22455_s8 + $0x6c] sm:$0xe] }
 0x151   : > { %v1905_v59 = vsel %vm22489_vm4, %v1896_v21, %v1904_v30  ;;  %19826 = vmatprep.mubr.msk.bf16.mxu1 %vm763_vm3, %v17546_v10  ;;  %v1914_v24 = vrot.slane %v1913_v22, 4  ;;  %v18121_v48 = vrot.slane %v18105_v25, 9  ;;  %v6779_v10 = vrot.slane %v22107_v47, 5 }
 0x152   : > { %v17548_v46 = vcombine.low %v1895_v54, %v1905_v59  ;;  %v1919_v51 = vrot.slane %v1917_v23, 4  ;;  %v1927_v63 = vor.u32 %v1926_v11, %v1923_v56  ;;  %v6773_v35 = vsel %vm23312_vm12, %v18120_v4, %v6772_v20  ;;  %20141 = vmatmul.mubr.msk.bf16.gmra.mrb[16].mxu0 %vm763_vm3, %v18136_v3  ;;  %v28746_v59 = vld [vmem:[#allocation30_spill] sm:$0xff] }
 0x153   : > { %v6774_v29 = vrot.slane %v6772_v20, 4  ;;  %v1918_v7 = vsel %vm22489_vm4, %v1914_v24, %v1917_v23  ;;  %v6782_v1 = vrot.slane %v22108_v60, 5  ;;  %v1930_v52 = vshrl.u32 %v22109_v12, 16 }
 0x154   : > { %v1928_v19 = vsel %vm22489_vm4, %v1919_v51, %v1927_v63  ;;  %v1933_v33 = vshll.u32 %v22109_v12, 16  ;;  %v28744_v3 = vshrl.u32 %v22956_v41, 16  ;;  %v6780_v17 = vsel %vm23312_vm12, %v18121_v48, %v6779_v10  ;;  %v22112_v12 = vld [vmem:[%s22455_s8 + $0xb0] sm:$0x1] }
 0x155   : > { %v6776_v8 = vsel %vm23312_vm12, %v6774_v29, %v6775_v61  ;;  %v17549_v9 = vcombine.low %v1918_v7, %v1928_v19  ;;  %v6781_v27 = vrot.slane %v6779_v10, 4  ;;  %v1932_v14 = vrot.slane %v1930_v52, 5  ;;  %v22111_v7 = vld [vmem:[%s22455_s8 + $0xac] sm:$0xf]  ;;  %v24201_v10 = vld [vmem:[%s22455_s8 + $0xb4] sm:$0xe] }
 0x156   : > { %v1938_v28 = vrot.slane %v28744_v3, 5  ;;  %v18137_v43 = vcombine.low %v6773_v35, %v6776_v8  ;;  %v1935_v26 = vrot.slane %v1933_v33, 6  ;;  %v28745_v2 = vshll.u32 %v22956_v41, 16  ;;  %v18106_v41 = vld [vmem:[%s22455_s8 + $0xa8] sm:$0xe] }
 0x157   : > { %v1944_v15 = vshrl.u32 %v1734_v16, 16  ;;  %v6783_v32 = vsel %vm23312_vm12, %v6781_v27, %v6782_v1  ;;  %v1947_v0 = vshll.u32 %v1734_v16, 16  ;;  %v1953_v21 = vshrl.u32 %v22110_v42, 16  ;;  %v22113_v27 = vld [vmem:[%s22455_s8 + $0xb8] sm:$0xf] }
 0x158   : > { %v1939_v18 = vrot.slane %v28745_v2, 6  ;;  %20144 = vmatprep.mubr.msk.bf16.mxu0 %vm763_vm3, %v18137_v43  ;;  %v1956_v30 = vshll.u32 %v22110_v42, 16  ;;  %19827 = vmatmul.mubr.msk.bf16.gmra.mrb[8].mxu1 %vm763_vm3, %v24137_v6  ;;  %v18138_v45 = vcombine.low %v6780_v17, %v6783_v32  ;;  %v1936_v36 = vor.u32 %v1935_v26, %v1932_v14  ;;  %v22114_v2 = vld [vmem:[%s22455_s8 + $0xbc] sm:$0x1]  ;;  %v22115_v32 = vld [vmem:[%s22455_s8 + $0x78] sm:$0xe] }
 0x159   : > { %v1946_v22 = vrot.slane %v1944_v15, 5  ;;  %19830 = vmatprep.mubr.msk.bf16.mxu1 %vm763_vm3, %v17548_v46  ;;  %v1949_v23 = vrot.slane %v1947_v0, 6  ;;  %v1955_v4 = vrot.slane %v1953_v21, 5  ;;  %v28747_v56 = vshrl.u32 %v28746_v59, 16  ;;  %v1736_v15 = vld [vmem:[%s22455_s8 + $0x80] sm:$0x3] }
 0x15a   : > { %v1940_v54 = vor.u32 %v1939_v18, %v1938_v28  ;;  %v1958_v25 = vrot.slane %v1956_v30, 6  ;;  %v1937_v37 = vrot.slane %v1936_v36, 4  ;;  %v28748_v24 = vshll.u32 %v28746_v59, 16  ;;  %20145 = vmatmul.mubr.msk.bf16.gmra.mrb[20].mxu0 %vm763_vm3, %v18138_v45 }
 0x15b   : > { %v1961_v11 = vrot.slane %v28747_v56, 5  ;;  %v1967_v51 = vshrl.u32 %v1735_v31, 16  ;;  %v1950_v40 = vor.u32 %v1949_v23, %v1946_v22  ;;  %v1970_v46 = vshll.u32 %v1735_v31, 16  ;;  %v28749_v22 = vld [vmem:[#allocation31_spill] sm:$0xff] }
 0x15c   : > { %v1942_v20 = vrot.slane %v1940_v54, 4  ;;  %v1962_v6 = vrot.slane %v28748_v24, 6  ;;  %v1959_v61 = vor.u32 %v1958_v25, %v1955_v4  ;;  %v18122_v63 = vrot.slane %v18106_v41, 9  ;;  %v1737_v24 = vld [vmem:[%s22455_s8 + $0x8c] sm:$0x3] }
 0x15d   : > { %v1941_v35 = vsel %vm22489_vm4, %v1937_v37, %v1940_v54  ;;  %v1969_v48 = vrot.slane %v1967_v51, 5  ;;  %v6786_v47 = vrot.slane %v22111_v7, 5  ;;  %v1972_v16 = vrot.slane %v1970_v46, 6 }
 0x15e   : > { %v1963_v29 = vor.u32 %v1962_v6, %v1961_v11  ;;  %v1951_v60 = vsel %vm22489_vm4, %v1942_v20, %v1950_v40  ;;  %v1960_v1 = vrot.slane %v1959_v61, 4  ;;  %v6789_v52 = vrot.slane %v22112_v12, 5  ;;  %v22116_v6 = vld [vmem:[%s22455_s8 + $0x84] sm:$0xe] }
 0x15f   : > { %v17550_v19 = vcombine.low %v1941_v35, %v1951_v60  ;;  %v6787_v33 = vsel %vm23312_vm12, %v18122_v63, %v6786_v47  ;;  %v6788_v3 = vrot.slane %v6786_v47, 4  ;;  %v1973_v43 = vor.u32 %v1972_v16, %v1969_v48  ;;  %v24235_v48 = vld [vmem:[%s22455_s8 + $0xc0] sm:$0xe] }
 0x160   : > { %v1965_v8 = vrot.slane %v1963_v29, 4  ;;  %v1964_v28 = vsel %vm22489_vm4, %v1960_v1, %v1963_v29  ;;  %v18123_v17 = vrot.slane %v24201_v10, 9  ;;  %v6793_v14 = vrot.slane %v22113_v27, 5  ;;  %19831 = vmatmul.mubr.msk.bf16.gmra.mrb[12].mxu1 %vm763_vm3, %v17549_v9 }
 0x161   : > { %v6790_v26 = vsel %vm23312_vm12, %v6788_v3, %v6789_v52  ;;  %v6796_v18 = vrot.slane %v22114_v2, 5  ;;  %v1976_v0 = vshrl.u32 %v22115_v32, 16  ;;  %v1979_v31 = vshll.u32 %v22115_v32, 16  ;;  %19834 = vmatprep.mubr.msk.bf16.mxu1 %vm763_vm3, %v17550_v19 }
 0x162   : > { %v1974_v42 = vsel %vm22489_vm4, %v1965_v8, %v1973_v43  ;;  %v18139_v21 = vcombine.low %v6787_v33, %v6790_v26  ;;  %v6794_v9 = vsel %vm23312_vm12, %v18123_v17, %v6793_v14  ;;  %v6795_v30 = vrot.slane %v6793_v14, 4  ;;  %v18109_v17 = vld [vmem:[%s22455_s8 + $0xcc] sm:$0xe]  ;;  %v22117_v26 = vld [vmem:[%s22455_s8 + $0xc4] sm:$0xf] }
 0x163   : > { %v17551_v45 = vcombine.low %v1964_v28, %v1974_v42  ;;  %v1978_v36 = vrot.slane %v1976_v0, 5  ;;  %v1981_v54 = vrot.slane %v1979_v31, 6  ;;  %v28750_v41 = vshrl.u32 %v28749_v22, 16  ;;  %v22118_v0 = vld [vmem:[%s22455_s8 + $0xc8] sm:$0x1] }
 0x164   : > { %20148 = vmatprep.mubr.msk.bf16.mxu0 %vm763_vm3, %v18139_v21  ;;  %v6797_v4 = vsel %vm23312_vm12, %v6795_v30, %v6796_v18  ;;  %v28751_v25 = vshll.u32 %v28749_v22, 16  ;;  %v1990_v56 = vshrl.u32 %v1736_v15, 16  ;;  %v1993_v11 = vshll.u32 %v1736_v15, 16  ;;  %v22120_v22 = vld [vmem:[%s22455_s8 + $0xd4] sm:$0x1] }
 0x165   : > { %v1984_v23 = vrot.slane %v28750_v41, 5  ;;  %v18140_v37 = vcombine.low %v6794_v9, %v6797_v4  ;;  %v1982_v20 = vor.u32 %v1981_v54, %v1978_v36  ;;  %v1999_v51 = vshrl.u32 %v22116_v6, 16  ;;  %v22119_v36 = vld [vmem:[%s22455_s8 + $0xd0] sm:$0xf] }
 0x166   : > { %v1985_v59 = vrot.slane %v28751_v25, 6  ;;  %v2002_v40 = vshll.u32 %v22116_v6, 16  ;;  %v1992_v46 = vrot.slane %v1990_v56, 5  ;;  %v1995_v63 = vrot.slane %v1993_v11, 6  ;;  %v22121_v4 = vld [vmem:[%s22455_s8 + $0x90] sm:$0xe] }
 0x167   : > { %v28752_v35 = vshrl.u32 %v23033_v5, 16  ;;  %20149 = vmatmul.mubr.msk.bf16.gmra.mrb[24].mxu0 %vm763_vm3, %v18140_v37  ;;  %v1983_v7 = vrot.slane %v1982_v20, 4  ;;  %v2001_v47 = vrot.slane %v1999_v51, 5  ;;  %v28753_v1 = vshll.u32 %v23033_v5, 16 }
 0x168   : > { %v1986_v61 = vor.u32 %v1985_v59, %v1984_v23  ;;  %v2004_v60 = vrot.slane %v2002_v40, 6  ;;  %v1996_v52 = vor.u32 %v1995_v63, %v1992_v46  ;;  %v2013_v19 = vshrl.u32 %v1737_v24, 16  ;;  %19835 = vmatmul.mubr.msk.bf16.gmra.mrb[16].mxu1 %vm763_vm3, %v17551_v45  ;;  %v1738_v23 = vld [vmem:[%s22455_s8 + $0x98] sm:$0x3] }
 0x169   : > { %v2007_v29 = vrot.slane %v28752_v35, 5  ;;  %v2008_v16 = vrot.slane %v28753_v1, 6  ;;  %v2016_v8 = vshll.u32 %v1737_v24, 16  ;;  %v18124_v43 = vrot.slane %v24235_v48, 9  ;;  %v22122_v1 = vld [vmem:[%s22455_s8 + $0x9c] sm:$0xe] }
 0x16a   : > { %v1988_v12 = vrot.slane %v1986_v61, 4  ;;  %v1987_v33 = vsel %vm22489_vm4, %v1983_v7, %v1986_v61  ;;  %v2005_v3 = vor.u32 %v2004_v60, %v2001_v47  ;;  %v2015_v5 = vrot.slane %v2013_v19, 5  ;;  %v1739_v60 = vld [vmem:[%s22455_s8 + $0xa4] sm:$0x3] }
 0x16b   : > { %v2009_v28 = vor.u32 %v2008_v16, %v2007_v29  ;;  %v2018_v14 = vrot.slane %v2016_v8, 6  ;;  %v6800_v2 = vrot.slane %v22117_v26, 5  ;;  %v6803_v31 = vrot.slane %v22118_v0, 5 }
 0x16c   : > { %v1997_v27 = vsel %vm22489_vm4, %v1988_v12, %v1996_v52  ;;  %v2006_v15 = vrot.slane %v2005_v3, 4  ;;  %v18125_v30 = vrot.slane %v18109_v17, 9  ;;  %v6807_v54 = vrot.slane %v22119_v36, 5 }
 0x16d   : > { %v17552_v18 = vcombine.low %v1987_v33, %v1997_v27  ;;  %v2011_v32 = vrot.slane %v2009_v28, 4  ;;  %v2019_v42 = vor.u32 %v2018_v14, %v2015_v5  ;;  %v6801_v21 = vsel %vm23312_vm12, %v18124_v43, %v6800_v2 }
 0x16e   : > { %v6802_v9 = vrot.slane %v6800_v2, 4  ;;  %v2010_v45 = vsel %vm22489_vm4, %v2006_v15, %v2009_v28  ;;  %v6810_v41 = vrot.slane %v22120_v22, 5  ;;  %v2022_v25 = vshrl.u32 %v22121_v4, 16 }
 0x16f   : > { %19838 = vmatprep.mubr.msk.bf16.mxu1 %vm763_vm3, %v17552_v18  ;;  %v2020_v59 = vsel %vm22489_vm4, %v2011_v32, %v2019_v42  ;;  %v2025_v11 = vshll.u32 %v22121_v4, 16  ;;  %v28754_v37 = vshrl.u32 %v23070_v13, 16  ;;  %v6808_v51 = vsel %vm23312_vm12, %v18125_v30, %v6807_v54  ;;  %v22123_v30 = vld [vmem:[%s22455_s8 + $0x18] sm:$0xe]  ;;  %v28758_v4 = vld [vmem:[#allocation32_spill] sm:$0xff] }
 0x170   : > { %v6804_v56 = vsel %vm23312_vm12, %v6802_v9, %v6803_v31  ;;  %v17553_v24 = vcombine.low %v2010_v45, %v2020_v59  ;;  %v6809_v40 = vrot.slane %v6807_v54, 4  ;;  %v2024_v61 = vrot.slane %v2022_v25, 5  ;;  %v24283_v9 = vld [vmem:[%s22455_s8 + $0x20] sm:$0x3] }
 0x171   : > { %v2030_v20 = vrot.slane %v28754_v37, 5  ;;  %v18141_v6 = vcombine.low %v6801_v21, %v6804_v56  ;;  %v2027_v46 = vrot.slane %v2025_v11, 6  ;;  %v28755_v63 = vshll.u32 %v23070_v13, 16 }
 0x172   : > { %v2036_v29 = vshrl.u32 %v1738_v23, 16  ;;  %19839 = vmatmul.mubr.msk.bf16.gmra.mrb[20].mxu1 %vm763_vm3, %v17553_v24  ;;  %v6811_v7 = vsel %vm23312_vm12, %v6809_v40, %v6810_v41  ;;  %v2039_v47 = vshll.u32 %v1738_v23, 16  ;;  %v2045_v16 = vshrl.u32 %v22122_v1, 16  ;;  %v24298_v40 = vld [vmem:[%s22455_s8 + $0x2c] sm:$0x3] }
 0x173   : > { %v2031_v35 = vrot.slane %v28755_v63, 6  ;;  %20152 = vmatprep.mubr.msk.bf16.mxu0 %vm763_vm3, %v18141_v6  ;;  %v2048_v12 = vshll.u32 %v22122_v1, 16  ;;  %v18142_v52 = vcombine.low %v6808_v51, %v6811_v7  ;;  %v2028_v19 = vor.u32 %v2027_v46, %v2024_v61  ;;  %v22124_v61 = vld [vmem:[%s22455_s8 + $0x24] sm:$0xe] }
 0x174   : > { %v2038_v33 = vrot.slane %v2036_v29, 5  ;;  %v2041_v3 = vrot.slane %v2039_v47, 6  ;;  %v2047_v13 = vrot.slane %v2045_v16, 5  ;;  %v28756_v43 = vshrl.u32 %v23089_v38, 16  ;;  %v28761_v47 = vld [vmem:[#allocation33_spill] sm:$0xff] }
 0x175   : > { %v2032_v8 = vor.u32 %v2031_v35, %v2030_v20  ;;  %v2050_v28 = vrot.slane %v2048_v12, 6  ;;  %20153 = vmatmul.mubr.msk.bf16.gmra.mrb[28].mxu0 %vm763_vm3, %v18142_v52  ;;  %v2029_v27 = vrot.slane %v2028_v19, 4  ;;  %v28757_v14 = vshll.u32 %v23089_v38, 16 }
 0x176   : > { %v2053_v17 = vrot.slane %v28756_v43, 5  ;;  %v2059_v2 = vshrl.u32 %v1739_v60, 16  ;;  %v2042_v18 = vor.u32 %v2041_v3, %v2038_v33  ;;  %v2062_v32 = vshll.u32 %v1739_v60, 16 }
 0x177   : > { %v2034_v5 = vrot.slane %v2032_v8, 4  ;;  %v2054_v26 = vrot.slane %v28757_v14, 6  ;;  %v2051_v15 = vor.u32 %v2050_v28, %v2047_v13  ;;  %v7123_v0 = vshrl.u32 %v23795_v62, 16 }
 0x178   : > { %v2033_v31 = vsel %vm22489_vm4, %v2029_v27, %v2032_v8  ;;  %v2061_v21 = vrot.slane %v2059_v2, 5  ;;  %v7126_v45 = vshll.u32 %v22123_v30, 16  ;;  %v2064_v54 = vrot.slane %v2062_v32, 6 }
 0x179   : > { %v2055_v42 = vor.u32 %v2054_v26, %v2053_v17  ;;  %v2043_v38 = vsel %vm22489_vm4, %v2034_v5, %v2042_v18  ;;  %v2052_v36 = vrot.slane %v2051_v15, 4  ;;  %v7125_v22 = vrot.slane %v7123_v0, 5  ;;  %v24315_v18 = vld [vmem:[%s22455_s8 + $0xb0] sm:$0x3]  ;;  %v22125_v15 = vld [vmem:[%s22455_s8 + $0xa8] sm:$0xe] }
 0x17a   : > { %v17554_v41 = vcombine.low %v2033_v31, %v2043_v38  ;;  %v7128_v62 = vrot.slane %v7126_v45, 6  ;;  %v28759_v25 = vshrl.u32 %v28758_v4, 16  ;;  %v2065_v11 = vor.u32 %v2064_v54, %v2061_v21 }
 0x17b   : > { %v2057_v23 = vrot.slane %v2055_v42, 4  ;;  %v2056_v56 = vsel %vm22489_vm4, %v2052_v36, %v2055_v42  ;;  %v28760_v37 = vshll.u32 %v28758_v4, 16  ;;  %v7137_v24 = vshrl.u32 %v24283_v9, 16 }
 0x17c   : > { %v7131_v59 = vrot.slane %v28759_v25, 5  ;;  %19842 = vmatprep.mubr.msk.bf16.mxu1 %vm763_vm3, %v17554_v41  ;;  %v7129_v6 = vor.u32 %v7128_v62, %v7125_v22  ;;  %v7140_v51 = vshll.u32 %v24283_v9, 16  ;;  %v7146_v46 = vshrl.u32 %v22124_v61, 16 }
 0x17d   : > { %v7132_v20 = vrot.slane %v28760_v37, 6  ;;  %v7149_v63 = vshll.u32 %v22124_v61, 16  ;;  %v2066_v35 = vsel %vm22489_vm4, %v2057_v23, %v2065_v11  ;;  %v7139_v7 = vrot.slane %v7137_v24, 5 }
 0x17e   : > { %v28762_v60 = vshrl.u32 %v28761_v47, 16  ;;  %v17555_v16 = vcombine.low %v2056_v56, %v2066_v35  ;;  %v7130_v12 = vrot.slane %v7129_v6, 4  ;;  %v7142_v52 = vrot.slane %v7140_v51, 6 }
 0x17f   : > { %v7133_v29 = vor.u32 %v7132_v20, %v7131_v59  ;;  %v7148_v19 = vrot.slane %v7146_v46, 5  ;;  %v7151_v33 = vrot.slane %v7149_v63, 6  ;;  %v28763_v3 = vshll.u32 %v28761_v47, 16  ;;  %v22126_v59 = vld [vmem:[%s22455_s8 + $0xb4] sm:$0xe] }
 0x180   : > { %v7154_v1 = vrot.slane %v28762_v60, 5  ;;  %v7160_v28 = vshrl.u32 %v24298_v40, 16  ;;  %19843 = vmatmul.mubr.msk.bf16.gmra.mrb[24].mxu1 %vm763_vm3, %v17555_v16  ;;  %v7143_v17 = vor.u32 %v7142_v52, %v7139_v7  ;;  %v7163_v27 = vshll.u32 %v24298_v40, 16  ;;  %v24342_v16 = vld [vmem:[%s28426_s1 + $0x1e] sm:$0x3] }
 0x181   : > { %v7135_v8 = vrot.slane %v7133_v29, 4  ;;  %v7155_v13 = vrot.slane %v28763_v3, 6  ;;  %v7134_v43 = vsel %vm22489_vm4, %v7130_v12, %v7133_v29  ;;  %v8043_v5 = vsel %vm812_vm0, %v24023_v55, 0  ;;  %v22127_v3 = vld [vmem:[%s22455_s8 + $0x30] sm:$0xe] }
 0x182   : > { %v7152_v14 = vor.u32 %v7151_v33, %v7148_v19  ;;  %v7162_v2 = vrot.slane %v7160_v28, 5  ;;  %v2068_v32 = vshrl.u32 %v22125_v15, 16  ;;  %v7165_v31 = vrot.slane %v7163_v27, 6 }
 0x183   : > { %v7156_v26 = vor.u32 %v7155_v13, %v7154_v1  ;;  %v7144_v0 = vsel %vm22489_vm4, %v7135_v8, %v7143_v17  ;;  %v2071_v42 = vshll.u32 %v22125_v15, 16  ;;  %v28764_v21 = vshrl.u32 %v23111_v50, 16 }
 0x184   : > { %v18176_v45 = vcombine.low %v7134_v43, %v7144_v0  ;;  %v7153_v38 = vrot.slane %v7152_v14, 4  ;;  %v2070_v55 = vrot.slane %v2068_v32, 5  ;;  %v7166_v54 = vor.u32 %v7165_v31, %v7162_v2 }
 0x185   : > { %v2076_v30 = vrot.slane %v28764_v21, 5  ;;  %v7158_v36 = vrot.slane %v7156_v26, 4  ;;  %v2073_v22 = vrot.slane %v2071_v42, 6  ;;  %v28765_v41 = vshll.u32 %v23111_v50, 16  ;;  %v24333_v50 = vld [vmem:[%s22455_s8 + $0xbc] sm:$0x3] }
 0x186   : > { %v2082_v62 = vshrl.u32 %v24315_v18, 16  ;;  %20158 = vmatprep.mubr.msk.bf16.mxu0 %vm763_vm3, %v18176_v45  ;;  %v7157_v4 = vsel %vm22489_vm4, %v7153_v38, %v7156_v26  ;;  %v2085_v25 = vshll.u32 %v24315_v18, 16  ;;  %v2091_v56 = vshrl.u32 %v22126_v59, 16  ;;  %v24353_v26 = vld [vmem:[%s22455_s8 + $0x38] sm:$0x3] }
 0x187   : > { %v2077_v23 = vrot.slane %v28765_v41, 6  ;;  %v2094_v11 = vshll.u32 %v22126_v59, 16  ;;  %v7167_v37 = vsel %vm22489_vm4, %v7158_v36, %v7166_v54  ;;  %v2074_v20 = vor.u32 %v2073_v22, %v2070_v55  ;;  %v28768_v42 = vld [vmem:[#allocation34_spill] sm:$0xff]  ;;  %v22128_v22 = vld [vmem:[%s22455_s8 + $0x3c] sm:$0xe] }
 0x188   : > { %v2084_v6 = vrot.slane %v2082_v62, 5  ;;  %v18177_v51 = vcombine.low %v7157_v4, %v7167_v37  ;;  %v2087_v61 = vrot.slane %v2085_v25, 6  ;;  %v2093_v46 = vrot.slane %v2091_v56, 5  ;;  %v24370_v4 = vld [vmem:[%s22455_s8 + $0x44] sm:$0x3]  ;;  %v28771_v59 = vld [vmem:[#allocation35_spill] sm:$0xff] }
 0x189   : > { %v2078_v24 = vor.u32 %v2077_v23, %v2076_v30  ;;  %v2096_v63 = vrot.slane %v2094_v11, 6  ;;  %v2075_v35 = vrot.slane %v2074_v20, 4  ;;  %v28766_v7 = vshrl.u32 %v23136_v49, 16 }
 0x18a   : > { %v28767_v60 = vshll.u32 %v23136_v49, 16  ;;  %20159 = vmatmul.mubr.msk.bf16.vlgmr.msra.gmra.mrb[0].mxu0 %vm763_vm3, %v18177_v51  ;;  %v2088_v12 = vor.u32 %v2087_v61, %v2084_v6  ;;  %v2105_v19 = vshrl.u32 %v24333_v50, 16  ;;  %v2108_v8 = vshll.u32 %v24333_v50, 16  ;;  %v2407_v51 = vld [vmem:[%s22455_s8] sm:$0xc] }
 0x18b   : > { %v2080_v29 = vrot.slane %v2078_v24, 4  ;;  %v2099_v47 = vrot.slane %v28766_v7, 5  ;;  %v2097_v52 = vor.u32 %v2096_v63, %v2093_v46  ;;  %20191 = vmatpush3.bf16.msra.mxu0 %v8043_v5  ;;  %v2079_v33 = vsel %vm22489_vm4, %v2075_v35, %v2078_v24 }
 0x18c   : > { %v2100_v1 = vrot.slane %v28767_v60, 6  ;;  %v7169_v13 = vshrl.u32 %v22127_v3, 16  ;;  %v7172_v28 = vshll.u32 %v22127_v3, 16  ;;  %v2107_v27 = vrot.slane %v2105_v19, 5  ;;  %21888 = vmatprep.subr.msk.bf16.mxu0 %vm812_vm0, %v24342_v16  ;;  %v2408_v3 = vld [vmem:[%s22455_s8 + $0xc] sm:$0xc] }
 0x18d   : > { %v2089_v43 = vsel %vm22489_vm4, %v2080_v29, %v2088_v12  ;;  %v2098_v17 = vrot.slane %v2097_v52, 4  ;;  %v2110_v14 = vrot.slane %v2108_v8, 6  ;;  %v28769_v21 = vshrl.u32 %v28768_v42, 16  ;;  %v24385_v12 = vld [vmem:[%s28426_s1 + $0xa] sm:$0x3] }
 0x18e   : > { %v2101_v49 = vor.u32 %v2100_v1, %v2099_v47  ;;  %v17556_v5 = vcombine.low %v2079_v33, %v2089_v43  ;;  %v7171_v15 = vrot.slane %v7169_v13, 5  ;;  %v7174_v32 = vrot.slane %v7172_v28, 6  ;;  %v22129_v8 = vld [vmem:[%s28426_s1 + $0x8] sm:$0x3] }
 0x18f   : > { %v2111_v31 = vor.u32 %v2110_v14, %v2107_v27  ;;  %v7177_v30 = vrot.slane %v28769_v21, 5  ;;  %v28770_v45 = vshll.u32 %v28768_v42, 16  ;;  %v7183_v55 = vshrl.u32 %v24353_v26, 16 }
 0x190   : > { %v2103_v2 = vrot.slane %v2101_v49, 4  ;;  %v2102_v0 = vsel %vm22489_vm4, %v2098_v17, %v2101_v49  ;;  %19846 = vmatprep.mubr.msk.bf16.mxu1 %vm763_vm3, %v17556_v5  ;;  %v7175_v36 = vor.u32 %v7174_v32, %v7171_v15  ;;  %v7186_v54 = vshll.u32 %v24353_v26, 16  ;;  %v22130_v17 = vld [vmem:[%s22455_s8 + $0x4] sm:$0xf]  ;;  %v22131_v15 = vld [vmem:[%s22455_s8 + $0x8] sm:$0x3] }
 0x191   : > { %v7178_v38 = vrot.slane %v28770_v45, 6  ;;  %v7192_v41 = vshrl.u32 %v22128_v22, 16  ;;  %v7195_v25 = vshll.u32 %v22128_v22, 16  ;;  %v28772_v56 = vshrl.u32 %v28771_v59, 16  ;;  %v24406_v22 = vld [vmem:[%s22455_s8 + $0x50] sm:$0x3] }
 0x192   : > { %v2112_v23 = vsel %vm22489_vm4, %v2103_v2, %v2111_v31  ;;  %v7176_v20 = vrot.slane %v7175_v36, 4  ;;  %v7185_v24 = vrot.slane %v7183_v55, 5  ;;  %v7188_v6 = vrot.slane %v7186_v54, 6  ;;  %v22133_v55 = vld [vmem:[%s22455_s8 + $0x14] sm:$0x3] }
 0x193   : > { %v7179_v62 = vor.u32 %v7178_v38, %v7177_v30  ;;  %v7200_v11 = vrot.slane %v28772_v56, 5  ;;  %v17557_v37 = vcombine.low %v2102_v0, %v2112_v23  ;;  %v7194_v46 = vrot.slane %v7192_v41, 5  ;;  %v22132_v38 = vld [vmem:[%s22455_s8 + $0x10] sm:$0xf]  ;;  %v22134_v41 = vld [vmem:[%s22455_s8 + $0x48] sm:$0xe] }
 0x194   : > { %v7197_v63 = vrot.slane %v7195_v25, 6  ;;  %v28773_v35 = vshll.u32 %v28771_v59, 16  ;;  %v7189_v47 = vor.u32 %v7188_v6, %v7185_v24  ;;  %v7206_v60 = vshrl.u32 %v24370_v4, 16  ;;  %v28775_v56 = vld [vmem:[#allocation36_spill] sm:$0xff] }
 0x195   : > { %v7181_v61 = vrot.slane %v7179_v62, 4  ;;  %19847 = vmatmul.mubr.msk.bf16.gmra.mrb[28].mxu1 %vm763_vm3, %v17557_v37  ;;  %v7180_v7 = vsel %vm22489_vm4, %v7176_v20, %v7179_v62  ;;  %v7209_v1 = vshll.u32 %v24370_v4, 16  ;;  %v2669_v33 = vsel %vm812_vm0, %v22129_v8, 0 }
 0x196   : > { %v7201_v29 = vrot.slane %v28773_v35, 6  ;;  %v7198_v52 = vor.u32 %v7197_v63, %v7194_v46  ;;  %v17574_v49 = vrot.slane %v2407_v51, 10  ;;  %v7208_v28 = vrot.slane %v7206_v60, 5  ;;  %19851 = vmatpush3.bf16.msra.mxu1 %v2669_v33  ;;  %v24426_v60 = vld [vmem:[%s22455_s8 + $0x5c] sm:$0x3] }
 0x197   : > { %v7190_v13 = vsel %vm22489_vm4, %v7181_v61, %v7189_v47  ;;  %v7211_v43 = vrot.slane %v7209_v1, 6  ;;  %v2460_v27 = vrot.slane %v22130_v17, 6  ;;  %v2463_v32 = vrot.slane %v22131_v15, 6  ;;  %21877 = vmatprep.subr.msk.bf16.mxu1 %vm812_vm0, %v24385_v12  ;;  %v22135_v1 = vld [vmem:[%s22455_s8 + $0x54] sm:$0xe] }
 0x198   : > { %v7202_v19 = vor.u32 %v7201_v29, %v7200_v11  ;;  %v18178_v14 = vcombine.low %v7180_v7, %v7190_v13  ;;  %v7199_v5 = vrot.slane %v7198_v52, 4  ;;  %v17575_v30 = vrot.slane %v2408_v3, 10  ;;  %v2409_v13 = vld [vmem:[%s22455_s8 + $0x18] sm:$0xc] }
 0x199   : > { %v7212_v0 = vor.u32 %v7211_v43, %v7208_v28  ;;  %v2461_v42 = vsel %vm22671_vm6, %v17574_v49, %v2460_v27  ;;  %v2462_v21 = vrot.slane %v2460_v27, 4  ;;  %v2467_v36 = vrot.slane %v22132_v38, 6  ;;  %v28778_v27 = vld [vmem:[#allocation37_spill] sm:$0xff] }
 0x19a   : > { %v7204_v2 = vrot.slane %v7202_v19, 4  ;;  %20162 = vmatprep.mubr.msk.bf16.mxu0 %vm763_vm3, %v18178_v14  ;;  %v7203_v45 = vsel %vm22489_vm4, %v7199_v5, %v7202_v19  ;;  %v2470_v54 = vrot.slane %v22133_v55, 6  ;;  %v7215_v23 = vshrl.u32 %v22134_v41, 16 }
 0x19b   : > { %v2464_v25 = vsel %vm22671_vm6, %v2462_v21, %v2463_v32  ;;  %v7218_v59 = vshll.u32 %v22134_v41, 16  ;;  %v28776_v11 = vshrl.u32 %v28775_v56, 16  ;;  %v2468_v6 = vsel %vm22671_vm6, %v17575_v30, %v2467_v36  ;;  %v22136_v41 = vld [vmem:[%s22455_s8 + $0x1c] sm:$0xf] }
 0x19c   : > { %v7213_v62 = vsel %vm22489_vm4, %v7204_v2, %v7212_v0  ;;  %v17591_v24 = vcombine.low %v2461_v42, %v2464_v25  ;;  %v2469_v51 = vrot.slane %v2467_v36, 4  ;;  %v7217_v61 = vrot.slane %v7215_v23, 5 }
 0x19d   : > { %v7223_v37 = vrot.slane %v28776_v11, 5  ;;  %v18179_v20 = vcombine.low %v7203_v45, %v7213_v62  ;;  %v7220_v46 = vrot.slane %v7218_v59, 6  ;;  %v28777_v63 = vshll.u32 %v28775_v56, 16  ;;  %v2410_v62 = vld [vmem:[%s22455_s8 + $0x24] sm:$0xc] }
 0x19e   : > { %v7229_v29 = vshrl.u32 %v24406_v22, 16  ;;  %19852 = vmatprep.mubr.msk.bf16.mxu1 %vm763_vm3, %v17591_v24  ;;  %v2471_v7 = vsel %vm22671_vm6, %v2469_v51, %v2470_v54  ;;  %v7232_v47 = vshll.u32 %v24406_v22, 16  ;;  %v7238_v52 = vshrl.u32 %v22135_v1, 16  ;;  %v22137_v11 = vld [vmem:[%s22455_s8 + $0x20] sm:$0x3] }
 0x19f   : > { %v7224_v35 = vrot.slane %v28777_v63, 6  ;;  %20163 = vmatmul.mubr.msk.bf16.gmra.mrb[4].mxu0 %vm763_vm3, %v18179_v20  ;;  %v7241_v19 = vshll.u32 %v22135_v1, 16  ;;  %v17592_v8 = vcombine.low %v2468_v6, %v2471_v7  ;;  %v7221_v33 = vor.u32 %v7220_v46, %v7217_v61 }
 0x1a0   : > { %v7231_v3 = vrot.slane %v7229_v29, 5  ;;  %v7234_v28 = vrot.slane %v7232_v47, 6  ;;  %v7240_v43 = vrot.slane %v7238_v52, 5  ;;  %v28779_v14 = vshrl.u32 %v28778_v27, 16  ;;  %v22139_v47 = vld [vmem:[%s22455_s8 + $0x2c] sm:$0x3] }
 0x1a1   : > { %v7225_v49 = vor.u32 %v7224_v35, %v7223_v37  ;;  %v7243_v17 = vrot.slane %v7241_v19, 6  ;;  %19853 = vmatmul.mubr.msk.bf16.vlgmr.msra.gmra.mrb[0].mxu1 %vm763_vm3, %v17592_v8  ;;  %v7222_v2 = vrot.slane %v7221_v33, 4  ;;  %v28780_v32 = vshll.u32 %v28778_v27, 16  ;;  %v22138_v35 = vld [vmem:[%s22455_s8 + $0x28] sm:$0xf] }
 0x1a2   : > { %v7246_v5 = vrot.slane %v28779_v14, 5  ;;  %v7252_v42 = vshrl.u32 %v24426_v60, 16  ;;  %v7235_v21 = vor.u32 %v7234_v28, %v7231_v3  ;;  %v7255_v45 = vshll.u32 %v24426_v60, 16  ;;  %v24454_v52 = vld [vmem:[%s22455_s8 + $0x68] sm:$0x3]  ;;  %v28781_v14 = vld [vmem:[#allocation38_spill] sm:$0xff] }
 0x1a3   : > { %v7227_v15 = vrot.slane %v7225_v49, 4  ;;  %v7247_v0 = vrot.slane %v28780_v32, 6  ;;  %v7244_v30 = vor.u32 %v7243_v17, %v7240_v43  ;;  %v17576_v38 = vrot.slane %v2409_v13, 10  ;;  %v22140_v19 = vld [vmem:[%s22455_s8 + $0x60] sm:$0xe] }
 0x1a4   : > { %v7226_v36 = vsel %vm22489_vm4, %v7222_v2, %v7225_v49  ;;  %v7254_v54 = vrot.slane %v7252_v42, 5  ;;  %v2474_v23 = vrot.slane %v22136_v41, 6  ;;  %v7257_v56 = vrot.slane %v7255_v45, 6 }
 0x1a5   : > { %v7248_v55 = vor.u32 %v7247_v0, %v7246_v5  ;;  %v7236_v25 = vsel %vm22489_vm4, %v7227_v15, %v7235_v21  ;;  %v7245_v59 = vrot.slane %v7244_v30, 4  ;;  %v2477_v37 = vrot.slane %v22137_v11, 6  ;;  %v2411_v11 = vld [vmem:[%s22455_s8 + $0x30] sm:$0xc] }
 0x1a6   : > { %v18180_v20 = vcombine.low %v7226_v36, %v7236_v25  ;;  %v2475_v6 = vsel %vm22671_vm6, %v17576_v38, %v2474_v23  ;;  %v2476_v51 = vrot.slane %v2474_v23, 4  ;;  %v7258_v46 = vor.u32 %v7257_v56, %v7254_v54  ;;  %v24472_v38 = vld [vmem:[%s22455_s8 + $0x74] sm:$0x3]  ;;  %v22141_v36 = vld [vmem:[%s22455_s8 + $0x6c] sm:$0xe]  ;;  %v28784_v25 = vld [vmem:[#allocation39_spill] sm:$0xff] }
 0x1a7   : > { %v7250_v24 = vrot.slane %v7248_v55, 4  ;;  %v7249_v61 = vsel %vm22489_vm4, %v7245_v59, %v7248_v55  ;;  %v17577_v63 = vrot.slane %v2410_v62, 10  ;;  %v2481_v29 = vrot.slane %v22138_v35, 6 }
 0x1a8   : > { %20166 = vmatprep.mubr.msk.bf16.mxu0 %vm763_vm3, %v18180_v20  ;;  %v2478_v7 = vsel %vm22671_vm6, %v2476_v51, %v2477_v37  ;;  %v2484_v1 = vrot.slane %v22139_v47, 6  ;;  %v7261_v8 = vshrl.u32 %v22140_v19, 16  ;;  %v7264_v33 = vshll.u32 %v22140_v19, 16  ;;  %v2412_v19 = vld [vmem:[%s22455_s8 + $0x3c] sm:$0xc] }
 0x1a9   : > { %v7259_v49 = vsel %vm22489_vm4, %v7250_v24, %v7258_v46  ;;  %v17593_v3 = vcombine.low %v2475_v6, %v2478_v7  ;;  %v2482_v13 = vsel %vm22671_vm6, %v17577_v63, %v2481_v29  ;;  %v2483_v28 = vrot.slane %v2481_v29, 4 }
 0x1aa   : > { %v18181_v43 = vcombine.low %v7249_v61, %v7259_v49  ;;  %v7263_v17 = vrot.slane %v7261_v8, 5  ;;  %v7266_v27 = vrot.slane %v7264_v33, 6  ;;  %v28782_v5 = vshrl.u32 %v28781_v14, 16 }
 0x1ab   : > { %19856 = vmatprep.mubr.msk.bf16.mxu1 %vm763_vm3, %v17593_v3  ;;  %v2485_v15 = vsel %vm22671_vm6, %v2483_v28, %v2484_v1  ;;  %v28783_v32 = vshll.u32 %v28781_v14, 16  ;;  %v7275_v42 = vshrl.u32 %v24454_v52, 16  ;;  %v7278_v21 = vshll.u32 %v24454_v52, 16  ;;  %v22142_v3 = vld [vmem:[%s22455_s8 + $0x34] sm:$0xf] }
 0x1ac   : > { %v7269_v2 = vrot.slane %v28782_v5, 5  ;;  %20167 = vmatmul.mubr.msk.bf16.gmra.mrb[8].mxu0 %vm763_vm3, %v18181_v43  ;;  %v17594_v30 = vcombine.low %v2482_v13, %v2485_v15  ;;  %v7267_v45 = vor.u32 %v7266_v27, %v7263_v17  ;;  %v7284_v55 = vshrl.u32 %v22141_v36, 16  ;;  %v22143_v27 = vld [vmem:[%s22455_s8 + $0x38] sm:$0x3] }
 0x1ad   : > { %v7270_v0 = vrot.slane %v28783_v32, 6  ;;  %v7287_v54 = vshll.u32 %v22141_v36, 16  ;;  %v7277_v23 = vrot.slane %v7275_v42, 5  ;;  %v7280_v62 = vrot.slane %v7278_v21, 6  ;;  %v22144_v42 = vld [vmem:[%s22455_s8 + $0x40] sm:$0xf] }
 0x1ae   : > { %v28785_v59 = vshrl.u32 %v28784_v25, 16  ;;  %19857 = vmatmul.mubr.msk.bf16.gmra.mrb[4].mxu1 %vm763_vm3, %v17594_v30  ;;  %v7268_v37 = vrot.slane %v7267_v45, 4  ;;  %v7286_v20 = vrot.slane %v7284_v55, 5  ;;  %v28786_v6 = vshll.u32 %v28784_v25, 16  ;;  %v22145_v30 = vld [vmem:[%s22455_s8 + $0x44] sm:$0x3] }
 0x1af   : > { %v7271_v41 = vor.u32 %v7270_v0, %v7269_v2  ;;  %v7289_v24 = vrot.slane %v7287_v54, 6  ;;  %v7281_v46 = vor.u32 %v7280_v62, %v7277_v23  ;;  %v7298_v63 = vshrl.u32 %v24472_v38, 16  ;;  %v24498_v36 = vld [vmem:[%s22455_s8 + $0x80] sm:$0x3]  ;;  %v22146_v55 = vld [vmem:[%s22455_s8 + $0x78] sm:$0xe] }
 0x1b0   : > { %v7292_v56 = vrot.slane %v28785_v59, 5  ;;  %v7293_v51 = vrot.slane %v28786_v6, 6  ;;  %v7301_v35 = vshll.u32 %v24472_v38, 16  ;;  %v17578_v1 = vrot.slane %v2411_v11, 10  ;;  %v28787_v25 = vld [vmem:[#allocation40_spill] sm:$0xff] }
 0x1b1   : > { %v7273_v61 = vrot.slane %v7271_v41, 4  ;;  %v7272_v29 = vsel %vm22489_vm4, %v7268_v37, %v7271_v41  ;;  %v7290_v7 = vor.u32 %v7289_v24, %v7286_v20  ;;  %v7300_v33 = vrot.slane %v7298_v63, 5 }
 0x1b2   : > { %v7294_v47 = vor.u32 %v7293_v51, %v7292_v56  ;;  %v7303_v49 = vrot.slane %v7301_v35, 6  ;;  %v2488_v13 = vrot.slane %v22142_v3, 6  ;;  %v2491_v14 = vrot.slane %v22143_v27, 6  ;;  %v28790_v27 = vld [vmem:[#allocation41_spill] sm:$0xff] }
 0x1b3   : > { %v7282_v8 = vsel %vm22489_vm4, %v7273_v61, %v7281_v46  ;;  %v7291_v43 = vrot.slane %v7290_v7, 4  ;;  %v17579_v32 = vrot.slane %v2412_v19, 10  ;;  %v2495_v21 = vrot.slane %v22144_v42, 6  ;;  %v24518_v7 = vld [vmem:[%s22455_s8 + $0x8c] sm:$0x3] }
 0x1b4   : > { %v18182_v28 = vcombine.low %v7272_v29, %v7282_v8  ;;  %v7296_v17 = vrot.slane %v7294_v47, 4  ;;  %v7304_v5 = vor.u32 %v7303_v49, %v7300_v33  ;;  %v2489_v2 = vsel %vm22671_vm6, %v17578_v1, %v2488_v13 }
 0x1b5   : > { %v2490_v15 = vrot.slane %v2488_v13, 4  ;;  %v7295_v0 = vsel %vm22489_vm4, %v7291_v43, %v7294_v47  ;;  %v2498_v45 = vrot.slane %v22145_v30, 6  ;;  %v7307_v54 = vshrl.u32 %v22146_v55, 16  ;;  %v22147_v47 = vld [vmem:[%s22455_s8 + $0x84] sm:$0xe] }
 0x1b6   : > { %20170 = vmatprep.mubr.msk.bf16.mxu0 %vm763_vm3, %v18182_v28  ;;  %v7305_v41 = vsel %vm22489_vm4, %v7296_v17, %v7304_v5  ;;  %v7310_v62 = vshll.u32 %v22146_v55, 16  ;;  %v28788_v59 = vshrl.u32 %v28787_v25, 16  ;;  %v2496_v20 = vsel %vm22671_vm6, %v17579_v32, %v2495_v21  ;;  %v2413_v13 = vld [vmem:[%s22455_s8 + $0x48] sm:$0xc] }
 0x1b7   : > { %v2492_v23 = vsel %vm22671_vm6, %v2490_v15, %v2491_v14  ;;  %v18183_v11 = vcombine.low %v7295_v0, %v7305_v41  ;;  %v2497_v24 = vrot.slane %v2495_v21, 4  ;;  %v7309_v6 = vrot.slane %v7307_v54, 5 }
 0x1b8   : > { %v7315_v56 = vrot.slane %v28788_v59, 5  ;;  %v17595_v37 = vcombine.low %v2489_v2, %v2492_v23  ;;  %v7312_v51 = vrot.slane %v7310_v62, 6  ;;  %v28789_v61 = vshll.u32 %v28787_v25, 16  ;;  %v22148_v62 = vld [vmem:[%s22455_s8 + $0x4c] sm:$0xf] }
 0x1b9   : > { %v7321_v63 = vshrl.u32 %v24498_v36, 16  ;;  %20171 = vmatmul.mubr.msk.bf16.gmra.mrb[12].mxu0 %vm763_vm3, %v18183_v11  ;;  %v2499_v35 = vsel %vm22671_vm6, %v2497_v24, %v2498_v45  ;;  %v7324_v29 = vshll.u32 %v24498_v36, 16  ;;  %v7330_v1 = vshrl.u32 %v22147_v47, 16  ;;  %v2414_v59 = vld [vmem:[%s22455_s8 + $0x54] sm:$0xc] }
 0x1ba   : > { %v7316_v46 = vrot.slane %v28789_v61, 6  ;;  %19860 = vmatprep.mubr.msk.bf16.mxu1 %vm763_vm3, %v17595_v37  ;;  %v7333_v19 = vshll.u32 %v22147_v47, 16  ;;  %v17596_v8 = vcombine.low %v2496_v20, %v2499_v35  ;;  %v7313_v33 = vor.u32 %v7312_v51, %v7309_v6  ;;  %v22149_v20 = vld [vmem:[%s22455_s8 + $0x50] sm:$0x3]  ;;  %v22150_v47 = vld [vmem:[%s22455_s8 + $0x58] sm:$0xf] }
 0x1bb   : > { %v7323_v3 = vrot.slane %v7321_v63, 5  ;;  %v7326_v28 = vrot.slane %v7324_v29, 6  ;;  %v7332_v43 = vrot.slane %v7330_v1, 5  ;;  %v28791_v14 = vshrl.u32 %v28790_v27, 16 }
 0x1bc   : > { %v7317_v49 = vor.u32 %v7316_v46, %v7315_v56  ;;  %v7335_v17 = vrot.slane %v7333_v19, 6  ;;  %19861 = vmatmul.mubr.msk.bf16.gmra.mrb[8].mxu1 %vm763_vm3, %v17596_v8  ;;  %v7314_v2 = vrot.slane %v7313_v33, 4  ;;  %v28792_v32 = vshll.u32 %v28790_v27, 16  ;;  %v22151_v8 = vld [vmem:[%s22455_s8 + $0x5c] sm:$0x3] }
 0x1bd   : > { %v7338_v5 = vrot.slane %v28791_v14, 5  ;;  %v7344_v42 = vshrl.u32 %v24518_v7, 16  ;;  %v7327_v21 = vor.u32 %v7326_v28, %v7323_v3  ;;  %v7347_v45 = vshll.u32 %v24518_v7, 16  ;;  %v22152_v3 = vld [vmem:[%s22455_s8 + $0x90] sm:$0xe] }
 0x1be   : > { %v7319_v15 = vrot.slane %v7317_v49, 4  ;;  %v7339_v0 = vrot.slane %v28792_v32, 6  ;;  %v7336_v30 = vor.u32 %v7335_v17, %v7332_v43  ;;  %v17580_v55 = vrot.slane %v2413_v13, 10  ;;  %v28793_v32 = vld [vmem:[#allocation42_spill] sm:$0xff] }
 0x1bf   : > { %v7318_v54 = vsel %vm22489_vm4, %v7314_v2, %v7317_v49  ;;  %v7346_v23 = vrot.slane %v7344_v42, 5  ;;  %v2502_v25 = vrot.slane %v22148_v62, 6  ;;  %v7349_v37 = vrot.slane %v7347_v45, 6  ;;  %v24546_v49 = vld [vmem:[%s22455_s8 + $0x98] sm:$0x3] }
 0x1c0   : > { %v7340_v41 = vor.u32 %v7339_v0, %v7338_v5  ;;  %v7328_v56 = vsel %vm22489_vm4, %v7319_v15, %v7327_v21  ;;  %v7337_v11 = vrot.slane %v7336_v30, 4  ;;  %v2505_v24 = vrot.slane %v22149_v20, 6  ;;  %v24564_v62 = vld [vmem:[%s22455_s8 + $0xa4] sm:$0x3] }
 0x1c1   : > { %v18184_v6 = vcombine.low %v7318_v54, %v7328_v56  ;;  %v2503_v61 = vsel %vm22671_vm6, %v17580_v55, %v2502_v25  ;;  %v2504_v46 = vrot.slane %v2502_v25, 4  ;;  %v7350_v35 = vor.u32 %v7349_v37, %v7346_v23  ;;  %v22153_v25 = vld [vmem:[%s22455_s8 + $0x9c] sm:$0xe] }
 0x1c2   : > { %v7342_v51 = vrot.slane %v7340_v41, 4  ;;  %v7341_v63 = vsel %vm22489_vm4, %v7337_v11, %v7340_v41  ;;  %v17581_v29 = vrot.slane %v2414_v59, 10  ;;  %v2509_v1 = vrot.slane %v22150_v47, 6 }
 0x1c3   : > { %20174 = vmatprep.mubr.msk.bf16.mxu0 %vm763_vm3, %v18184_v6  ;;  %v2506_v19 = vsel %vm22671_vm6, %v2504_v46, %v2505_v24  ;;  %v2512_v33 = vrot.slane %v22151_v8, 6  ;;  %v7353_v13 = vshrl.u32 %v22152_v3, 16  ;;  %v7356_v28 = vshll.u32 %v22152_v3, 16  ;;  %v28796_v24 = vld [vmem:[#allocation43_spill] sm:$0xff] }
 0x1c4   : > { %v7351_v43 = vsel %vm22489_vm4, %v7342_v51, %v7350_v35  ;;  %v17597_v17 = vcombine.low %v2503_v61, %v2506_v19  ;;  %v2510_v27 = vsel %vm22671_vm6, %v17581_v29, %v2509_v1  ;;  %v2511_v14 = vrot.slane %v2509_v1, 4  ;;  %v2415_v61 = vld [vmem:[%s22455_s8 + $0x60] sm:$0xc] }
 0x1c5   : > { %v18185_v5 = vcombine.low %v7341_v63, %v7351_v43  ;;  %v7355_v2 = vrot.slane %v7353_v13, 5  ;;  %v7358_v15 = vrot.slane %v7356_v28, 6  ;;  %v28794_v0 = vshrl.u32 %v28793_v32, 16 }
 0x1c6   : > { %19864 = vmatprep.mubr.msk.bf16.mxu1 %vm763_vm3, %v17597_v17  ;;  %v2513_v21 = vsel %vm22671_vm6, %v2511_v14, %v2512_v33  ;;  %v28795_v30 = vshll.u32 %v28793_v32, 16  ;;  %v7367_v55 = vshrl.u32 %v24546_v49, 16  ;;  %v7370_v54 = vshll.u32 %v24546_v49, 16  ;;  %v2416_v17 = vld [vmem:[%s22455_s8 + $0x6c] sm:$0xc] }
 0x1c7   : > { %v7361_v42 = vrot.slane %v28794_v0, 5  ;;  %20175 = vmatmul.mubr.msk.bf16.gmra.mrb[16].mxu0 %vm763_vm3, %v18185_v5  ;;  %v17598_v41 = vcombine.low %v2510_v27, %v2513_v21  ;;  %v7359_v23 = vor.u32 %v7358_v15, %v7355_v2  ;;  %v7376_v59 = vshrl.u32 %v22153_v25, 16  ;;  %v22154_v2 = vld [vmem:[%s22455_s8 + $0x64] sm:$0xf]  ;;  %v22155_v21 = vld [vmem:[%s22455_s8 + $0x68] sm:$0x3] }
 0x1c8   : > { %v7362_v45 = vrot.slane %v28795_v30, 6  ;;  %v7379_v56 = vshll.u32 %v22153_v25, 16  ;;  %v7369_v37 = vrot.slane %v7367_v55, 5  ;;  %v7372_v20 = vrot.slane %v7370_v54, 6  ;;  %v22156_v25 = vld [vmem:[%s22455_s8 + $0x70] sm:$0xf] }
 0x1c9   : > { %v28797_v6 = vshrl.u32 %v28796_v24, 16  ;;  %19865 = vmatmul.mubr.msk.bf16.gmra.mrb[12].mxu1 %vm763_vm3, %v17598_v41  ;;  %v7360_v46 = vrot.slane %v7359_v23, 4  ;;  %v7378_v63 = vrot.slane %v7376_v59, 5  ;;  %v28798_v29 = vshll.u32 %v28796_v24, 16 }
 0x1ca   : > { %v7363_v11 = vor.u32 %v7362_v45, %v7361_v42  ;;  %v7381_v35 = vrot.slane %v7379_v56, 6  ;;  %v7373_v19 = vor.u32 %v7372_v20, %v7369_v37  ;;  %v7390_v8 = vshrl.u32 %v24564_v62, 16  ;;  %v22157_v56 = vld [vmem:[%s22455_s8 + $0x74] sm:$0x3]  ;;  %v24590_v37 = vld [vmem:[%s22455_s8 + $0xb0] sm:$0x3] }
 0x1cb   : > { %v7384_v51 = vrot.slane %v28797_v6, 5  ;;  %v7385_v47 = vrot.slane %v28798_v29, 6  ;;  %v7393_v33 = vshll.u32 %v24564_v62, 16  ;;  %v17582_v43 = vrot.slane %v2415_v61, 10  ;;  %v22158_v20 = vld [vmem:[%s22455_s8 + $0xa8] sm:$0xe] }
 0x1cc   : > { %v7365_v1 = vrot.slane %v7363_v11, 4  ;;  %v7364_v3 = vsel %vm22489_vm4, %v7360_v46, %v7363_v11  ;;  %v7382_v13 = vor.u32 %v7381_v35, %v7378_v63  ;;  %v7392_v14 = vrot.slane %v7390_v8, 5 }
 0x1cd   : > { %v7386_v28 = vor.u32 %v7385_v47, %v7384_v51  ;;  %v7395_v5 = vrot.slane %v7393_v33, 6  ;;  %v2516_v15 = vrot.slane %v22154_v2, 6  ;;  %v2519_v30 = vrot.slane %v22155_v21, 6 }
 0x1ce   : > { %v7374_v27 = vsel %vm22489_vm4, %v7365_v1, %v7373_v19  ;;  %v7383_v0 = vrot.slane %v7382_v13, 4  ;;  %v17583_v41 = vrot.slane %v2416_v17, 10  ;;  %v2523_v59 = vrot.slane %v22156_v25, 6  ;;  %v24610_v17 = vld [vmem:[%s22455_s8 + $0xbc] sm:$0x3] }
 0x1cf   : > { %v18186_v32 = vcombine.low %v7364_v3, %v7374_v27  ;;  %v7388_v42 = vrot.slane %v7386_v28, 4  ;;  %v7396_v45 = vor.u32 %v7395_v5, %v7392_v14  ;;  %v2517_v55 = vsel %vm22671_vm6, %v17582_v43, %v2516_v15  ;;  %v22159_v14 = vld [vmem:[%s22455_s8 + $0xb4] sm:$0xe] }
 0x1d0   : > { %v2518_v54 = vrot.slane %v2516_v15, 4  ;;  %v7387_v23 = vsel %vm22489_vm4, %v7383_v0, %v7386_v28  ;;  %v2526_v11 = vrot.slane %v22157_v56, 6  ;;  %v7399_v24 = vshrl.u32 %v22158_v20, 16  ;;  %v2417_v0 = vld [vmem:[%s22455_s8 + $0x78] sm:$0xc] }
 0x1d1   : > { %20178 = vmatprep.mubr.msk.bf16.mxu0 %vm763_vm3, %v18186_v32  ;;  %v7397_v6 = vsel %vm22489_vm4, %v7388_v42, %v7396_v45  ;;  %v7402_v61 = vshll.u32 %v22158_v20, 16  ;;  %v28799_v46 = vshrl.u32 %v23640_v44, 16  ;;  %v2524_v47 = vsel %vm22671_vm6, %v17583_v41, %v2523_v59 }
 0x1d2   : > { %v2520_v51 = vsel %vm22671_vm6, %v2518_v54, %v2519_v30  ;;  %v18187_v35 = vcombine.low %v7387_v23, %v7397_v6  ;;  %v2525_v1 = vrot.slane %v2523_v59, 4  ;;  %v7401_v19 = vrot.slane %v7399_v24, 5 }
 0x1d3   : > { %v7407_v63 = vrot.slane %v28799_v46, 5  ;;  %v17599_v29 = vcombine.low %v2517_v55, %v2520_v51  ;;  %v7404_v8 = vrot.slane %v7402_v61, 6  ;;  %v28800_v33 = vshll.u32 %v23640_v44, 16  ;;  %v22160_v61 = vld [vmem:[%s22455_s8 + $0x7c] sm:$0xf] }
 0x1d4   : > { %v7413_v13 = vshrl.u32 %v24590_v37, 16  ;;  %20179 = vmatmul.mubr.msk.bf16.gmra.mrb[20].mxu0 %vm763_vm3, %v18187_v35  ;;  %v2527_v28 = vsel %vm22671_vm6, %v2525_v1, %v2526_v11  ;;  %v7416_v43 = vshll.u32 %v24590_v37, 16  ;;  %v7422_v27 = vshrl.u32 %v24201_v10, 16 }
 0x1d5   : > { %v7408_v3 = vrot.slane %v28800_v33, 6  ;;  %19868 = vmatprep.mubr.msk.bf16.mxu1 %vm763_vm3, %v17599_v29  ;;  %v7425_v5 = vshll.u32 %v22159_v14, 16  ;;  %v17600_v2 = vcombine.low %v2524_v47, %v2527_v28  ;;  %v7405_v44 = vor.u32 %v7404_v8, %v7401_v19  ;;  %v22161_v47 = vld [vmem:[%s22455_s8 + $0x80] sm:$0x3] }
 0x1d6   : > { %v7415_v32 = vrot.slane %v7413_v13, 5  ;;  %v7418_v42 = vrot.slane %v7416_v43, 6  ;;  %v7424_v21 = vrot.slane %v7422_v27, 5  ;;  %v28801_v45 = vshrl.u32 %v23669_v53, 16  ;;  %v22162_v27 = vld [vmem:[%s22455_s8 + $0x88] sm:$0xf] }
 0x1d7   : > { %v7409_v15 = vor.u32 %v7408_v3, %v7407_v63  ;;  %v7427_v30 = vrot.slane %v7425_v5, 6  ;;  %19869 = vmatmul.mubr.msk.bf16.gmra.mrb[16].mxu1 %vm763_vm3, %v17600_v2  ;;  %v7406_v54 = vrot.slane %v7405_v44, 4  ;;  %v28802_v10 = vshll.u32 %v23669_v53, 16  ;;  %v2418_v63 = vld [vmem:[%s22455_s8 + $0x84] sm:$0xc] }
 0x1d8   : > { %v7430_v55 = vrot.slane %v28801_v45, 5  ;;  %v7436_v25 = vshrl.u32 %v24610_v17, 16  ;;  %v7419_v59 = vor.u32 %v7418_v42, %v7415_v32  ;;  %v7439_v11 = vshll.u32 %v24610_v17, 16  ;;  %v22163_v2 = vld [vmem:[%s22455_s8 + $0x8c] sm:$0x3] }
 0x1d9   : > { %v7411_v41 = vrot.slane %v7409_v15, 4  ;;  %v7431_v23 = vrot.slane %v28802_v10, 6  ;;  %v7428_v56 = vor.u32 %v7427_v30, %v7424_v21  ;;  %v17584_v20 = vrot.slane %v2417_v0, 10 }
 0x1da   : > { %v7410_v24 = vsel %vm22489_vm4, %v7406_v54, %v7409_v15  ;;  %v7438_v51 = vrot.slane %v7436_v25, 5  ;;  %v2530_v46 = vrot.slane %v22160_v61, 6  ;;  %v7441_v29 = vrot.slane %v7439_v11, 6  ;;  %v24639_v15 = vld [vmem:[%s22455_s8 + $0xc8] sm:$0x3] }
 0x1db   : > { %v7432_v6 = vor.u32 %v7431_v23, %v7430_v55  ;;  %v7420_v53 = vsel %vm22489_vm4, %v7411_v41, %v7419_v59  ;;  %v7429_v35 = vrot.slane %v7428_v56, 4  ;;  %v2533_v1 = vrot.slane %v22161_v47, 6  ;;  %v2419_v47 = vld [vmem:[%s22455_s8 + $0x90] sm:$0xc] }
 0x1dc   : > { %v18188_v19 = vcombine.low %v7410_v24, %v7420_v53  ;;  %v2531_v33 = vsel %vm22671_vm6, %v17584_v20, %v2530_v46  ;;  %v2532_v3 = vrot.slane %v2530_v46, 4  ;;  %v7442_v28 = vor.u32 %v7441_v29, %v7438_v51  ;;  %v22164_v51 = vld [vmem:[%s22455_s8 + $0xcc] sm:$0xe] }
 0x1dd   : > { %v7434_v8 = vrot.slane %v7432_v6, 4  ;;  %v7433_v13 = vsel %vm22489_vm4, %v7429_v35, %v7432_v6  ;;  %v17585_v43 = vrot.slane %v2418_v63, 10  ;;  %v2537_v14 = vrot.slane %v22162_v27, 6  ;;  %v24658_v6 = vld [vmem:[%s22455_s8 + $0xd4] sm:$0x3] }
 0x1de   : > { %20182 = vmatprep.mubr.msk.bf16.mxu0 %vm763_vm3, %v18188_v19  ;;  %v2534_v5 = vsel %vm22671_vm6, %v2532_v3, %v2533_v1  ;;  %v2540_v44 = vrot.slane %v22163_v2, 6  ;;  %v7445_v32 = vshrl.u32 %v24235_v48, 16  ;;  %v7448_v0 = vshll.u32 %v24235_v48, 16 }
 0x1df   : > { %v7443_v42 = vsel %vm22489_vm4, %v7434_v8, %v7442_v28  ;;  %v17601_v21 = vcombine.low %v2531_v33, %v2534_v5  ;;  %v2538_v30 = vsel %vm22671_vm6, %v17585_v43, %v2537_v14  ;;  %v2539_v45 = vrot.slane %v2537_v14, 4 }
 0x1e0   : > { %v18189_v55 = vcombine.low %v7433_v13, %v7443_v42  ;;  %v7447_v54 = vrot.slane %v7445_v32, 5  ;;  %v7450_v41 = vrot.slane %v7448_v0, 6  ;;  %v28803_v10 = vshrl.u32 %v23713_v39, 16  ;;  %v2420_v32 = vld [vmem:[%s22455_s8 + $0x9c] sm:$0xc] }
 0x1e1   : > { %19872 = vmatprep.mubr.msk.bf16.mxu1 %vm763_vm3, %v17601_v21  ;;  %v2541_v48 = vsel %vm22671_vm6, %v2539_v45, %v2540_v44  ;;  %v28804_v25 = vshll.u32 %v23713_v39, 16  ;;  %v7459_v56 = vshrl.u32 %v24639_v15, 16  ;;  %v7462_v11 = vshll.u32 %v24639_v15, 16  ;;  %v22165_v21 = vld [vmem:[%s22455_s8 + $0x94] sm:$0xf] }
 0x1e2   : > { %v7453_v23 = vrot.slane %v28803_v10, 5  ;;  %20183 = vmatmul.mubr.msk.bf16.gmra.mrb[24].mxu0 %vm763_vm3, %v18189_v55  ;;  %v17602_v20 = vcombine.low %v2538_v30, %v2541_v48  ;;  %v7451_v24 = vor.u32 %v7450_v41, %v7447_v54  ;;  %v7468_v61 = vshrl.u32 %v22164_v51, 16  ;;  %v18208_v45 = vld [vmem:[%s22455_s8 + $0x18] sm:$0xc]  ;;  %v22166_v10 = vld [vmem:[%s22455_s8 + $0x98] sm:$0x3] }
 0x1e3   : > { %v7454_v59 = vrot.slane %v28804_v25, 6  ;;  %v7471_v46 = vshll.u32 %v22164_v51, 16  ;;  %v7461_v53 = vrot.slane %v7459_v56, 5  ;;  %v7464_v35 = vrot.slane %v7462_v11, 6  ;;  %v22168_v51 = vld [vmem:[%s22455_s8 + $0xa4] sm:$0x3] }
 0x1e4   : > { %v28805_v29 = vshrl.u32 %v23747_v58, 16  ;;  %19873 = vmatmul.mubr.msk.bf16.gmra.mrb[20].mxu1 %vm763_vm3, %v17602_v20  ;;  %v7452_v1 = vrot.slane %v7451_v24, 4  ;;  %v7470_v19 = vrot.slane %v7468_v61, 5  ;;  %v28806_v33 = vshll.u32 %v23747_v58, 16  ;;  %v22167_v20 = vld [vmem:[%s22455_s8 + $0xa0] sm:$0xf] }
 0x1e5   : > { %v7455_v63 = vor.u32 %v7454_v59, %v7453_v23  ;;  %v7473_v8 = vrot.slane %v7471_v46, 6  ;;  %v7465_v28 = vor.u32 %v7464_v35, %v7461_v53  ;;  %v7482_v43 = vshrl.u32 %v24658_v6, 16 }
 0x1e6   : > { %v7476_v39 = vrot.slane %v28805_v29, 5  ;;  %v7477_v3 = vrot.slane %v28806_v33, 6  ;;  %v7485_v27 = vshll.u32 %v24658_v6, 16  ;;  %v17586_v44 = vrot.slane %v2419_v47, 10  ;;  %v22169_v29 = vld [vmem:[%s22455_s8 + $0x1c] sm:$0xf] }
 0x1e7   : > { %v7457_v13 = vrot.slane %v7455_v63, 4  ;;  %v7456_v14 = vsel %vm22489_vm4, %v7452_v1, %v7455_v63  ;;  %v7474_v5 = vor.u32 %v7473_v8, %v7470_v19  ;;  %v7484_v58 = vrot.slane %v7482_v43, 5  ;;  %v18209_v63 = vld [vmem:[%s22455_s8 + $0x24] sm:$0xc]  ;;  %v2421_v1 = vld [vmem:[%s22455_s8 + $0xa8] sm:$0xc] }
 0x1e8   : > { %v7478_v2 = vor.u32 %v7477_v3, %v7476_v39  ;;  %v7487_v42 = vrot.slane %v7485_v27, 6  ;;  %v2544_v30 = vrot.slane %v22165_v21, 6  ;;  %v2547_v23 = vrot.slane %v22166_v10, 6  ;;  %v22170_v27 = vld [vmem:[%s22455_s8 + $0x28] sm:$0xf] }
 0x1e9   : > { %v7466_v0 = vsel %vm22489_vm4, %v7457_v13, %v7465_v28  ;;  %v7475_v54 = vrot.slane %v7474_v5, 4  ;;  %v17587_v56 = vrot.slane %v2420_v32, 10  ;;  %v2551_v24 = vrot.slane %v22167_v20, 6  ;;  %v2422_v5 = vld [vmem:[%s22455_s8 + $0xb4] sm:$0xc] }
 0x1ea   : > { %v18190_v55 = vcombine.low %v7456_v14, %v7466_v0  ;;  %v7480_v41 = vrot.slane %v7478_v2, 4  ;;  %v7488_v48 = vor.u32 %v7487_v42, %v7484_v58  ;;  %v2545_v25 = vsel %vm22671_vm6, %v17586_v44, %v2544_v30  ;;  %v18210_v0 = vld [vmem:[%s22455_s8 + $0x30] sm:$0xc]  ;;  %v18211_v10 = vld [vmem:[%s22455_s8 + $0x3c] sm:$0xc] }
 0x1eb   : > { %v2546_v59 = vrot.slane %v2544_v30, 4  ;;  %v7479_v11 = vsel %vm22489_vm4, %v7475_v54, %v7478_v2  ;;  %v2554_v61 = vrot.slane %v22168_v51, 6  ;;  %v18224_v46 = vrot.slane %v18208_v45, 10  ;;  %v22173_v20 = vld [vmem:[%s22455_s8 + $0x34] sm:$0xf] }
 0x1ec   : > { %20186 = vmatprep.mubr.msk.bf16.mxu0 %vm763_vm3, %v18190_v55  ;;  %v7489_v53 = vsel %vm22489_vm4, %v7480_v41, %v7488_v48  ;;  %v7834_v39 = vrot.slane %v22169_v29, 6  ;;  %v7837_v47 = vrot.slane %v24283_v9, 6  ;;  %v2552_v33 = vsel %vm22671_vm6, %v17587_v56, %v2551_v24  ;;  %v22171_v55 = vld [vmem:[%s22455_s8 + $0xac] sm:$0xf]  ;;  %v22174_v29 = vld [vmem:[%s22455_s8 + $0x40] sm:$0xf] }
 0x1ed   : > { %v2548_v35 = vsel %vm22671_vm6, %v2546_v59, %v2547_v23  ;;  %v18191_v19 = vcombine.low %v7479_v11, %v7489_v53  ;;  %v2553_v3 = vrot.slane %v2551_v24, 4  ;;  %v18225_v43 = vrot.slane %v18209_v63, 10  ;;  %v22172_v23 = vld [vmem:[%s22455_s8 + $0xb8] sm:$0xf] }
 0x1ee   : > { %v17603_v8 = vcombine.low %v2545_v25, %v2548_v35  ;;  %v7835_v13 = vsel %vm22671_vm6, %v18224_v46, %v7834_v39  ;;  %v7836_v28 = vrot.slane %v7834_v39, 4  ;;  %v7841_v14 = vrot.slane %v22170_v27, 6  ;;  %v21972_v27 = vld [vmem:[%s22455_s8 + $0xc] sm:$0xff]  }
 0x1ef   : > { %20187 = vmatmul.mubr.msk.bf16.gmra.mrb[28].mxu0 %vm763_vm3, %v18191_v19  ;;  %v2555_v9 = vsel %vm22671_vm6, %v2553_v3, %v2554_v61  ;;  %v7844_v2 = vrot.slane %v24298_v40, 6  ;;  %v8402_v44 = vsel %vm812_vm0, %v24342_v16, 0  ;;  %v17588_v32 = vrot.slane %v2421_v1, 10  ;;  %v18213_v1 = vld [vmem:[%s22455_s8 + $0x54] sm:$0xc] }
 0x1f0   : > { %19876 = vmatprep.mubr.msk.bf16.mxu1 %vm763_vm3, %v17603_v8  ;;  %v17604_v58 = vcombine.low %v2552_v33, %v2555_v9  ;;  %v7838_v42 = vsel %vm22671_vm6, %v7836_v28, %v7837_v47  ;;  %v7842_v21 = vsel %vm22671_vm6, %v18225_v43, %v7841_v14  ;;  %v7843_v30 = vrot.slane %v7841_v14, 4  ;;  %v18212_v47 = vld [vmem:[%s22455_s8 + $0x48] sm:$0xc]  ;;  %v24740_v3 = vld [vmem:[%s28426_s1 + $0x20] sm:$0x3] }
 0x1f1   : > { %v18241_v45 = vcombine.low %v7835_v13, %v7838_v42  ;;  %v2558_v54 = vrot.slane %v22171_v55, 6  ;;  %v2561_v40 = vrot.slane %v24315_v18, 6  ;;  %v17589_v41 = vrot.slane %v2422_v5, 10  ;;  %v24745_v13 = vld [vmem:[%s28426_s1 + $0xc] sm:$0x3] }
 0x1f2   : > { %19877 = vmatmul.mubr.msk.bf16.gmra.mrb[24].mxu1 %vm763_vm3, %v17604_v58  ;;  %v7845_v16 = vsel %vm22671_vm6, %v7843_v30, %v7844_v2  ;;  %v2565_v48 = vrot.slane %v22172_v23, 6  ;;  %v2568_v25 = vrot.slane %v24333_v50, 6  ;;  %v18226_v59 = vrot.slane %v18210_v0, 10  ;;  %v18214_v14 = vld [vmem:[%s22455_s8 + $0x60] sm:$0xc] }
 0x1f3   : > { %20192 = vmatprep.mubr.msk.bf16.mxu0 %vm763_vm3, %v18241_v45  ;;  %v18242_v56 = vcombine.low %v7842_v21, %v7845_v16  ;;  %v2559_v18 = vsel %vm22671_vm6, %v17588_v32, %v2558_v54  ;;  %v2560_v11 = vrot.slane %v2558_v54, 4  ;;  %v7848_v24 = vrot.slane %v22173_v20, 6  ;;  %v22175_v2 = vld [vmem:[%s22455_s8 + $0x4c] sm:$0xf]  ;;  %v22176_v21 = vld [vmem:[%s22455_s8 + $0x58] sm:$0xf] }
 0x1f4   : > { %v2566_v51 = vsel %vm22671_vm6, %v17589_v41, %v2565_v48  ;;  %v2567_v61 = vrot.slane %v2565_v48, 4  ;;  %v7851_v46 = vrot.slane %v24353_v26, 6  ;;  %v18227_v63 = vrot.slane %v18211_v10, 10  ;;  %v18215_v55 = vld [vmem:[%s22455_s8 + $0x6c] sm:$0xc] }
 0x1f5   : > { %v2562_v50 = vsel %vm22671_vm6, %v2560_v11, %v2561_v40  ;;  %v7849_v53 = vsel %vm22671_vm6, %v18226_v59, %v7848_v24  ;;  %v7850_v35 = vrot.slane %v7848_v24, 4  ;;  %v7855_v39 = vrot.slane %v22174_v29, 6  ;;  %v22177_v10 = vld [vmem:[%s22455_s8 + $0x64] sm:$0xf]  ;;  %v18216_v48 = vld [vmem:[%s22455_s8 + $0x78] sm:$0xc] }
 0x1f6   : > { %v17605_v19 = vcombine.low %v2559_v18, %v2562_v50  ;;  %v2569_v8 = vsel %vm22671_vm6, %v2567_v61, %v2568_v25  ;;  %v7858_v26 = vrot.slane %v24370_v4, 6  ;;  %v3028_v33 = vsel %vm812_vm0, %v24385_v12, 0  ;;  %v18217_v20 = vld [vmem:[%s22455_s8 + $0x84] sm:$0xc] }
 0x1f7   : > { %20193 = vmatmul.mubr.msk.bf16.vlgmr.msra.gmra.mrb[0].mxu0 %vm763_vm3, %v18242_v56  ;;  %v17606_v28 = vcombine.low %v2566_v51, %v2569_v8  ;;  %v7852_v4 = vsel %vm22671_vm6, %v7850_v35, %v7851_v46  ;;  %v7856_v12 = vsel %vm22671_vm6, %v18227_v63, %v7855_v39  ;;  %v7857_v43 = vrot.slane %v7855_v39, 4  ;;  %19885 = vmatpush3.bf16.msra.mxu1 %v3028_v33  ;;  %v22178_v56 = vld [vmem:[%s22455_s8 + $0x70] sm:$0xf]  ;;  %v21973_v46 = vld [vmem:[%s22455_s8 + $0x18] sm:$0xff]   ;;  %v21974_v29 = vld [vmem:[%s22455_s8 + $0x24] sm:$0xff]  }
 0x1f8   : > { %20225 = vmatpush3.bf16.msra.mxu0 %v8402_v44  ;;  %19880 = vmatprep.mubr.msk.bf16.mxu1 %vm763_vm3, %v17605_v19  ;;  %v18243_v5 = vcombine.low %v7849_v53, %v7852_v4  ;;  %v18228_v9 = vrot.slane %v18212_v47, 10  ;;  %v7862_v32 = vrot.slane %v22175_v2, 6  ;;  %v7865_v0 = vrot.slane %v24406_v22, 6  ;;  %v18218_v35 = vld [vmem:[%s22455_s8 + $0x90] sm:$0xc] }
 0x1f9   : > { %v7859_v58 = vsel %vm22671_vm6, %v7857_v43, %v7858_v26  ;;  %v18229_v42 = vrot.slane %v18213_v1, 10  ;;  %v7869_v30 = vrot.slane %v22176_v21, 6  ;;  %v7872_v45 = vrot.slane %v24426_v60, 6  ;;  %21889 = vmatprep.subr.msk.bf16.mxu0 %vm812_vm0, %v24740_v3  ;;  %21878 = vmatprep.subr.msk.bf16.mxu1 %vm812_vm0, %v24745_v13  ;;  %v22179_v47 = vld [vmem:[%s22455_s8 + $0x7c] sm:$0xf] }
 0x1fa   : > { %19881 = vmatmul.mubr.msk.bf16.gmra.mrb[28].mxu1 %vm763_vm3, %v17606_v28  ;;  %20196 = vmatprep.mubr.msk.bf16.mxu0 %vm763_vm3, %v18243_v5  ;;  %v18244_v22 = vcombine.low %v7856_v12, %v7859_v58  ;;  %v7863_v44 = vsel %vm22671_vm6, %v18228_v9, %v7862_v32  ;;  %v7864_v54 = vrot.slane %v7862_v32, 4  ;;  %v18230_v60 = vrot.slane %v18214_v14, 10  ;;  %v22180_v28 = vld [vmem:[%s22455_s8 + $0x88] sm:$0xf]  ;;  %v18219_v43 = vld [vmem:[%s22455_s8 + $0x9c] sm:$0xc] }
 0x1fb   : > { %19886 = vmatprep.mubr.msk.bf16.mxu1 %vm763_vm3, %v21972_v27  ;;  %v24773_v40 = vsel %vm22671_vm6, %v18229_v42, %v7869_v30  ;;  %v7871_v41 = vrot.slane %v7869_v30, 4  ;;  %v7876_v16 = vrot.slane %v22177_v10, 6  ;;  %v7879_v23 = vrot.slane %v24454_v52, 6  ;;  %v18220_v58 = vld [vmem:[%s22455_s8 + $0xa8] sm:$0xc] }
 0x1fc   : > { %v7866_v25 = vsel %vm22671_vm6, %v7864_v54, %v7865_v0  ;;  %v18231_v59 = vrot.slane %v18215_v55, 10  ;;  %v7883_v18 = vrot.slane %v22178_v56, 6  ;;  %v7886_v11 = vrot.slane %v24472_v38, 6  ;;  %v22182_v30 = vld [vmem:[%s22455_s8 + $0xa0] sm:$0xf] }
 0x1fd   : > { %v18245_v24 = vcombine.low %v7863_v44, %v7866_v25  ;;  %v7873_v51 = vsel %vm22671_vm6, %v7871_v41, %v7872_v45  ;;  %v24787_v52 = vsel %vm22671_vm6, %v18230_v60, %v7876_v16  ;;  %v7878_v61 = vrot.slane %v7876_v16, 4  ;;  %v18222_v16 = vld [vmem:[%s22455_s8 + $0xc0] sm:$0xc]  ;;  %v22183_v25 = vld [vmem:[%s22455_s8 + $0xac] sm:$0xf] }
 0x1fe   : > { %v18246_v63 = vcombine.low %v24773_v40, %v7873_v51  ;;  %v24793_v50 = vsel %vm22671_vm6, %v18231_v59, %v7883_v18  ;;  %v7885_v53 = vrot.slane %v7883_v18, 4  ;;  %v18232_v38 = vrot.slane %v18216_v48, 10  ;;  %v22184_v51 = vld [vmem:[%s22455_s8 + $0xb8] sm:$0xf] }
 0x1ff   : > { %20197 = vmatmul.mubr.msk.bf16.gmra.mrb[4].mxu0 %vm763_vm3, %v18244_v22  ;;  %v7880_v39 = vsel %vm22671_vm6, %v7878_v61, %v7879_v23  ;;  %v7890_v1 = vrot.slane %v22179_v47, 6  ;;  %v7893_v19 = vrot.slane %v24498_v36, 6  ;;  %v18233_v8 = vrot.slane %v18217_v20, 10  ;;  %v18221_v22 = vld [vmem:[%s22455_s8 + $0xb4] sm:$0xc] }
 0x200   : > { %20200 = vmatprep.mubr.msk.bf16.mxu0 %vm763_vm3, %v18245_v24  ;;  %v18247_v26 = vcombine.low %v24787_v52, %v7880_v39  ;;  %v24806_v33 = vsel %vm22671_vm6, %v7885_v53, %v7886_v11  ;;  %v7897_v4 = vrot.slane %v22180_v28, 6  ;;  %v7900_v12 = vrot.slane %v24518_v7, 6  ;;  %v22181_v7 = vld [vmem:[%s22455_s8 + $0x94] sm:$0xf]  ;;  %v21976_v11 = vld [vmem:[%s22455_s8 + $0x3c] sm:$0xff]  }
 0x201   : > { %v18248_v36 = vcombine.low %v24793_v50, %v24806_v33  ;;  %v24815_v27 = vsel %vm22671_vm6, %v18232_v38, %v7890_v1  ;;  %v7892_v14 = vrot.slane %v7890_v1, 4  ;;  %v18234_v5 = vrot.slane %v18218_v35, 10  ;;  %v21975_v23 = vld [vmem:[%s22455_s8 + $0x30] sm:$0xff]  }
 0x202   : > { %19887 = vmatmul.mubr.msk.bf16.vlgmr.msra.gmra.mrb[0].mxu1 %vm763_vm3, %v21973_v46  ;;  %v24820_v9 = vsel %vm22671_vm6, %v18233_v8, %v7897_v4  ;;  %v7899_v2 = vrot.slane %v7897_v4, 4  ;;  %v7904_v32 = vrot.slane %v22181_v7, 6  ;;  %v7907_v0 = vrot.slane %v24546_v49, 6  ;;  %v18223_v46 = vld [vmem:[%s22455_s8 + $0xcc] sm:$0xc] }
 0x203   : > { %19890 = vmatprep.mubr.msk.bf16.mxu1 %vm763_vm3, %v21974_v29  ;;  %v24828_v42 = vsel %vm22671_vm6, %v7892_v14, %v7893_v19  ;;  %v18235_v21 = vrot.slane %v18219_v43, 10  ;;  %v7911_v45 = vrot.slane %v22182_v30, 6  ;;  %v7914_v55 = vrot.slane %v24564_v62, 6  ;;  %v22186_v8 = vld [vmem:[%s22455_s8 + $0xd0] sm:$0xf] }
 0x204   : > { %v18249_v44 = vcombine.low %v24815_v27, %v24828_v42  ;;  %v24837_v49 = vsel %vm22671_vm6, %v7899_v2, %v7900_v12  ;;  %v24841_v54 = vsel %vm22671_vm6, %v18234_v5, %v7904_v32  ;;  %v7906_v60 = vrot.slane %v7904_v32, 4  ;;  %v17688_v4 = vld [vmem:[%s22455_s8 + $0xc] sm:$0xf]  ;;  %v24901_v5 = vld [vmem:[%s22455_s8 + $0x14] sm:$0x1] }
 0x205   : > { %v18250_v40 = vcombine.low %v24820_v9, %v24837_v49  ;;  %v24847_v62 = vsel %vm22671_vm6, %v18235_v21, %v7911_v45  ;;  %v7913_v41 = vrot.slane %v7911_v45, 4  ;;  %v18236_v10 = vrot.slane %v18220_v58, 10  ;;  %v24917_v58 = vld [vmem:[%s28426_s1 + $0xe] sm:$0x3]  ;;  %v28810_v42 = vld [vmem:[#allocation14_spill] sm:$0xff] }
 0x206   : > { %v24853_v48 = vsel %vm22671_vm6, %v7906_v60, %v7907_v0  ;;  %v7918_v59 = vrot.slane %v22183_v25, 6  ;;  %v7921_v56 = vrot.slane %v24590_v37, 6  ;;  %v18237_v18 = vrot.slane %v18221_v22, 10  ;;  %v17691_v0 = vld [vmem:[%s22455_s8 + $0x18] sm:$0xf] }
 0x207   : > { %20201 = vmatmul.mubr.msk.bf16.gmra.mrb[8].mxu0 %vm763_vm3, %v18246_v63  ;;  %v18251_v20 = vcombine.low %v24841_v54, %v24853_v48  ;;  %v24863_v24 = vsel %vm22671_vm6, %v7913_v41, %v7914_v55  ;;  %v7925_v52 = vrot.slane %v22184_v51, 6  ;;  %v7928_v61 = vrot.slane %v24610_v17, 6  ;;  %v22185_v17 = vld [vmem:[%s22455_s8 + $0xc4] sm:$0xf]  ;;  %v24926_v22 = vld [vmem:[%s22455_s8 + $0x20] sm:$0x1] }
 0x208   : > { %20204 = vmatprep.mubr.msk.bf16.mxu0 %vm763_vm3, %v18247_v26  ;;  %v18252_v37 = vcombine.low %v24847_v62, %v24863_v24  ;;  %v24873_v63 = vsel %vm22671_vm6, %v18236_v10, %v7918_v59  ;;  %v7920_v53 = vrot.slane %v7918_v59, 4  ;;  %v18238_v38 = vrot.slane %v18222_v16, 10  ;;  %v28807_v10 = vld [vmem:[#allocation9_spill] sm:$0xff]  ;;  %v21978_v59 = vld [vmem:[%s22455_s8 + $0x54] sm:$0xff]   ;;  %v25003_v48 = vld [vmem:[%s22455_s8 + $0x44] sm:$0x1] }
 0x209   : > { %v24877_v35 = vsel %vm22671_vm6, %v18237_v18, %v7925_v52  ;;  %v7927_v29 = vrot.slane %v7925_v52, 4  ;;  %v7932_v39 = vrot.slane %v22185_v17, 6  ;;  %v7935_v47 = vrot.slane %v24639_v15, 6  ;;  %v28809_v52 = vld [vmem:[#allocation11_spill] sm:$0xff] }
 0x20a   : > { %19891 = vmatmul.mubr.msk.bf16.gmra.mrb[4].mxu1 %vm763_vm3, %v21975_v23  ;;  %v24884_v1 = vsel %vm22671_vm6, %v7920_v53, %v7921_v56  ;;  %v18239_v19 = vrot.slane %v18223_v46, 10  ;;  %v7939_v26 = vrot.slane %v22186_v8, 6  ;;  %v7942_v28 = vrot.slane %v24658_v6, 6  ;;  %v17697_v8 = vld [vmem:[%s22455_s8 + $0x30] sm:$0xf] }
 0x20b   : > { %19894 = vmatprep.mubr.msk.bf16.mxu1 %vm763_vm3, %v21976_v11  ;;  %v18253_v12 = vcombine.low %v24873_v63, %v24884_v1  ;;  %v24894_v15 = vsel %vm22671_vm6, %v7927_v29, %v7928_v61  ;;  %v24898_v43 = vsel %vm22671_vm6, %v18238_v38, %v7932_v39  ;;  %v7934_v14 = vrot.slane %v7932_v39, 4  ;;  %v24955_v38 = vld [vmem:[%s22455_s8 + $0x2c] sm:$0x1]  ;;  %v17708_v62 = vld [vmem:[%s22455_s8 + $0x5c] sm:$0x1] }
 0x20c   : > { %v18254_v6 = vcombine.low %v24877_v35, %v24894_v15  ;;  %v24907_v2 = vsel %vm22671_vm6, %v18239_v19, %v7939_v26  ;;  %v7941_v7 = vrot.slane %v7939_v26, 4  ;;  %v24911_v32 = vsel %vm812_vm0, %v24740_v3, 0  ;;  %v21977_v3 = vld [vmem:[%s22455_s8 + $0x48] sm:$0xff]   ;;  %v17714_v15 = vld [vmem:[%s22455_s8 + $0x74] sm:$0x1] }
 0x20d   : > { %v24921_v21 = vsel %vm22671_vm6, %v7934_v14, %v7935_v47  ;;  %v3754_v30 = vsel %vm812_vm0, %v24745_v13, 0  ;;  %v3272_v45 = vshrl.u32 %v17688_v4, 16  ;;  %v3275_v55 = vshll.u32 %v17688_v4, 16  ;;  %v17694_v13 = vld [vmem:[%s22455_s8 + $0x24] sm:$0xf] }
 0x20e   : > { %v18255_v60 = vcombine.low %v24898_v43, %v24921_v21  ;;  %v24933_v41 = vsel %vm22671_vm6, %v7941_v7, %v7942_v28  ;;  %19919 = vmatpush3.bf16.msra.mxu1 %v3754_v30  ;;  %v28808_v16 = vshll.u32 %v28807_v10, 16  ;;  %v3291_v25 = vshll.u32 %v24901_v5, 16  ;;  %v17715_v21 = vld [vmem:[%s22455_s8 + $0x78] sm:$0xf] }
 0x20f   : > { %20205 = vmatmul.mubr.msk.bf16.gmra.mrb[12].mxu0 %vm763_vm3, %v18248_v36  ;;  %v18256_v56 = vcombine.low %v24907_v2, %v24933_v41  ;;  %v3274_v18 = vrot.slane %v3272_v45, 4  ;;  %v3277_v11 = vrot.slane %v3275_v55, 5  ;;  %v3296_v51 = vshrl.u32 %v17691_v0, 16  ;;  %21879 = vmatprep.subr.msk.bf16.mxu1 %vm812_vm0, %v24917_v58  ;;  %v28814_v55 = vld [vmem:[#allocation15_spill] sm:$0xff]  ;;  %v17721_v41 = vld [vmem:[%s22455_s8 + $0x90] sm:$0xf] }
 0x210   : > { %v3283_v23 = vrot.slane %v28808_v16, 5  ;;  %20208 = vmatprep.mubr.msk.bf16.mxu0 %vm763_vm3, %v18249_v44  ;;  %v3293_v33 = vrot.slane %v3291_v25, 5  ;;  %v3299_v36 = vshll.u32 %v17691_v0, 16  ;;  %v3315_v61 = vshll.u32 %v24926_v22, 16 }
 0x211   : > { %v3278_v46 = vor.u32 %v3277_v11, %v3274_v18  ;;  %v3298_v53 = vrot.slane %v3296_v51, 4  ;;  %v3320_v29 = vshrl.u32 %v17694_v13, 16  ;;  %v3323_v17 = vshll.u32 %v17694_v13, 16  ;;  %v21979_v11 = vld [vmem:[%s22455_s8 + $0x60] sm:$0xff]  }
 0x212   : > { %v3288_v50 = vor.u32 %v28809_v52, %v3283_v23  ;;  %19895 = vmatmul.mubr.msk.bf16.gmra.mrb[8].mxu1 %vm763_vm3, %v21977_v3  ;;  %v3301_v47 = vrot.slane %v3299_v36, 5  ;;  %v3317_v27 = vrot.slane %v3315_v61, 5  ;;  %v28811_v44 = vshll.u32 %v28810_v42, 16  ;;  %v17700_v36 = vld [vmem:[%s22455_s8 + $0x3c] sm:$0xf] }
 0x213   : > { %19898 = vmatprep.mubr.msk.bf16.mxu1 %vm763_vm3, %v21978_v59  ;;  %v3279_v26 = vrot.slane %v3278_v46, 4  ;;  %v3322_v28 = vrot.slane %v3320_v29, 4  ;;  %v3325_v4 = vrot.slane %v3323_v17, 5  ;;  %v28812_v14 = vshrl.u32 %v28810_v42, 16  ;;  %v24973_v59 = vld [vmem:[%s22455_s8 + $0x38] sm:$0x1] }
 0x214   : > { %v3289_v39 = vrot.slane %v3288_v50, 4  ;;  %v3331_v19 = vrot.slane %v28811_v44, 5  ;;  %v3302_v45 = vor.u32 %v3301_v47, %v3298_v53  ;;  %v3318_v3 = vsel %vm22737_vm9, %v28814_v55, %v3317_v27  ;;  %v28815_v29 = vld [vmem:[#allocation16_spill] sm:$0xff] }
 0x215   : > { %v3335_v7 = vrot.slane %v28812_v14, 4  ;;  %v3339_v10 = vshll.u32 %v24955_v38, 16  ;;  %v3284_v16 = vsel %vm22737_vm9, %v3279_v26, %v3283_v23  ;;  %v3326_v25 = vor.u32 %v3325_v4, %v3322_v28  ;;  %v21980_v23 = vld [vmem:[%s22455_s8 + $0x6c] sm:$0xff]   ;;  %v28817_v47 = vld [vmem:[#allocation12_spill] sm:$0xff] }
 0x216   : > { %v3294_v30 = vsel %vm22737_vm9, %v3289_v39, %v3293_v33  ;;  %v3344_v18 = vshrl.u32 %v17697_v8, 16  ;;  %v3303_v52 = vrot.slane %v3302_v45, 4  ;;  %v3347_v33 = vshll.u32 %v17697_v8, 16  ;;  %v17703_v26 = vld [vmem:[%s22455_s8 + $0x48] sm:$0xf] }
 0x217   : > { %v3336_v13 = vor.u32 %v3335_v7, %v3331_v19  ;;  %v24976_v51 = vcombine.low %v3284_v16, %v3294_v30  ;;  %v3341_v50 = vrot.slane %v3339_v10, 5  ;;  %20209 = vmatmul.mubr.msk.bf16.gmra.mrb[16].mxu0 %vm763_vm3, %v18250_v40  ;;  %v3327_v61 = vrot.slane %v3326_v25, 4  ;;  %v28819_v45 = vld [vmem:[#allocation17_spill] sm:$0xff] }
 0x218   : > { %v3346_v53 = vrot.slane %v3344_v18, 4  ;;  %v28816_v17 = vshll.u32 %v28815_v29, 16  ;;  %20212 = vmatprep.mubr.msk.bf16.mxu0 %vm763_vm3, %v18251_v20  ;;  %v3308_v27 = vsel %vm22737_vm9, %v3303_v52, %v28817_v47  ;;  %v3349_v9 = vrot.slane %v3347_v33, 5 }
 0x219   : > { %v3337_v46 = vrot.slane %v3336_v13, 4  ;;  %v28818_v49 = vshrl.u32 %v28815_v29, 16  ;;  %v3363_v42 = vshll.u32 %v24973_v59, 16  ;;  %v24996_v44 = vcombine.low %v3308_v27, %v3318_v3  ;;  %v21981_v29 = vld [vmem:[%s22455_s8 + $0x78] sm:$0xff]  }
 0x21a   : > { %v3355_v39 = vrot.slane %v28816_v17, 5  ;;  %v3332_v8 = vsel %vm22737_vm9, %v3327_v61, %v3331_v19  ;;  %v3368_v20 = vshrl.u32 %v17700_v36, 16  ;;  %19899 = vmatmul.mubr.msk.bf16.gmra.mrb[12].mxu1 %vm763_vm3, %v21979_v11  ;;  %v3350_v4 = vor.u32 %v3349_v9, %v3346_v53  ;;  %v25016_v11 = vld [vmem:[%s22455_s8 + $0x50] sm:$0x1]  ;;  %v17706_v53 = vld [vmem:[%s22455_s8 + $0x54] sm:$0xf] }
 0x21b   : > { %v3359_v40 = vrot.slane %v28818_v49, 4  ;;  %v3342_v54 = vsel %vm22737_vm9, %v3337_v46, %v3341_v50  ;;  %v3365_v7 = vrot.slane %v3363_v42, 5  ;;  %19902 = vmatprep.mubr.msk.bf16.mxu1 %vm763_vm3, %v21980_v23  ;;  %v3371_v30 = vshll.u32 %v17700_v36, 16  ;;  %v28822_v23 = vld [vmem:[#allocation18_spill] sm:$0xff]  ;;  %v21982_v49 = vld [vmem:[%s22455_s8 + $0x84] sm:$0xff]  }
 0x21c   : > { %v25007_v28 = vcombine.low %v3332_v8, %v3342_v54  ;;  %v3370_v19 = vrot.slane %v3368_v20, 4  ;;  %v28820_v55 = vshll.u32 %v28819_v45, 16  ;;  %v28821_v10 = vshrl.u32 %v28819_v45, 16 }
 0x21d   : > { %v3360_v14 = vor.u32 %v3359_v40, %v3355_v39  ;;  %v3351_v25 = vrot.slane %v3350_v4, 4  ;;  %v3387_v18 = vshll.u32 %v25003_v48, 16  ;;  %v3392_v52 = vshrl.u32 %v17703_v26, 16 }
 0x21e   : > { %v3379_v3 = vrot.slane %v28820_v55, 5  ;;  %v3383_v16 = vrot.slane %v28821_v10, 4  ;;  %v3373_v50 = vrot.slane %v3371_v30, 5  ;;  %v3395_v61 = vshll.u32 %v17703_v26, 16  ;;  %v17709_v55 = vld [vmem:[%s22455_s8 + $0x60] sm:$0xf] }
 0x21f   : > { %v3361_v13 = vrot.slane %v3360_v14, 4  ;;  %v28823_v46 = vshll.u32 %v28822_v23, 16  ;;  %v3356_v17 = vsel %vm22737_vm9, %v3351_v25, %v3355_v39  ;;  %v3389_v27 = vrot.slane %v3387_v18, 5  ;;  %20213 = vmatmul.mubr.msk.bf16.gmra.mrb[20].mxu0 %vm763_vm3, %v18252_v37 }
 0x220   : > { %v3384_v33 = vor.u32 %v3383_v16, %v3379_v3  ;;  %v3394_v9 = vrot.slane %v3392_v52, 4  ;;  %v3374_v42 = vor.u32 %v3373_v50, %v3370_v19  ;;  %v3397_v54 = vrot.slane %v3395_v61, 5  ;;  %20216 = vmatprep.mubr.msk.bf16.mxu0 %vm763_vm3, %v18253_v12  ;;  %v28825_v19 = vld [vmem:[#allocation19_spill] sm:$0xff] }
 0x221   : > { %v3403_v36 = vrot.slane %v28823_v46, 5  ;;  %v3366_v47 = vsel %vm22737_vm9, %v3361_v13, %v3365_v7  ;;  %v28824_v39 = vshrl.u32 %v28822_v23, 16  ;;  %v3411_v26 = vshll.u32 %v25016_v11, 16 }
 0x222   : > { %v25031_v40 = vcombine.low %v3356_v17, %v3366_v47  ;;  %v3385_v8 = vrot.slane %v3384_v33, 4  ;;  %v3416_v24 = vshrl.u32 %v17706_v53, 16  ;;  %v3419_v37 = vshll.u32 %v17706_v53, 16  ;;  %19903 = vmatmul.mubr.msk.bf16.gmra.mrb[16].mxu1 %vm763_vm3, %v21981_v29  ;;  %v25057_v17 = vld [vmem:[%s22455_s8 + $0x68] sm:$0x1] }
 0x223   : > { %v3407_v20 = vrot.slane %v28824_v39, 4  ;;  %v3375_v4 = vrot.slane %v3374_v42, 4  ;;  %v3398_v7 = vor.u32 %v3397_v54, %v3394_v9  ;;  %v28826_v30 = vshll.u32 %v28825_v19, 16  ;;  %19906 = vmatprep.mubr.msk.bf16.mxu1 %vm763_vm3, %v21982_v49 }
 0x224   : > { %v3390_v14 = vsel %vm22737_vm9, %v3385_v8, %v3389_v27  ;;  %v3413_v1 = vrot.slane %v3411_v26, 5  ;;  %v3418_v12 = vrot.slane %v3416_v24, 4  ;;  %v3421_v10 = vrot.slane %v3419_v37, 5  ;;  %v21983_v27 = vld [vmem:[%s22455_s8 + $0x90] sm:$0xff]   ;;  %v28828_v8 = vld [vmem:[#allocation20_spill] sm:$0xff] }
 0x225   : > { %v3427_v45 = vrot.slane %v28826_v30, 5  ;;  %v3408_v63 = vor.u32 %v3407_v20, %v3403_v36  ;;  %v3380_v16 = vsel %vm22737_vm9, %v3375_v4, %v3379_v3  ;;  %v3399_v25 = vrot.slane %v3398_v7, 4  ;;  %v17712_v3 = vld [vmem:[%s22455_s8 + $0x6c] sm:$0xf] }
 0x226   : > { %v28827_v13 = vshrl.u32 %v28825_v19, 16  ;;  %v3435_v52 = vshll.u32 %v17708_v62, 16  ;;  %v25052_v50 = vcombine.low %v3380_v16, %v3390_v14  ;;  %v3422_v61 = vor.u32 %v3421_v10, %v3418_v12 }
 0x227   : > { %v3409_v33 = vrot.slane %v3408_v63, 4  ;;  %v3440_v23 = vshrl.u32 %v17709_v55, 16  ;;  %v3404_v46 = vsel %vm22737_vm9, %v3399_v25, %v3403_v36  ;;  %v3443_v47 = vshll.u32 %v17709_v55, 16  ;;  %20217 = vmatmul.mubr.msk.bf16.gmra.mrb[24].mxu0 %vm763_vm3, %v18254_v6  ;;  %v21984_v36 = vld [vmem:[%s22455_s8 + $0x9c] sm:$0xff]   ;;  %v28831_v55 = vld [vmem:[#allocation21_spill] sm:$0xff] }
 0x228   : > { %v3431_v18 = vrot.slane %v28827_v13, 4  ;;  %v3437_v29 = vrot.slane %v3435_v52, 5  ;;  %v3423_v49 = vrot.slane %v3422_v61, 4  ;;  %v28829_v54 = vshll.u32 %v28828_v8, 16  ;;  %20220 = vmatprep.mubr.msk.bf16.mxu0 %vm763_vm3, %v18255_v60  ;;  %v17717_v52 = vld [vmem:[%s22455_s8 + $0x80] sm:$0x1] }
 0x229   : > { %v3414_v9 = vsel %vm22737_vm9, %v3409_v33, %v3413_v1  ;;  %v3442_v42 = vrot.slane %v3440_v23, 4  ;;  %v3445_v62 = vrot.slane %v3443_v47, 5  ;;  %v28830_v24 = vshrl.u32 %v28828_v8, 16  ;;  %v21986_v33 = vld [vmem:[%s22455_s8 + $0x24] sm:$0xff]  }
 0x22a   : > { %v3432_v53 = vor.u32 %v3431_v18, %v3427_v45  ;;  %v3451_v39 = vrot.slane %v28829_v54, 5  ;;  %v25070_v20 = vcombine.low %v3404_v46, %v3414_v9  ;;  %v3428_v4 = vsel %vm22737_vm9, %v3423_v49, %v3427_v45  ;;  %19907 = vmatmul.mubr.msk.bf16.gmra.mrb[20].mxu1 %vm763_vm3, %v21983_v27  ;;  %v21985_v8 = vld [vmem:[%s22455_s8 + $0xa8] sm:$0xff]  }
 0x22b   : > { %v3455_v37 = vrot.slane %v28830_v24, 4  ;;  %v3459_v35 = vshll.u32 %v25057_v17, 16  ;;  %v3464_v6 = vshrl.u32 %v17712_v3, 16  ;;  %v3467_v14 = vshll.u32 %v17712_v3, 16  ;;  %19910 = vmatprep.mubr.msk.bf16.mxu1 %vm763_vm3, %v21984_v36  ;;  %v17718_v3 = vld [vmem:[%s22455_s8 + $0x84] sm:$0xf] }
 0x22c   : > { %v3433_v26 = vrot.slane %v3432_v53, 4  ;;  %v3446_v19 = vor.u32 %v3445_v62, %v3442_v42  ;;  %v28832_v63 = vshll.u32 %v28831_v55, 16  ;;  %v28833_v25 = vshrl.u32 %v28831_v55, 16  ;;  %v28834_v53 = vld [vmem:[#allocation22_spill] sm:$0xff] }
 0x22d   : > { %v3456_v30 = vor.u32 %v3455_v37, %v3451_v39  ;;  %v3461_v45 = vrot.slane %v3459_v35, 5  ;;  %v3466_v1 = vrot.slane %v3464_v6, 4  ;;  %v3469_v12 = vrot.slane %v3467_v14, 5 }
 0x22e   : > { %v3438_v7 = vsel %vm22737_vm9, %v3433_v26, %v3437_v29  ;;  %v3475_v43 = vrot.slane %v28832_v63, 5  ;;  %v3447_v10 = vrot.slane %v3446_v19, 4  ;;  %v3479_v13 = vrot.slane %v28833_v25, 4 }
 0x22f   : > { %v25088_v60 = vcombine.low %v3428_v4, %v3438_v7  ;;  %v3457_v16 = vrot.slane %v3456_v30, 4  ;;  %v3483_v18 = vshll.u32 %v17714_v15, 16  ;;  %v3470_v61 = vor.u32 %v3469_v12, %v3466_v1  ;;  %20221 = vmatmul.mubr.msk.bf16.gmra.mrb[28].mxu0 %vm763_vm3, %v18256_v56  ;;  %v17720_v7 = vld [vmem:[%s22455_s8 + $0x8c] sm:$0x1]  ;;  %v25117_v30 = vld [vmem:[%s22455_s8 + $0x88] sm:$0xf] }
 0x230   : > { %v3488_v23 = vshrl.u32 %v17715_v21, 16  ;;  %v3491_v46 = vshll.u32 %v17715_v21, 16  ;;  %v28835_v29 = vshll.u32 %v28834_v53, 16  ;;  %v3452_v27 = vsel %vm22737_vm9, %v3447_v10, %v3451_v39  ;;  %v21988_v39 = vld [vmem:[%s22455_s8 + $0xb4] sm:$0xff]   ;;  %20226 = vmatprep.mubr.msk.bf16.mxu0 %vm763_vm3, %v21986_v33 }
 0x231   : > { %v3462_v9 = vsel %vm22737_vm9, %v3457_v16, %v3461_v45  ;;  %v3480_v49 = vor.u32 %v3479_v13, %v3475_v43  ;;  %v3485_v42 = vrot.slane %v3483_v18, 5  ;;  %v3471_v36 = vrot.slane %v3470_v61, 4  ;;  %v21987_v10 = vld [vmem:[%s22455_s8 + $0x30] sm:$0xff]  }
 0x232   : > { %v3499_v47 = vrot.slane %v28835_v29, 5  ;;  %v25103_v54 = vcombine.low %v3452_v27, %v3462_v9  ;;  %v3490_v26 = vrot.slane %v3488_v23, 4  ;;  %v3493_v62 = vrot.slane %v3491_v46, 5  ;;  %19911 = vmatmul.mubr.msk.bf16.gmra.mrb[24].mxu1 %vm763_vm3, %v21985_v8  ;;  %v17723_v23 = vld [vmem:[%s22455_s8 + $0x98] sm:$0x1]  ;;  %v21989_v8 = vld [vmem:[%s22455_s8 + $0xc0] sm:$0xff]  }
 0x233   : > { %v3481_v24 = vrot.slane %v3480_v49, 4  ;;  %v28836_v37 = vshrl.u32 %v28834_v53, 16  ;;  %v3507_v35 = vshll.u32 %v17717_v52, 16  ;;  %v3512_v15 = vshrl.u32 %v17718_v3, 16  ;;  %19914 = vmatprep.mubr.msk.bf16.mxu1 %vm763_vm3, %v21988_v39  ;;  %v21990_v52 = vld [vmem:[%s22455_s8 + $0x3c] sm:$0xff]  }
 0x234   : > { %v3476_v6 = vsel %vm22737_vm9, %v3471_v36, %v3475_v43  ;;  %v3494_v14 = vor.u32 %v3493_v62, %v3490_v26  ;;  %v3515_v19 = vshll.u32 %v17718_v3, 16  ;;  %v28587_v2 = vshll.u32 %v25117_v30, 16  ;;  %v22188_v53 = vld [vmem:[%s22455_s8 + $0x94] sm:$0xf]  ;;  %v25147_v39 = vld [vmem:[%s28426_s1 + $0x22] sm:$0x3] }
 0x235   : > { %v3503_v4 = vrot.slane %v28836_v37, 4  ;;  %v3486_v56 = vsel %vm22737_vm9, %v3481_v24, %v3485_v42  ;;  %v3509_v63 = vrot.slane %v3507_v35, 5  ;;  %v3514_v21 = vrot.slane %v3512_v15, 4  ;;  %v17724_v42 = vld [vmem:[%s22455_s8 + $0x9c] sm:$0xf] }
 0x236   : > { %v25124_v43 = vcombine.low %v3476_v6, %v3486_v56  ;;  %v3495_v45 = vrot.slane %v3494_v14, 4  ;;  %v3517_v1 = vrot.slane %v3515_v19, 5  ;;  %v3523_v12 = vrot.slane %v28587_v2, 5  ;;  %v22197_v2 = vld [vmem:[%s22455_s8 + $0x24] sm:$0xe] }
 0x237   : > { %v3504_v55 = vor.u32 %v3503_v4, %v3499_v47  ;;  %v28591_v25 = vshrl.u32 %v25117_v30, 16  ;;  %v3531_v13 = vshll.u32 %v17720_v7, 16  ;;  %v3536_v18 = vshrl.u32 %v17721_v41, 16  ;;  %20227 = vmatmul.mubr.msk.bf16.vlgmr.msra.gmra.mrb[0].mxu0 %vm763_vm3, %v21987_v10  ;;  %v21991_v10 = vld [vmem:[%s22455_s8 + $0x48] sm:$0xff]  }
 0x238   : > { %v3500_v33 = vsel %vm22737_vm9, %v3495_v45, %v3499_v47  ;;  %v3518_v61 = vor.u32 %v3517_v1, %v3514_v21  ;;  %v3539_v46 = vshll.u32 %v17721_v41, 16  ;;  %v3545_v29 = vshll.u32 %v22188_v53, 16  ;;  %20259 = vmatpush3.bf16.msra.mxu0 %v24911_v32  ;;  %20230 = vmatprep.mubr.msk.bf16.mxu0 %vm763_vm3, %v21990_v52  ;;  %v25159_v1 = vld [vmem:[%s22455_s8 + $0xa0] sm:$0xf] }
 0x239   : > { %v3505_v16 = vrot.slane %v3504_v55, 4  ;;  %v3527_v27 = vrot.slane %v28591_v25, 4  ;;  %v3533_v9 = vrot.slane %v3531_v13, 5  ;;  %v3538_v49 = vrot.slane %v3536_v18, 4  ;;  %21890 = vmatprep.subr.msk.bf16.mxu0 %vm812_vm0, %v25147_v39  ;;  %v18356_v25 = vld [vmem:[%s22455_s8 + $0x6c] sm:$0xf] }
 0x23a   : > { %v3519_v26 = vrot.slane %v3518_v61, 4  ;;  %v3541_v62 = vrot.slane %v3539_v46, 5  ;;  %v3547_v47 = vrot.slane %v3545_v29, 5  ;;  %v3549_v37 = vshrl.u32 %v22188_v53, 16  ;;  %19915 = vmatmul.mubr.msk.bf16.gmra.mrb[28].mxu1 %vm763_vm3, %v21989_v8  ;;  %v21992_v61 = vld [vmem:[%s22455_s8 + $0x54] sm:$0xff]  }
 0x23b   : > { %v3510_v3 = vsel %vm22737_vm9, %v3505_v16, %v3509_v63  ;;  %v3528_v24 = vor.u32 %v3527_v27, %v3523_v12  ;;  %v3555_v4 = vshll.u32 %v17723_v23, 16  ;;  %v4698_v35 = vrot.slane %v3545_v29, 6  ;;  %v17726_v63 = vld [vmem:[%s22455_s8 + $0xa4] sm:$0x1]  ;;  %19920 = vmatprep.mubr.msk.bf16.mxu1 %vm763_vm3, %v24976_v51 }
 0x23c   : > { %v25142_v36 = vcombine.low %v3500_v33, %v3510_v3  ;;  %v3524_v15 = vsel %vm22737_vm9, %v3519_v26, %v3523_v12  ;;  %v3542_v6 = vor.u32 %v3541_v62, %v3538_v49  ;;  %v3560_v14 = vshrl.u32 %v17724_v42, 16  ;;  %v17727_v33 = vld [vmem:[%s22455_s8 + $0xa8] sm:$0xf]  ;;  %v25183_v62 = vld [vmem:[%s22455_s8 + $0xac] sm:$0xf] }
 0x23d   : > { %v3563_v7 = vshll.u32 %v17724_v42, 16  ;;  %v3529_v19 = vrot.slane %v3528_v24, 4  ;;  %v3551_v41 = vrot.slane %v3549_v37, 4  ;;  %v3557_v56 = vrot.slane %v3555_v4, 5  ;;  %v17729_v42 = vld [vmem:[%s22455_s8 + $0xb0] sm:$0x1] }
 0x23e   : > { %v4697_v55 = vrot.slane %v3549_v37, 5  ;;  %v3543_v32 = vrot.slane %v3542_v6, 4  ;;  %v3562_v21 = vrot.slane %v3560_v14, 4  ;;  %v28585_v12 = vshll.u32 %v25159_v1, 16  ;;  %v25192_v6 = vld [vmem:[%s22455_s8 + $0x28] sm:$0xf] }
 0x23f   : > { %v3565_v45 = vrot.slane %v3563_v7, 5  ;;  %v3534_v16 = vsel %vm22737_vm9, %v3529_v19, %v3533_v9  ;;  %v3552_v13 = vor.u32 %v3551_v41, %v3547_v47  ;;  %v28586_v52 = vshrl.u32 %v25159_v1, 16  ;;  %20231 = vmatmul.mubr.msk.bf16.gmra.mrb[4].mxu0 %vm763_vm3, %v21991_v10  ;;  %28837 = vst [vmem:[#allocation25_spill] sm:$0xff] %v25192_v6 }
 0x240   : > { %v25167_v18 = vor.u32 %v4698_v35, %v4697_v55  ;;  %v25172_v23 = vcombine.low %v3524_v15, %v3534_v16  ;;  %v3548_v46 = vsel %vm22737_vm9, %v3543_v32, %v3547_v47  ;;  %v3571_v51 = vrot.slane %v28585_v12, 5  ;;  %v18338_v15 = vld [vmem:[%s22455_s8 + $0x24] sm:$0xf]  ;;  %20234 = vmatprep.mubr.msk.bf16.mxu0 %vm763_vm3, %v21992_v61 }
 0x241   : > { %v3566_v53 = vor.u32 %v3565_v45, %v3562_v21  ;;  %v3553_v29 = vrot.slane %v3552_v13, 4  ;;  %v3575_v27 = vrot.slane %v28586_v52, 4  ;;  %v3579_v9 = vshll.u32 %v17726_v63, 16  ;;  %v18340_v45 = vld [vmem:[%s22455_s8 + $0x2c] sm:$0x1] }
 0x242   : > { %v3584_v8 = vshrl.u32 %v17727_v33, 16  ;;  %v3587_v26 = vshll.u32 %v17727_v33, 16  ;;  %v28582_v47 = vshll.u32 %v25183_v62, 16  ;;  %v28583_v35 = vshrl.u32 %v25183_v62, 16  ;;  %19921 = vmatmul.mubr.msk.bf16.vlgmr.msra.gmra.mrb[0].mxu1 %vm763_vm3, %v24996_v44  ;;  %v21993_v33 = vld [vmem:[%s22455_s8 + $0x60] sm:$0xff]  }
 0x243   : > { %v3567_v49 = vrot.slane %v3566_v53, 4  ;;  %v3558_v24 = vsel %vm22737_vm9, %v3553_v29, %v3557_v56  ;;  %v3576_v37 = vor.u32 %v3575_v27, %v3571_v51  ;;  %v3581_v4 = vrot.slane %v3579_v9, 5  ;;  %19924 = vmatprep.mubr.msk.bf16.mxu1 %vm763_vm3, %v25007_v28  ;;  %v18341_v44 = vld [vmem:[%s22455_s8 + $0x30] sm:$0xf] }
 0x244   : > { %v25195_v14 = vcombine.low %v3548_v46, %v3558_v24  ;;  %v3586_v19 = vrot.slane %v3584_v8, 4  ;;  %v3589_v41 = vrot.slane %v3587_v26, 5  ;;  %v3595_v56 = vrot.slane %v28582_v47, 5  ;;  %v21994_v29 = vld [vmem:[%s22455_s8 + $0x6c] sm:$0xff]   ;;  %v25218_v8 = vld [vmem:[%s22455_s8 + $0x34] sm:$0xf] }
 0x245   : > { %v3572_v7 = vsel %vm22737_vm9, %v3567_v49, %v3571_v51  ;;  %v3577_v55 = vrot.slane %v3576_v37, 4  ;;  %v3599_v32 = vrot.slane %v28583_v35, 4  ;;  %v3603_v63 = vshll.u32 %v17729_v42, 16  ;;  %28838 = vst [vmem:[#allocation26_spill] sm:$0xff] %v25218_v8  ;;  %v22195_v47 = vld [vmem:[%s22455_s8 + $0x1c] sm:$0xf] }
 0x246   : > { %v3590_v21 = vor.u32 %v3589_v41, %v3586_v19  ;;  %v8646_v10 = vshrl.u32 %v18338_v15, 16  ;;  %v8649_v16 = vshll.u32 %v18338_v15, 16  ;;  %v28572_v13 = vshll.u32 %v25192_v6, 16  ;;  %v18350_v35 = vld [vmem:[%s22455_s8 + $0x54] sm:$0xf] }
 0x247   : > { %v3582_v61 = vsel %vm22737_vm9, %v3577_v55, %v3581_v4  ;;  %v3600_v46 = vor.u32 %v3599_v32, %v3595_v56  ;;  %v3605_v53 = vrot.slane %v3603_v63, 5  ;;  %v28573_v51 = vshrl.u32 %v25192_v6, 16  ;;  %20235 = vmatmul.mubr.msk.bf16.gmra.mrb[8].mxu0 %vm763_vm3, %v21993_v33 }
 0x248   : > { %v25215_v27 = vcombine.low %v3572_v7, %v3582_v61  ;;  %v3591_v9 = vrot.slane %v3590_v21, 4  ;;  %v8648_v49 = vrot.slane %v8646_v10, 4  ;;  %v8651_v42 = vrot.slane %v8649_v16, 5  ;;  %v18343_v7 = vld [vmem:[%s22455_s8 + $0x38] sm:$0x1]  ;;  %20238 = vmatprep.mubr.msk.bf16.mxu0 %vm763_vm3, %v21994_v29 }
 0x249   : > { %v3601_v26 = vrot.slane %v3600_v46, 4  ;;  %v8657_v28 = vrot.slane %v28572_v13, 5  ;;  %v8661_v24 = vrot.slane %v28573_v51, 4  ;;  %v8665_v37 = vshll.u32 %v18340_v45, 16  ;;  %v17730_v10 = vld [vmem:[%s22455_s8 + $0xb4] sm:$0xf] }
 0x24a   : > { %v3596_v4 = vsel %vm22737_vm9, %v3591_v9, %v3595_v56  ;;  %v8652_v15 = vor.u32 %v8651_v42, %v8648_v49  ;;  %v8670_v19 = vshrl.u32 %v18341_v44, 16  ;;  %v8673_v41 = vshll.u32 %v18341_v44, 16  ;;  %19925 = vmatmul.mubr.msk.bf16.gmra.mrb[4].mxu1 %vm763_vm3, %v25031_v40  ;;  %v17732_v42 = vld [vmem:[%s22455_s8 + $0xbc] sm:$0x1] }
 0x24b   : > { %v3606_v55 = vsel %vm22737_vm9, %v3601_v26, %v3605_v53  ;;  %v8662_v32 = vor.u32 %v8661_v24, %v8657_v28  ;;  %v8667_v63 = vrot.slane %v8665_v37, 5  ;;  %v28570_v21 = vshll.u32 %v25218_v8, 16  ;;  %v21995_v24 = vld [vmem:[%s22455_s8 + $0x78] sm:$0xff]   ;;  %19928 = vmatprep.mubr.msk.bf16.mxu1 %vm763_vm3, %v25052_v50 }
 0x24c   : > { %v25233_v45 = vcombine.low %v3596_v4, %v3606_v55  ;;  %v8653_v56 = vrot.slane %v8652_v15, 4  ;;  %v8672_v16 = vrot.slane %v8670_v19, 4  ;;  %v8675_v61 = vrot.slane %v8673_v41, 5  ;;  %v17733_v15 = vld [vmem:[%s22455_s8 + $0xc0] sm:$0xf] }
 0x24d   : > { %v8663_v46 = vrot.slane %v8662_v32, 4  ;;  %v8681_v33 = vrot.slane %v28570_v21, 5  ;;  %v28571_v53 = vshrl.u32 %v25218_v8, 16  ;;  %v8689_v44 = vshll.u32 %v18343_v7, 16  ;;  %v21996_v7 = vld [vmem:[%s22455_s8 + $0x84] sm:$0xff]  }
 0x24e   : > { %v8658_v29 = vsel %vm22737_vm9, %v8653_v56, %v8657_v28  ;;  %v8676_v9 = vor.u32 %v8675_v61, %v8672_v16  ;;  %v25244_v49 = vsel %vm812_vm0, %v25147_v39, 0  ;;  %v3608_v26 = vshrl.u32 %v17730_v10, 16  ;;  %v25259_v55 = vld [vmem:[%s22455_s8 + $0xb8] sm:$0xf] }
 0x24f   : > { %v8668_v37 = vsel %vm22737_vm9, %v8663_v46, %v8667_v63  ;;  %v8685_v40 = vrot.slane %v28571_v53, 4  ;;  %v8691_v28 = vrot.slane %v8689_v44, 5  ;;  %v3611_v4 = vshll.u32 %v17730_v10, 16  ;;  %v25268_v46 = vld [vmem:[%s22455_s8 + $0xc8] sm:$0x1]  ;;  %20239 = vmatmul.mubr.msk.bf16.gmra.mrb[12].mxu0 %vm763_vm3, %v21995_v24 }
 0x250   : > { %v25256_v19 = vcombine.low %v8658_v29, %v8668_v37  ;;  %v8677_v39 = vrot.slane %v8676_v9, 4  ;;  %v3610_v41 = vrot.slane %v3608_v26, 4  ;;  %v28576_v32 = vshll.u32 %v25259_v55, 16  ;;  %20242 = vmatprep.mubr.msk.bf16.mxu0 %vm763_vm3, %v21996_v7  ;;  %v18344_v24 = vld [vmem:[%s22455_s8 + $0x3c] sm:$0xf] }
 0x251   : > { %v8686_v50 = vor.u32 %v8685_v40, %v8681_v33  ;;  %v3613_v56 = vrot.slane %v3611_v4, 5  ;;  %v28577_v63 = vshrl.u32 %v25259_v55, 16  ;;  %v3627_v16 = vshll.u32 %v17732_v42, 16  ;;  %v25275_v4 = vld [vmem:[%s22455_s8 + $0xc4] sm:$0xf] }
 0x252   : > { %v8682_v61 = vsel %vm22737_vm9, %v8677_v39, %v8681_v33  ;;  %v3619_v10 = vrot.slane %v28576_v32, 5  ;;  %v3632_v44 = vshrl.u32 %v17733_v15, 16  ;;  %v3635_v29 = vshll.u32 %v17733_v15, 16  ;;  %v25284_v7 = vld [vmem:[%s22455_s8 + $0x40] sm:$0xf]  ;;  %19929 = vmatmul.mubr.msk.bf16.gmra.mrb[8].mxu1 %vm763_vm3, %v25070_v20 }
 0x253   : > { %v8687_v9 = vrot.slane %v8686_v50, 4  ;;  %v3614_v26 = vor.u32 %v3613_v56, %v3610_v41  ;;  %v3623_v37 = vrot.slane %v28577_v63, 4  ;;  %v3629_v42 = vrot.slane %v3627_v16, 5  ;;  %19932 = vmatprep.mubr.msk.bf16.mxu1 %vm763_vm3, %v25088_v60 }
 0x254   : > { %v3634_v33 = vrot.slane %v3632_v44, 4  ;;  %v3637_v40 = vrot.slane %v3635_v29, 5  ;;  %v28574_v39 = vshll.u32 %v25275_v4, 16  ;;  %v28575_v15 = vshrl.u32 %v25275_v4, 16 }
 0x255   : > { %v8692_v41 = vsel %vm22737_vm9, %v8687_v9, %v8691_v28  ;;  %v3615_v50 = vrot.slane %v3614_v26, 4  ;;  %v3624_v56 = vor.u32 %v3623_v37, %v3619_v10  ;;  %v3651_v16 = vshll.u32 %v25268_v46, 16  ;;  %v25295_v9 = vld [vmem:[%s22455_s8 + $0x44] sm:$0x1]  ;;  %v21997_v26 = vld [vmem:[%s22455_s8 + $0x90] sm:$0xff]  }
 0x256   : > { %v25288_v44 = vcombine.low %v8682_v61, %v8692_v41  ;;  %v3638_v29 = vor.u32 %v3637_v40, %v3634_v33  ;;  %v3643_v21 = vrot.slane %v28574_v39, 5  ;;  %v3647_v28 = vrot.slane %v28575_v15, 4  ;;  %v21998_v33 = vld [vmem:[%s22455_s8 + $0x9c] sm:$0xff]   ;;  %v18347_v39 = vld [vmem:[%s22455_s8 + $0x48] sm:$0xf] }
 0x257   : > { %v3620_v20 = vsel %vm22737_vm9, %v3615_v50, %v3619_v10  ;;  %v3625_v61 = vrot.slane %v3624_v56, 4  ;;  %v3653_v37 = vrot.slane %v3651_v16, 5  ;;  %v8694_v41 = vshrl.u32 %v18344_v24, 16  ;;  %v25310_v10 = vld [vmem:[%s22455_s8 + $0x4c] sm:$0xf]  ;;  %20243 = vmatmul.mubr.msk.bf16.gmra.mrb[16].mxu0 %vm763_vm3, %v21997_v26 }
 0x258   : > { %v3639_v40 = vrot.slane %v3638_v29, 4  ;;  %v3648_v53 = vor.u32 %v3647_v28, %v3643_v21  ;;  %v8697_v13 = vshll.u32 %v18344_v24, 16  ;;  %v28578_v51 = vshll.u32 %v25284_v7, 16  ;;  %20246 = vmatprep.mubr.msk.bf16.mxu0 %vm763_vm3, %v21998_v33 }
 0x259   : > { %v3630_v15 = vsel %vm22737_vm9, %v3625_v61, %v3629_v42  ;;  %v8696_v32 = vrot.slane %v8694_v41, 4  ;;  %v28581_v60 = vshrl.u32 %v25284_v7, 16  ;;  %v8713_v63 = vshll.u32 %v25295_v9, 16  ;;  %v25322_v61 = vld [vmem:[%s22455_s8 + $0x50] sm:$0x1] }
 0x25a   : > { %v25312_v50 = vcombine.low %v3620_v20, %v3630_v15  ;;  %v3644_v56 = vsel %vm22737_vm9, %v3639_v40, %v3643_v21  ;;  %v3649_v24 = vrot.slane %v3648_v53, 4  ;;  %v8699_v16 = vrot.slane %v8697_v13, 5  ;;  %19933 = vmatmul.mubr.msk.bf16.gmra.mrb[12].mxu1 %vm763_vm3, %v25103_v54 }
 0x25b   : > { %v8705_v29 = vrot.slane %v28578_v51, 5  ;;  %v8709_v42 = vrot.slane %v28581_v60, 4  ;;  %v8715_v28 = vrot.slane %v8713_v63, 5  ;;  %v8718_v41 = vshrl.u32 %v18347_v39, 16  ;;  %19936 = vmatprep.mubr.msk.bf16.mxu1 %vm763_vm3, %v25124_v43  ;;  %v22194_v43 = vld [vmem:[%s22455_s8 + $0x10] sm:$0xf] }
 0x25c   : > { %v3654_v21 = vsel %vm22737_vm9, %v3649_v24, %v3653_v37  ;;  %v8700_v53 = vor.u32 %v8699_v16, %v8696_v32  ;;  %v8721_v13 = vshll.u32 %v18347_v39, 16  ;;  %v28579_v15 = vshll.u32 %v25310_v10, 16  ;;  %v21999_v37 = vld [vmem:[%s22455_s8 + $0xa8] sm:$0xff]  }
 0x25d   : > { %v25328_v26 = vcombine.low %v3644_v56, %v3654_v21  ;;  %v8710_v20 = vor.u32 %v8709_v42, %v8705_v29  ;;  %v8720_v40 = vrot.slane %v8718_v41, 4  ;;  %v28580_v63 = vshrl.u32 %v25310_v10, 16  ;;  %v22193_v16 = vld [vmem:[%s22455_s8 + $0xc] sm:$0xe]  ;;  %v22000_v41 = vld [vmem:[%s22455_s8 + $0xb4] sm:$0xff]  }
 0x25e   : > { %v8701_v51 = vrot.slane %v8700_v53, 4  ;;  %v8723_v33 = vrot.slane %v8721_v13, 5  ;;  %v8729_v32 = vrot.slane %v28579_v15, 5  ;;  %v8737_v39 = vshll.u32 %v25322_v61, 16 }
 0x25f   : > { %v8711_v56 = vrot.slane %v8710_v20, 4  ;;  %v8733_v24 = vrot.slane %v28580_v63, 4  ;;  %v4224_v54 = vsel %vm812_vm0, %v24917_v58, 0  ;;  %v17785_v42 = vrot.slane %v22193_v16, 9  ;;  %20247 = vmatmul.mubr.msk.bf16.gmra.mrb[20].mxu0 %vm763_vm3, %v21999_v37 }
 0x260   : > { %v8706_v21 = vsel %vm22737_vm9, %v8701_v51, %v8705_v29  ;;  %v8724_v53 = vor.u32 %v8723_v33, %v8720_v40  ;;  %v8739_v13 = vrot.slane %v8737_v39, 5  ;;  %19953 = vmatpush3.bf16.msra.mxu1 %v4224_v54  ;;  %v4015_v15 = vrot.slane %v22194_v43, 5  ;;  %v22196_v51 = vld [vmem:[%s28426_s1 + $0x10] sm:$0x3]  ;;  %v28839_v39 = vld [vmem:[#allocation10_spill] sm:$0xff]  ;;  %20250 = vmatprep.mubr.msk.bf16.mxu0 %vm763_vm3, %v22000_v41 }
 0x261   : > { %v8716_v20 = vsel %vm22737_vm9, %v8711_v56, %v8715_v28  ;;  %v8734_v63 = vor.u32 %v8733_v24, %v8729_v32  ;;  %v4018_v60 = vrot.slane %v24901_v5, 5  ;;  %v4022_v58 = vrot.slane %v22195_v47, 5  ;;  %21881 = vmatprep.subr.msk.bf16.mxu1 %vm812_vm0, %v22196_v51  ;;  %v25364_v5 = vld [vmem:[%s22455_s8 + $0x58] sm:$0xf]  ;;  %v25395_v41 = vld [vmem:[%s22455_s8 + $0x64] sm:$0xf] }
 0x262   : > { %v25357_v29 = vcombine.low %v8706_v21, %v8716_v20  ;;  %v8725_v40 = vrot.slane %v8724_v53, 4  ;;  %v25361_v28 = vsel %vm23312_vm12, %v17785_v42, %v4015_v15  ;;  %v4017_v33 = vrot.slane %v4015_v15, 4  ;;  %v18353_v53 = vld [vmem:[%s22455_s8 + $0x60] sm:$0xf]  ;;  %19937 = vmatmul.mubr.msk.bf16.gmra.mrb[16].mxu1 %vm763_vm3, %v25142_v36  ;;  %v25404_v51 = vld [vmem:[%s22455_s8 + $0x68] sm:$0x1] }
 0x263   : > { %v8735_v47 = vrot.slane %v8734_v63, 4  ;;  %v28840_v56 = vrot.slane %v28839_v39, 9  ;;  %v4024_v54 = vrot.slane %v4022_v58, 4  ;;  %v4025_v16 = vrot.slane %v24926_v22, 5  ;;  %v25382_v63 = vld [vmem:[%s22455_s8 + $0x5c] sm:$0x1]  ;;  %19940 = vmatprep.mubr.msk.bf16.mxu1 %vm763_vm3, %v25172_v23 }
 0x264   : > { %v8730_v15 = vsel %vm22737_vm9, %v8725_v40, %v8729_v32  ;;  %v25379_v37 = vsel %vm23312_vm12, %v4017_v33, %v4018_v60  ;;  %v8742_v42 = vshrl.u32 %v18350_v35, 16  ;;  %v8745_v21 = vshll.u32 %v18350_v35, 16  ;;  %v22001_v40 = vld [vmem:[%s22455_s8 + $0xc0] sm:$0xff]  }
 0x265   : > { %v25371_v24 = vsel %vm23312_vm12, %v28840_v56, %v4022_v58  ;;  %v8740_v43 = vsel %vm22737_vm9, %v8735_v47, %v8739_v13  ;;  %v25391_v32 = vsel %vm23312_vm12, %v4024_v54, %v4025_v16  ;;  %v28584_v60 = vshll.u32 %v25364_v5, 16  ;;  %v22002_v56 = vld [vmem:[%s22455_s8 + $0xcc] sm:$0xff]   ;;  %v18362_v22 = vld [vmem:[%s22455_s8 + $0x84] sm:$0xf] }
 0x266   : > { %v25399_v35 = vcombine.low %v8730_v15, %v8740_v43  ;;  %v8744_v20 = vrot.slane %v8742_v42, 4  ;;  %v8747_v58 = vrot.slane %v8745_v21, 5  ;;  %v28588_v47 = vshrl.u32 %v25364_v5, 16 }
 0x267   : > { %v8753_v33 = vrot.slane %v28584_v60, 5  ;;  %v8761_v36 = vshll.u32 %v25382_v63, 16  ;;  %v8766_v39 = vshrl.u32 %v18353_v53, 16  ;;  %v8769_v16 = vshll.u32 %v18353_v53, 16  ;;  %20251 = vmatmul.mubr.msk.bf16.gmra.mrb[24].mxu0 %vm763_vm3, %v22001_v40 }
 0x268   : > { %v8748_v54 = vor.u32 %v8747_v58, %v8744_v20  ;;  %v28589_v15 = vshll.u32 %v25395_v41, 16  ;;  %v28590_v42 = vshrl.u32 %v25395_v41, 16  ;;  %v8757_v23 = vrot.slane %v28588_v47, 4  ;;  %20254 = vmatprep.mubr.msk.bf16.mxu0 %vm763_vm3, %v22002_v56  ;;  %v22003_v56 = vld [vmem:[%s22455_s8 + $0xd8] sm:$0xff]  }
 0x269   : > { %v8763_v21 = vrot.slane %v8761_v36, 5  ;;  %v8768_v43 = vrot.slane %v8766_v39, 4  ;;  %v8785_v60 = vshll.u32 %v25404_v51, 16  ;;  %v8771_v52 = vrot.slane %v8769_v16, 5  ;;  %v22198_v39 = vld [vmem:[%s22455_s8 + $0x28] sm:$0xf] }
 0x26a   : > { %v8749_v12 = vrot.slane %v8748_v54, 4  ;;  %v8777_v3 = vrot.slane %v28589_v15, 5  ;;  %v8781_v53 = vrot.slane %v28590_v42, 4  ;;  %v8758_v20 = vor.u32 %v8757_v23, %v8753_v33  ;;  %v22199_v23 = vld [vmem:[%s22455_s8 + $0x30] sm:$0xe]  ;;  %19941 = vmatmul.mubr.msk.bf16.gmra.mrb[20].mxu1 %vm763_vm3, %v25195_v14 }
 0x26b   : > { %v8787_v58 = vrot.slane %v8785_v60, 5  ;;  %v17787_v36 = vrot.slane %v22197_v2, 9  ;;  %v4029_v47 = vrot.slane %v22198_v39, 5  ;;  %v8772_v16 = vor.u32 %v8771_v52, %v8768_v43  ;;  %19944 = vmatprep.mubr.msk.bf16.mxu1 %vm763_vm3, %v25215_v27  ;;  %v25450_v14 = vld [vmem:[%s22455_s8 + $0x70] sm:$0xf] }
 0x26c   : > { %v8754_v54 = vsel %vm22737_vm9, %v8749_v12, %v8753_v33  ;;  %v8782_v15 = vor.u32 %v8781_v53, %v8777_v3  ;;  %v4032_v42 = vrot.slane %v24955_v38, 5  ;;  %v8759_v40 = vrot.slane %v8758_v20, 4  ;;  %v22200_v38 = vld [vmem:[%s22455_s8 + $0x34] sm:$0xf] }
 0x26d   : > { %v25433_v60 = vsel %vm23312_vm12, %v17787_v36, %v4029_v47  ;;  %v4031_v2 = vrot.slane %v4029_v47, 4  ;;  %v17788_v39 = vrot.slane %v22199_v23, 9  ;;  %v8773_v12 = vrot.slane %v8772_v16, 4  ;;  %v25453_v20 = vld [vmem:[%s22455_s8 + $0x74] sm:$0x1] }
 0x26e   : > { %v8783_v52 = vrot.slane %v8782_v15, 4  ;;  %v4036_v33 = vrot.slane %v22200_v38, 5  ;;  %v4039_v43 = vrot.slane %v24973_v59, 5  ;;  %v8764_v47 = vsel %vm22737_vm9, %v8759_v40, %v8763_v21  ;;  %v25465_v40 = vld [vmem:[%s22455_s8 + $0x7c] sm:$0xf] }
 0x26f   : > { %v25447_v53 = vsel %vm23312_vm12, %v4031_v2, %v4032_v42  ;;  %v8790_v15 = vshrl.u32 %v18356_v25, 16  ;;  %v8793_v36 = vshll.u32 %v18356_v25, 16  ;;  %v25455_v16 = vcombine.low %v8754_v54, %v8764_v47  ;;  %v18359_v42 = vld [vmem:[%s22455_s8 + $0x78] sm:$0xf]  ;;  %20255 = vmatmul.mubr.msk.bf16.gmra.mrb[28].mxu0 %vm763_vm3, %v22003_v56  ;;  %v25482_v47 = vld [vmem:[%s22455_s8 + $0x80] sm:$0x1] }
 0x270   : > { %v8778_v59 = vsel %vm22737_vm9, %v8773_v12, %v8777_v3  ;;  %v8788_v27 = vsel %vm22737_vm9, %v8783_v52, %v8787_v58  ;;  %v25471_v25 = vsel %vm23312_vm12, %v17788_v39, %v4036_v33  ;;  %v4038_v54 = vrot.slane %v4036_v33, 4  ;;  %20260 = vmatprep.mubr.msk.bf16.mxu0 %vm763_vm3, %v25256_v19 }
 0x271   : > { %v25467_v2 = vcombine.low %v8778_v59, %v8788_v27  ;;  %v8792_v23 = vrot.slane %v8790_v15, 4  ;;  %v8795_v38 = vrot.slane %v8793_v36, 5  ;;  %v28592_v3 = vshll.u32 %v25450_v14, 16 }
 0x272   : > { %v28594_v12 = vshrl.u32 %v25450_v14, 16  ;;  %v8809_v58 = vshll.u32 %v25453_v20, 16  ;;  %v25479_v52 = vsel %vm23312_vm12, %v4038_v54, %v4039_v43  ;;  %v8814_v59 = vshrl.u32 %v18359_v42, 16  ;;  %19945 = vmatmul.mubr.msk.bf16.gmra.mrb[24].mxu1 %vm763_vm3, %v25233_v45 }
 0x273   : > { %v8817_v39 = vshll.u32 %v18359_v42, 16  ;;  %v28593_v33 = vshll.u32 %v25465_v40, 16  ;;  %v8796_v36 = vor.u32 %v8795_v38, %v8792_v23  ;;  %v8801_v56 = vrot.slane %v28592_v3, 5  ;;  %19948 = vmatprep.mubr.msk.bf16.mxu1 %vm763_vm3, %v25312_v50  ;;  %v22202_v3 = vld [vmem:[%s22455_s8 + $0x40] sm:$0xf] }
 0x274   : > { %v8805_v43 = vrot.slane %v28594_v12, 4  ;;  %v8811_v27 = vrot.slane %v8809_v58, 5  ;;  %v8816_v54 = vrot.slane %v8814_v59, 4  ;;  %v28596_v23 = vshrl.u32 %v25465_v40, 16  ;;  %v22201_v59 = vld [vmem:[%s22455_s8 + $0x3c] sm:$0xe] }
 0x275   : > { %v8819_v42 = vrot.slane %v8817_v39, 5  ;;  %v8825_v21 = vrot.slane %v28593_v33, 5  ;;  %v8797_v19 = vrot.slane %v8796_v36, 4  ;;  %v8833_v38 = vshll.u32 %v25482_v47, 16 }
 0x276   : > { %v8806_v15 = vor.u32 %v8805_v43, %v8801_v56  ;;  %v17789_v39 = vrot.slane %v22201_v59, 9  ;;  %v4043_v33 = vrot.slane %v22202_v3, 5  ;;  %v4046_v12 = vrot.slane %v25003_v48, 5  ;;  %v22203_v3 = vld [vmem:[%s22455_s8 + $0x48] sm:$0xe] }
 0x277   : > { %v8820_v58 = vor.u32 %v8819_v42, %v8816_v54  ;;  %v8802_v45 = vsel %vm22737_vm9, %v8797_v19, %v8801_v56  ;;  %v8829_v43 = vrot.slane %v28596_v23, 4  ;;  %v8835_v13 = vrot.slane %v8833_v38, 5  ;;  %v25519_v38 = vld [vmem:[%s22455_s8 + $0x88] sm:$0xf]  ;;  %20261 = vmatmul.mubr.msk.bf16.vlgmr.msra.gmra.mrb[0].mxu0 %vm763_vm3, %v25288_v44 }
 0x278   : > { %v8807_v36 = vrot.slane %v8806_v15, 4  ;;  %v25511_v50 = vsel %vm23312_vm12, %v17789_v39, %v4043_v33  ;;  %v4045_v54 = vrot.slane %v4043_v33, 4  ;;  %v17790_v48 = vrot.slane %v22203_v3, 9  ;;  %v22204_v15 = vld [vmem:[%s22455_s8 + $0x4c] sm:$0xf]  ;;  %20293 = vmatpush3.bf16.msra.mxu0 %v25244_v49  ;;  %20264 = vmatprep.mubr.msk.bf16.mxu0 %vm763_vm3, %v25357_v29 }
 0x279   : > { %v8821_v31 = vrot.slane %v8820_v58, 4  ;;  %v8830_v56 = vor.u32 %v8829_v43, %v8825_v21  ;;  %v4050_v19 = vrot.slane %v22204_v15, 5  ;;  %v4053_v59 = vrot.slane %v25016_v11, 5  ;;  %v25524_v58 = vld [vmem:[%s28426_s1 + $0x24] sm:$0x3] }
 0x27a   : > { %v8812_v42 = vsel %vm22737_vm9, %v8807_v36, %v8811_v27  ;;  %v25534_v39 = vsel %vm23312_vm12, %v4045_v54, %v4046_v12  ;;  %v25537_v11 = vld [vmem:[%s22455_s8 + $0x8c] sm:$0x1]  ;;  %v8838_v36 = vshrl.u32 %v18362_v22, 16  ;;  %v18365_v43 = vld [vmem:[%s22455_s8 + $0x90] sm:$0xf]  ;;  %v8841_v54 = vshll.u32 %v18362_v22, 16  ;;  %21891 = vmatprep.subr.msk.bf16.mxu0 %vm812_vm0, %v25524_v58  ;;  %19949 = vmatmul.mubr.msk.bf16.gmra.mrb[28].mxu1 %vm763_vm3, %v25328_v26 }
 0x27b   : > { %v25528_v33 = vcombine.low %v8802_v45, %v8812_v42  ;;  %v8826_v27 = vsel %vm22737_vm9, %v8821_v31, %v8825_v21  ;;  %v8831_v44 = vrot.slane %v8830_v56, 4  ;;  %v25547_v31 = vsel %vm23312_vm12, %v17790_v48, %v4050_v19  ;;  %v25563_v22 = vld [vmem:[%s22455_s8 + $0x94] sm:$0xf]  ;;  %v25566_v56 = vld [vmem:[%s22455_s8 + $0x98] sm:$0x1] }
 0x27c   : > { %v4052_v21 = vrot.slane %v4050_v19, 4  ;;  %v8840_v12 = vrot.slane %v8838_v36, 4  ;;  %v28599_v3 = vshll.u32 %v25519_v38, 16  ;;  %v28604_v42 = vshrl.u32 %v25519_v38, 16 }
 0x27d   : > { %v8836_v49 = vsel %vm22737_vm9, %v8831_v44, %v8835_v13  ;;  %v8857_v48 = vshll.u32 %v25537_v11, 16  ;;  %v8862_v15 = vshrl.u32 %v18365_v43, 16  ;;  %v28841_v19 = vcombine.low %v25361_v28, %v25379_v37 }
 0x27e   : > { %v25559_v29 = vsel %vm23312_vm12, %v4052_v21, %v4053_v59  ;;  %v25572_v26 = vcombine.low %v8826_v27, %v8836_v49  ;;  %v8843_v59 = vrot.slane %v8841_v54, 5  ;;  %v8849_v36 = vrot.slane %v28599_v3, 5  ;;  %v22205_v54 = vld [vmem:[%s22455_s8 + $0x54] sm:$0xe]  ;;  %v22206_v3 = vld [vmem:[%s22455_s8 + $0x58] sm:$0xf] }
 0x27f   : > { %19954 = vmatprep.mubr.msk.bf16.mxu1 %vm763_vm3, %v28841_v19  ;;  %v8853_v44 = vrot.slane %v28604_v42, 4  ;;  %v8859_v21 = vrot.slane %v8857_v48, 5  ;;  %v8864_v23 = vrot.slane %v8862_v15, 4  ;;  %v8865_v45 = vshll.u32 %v18365_v43, 16  ;;  %20265 = vmatmul.mubr.msk.bf16.gmra.mrb[4].mxu0 %vm763_vm3, %v25399_v35 }
 0x280   : > { %v8844_v28 = vor.u32 %v8843_v59, %v8840_v12  ;;  %v28602_v37 = vshll.u32 %v25563_v22, 16  ;;  %v28603_v27 = vshrl.u32 %v25563_v22, 16  ;;  %v8881_v49 = vshll.u32 %v25566_v56, 16  ;;  %20268 = vmatprep.mubr.msk.bf16.mxu0 %vm763_vm3, %v25455_v16 }
 0x281   : > { %v8854_v19 = vor.u32 %v8853_v44, %v8849_v36  ;;  %v8867_v13 = vrot.slane %v8865_v45, 5  ;;  %v17791_v8 = vrot.slane %v22205_v54, 9  ;;  %v4057_v6 = vrot.slane %v22206_v3, 5  ;;  %v18368_v44 = vld [vmem:[%s22455_s8 + $0x9c] sm:$0xf] }
 0x282   : > { %v8845_v43 = vrot.slane %v8844_v28, 4  ;;  %v8873_v12 = vrot.slane %v28602_v37, 5  ;;  %v8877_v48 = vrot.slane %v28603_v27, 4  ;;  %v8883_v15 = vrot.slane %v8881_v49, 5  ;;  %v22207_v37 = vld [vmem:[%s22455_s8 + $0x5c] sm:$0x1] }
 0x283   : > { %v8855_v45 = vrot.slane %v8854_v19, 4  ;;  %v8868_v59 = vor.u32 %v8867_v13, %v8864_v23  ;;  %v25595_v3 = vsel %vm23312_vm12, %v17791_v8, %v4057_v6  ;;  %v4059_v35 = vrot.slane %v4057_v6, 4  ;;  %v22208_v27 = vld [vmem:[%s22455_s8 + $0x60] sm:$0xe]  ;;  %v22209_v6 = vld [vmem:[%s22455_s8 + $0x64] sm:$0xf] }
 0x284   : > { %v8850_v28 = vsel %vm22737_vm9, %v8845_v43, %v8849_v36  ;;  %v8878_v54 = vor.u32 %v8877_v48, %v8873_v12  ;;  %v4060_v49 = vrot.slane %v22207_v37, 5  ;;  %v17792_v42 = vrot.slane %v22208_v27, 9  ;;  %v25611_v19 = vld [vmem:[%s22455_s8 + $0xa0] sm:$0xf]  ;;  %v25624_v27 = vld [vmem:[%s22455_s8 + $0xa4] sm:$0x1] }
 0x285   : > { %v28842_v16 = vcombine.low %v25371_v24, %v25391_v32  ;;  %v8860_v8 = vsel %vm22737_vm9, %v8855_v45, %v8859_v21  ;;  %v8869_v23 = vrot.slane %v8868_v59, 4  ;;  %v4064_v13 = vrot.slane %v22209_v6, 5  ;;  %v28844_v48 = vld [vmem:[#allocation8_spill] sm:$0xff]  ;;  %v25651_v6 = vld [vmem:[%s22455_s8 + $0xb0] sm:$0x1] }
 0x286   : > { %v4067_v36 = vrot.slane %v25057_v17, 5  ;;  %v28843_v37 = vcombine.low %v25433_v60, %v25447_v53  ;;  %v25617_v24 = vcombine.low %v8850_v28, %v8860_v8  ;;  %v8879_v32 = vrot.slane %v8878_v54, 4  ;;  %v18371_v59 = vld [vmem:[%s22455_s8 + $0xa8] sm:$0xf]  ;;  %28845 = vst [vmem:[#allocation27_spill] sm:$0xff] %v25651_v6 }
 0x287   : > { %19955 = vmatmul.mubr.msk.bf16.vlgmr.msra.gmra.mrb[0].mxu1 %vm763_vm3, %v28842_v16  ;;  %v25621_v21 = vsel %vm23312_vm12, %v4059_v35, %v4060_v49  ;;  %v8886_v43 = vshrl.u32 %v18368_v44, 16  ;;  %v8874_v17 = vsel %vm22737_vm9, %v8869_v23, %v8873_v12  ;;  %v25633_v53 = vsel %vm23312_vm12, %v17792_v42, %v4064_v13  ;;  %v25640_v16 = vld [vmem:[%s22455_s8 + $0xac] sm:$0xf]  ;;  %20269 = vmatmul.mubr.msk.bf16.gmra.mrb[8].mxu0 %vm763_vm3, %v25467_v2 }
 0x288   : > { %19958 = vmatprep.mubr.msk.bf16.mxu1 %vm763_vm3, %v28843_v37  ;;  %20911 = vmatpush3.bf16.msra.mxu1 %v28844_v48  ;;  %v4066_v45 = vrot.slane %v4064_v13, 4  ;;  %v8884_v35 = vsel %vm22737_vm9, %v8879_v32, %v8883_v15  ;;  %v8889_v54 = vshll.u32 %v18368_v44, 16  ;;  %v28605_v49 = vshll.u32 %v25611_v19, 16 }
 0x289   : > { %v8888_v28 = vrot.slane %v8886_v43, 4  ;;  %v25642_v8 = vcombine.low %v8874_v17, %v8884_v35  ;;  %v28606_v42 = vshrl.u32 %v25611_v19, 16  ;;  %v8905_v23 = vshll.u32 %v25624_v27, 16  ;;  %20272 = vmatprep.mubr.msk.bf16.mxu0 %vm763_vm3, %v25528_v33 }
 0x28a   : > { %v25646_v12 = vsel %vm23312_vm12, %v4066_v45, %v4067_v36  ;;  %v8891_v44 = vrot.slane %v8889_v54, 5  ;;  %v8897_v13 = vrot.slane %v28605_v49, 5  ;;  %v8910_v37 = vshrl.u32 %v18371_v59, 16 }
 0x28b   : > { %v8901_v36 = vrot.slane %v28606_v42, 4  ;;  %v8907_v32 = vrot.slane %v8905_v23, 5  ;;  %v8913_v43 = vshll.u32 %v18371_v59, 16  ;;  %v28607_v2 = vshll.u32 %v25640_v16, 16  ;;  %v22210_v23 = vld [vmem:[%s22455_s8 + $0x6c] sm:$0xe] }
 0x28c   : > { %v8892_v48 = vor.u32 %v8891_v44, %v8888_v28  ;;  %v8912_v17 = vrot.slane %v8910_v37, 4  ;;  %v28612_v45 = vshrl.u32 %v25640_v16, 16  ;;  %v8929_v35 = vshll.u32 %v25651_v6, 16  ;;  %v18374_v6 = vld [vmem:[%s22455_s8 + $0xb4] sm:$0xf] }
 0x28d   : > { %v28846_v54 = vcombine.low %v25471_v25, %v25479_v52  ;;  %v8902_v33 = vor.u32 %v8901_v36, %v8897_v13  ;;  %v8915_v49 = vrot.slane %v8913_v43, 5  ;;  %v8921_v59 = vrot.slane %v28607_v2, 5  ;;  %v22212_v2 = vld [vmem:[%s22455_s8 + $0x74] sm:$0x1] }
 0x28e   : > { %v17793_v28 = vrot.slane %v22210_v23, 9  ;;  %v28847_v44 = vcombine.low %v25511_v50, %v25534_v39  ;;  %v8893_v37 = vrot.slane %v8892_v48, 4  ;;  %v8925_v25 = vrot.slane %v28612_v45, 4  ;;  %v22213_v23 = vld [vmem:[%s22455_s8 + $0x78] sm:$0xe] }
 0x28f   : > { %19959 = vmatmul.mubr.msk.bf16.gmra.mrb[4].mxu1 %vm763_vm3, %v28846_v54  ;;  %v8931_v52 = vrot.slane %v8929_v35, 5  ;;  %v22211_v54 = vld [vmem:[%s22455_s8 + $0x70] sm:$0xf]  ;;  %v8903_v43 = vrot.slane %v8902_v33, 4  ;;  %v8916_v42 = vor.u32 %v8915_v49, %v8912_v17  ;;  %v4074_v15 = vrot.slane %v22212_v2, 5  ;;  %20273 = vmatmul.mubr.msk.bf16.gmra.mrb[12].mxu0 %vm763_vm3, %v25572_v26 }
 0x290   : > { %19962 = vmatprep.mubr.msk.bf16.mxu1 %vm763_vm3, %v28847_v44  ;;  %v4071_v36 = vrot.slane %v22211_v54, 5  ;;  %v17794_v60 = vrot.slane %v22213_v23, 9  ;;  %v8898_v50 = vsel %vm22737_vm9, %v8893_v37, %v8897_v13  ;;  %v8926_v39 = vor.u32 %v8925_v25, %v8921_v59  ;;  %v22214_v17 = vld [vmem:[%s22455_s8 + $0x7c] sm:$0xf]  ;;  %v22215_v44 = vld [vmem:[%s22455_s8 + $0x80] sm:$0x1]  ;;  %20276 = vmatprep.mubr.msk.bf16.mxu0 %vm763_vm3, %v25617_v24 }
 0x291   : > { %v8908_v33 = vsel %vm22737_vm9, %v8903_v43, %v8907_v32  ;;  %v8917_v49 = vrot.slane %v8916_v42, 4  ;;  %v4078_v2 = vrot.slane %v22214_v17, 5  ;;  %v4081_v54 = vrot.slane %v22215_v44, 5  ;;  %v25694_v23 = vld [vmem:[%s22455_s8 + $0xb8] sm:$0xf] }
 0x292   : > { %v25687_v48 = vsel %vm23312_vm12, %v17793_v28, %v4071_v36  ;;  %v4073_v35 = vrot.slane %v4071_v36, 4  ;;  %v18397_v13 = vcombine.low %v8898_v50, %v8908_v33  ;;  %v8927_v37 = vrot.slane %v8926_v39, 4  ;;  %v25703_v25 = vld [vmem:[%s22455_s8 + $0xbc] sm:$0x1]  ;;  %v25720_v33 = vld [vmem:[%s22455_s8 + $0xc4] sm:$0xf] }
 0x293   : > { %v8934_v42 = vshrl.u32 %v18374_v6, 16  ;;  %v8922_v32 = vsel %vm22737_vm9, %v8917_v49, %v8921_v59  ;;  %v25713_v36 = vsel %vm23312_vm12, %v17794_v60, %v4078_v2  ;;  %v4080_v43 = vrot.slane %v4078_v2, 4 }
 0x294   : > { %v25700_v28 = vsel %vm23312_vm12, %v4073_v35, %v4074_v15  ;;  %v18377_v15 = vld [vmem:[%s22455_s8 + $0xc0] sm:$0xf]  ;;  %v8932_v50 = vsel %vm22737_vm9, %v8927_v37, %v8931_v52  ;;  %v8937_v35 = vshll.u32 %v18374_v6, 16  ;;  %v28609_v24 = vshll.u32 %v25694_v23, 16  ;;  %v25735_v6 = vld [vmem:[%s22455_s8 + $0xc8] sm:$0x1] }
 0x295   : > { %v17810_v26 = vcombine.low %v25687_v48, %v25700_v28  ;;  %v8936_v39 = vrot.slane %v8934_v42, 4  ;;  %v28848_v59 = vcombine.low %v25547_v31, %v25559_v29  ;;  %v25726_v48 = vcombine.low %v8922_v32, %v8932_v50 }
 0x296   : > { %v25730_v60 = vsel %vm23312_vm12, %v4080_v43, %v4081_v54  ;;  %v28610_v52 = vshrl.u32 %v25694_v23, 16  ;;  %v8953_v49 = vshll.u32 %v25703_v25, 16  ;;  %v28849_v17 = vcombine.low %v25595_v3, %v25621_v21  ;;  %v25746_v54 = vld [vmem:[%s22455_s8 + $0x84] sm:$0xe] }
 0x297   : > { %19963 = vmatmul.mubr.msk.bf16.gmra.mrb[8].mxu1 %vm763_vm3, %v28848_v59  ;;  %v8939_v29 = vrot.slane %v8937_v35, 5  ;;  %v8945_v2 = vrot.slane %v28609_v24, 5  ;;  %v8958_v44 = vshrl.u32 %v18377_v15, 16  ;;  %v8961_v42 = vshll.u32 %v18377_v15, 16  ;;  %v17780_v35 = vld [vmem:[%s22455_s8 + $0x90] sm:$0xe]  ;;  %20277 = vmatmul.mubr.msk.bf16.gmra.mrb[16].mxu0 %vm763_vm3, %v25642_v8 }
 0x298   : > { %19966 = vmatprep.mubr.msk.bf16.mxu1 %vm763_vm3, %v28849_v17  ;;  %v8949_v37 = vrot.slane %v28610_v52, 4  ;;  %v8955_v28 = vrot.slane %v8953_v49, 5  ;;  %v28611_v3 = vshll.u32 %v25720_v33, 16  ;;  %v28613_v43 = vshrl.u32 %v25720_v33, 16  ;;  %20280 = vmatprep.mubr.msk.bf16.mxu0 %vm763_vm3, %v18397_v13 }
 0x299   : > { %v8940_v21 = vor.u32 %v8939_v29, %v8936_v39  ;;  %v8960_v32 = vrot.slane %v8958_v44, 4  ;;  %v8977_v50 = vshll.u32 %v25735_v6, 16  ;;  %v8963_v17 = vrot.slane %v8961_v42, 5  ;;  %v22216_v29 = vld [vmem:[%s22455_s8 + $0x88] sm:$0xf] }
 0x29a   : > { %v8950_v59 = vor.u32 %v8949_v37, %v8945_v2  ;;  %v8969_v24 = vrot.slane %v28611_v3, 5  ;;  %v17795_v52 = vrot.slane %v25746_v54, 9  ;;  %v8973_v39 = vrot.slane %v28613_v43, 4  ;;  %v22217_v3 = vld [vmem:[%s22455_s8 + $0x8c] sm:$0x1] }
 0x29b   : > { %v8941_v15 = vrot.slane %v8940_v21, 4  ;;  %v8979_v49 = vrot.slane %v8977_v50, 5  ;;  %v4085_v44 = vrot.slane %v22216_v29, 5  ;;  %v8964_v42 = vor.u32 %v8963_v17, %v8960_v32  ;;  %v22219_v17 = vld [vmem:[%s22455_s8 + $0x98] sm:$0x1] }
 0x29c   : > { %v8951_v37 = vrot.slane %v8950_v59, 4  ;;  %v4088_v45 = vrot.slane %v22217_v3, 5  ;;  %v17796_v31 = vrot.slane %v17780_v35, 9  ;;  %v8974_v21 = vor.u32 %v8973_v39, %v8969_v24  ;;  %v22218_v3 = vld [vmem:[%s22455_s8 + $0x94] sm:$0xf] }
 0x29d   : > { %v8946_v8 = vsel %vm22737_vm9, %v8941_v15, %v8945_v2  ;;  %v4086_v50 = vsel %vm23312_vm12, %v17795_v52, %v4085_v44  ;;  %v4087_v43 = vrot.slane %v4085_v44, 4  ;;  %v28850_v29 = vcombine.low %v25633_v53, %v25646_v12  ;;  %v18380_v15 = vld [vmem:[%s22455_s8 + $0xcc] sm:$0xf]  ;;  %v25781_v44 = vld [vmem:[%s22455_s8 + $0xd0] sm:$0xf] }
 0x29e   : > { %v8956_v13 = vsel %vm22737_vm9, %v8951_v37, %v8955_v28  ;;  %v8965_v32 = vrot.slane %v8964_v42, 4  ;;  %v4092_v59 = vrot.slane %v22218_v3, 5  ;;  %v4095_v2 = vrot.slane %v22219_v17, 5  ;;  %v18383_v3 = vld [vmem:[%s22455_s8 + $0xd8] sm:$0xf] }
 0x29f   : > { %19967 = vmatmul.mubr.msk.bf16.gmra.mrb[12].mxu1 %vm763_vm3, %v28850_v29  ;;  %v18399_v52 = vcombine.low %v8946_v8, %v8956_v13  ;;  %v8975_v39 = vrot.slane %v8974_v21, 4  ;;  %v4089_v53 = vsel %vm23312_vm12, %v4087_v43, %v4088_v45  ;;  %v4689_v12 = vshrl.u32 %v17780_v35, 16  ;;  %v25793_v45 = vld [vmem:[%s22455_s8 + $0xd4] sm:$0x1]  ;;  %20281 = vmatmul.mubr.msk.bf16.gmra.mrb[20].mxu0 %vm763_vm3, %v25726_v48 }
 0x2a0   : > { %19970 = vmatprep.mubr.msk.bf16.mxu1 %vm763_vm3, %v17810_v26  ;;  %v8970_v28 = vsel %vm22737_vm9, %v8965_v32, %v8969_v24  ;;  %v17812_v37 = vcombine.low %v4086_v50, %v4089_v53  ;;  %v25787_v42 = vsel %vm23312_vm12, %v17796_v31, %v4092_v59  ;;  %v4094_v29 = vrot.slane %v4092_v59, 4  ;;  %28851 = vst [vmem:[#allocation30_spill] sm:$0xff] %v25793_v45  ;;  %v25801_v32 = vld [vmem:[%s22455_s8 + $0xdc] sm:$0xf]  ;;  %v25813_v53 = vld [vmem:[%s22455_s8 + $0xe0] sm:$0x1] }
 0x2a1   : > { %v8980_v26 = vsel %vm22737_vm9, %v8975_v39, %v8979_v49  ;;  %v4691_v8 = vrot.slane %v4689_v12, 5  ;;  %v4692_v21 = vshll.u32 %v17780_v35, 16  ;;  %v8982_v43 = vshrl.u32 %v18380_v15, 16  ;;  %28852 = vst [vmem:[#allocation31_spill] sm:$0xff] %v25801_v32  ;;  %20284 = vmatprep.mubr.msk.bf16.mxu0 %vm763_vm3, %v18399_v52  ;;  %28853 = vst [vmem:[#allocation32_spill] sm:$0xff] %v25813_v53 }
 0x2a2   : > { %v18400_v13 = vcombine.low %v8970_v28, %v8980_v26  ;;  %v25797_v24 = vsel %vm23312_vm12, %v4094_v29, %v4095_v2  ;;  %v8985_v50 = vshll.u32 %v18380_v15, 16  ;;  %v28614_v31 = vshll.u32 %v25781_v44, 16  ;;  %v25819_v26 = vld [vmem:[%s22455_s8 + $0x9c] sm:$0xe] }
 0x2a3   : > { %v17813_v35 = vcombine.low %v25787_v42, %v25797_v24  ;;  %v4694_v49 = vrot.slane %v4692_v21, 6  ;;  %v8984_v59 = vrot.slane %v8982_v43, 4  ;;  %v28616_v17 = vshrl.u32 %v25781_v44, 16 }
 0x2a4   : > { %v8987_v2 = vrot.slane %v8985_v50, 5  ;;  %v8993_v15 = vrot.slane %v28614_v31, 5  ;;  %v9001_v39 = vshll.u32 %v25793_v45, 16  ;;  %v9006_v12 = vshrl.u32 %v18383_v3, 16 }
 0x2a5   : > { %v4695_v48 = vor.u32 %v4694_v49, %v4691_v8  ;;  %v8997_v28 = vrot.slane %v28616_v17, 4  ;;  %v9009_v42 = vshll.u32 %v18383_v3, 16  ;;  %v28615_v29 = vshll.u32 %v25801_v32, 16 }
 0x2a6   : > { %v28854_v52 = vcombine.low %v25713_v36, %v25730_v60  ;;  %v8988_v21 = vor.u32 %v8987_v2, %v8984_v59  ;;  %v9003_v43 = vrot.slane %v9001_v39, 5  ;;  %v9008_v24 = vrot.slane %v9006_v12, 4  ;;  %v25832_v36 = vld [vmem:[%s22455_s8 + $0xa8] sm:$0xe] }
 0x2a7   : > { %v28619_v8 = vshrl.u32 %v25801_v32, 16  ;;  %v25827_v50 = vrot.slane %v4695_v48, 4  ;;  %v8998_v3 = vor.u32 %v8997_v28, %v8993_v15  ;;  %v9011_v49 = vrot.slane %v9009_v42, 5  ;;  %v22220_v48 = vld [vmem:[%s22455_s8 + $0xa0] sm:$0xf]  ;;  %20285 = vmatmul.mubr.msk.bf16.gmra.mrb[24].mxu0 %vm763_vm3, %v18400_v13 }
 0x2a8   : > { %19971 = vmatmul.mubr.msk.bf16.gmra.mrb[16].mxu1 %vm763_vm3, %v28854_v52  ;;  %v9017_v31 = vrot.slane %v28615_v29, 5  ;;  %v8989_v60 = vrot.slane %v8988_v21, 4  ;;  %v9025_v2 = vshll.u32 %v25813_v53, 16  ;;  %v17797_v39 = vrot.slane %v25819_v26, 9  ;;  %v22221_v42 = vld [vmem:[%s22455_s8 + $0xa4] sm:$0x1] }
 0x2a9   : > { %19974 = vmatprep.mubr.msk.bf16.mxu1 %vm763_vm3, %v17812_v37  ;;  %v9021_v59 = vrot.slane %v28619_v8, 4  ;;  %v8999_v12 = vrot.slane %v8998_v3, 4  ;;  %v9012_v37 = vor.u32 %v9011_v49, %v9008_v24  ;;  %v4099_v28 = vrot.slane %v22220_v48, 5  ;;  %v25844_v8 = vld [vmem:[%s22455_s8 + $0x24] sm:$0xe] }
 0x2aa   : > { %v4102_v52 = vrot.slane %v22221_v42, 5  ;;  %v8994_v29 = vsel %vm22737_vm9, %v8989_v60, %v8993_v15  ;;  %v9027_v21 = vrot.slane %v9025_v2, 5  ;;  %v17798_v32 = vrot.slane %v25832_v36, 9  ;;  %v22222_v60 = vld [vmem:[%s22455_s8 + $0xac] sm:$0xf] }
 0x2ab   : > { %v9022_v17 = vor.u32 %v9021_v59, %v9017_v31  ;;  %v9004_v24 = vsel %vm22737_vm9, %v8999_v12, %v9003_v43  ;;  %v9013_v3 = vrot.slane %v9012_v37, 4  ;;  %v4100_v49 = vsel %vm23312_vm12, %v17797_v39, %v4099_v28  ;;  %v22223_v2 = vld [vmem:[%s22455_s8 + $0xb0] sm:$0x1]  ;;  %v22224_v12 = vld [vmem:[%s22455_s8 + $0x28] sm:$0xf] }
 0x2ac   : > { %v4101_v48 = vrot.slane %v4099_v28, 4  ;;  %v18401_v42 = vcombine.low %v8994_v29, %v9004_v24  ;;  %v4106_v59 = vrot.slane %v22222_v60, 5  ;;  %v4109_v53 = vrot.slane %v22223_v2, 5  ;;  %v25860_v39 = vld [vmem:[%s22455_s8 + $0x30] sm:$0xe] }
 0x2ad   : > { %v9023_v15 = vrot.slane %v9022_v17, 4  ;;  %v9018_v45 = vsel %vm22737_vm9, %v9013_v3, %v9017_v31  ;;  %v18435_v43 = vrot.slane %v25844_v8, 9  ;;  %v9389_v37 = vrot.slane %v22224_v12, 5  ;;  %v22227_v60 = vld [vmem:[%s22455_s8 + $0x38] sm:$0x1] }
 0x2ae   : > { %v4103_v13 = vsel %vm23312_vm12, %v4101_v48, %v4102_v52  ;;  %20288 = vmatprep.mubr.msk.bf16.mxu0 %vm763_vm3, %v18401_v42  ;;  %v4107_v29 = vsel %vm23312_vm12, %v17798_v32, %v4106_v59  ;;  %v4108_v28 = vrot.slane %v4106_v59, 4  ;;  %v25869_v52 = vld [vmem:[%s22455_s8 + $0xb4] sm:$0xe]  ;;  %v22225_v48 = vld [vmem:[%s22455_s8 + $0x2c] sm:$0x1]  ;;  %v9399_v59 = vrot.slane %v22227_v60, 5 }
 0x2af   : > { %v9028_v17 = vsel %vm22737_vm9, %v9023_v15, %v9027_v21  ;;  %v17814_v31 = vcombine.low %v4100_v49, %v4103_v13  ;;  %v9390_v3 = vsel %vm23312_vm12, %v18435_v43, %v9389_v37  ;;  %v9392_v42 = vrot.slane %v22225_v48, 5  ;;  %v22226_v32 = vld [vmem:[%s22455_s8 + $0x34] sm:$0xf] }
 0x2b0   : > { %19975 = vmatmul.mubr.msk.bf16.gmra.mrb[20].mxu1 %vm763_vm3, %v17813_v35  ;;  %v18402_v24 = vcombine.low %v9018_v45, %v9028_v17  ;;  %v9391_v35 = vrot.slane %v9389_v37, 4  ;;  %v4110_v21 = vsel %vm23312_vm12, %v4108_v28, %v4109_v53  ;;  %v18436_v49 = vrot.slane %v25860_v39, 9  ;;  %v25881_v45 = vld [vmem:[%s22455_s8 + $0xc0] sm:$0xe]  ;;  %v25889_v53 = vld [vmem:[%s22455_s8 + $0x3c] sm:$0xe] }
 0x2b1   : > { %19978 = vmatprep.mubr.msk.bf16.mxu1 %vm763_vm3, %v17814_v31  ;;  %v9396_v15 = vrot.slane %v22226_v32, 5  ;;  %v17815_v2 = vcombine.low %v4107_v29, %v4110_v21  ;;  %v10276_v43 = vsel %vm812_vm0, %v25524_v58, 0  ;;  %v17799_v12 = vrot.slane %v25869_v52, 9  ;;  %v22228_v29 = vld [vmem:[%s22455_s8 + $0xbc] sm:$0x1] }
 0x2b2   : > { %v9393_v13 = vsel %vm23312_vm12, %v9391_v35, %v9392_v42  ;;  %v4113_v28 = vrot.slane %v25259_v55, 5  ;;  %20289 = vmatmul.mubr.msk.bf16.gmra.mrb[28].mxu0 %vm763_vm3, %v18402_v24  ;;  %v4116_v48 = vrot.slane %v22228_v29, 5  ;;  %v17800_v35 = vrot.slane %v25881_v45, 9  ;;  %v25900_v21 = vld [vmem:[%s22455_s8 + $0x48] sm:$0xe] }
 0x2b3   : > { %v18452_v37 = vcombine.low %v9390_v3, %v9393_v13  ;;  %v9397_v17 = vsel %vm23312_vm12, %v18436_v49, %v9396_v15  ;;  %v9398_v31 = vrot.slane %v9396_v15, 4  ;;  %v4120_v42 = vrot.slane %v25275_v4, 5 }
 0x2b4   : > { %v4123_v58 = vrot.slane %v25268_v46, 5  ;;  %v4114_v49 = vsel %vm23312_vm12, %v17799_v12, %v4113_v28  ;;  %v4115_v32 = vrot.slane %v4113_v28, 4  ;;  %v18437_v24 = vrot.slane %v25889_v53, 9 }
 0x2b5   : > { %20294 = vmatprep.mubr.msk.bf16.mxu0 %vm763_vm3, %v18452_v37  ;;  %v9400_v3 = vsel %vm23312_vm12, %v9398_v31, %v9399_v59  ;;  %v4121_v60 = vsel %vm23312_vm12, %v17800_v35, %v4120_v42  ;;  %v4122_v13 = vrot.slane %v4120_v42, 4  ;;  %v9403_v46 = vrot.slane %v25284_v7, 5 }
 0x2b6   : > { %v18453_v15 = vcombine.low %v9397_v17, %v9400_v3  ;;  %v4117_v37 = vsel %vm23312_vm12, %v4115_v32, %v4116_v48  ;;  %v9406_v59 = vrot.slane %v25295_v9, 5  ;;  %v18438_v31 = vrot.slane %v25900_v21, 9 }
 0x2b7   : > { %v9410_v12 = vrot.slane %v25310_v10, 5  ;;  %v17816_v28 = vcombine.low %v4114_v49, %v4117_v37  ;;  %v4124_v17 = vsel %vm23312_vm12, %v4122_v13, %v4123_v58  ;;  %v9404_v29 = vsel %vm23312_vm12, %v18437_v24, %v9403_v46  ;;  %v22229_v37 = vld [vmem:[%s22455_s8 + $0x8c] sm:$0x3] }
 0x2b8   : > { %19979 = vmatmul.mubr.msk.bf16.gmra.mrb[24].mxu1 %vm763_vm3, %v17815_v2  ;;  %v9405_v35 = vrot.slane %v9403_v46, 4  ;;  %v17817_v2 = vcombine.low %v4121_v60, %v4124_v17  ;;  %v9413_v9 = vrot.slane %v25322_v61, 5  ;;  %v4666_v58 = vshrl.u32 %v25746_v54, 16 }
 0x2b9   : > { %v9411_v48 = vsel %vm23312_vm12, %v18438_v31, %v9410_v12  ;;  %v9412_v42 = vrot.slane %v9410_v12, 4  ;;  %19982 = vmatprep.mubr.msk.bf16.mxu1 %vm763_vm3, %v17816_v28  ;;  %v4669_v49 = vshll.u32 %v25746_v54, 16  ;;  %v28855_v32 = vshrl.u32 %v25117_v30, 16  ;;  %v25937_v12 = vld [vmem:[%s22455_s8 + $0x54] sm:$0xe] }
 0x2ba   : > { %v9407_v3 = vsel %vm23312_vm12, %v9405_v35, %v9406_v59  ;;  %v28856_v46 = vshll.u32 %v25117_v30, 16  ;;  %v4680_v31 = vshrl.u32 %v22229_v37, 16  ;;  %v25942_v59 = vld [vmem:[%s28426_s1 + $0x26] sm:$0x3]  ;;  %20295 = vmatmul.mubr.msk.bf16.vlgmr.msra.gmra.mrb[0].mxu0 %vm763_vm3, %v18453_v15  ;;  %v4668_v28 = vrot.slane %v4666_v58, 5 }
 0x2bb   : > { %v4674_v24 = vrot.slane %v28855_v32, 5  ;;  %v18454_v60 = vcombine.low %v9404_v29, %v9407_v3  ;;  %v9414_v13 = vsel %vm23312_vm12, %v9412_v42, %v9413_v9  ;;  %v4671_v17 = vrot.slane %v4669_v49, 6  ;;  %v25946_v35 = vld [vmem:[%s22455_s8 + $0x60] sm:$0xe]  ;;  %20327 = vmatpush3.bf16.msra.mxu0 %v10276_v43  ;;  %v28857_v3 = vld [vmem:[#allocation29_spill] sm:$0xff] }
 0x2bc   : > { %v4675_v61 = vrot.slane %v28856_v46, 6  ;;  %v18455_v54 = vcombine.low %v9411_v48, %v9414_v13  ;;  %v4683_v29 = vshll.u32 %v22229_v37, 16  ;;  %v4682_v42 = vrot.slane %v4680_v31, 5  ;;  %v28858_v32 = vld [vmem:[#allocation28_spill] sm:$0xff]  ;;  %21892 = vmatprep.subr.msk.bf16.mxu0 %vm812_vm0, %v25942_v59 }
 0x2bd   : > { %20298 = vmatprep.mubr.msk.bf16.mxu0 %vm763_vm3, %v18454_v60  ;;  %v4700_v9 = vsel %vm22489_vm4, %v25827_v50, %v25167_v18  ;;  %v28859_v46 = vor.u32 %v28857_v3, %v28858_v32  ;;  %v28860_v15 = vrot.slane %v25167_v18, 4  ;;  %v4672_v58 = vor.u32 %v4671_v17, %v4668_v28 }
 0x2be   : > { %v4676_v30 = vor.u32 %v4675_v61, %v4674_v24  ;;  %v4685_v49 = vrot.slane %v4683_v29, 6  ;;  %v18439_v60 = vrot.slane %v25937_v12, 9  ;;  %v9417_v50 = vrot.slane %v25364_v5, 5 }
 0x2bf   : > { %v4710_v48 = vsel %vm22489_vm4, %v28860_v15, %v28859_v46  ;;  %v9420_v13 = vrot.slane %v25382_v63, 5  ;;  %v18440_v18 = vrot.slane %v25946_v35, 9  ;;  %v4673_v61 = vrot.slane %v4672_v58, 4 }
 0x2c0   : > { %v17862_v43 = vcombine.low %v4700_v9, %v4710_v48  ;;  %19983 = vmatmul.mubr.msk.bf16.gmra.mrb[28].mxu1 %vm763_vm3, %v17817_v2  ;;  %v4678_v24 = vrot.slane %v4676_v30, 4  ;;  %v4686_v37 = vor.u32 %v4685_v49, %v4682_v42  ;;  %v9424_v31 = vrot.slane %v25395_v41, 5 }
 0x2c1   : > { %v9427_v28 = vrot.slane %v25404_v51, 5  ;;  %v9418_v17 = vsel %vm23312_vm12, %v18439_v60, %v9417_v50  ;;  %v9419_v29 = vrot.slane %v9417_v50, 4  ;;  %v4712_v9 = vshrl.u32 %v25819_v26, 16 }
 0x2c2   : > { %v4715_v2 = vshll.u32 %v25819_v26, 16  ;;  %v4677_v3 = vsel %vm22489_vm4, %v4673_v61, %v4676_v30  ;;  %v4687_v63 = vsel %vm22489_vm4, %v4678_v24, %v4686_v37  ;;  %v9425_v42 = vsel %vm23312_vm12, %v18440_v18, %v9424_v31  ;;  %20299 = vmatmul.mubr.msk.bf16.gmra.mrb[4].mxu0 %vm763_vm3, %v18455_v54 }
 0x2c3   : > { %v9426_v32 = vrot.slane %v9424_v31, 4  ;;  %v17861_v51 = vcombine.low %v4677_v3, %v4687_v63  ;;  %v9421_v46 = vsel %vm23312_vm12, %v9419_v29, %v9420_v13  ;;  %v4714_v15 = vrot.slane %v4712_v9, 5  ;;  %v22230_v13 = vld [vmem:[%s22455_s8 + $0xa4] sm:$0x3] }
 0x2c4   : > { %v4717_v48 = vrot.slane %v4715_v2, 6  ;;  %v18456_v26 = vcombine.low %v9418_v17, %v9421_v46  ;;  %v28861_v58 = vshrl.u32 %v25159_v1, 16  ;;  %v28862_v60 = vshll.u32 %v25159_v1, 16 }
 0x2c5   : > { %v9428_v30 = vsel %vm23312_vm12, %v9426_v32, %v9427_v28  ;;  %20008 = vmatprep.mubr.msk.bf16.mxu1 %vm763_vm3, %v17861_v51  ;;  %v4726_v61 = vshrl.u32 %v22230_v13, 16  ;;  %v4729_v37 = vshll.u32 %v22230_v13, 16  ;;  %v4735_v31 = vshrl.u32 %v25832_v36, 16 }
 0x2c6   : > { %v4720_v49 = vrot.slane %v28861_v58, 5  ;;  %v4721_v24 = vrot.slane %v28862_v60, 6  ;;  %v18457_v50 = vcombine.low %v9425_v42, %v9428_v30  ;;  %v4718_v18 = vor.u32 %v4717_v48, %v4714_v15  ;;  %20302 = vmatprep.mubr.msk.bf16.mxu0 %vm763_vm3, %v18456_v26  ;;  %v25999_v42 = vld [vmem:[%s22455_s8 + $0x6c] sm:$0xe]  ;;  %v22231_v15 = vld [vmem:[%s22455_s8 + $0xb0] sm:$0x3] }
 0x2c7   : > { %v4738_v28 = vshll.u32 %v25832_v36, 16  ;;  %v28863_v17 = vshrl.u32 %v25183_v62, 16  ;;  %v4728_v9 = vrot.slane %v4726_v61, 5  ;;  %v4731_v2 = vrot.slane %v4729_v37, 6 }
 0x2c8   : > { %v4722_v54 = vor.u32 %v4721_v24, %v4720_v49  ;;  %20009 = vmatmul.mubr.msk.bf16.vlgmr.msra.gmra.mrb[20].mxu1 %vm763_vm3, %v17862_v43  ;;  %v4719_v29 = vrot.slane %v4718_v18, 4  ;;  %v28864_v3 = vshll.u32 %v25183_v62, 16  ;;  %v4737_v51 = vrot.slane %v4735_v31, 5  ;;  %v26007_v24 = vld [vmem:[%s22455_s8 + $0x78] sm:$0xe] }
 0x2c9   : > { %v4743_v1 = vrot.slane %v28863_v17, 5  ;;  %v4740_v46 = vrot.slane %v4738_v28, 6  ;;  %v4749_v48 = vshrl.u32 %v22231_v15, 16  ;;  %v4732_v26 = vor.u32 %v4731_v2, %v4728_v9 }
 0x2ca   : > { %v4744_v63 = vrot.slane %v28864_v3, 6  ;;  %v4724_v32 = vrot.slane %v4722_v54, 4  ;;  %v4723_v36 = vsel %vm22489_vm4, %v4719_v29, %v4722_v54  ;;  %v4752_v43 = vshll.u32 %v22231_v15, 16  ;;  %20303 = vmatmul.mubr.msk.bf16.gmra.mrb[8].mxu0 %vm763_vm3, %v18457_v50 }
 0x2cb   : > { %v4741_v58 = vor.u32 %v4740_v46, %v4737_v51  ;;  %v4751_v49 = vrot.slane %v4749_v48, 5  ;;  %v18441_v60 = vrot.slane %v25999_v42, 9  ;;  %v9431_v62 = vrot.slane %v25450_v14, 5 }
 0x2cc   : > { %v4745_v30 = vor.u32 %v4744_v63, %v4743_v1  ;;  %v4733_v18 = vsel %vm22489_vm4, %v4724_v32, %v4732_v26  ;;  %v4754_v61 = vrot.slane %v4752_v43, 6  ;;  %v9434_v37 = vrot.slane %v25453_v20, 5 }
 0x2cd   : > { %v17863_v54 = vcombine.low %v4723_v36, %v4733_v18  ;;  %v4742_v31 = vrot.slane %v4741_v58, 4  ;;  %v9432_v28 = vsel %vm23312_vm12, %v18441_v60, %v9431_v62  ;;  %v9433_v17 = vrot.slane %v9431_v62, 4 }
 0x2ce   : > { %v4747_v13 = vrot.slane %v4745_v30, 4  ;;  %v4755_v1 = vor.u32 %v4754_v61, %v4751_v49  ;;  %v18442_v29 = vrot.slane %v26007_v24, 9  ;;  %v9438_v9 = vrot.slane %v25465_v40, 5  ;;  %v22232_v49 = vld [vmem:[%s22455_s8 + $0xbc] sm:$0x3] }
 0x2cf   : > { %v9441_v2 = vrot.slane %v25482_v47, 5  ;;  %20012 = vmatprep.mubr.msk.bf16.mxu1 %vm763_vm3, %v17863_v54  ;;  %v4746_v20 = vsel %vm22489_vm4, %v4742_v31, %v4745_v30  ;;  %v9435_v50 = vsel %vm23312_vm12, %v9433_v17, %v9434_v37  ;;  %v4758_v3 = vshrl.u32 %v25869_v52, 16 }
 0x2d0   : > { %v4761_v63 = vshll.u32 %v25869_v52, 16  ;;  %v4756_v32 = vsel %vm22489_vm4, %v4747_v13, %v4755_v1  ;;  %v18458_v51 = vcombine.low %v9432_v28, %v9435_v50  ;;  %v9439_v47 = vsel %vm23312_vm12, %v18442_v29, %v9438_v9 }
 0x2d1   : > { %v9440_v46 = vrot.slane %v9438_v9, 4  ;;  %v17864_v15 = vcombine.low %v4746_v20, %v4756_v32  ;;  %v4760_v48 = vrot.slane %v4758_v3, 5  ;;  %v28865_v26 = vshrl.u32 %v25259_v55, 16 }
 0x2d2   : > { %v4763_v36 = vrot.slane %v4761_v63, 6  ;;  %20306 = vmatprep.mubr.msk.bf16.mxu0 %vm763_vm3, %v18458_v51  ;;  %v28866_v43 = vshll.u32 %v25259_v55, 16  ;;  %v4772_v60 = vshrl.u32 %v22232_v49, 16  ;;  %v4775_v62 = vshll.u32 %v22232_v49, 16  ;;  %v26043_v55 = vld [vmem:[%s22455_s8 + $0x84] sm:$0xe] }
 0x2d3   : > { %v4766_v30 = vrot.slane %v28865_v26, 5  ;;  %v9442_v52 = vsel %vm23312_vm12, %v9440_v46, %v9441_v2  ;;  %20013 = vmatmul.mubr.msk.bf16.gmra.mrb[24].mxu1 %vm763_vm3, %v17864_v15  ;;  %v4781_v61 = vshrl.u32 %v25881_v45, 16  ;;  %v4784_v37 = vshll.u32 %v25881_v45, 16  ;;  %v22233_v63 = vld [vmem:[%s22455_s8 + $0xc8] sm:$0x3] }
 0x2d4   : > { %v4767_v58 = vrot.slane %v28866_v43, 6  ;;  %v18459_v18 = vcombine.low %v9439_v47, %v9442_v52  ;;  %v4764_v13 = vor.u32 %v4763_v36, %v4760_v48  ;;  %v4774_v31 = vrot.slane %v4772_v60, 5  ;;  %v26053_v36 = vld [vmem:[%s22455_s8 + $0x90] sm:$0xe]  ;;  %v26059_v43 = vld [vmem:[%s22455_s8 + $0x9c] sm:$0xe] }
 0x2d5   : > { %v4777_v28 = vrot.slane %v4775_v62, 6  ;;  %v28867_v17 = vshrl.u32 %v25275_v4, 16  ;;  %v4783_v9 = vrot.slane %v4781_v61, 5  ;;  %v4786_v2 = vrot.slane %v4784_v37, 6 }
 0x2d6   : > { %v4768_v54 = vor.u32 %v4767_v58, %v4766_v30  ;;  %20307 = vmatmul.mubr.msk.bf16.gmra.mrb[12].mxu0 %vm763_vm3, %v18459_v18  ;;  %v4765_v29 = vrot.slane %v4764_v13, 4  ;;  %v28868_v20 = vshll.u32 %v25275_v4, 16  ;;  %v4795_v32 = vshrl.u32 %v22233_v63, 16 }
 0x2d7   : > { %v4789_v1 = vrot.slane %v28867_v17, 5  ;;  %v4778_v45 = vor.u32 %v4777_v28, %v4774_v31  ;;  %v4798_v51 = vshll.u32 %v22233_v63, 16  ;;  %v4787_v46 = vor.u32 %v4786_v2, %v4783_v9 }
 0x2d8   : > { %v4790_v50 = vrot.slane %v28868_v20, 6  ;;  %v4770_v3 = vrot.slane %v4768_v54, 4  ;;  %v4769_v47 = vsel %vm22489_vm4, %v4765_v29, %v4768_v54  ;;  %v18443_v48 = vrot.slane %v26043_v55, 9  ;;  %v26081_v20 = vld [vmem:[%s22455_s8 + $0xb4] sm:$0xe] }
 0x2d9   : > { %v4797_v4 = vrot.slane %v4795_v32, 5  ;;  %v4800_v30 = vrot.slane %v4798_v51, 6  ;;  %v9445_v52 = vrot.slane %v25519_v38, 5  ;;  %v4788_v49 = vrot.slane %v4787_v46, 4  ;;  %v28869_v46 = vld [vmem:[#allocation27_spill] sm:$0xff] }
 0x2da   : > { %v4791_v15 = vor.u32 %v4790_v50, %v4789_v1  ;;  %v4779_v26 = vsel %vm22489_vm4, %v4770_v3, %v4778_v45  ;;  %v9448_v62 = vrot.slane %v25537_v11, 5  ;;  %v18444_v37 = vrot.slane %v26053_v36, 9  ;;  %v26072_v1 = vld [vmem:[%s22455_s8 + $0xa8] sm:$0xe] }
 0x2db   : > { %v17865_v58 = vcombine.low %v4769_v47, %v4779_v26  ;;  %v4801_v18 = vor.u32 %v4800_v30, %v4797_v4  ;;  %v9446_v13 = vsel %vm23312_vm12, %v18443_v48, %v9445_v52  ;;  %v9447_v61 = vrot.slane %v9445_v52, 4  ;;  %v26097_v4 = vld [vmem:[%s22455_s8 + $0xc0] sm:$0xe] }
 0x2dc   : > { %v4793_v60 = vrot.slane %v4791_v15, 4  ;;  %v4792_v54 = vsel %vm22489_vm4, %v4788_v49, %v4791_v15  ;;  %v9452_v31 = vrot.slane %v25563_v22, 5  ;;  %v9455_v28 = vrot.slane %v25566_v56, 5 }
 0x2dd   : > { %20016 = vmatprep.mubr.msk.bf16.mxu1 %vm763_vm3, %v17865_v58  ;;  %v18445_v17 = vrot.slane %v26059_v43, 9  ;;  %v9449_v29 = vsel %vm23312_vm12, %v9447_v61, %v9448_v62  ;;  %v9459_v9 = vrot.slane %v25611_v19, 5  ;;  %v9462_v2 = vrot.slane %v25624_v27, 5 }
 0x2de   : > { %v4802_v11 = vsel %vm22489_vm4, %v4793_v60, %v4801_v18  ;;  %v18460_v3 = vcombine.low %v9446_v13, %v9449_v29  ;;  %v9453_v56 = vsel %vm23312_vm12, %v18444_v37, %v9452_v31  ;;  %v9454_v45 = vrot.slane %v9452_v31, 4  ;;  %v26104_v60 = vld [vmem:[%s22455_s8 + $0xcc] sm:$0xe] }
 0x2df   : > { %v17866_v50 = vcombine.low %v4792_v54, %v4802_v11  ;;  %v9460_v63 = vsel %vm23312_vm12, %v18445_v17, %v9459_v9  ;;  %v9461_v32 = vrot.slane %v9459_v9, 4  ;;  %v18446_v51 = vrot.slane %v26072_v1, 9  ;;  %v26116_v17 = vld [vmem:[%s22455_s8 + $0xd8] sm:$0xe] }
 0x2e0   : > { %v9466_v47 = vrot.slane %v25640_v16, 5  ;;  %20310 = vmatprep.mubr.msk.bf16.mxu0 %vm763_vm3, %v18460_v3  ;;  %v9456_v27 = vsel %vm23312_vm12, %v9454_v45, %v9455_v28  ;;  %v9469_v15 = vrot.slane %v28869_v46, 5  ;;  %v18447_v48 = vrot.slane %v26081_v20, 9  ;;  %v28872_v46 = vld [vmem:[#allocation32_spill] sm:$0xff] }
 0x2e1   : > { %20017 = vmatmul.mubr.msk.bf16.gmra.mrb[28].mxu1 %vm763_vm3, %v17866_v50  ;;  %v9473_v26 = vrot.slane %v25694_v23, 5  ;;  %v18461_v30 = vcombine.low %v9453_v56, %v9456_v27  ;;  %v9463_v52 = vsel %vm23312_vm12, %v9461_v32, %v9462_v2  ;;  %v9476_v61 = vrot.slane %v25703_v25, 5  ;;  %v28870_v56 = vld [vmem:[#allocation30_spill] sm:$0xff] }
 0x2e2   : > { %v9467_v58 = vsel %vm23312_vm12, %v18446_v51, %v9466_v47  ;;  %v9468_v49 = vrot.slane %v9466_v47, 4  ;;  %v18462_v62 = vcombine.low %v9460_v63, %v9463_v52  ;;  %v18448_v54 = vrot.slane %v26097_v4, 9  ;;  %v28871_v51 = vld [vmem:[#allocation31_spill] sm:$0xff] }
 0x2e3   : > { %v9474_v18 = vsel %vm23312_vm12, %v18447_v48, %v9473_v26  ;;  %v9475_v13 = vrot.slane %v9473_v26, 4  ;;  %20311 = vmatmul.mubr.msk.bf16.gmra.mrb[16].mxu0 %vm763_vm3, %v18461_v30  ;;  %v9480_v31 = vrot.slane %v25720_v33, 5  ;;  %v9483_v28 = vrot.slane %v25735_v6, 5  ;;  %v26136_v48 = vld [vmem:[%s22455_s8 + $0x2c] sm:$0x3] }
 0x2e4   : > { %v9470_v37 = vsel %vm23312_vm12, %v9468_v49, %v9469_v15  ;;  %20314 = vmatprep.mubr.msk.bf16.mxu0 %vm763_vm3, %v18462_v62  ;;  %v18449_v29 = vrot.slane %v26104_v60, 9  ;;  %v9487_v9 = vrot.slane %v25781_v44, 5  ;;  %v9490_v6 = vrot.slane %v28870_v56, 5  ;;  %v26161_v56 = vld [vmem:[%s22455_s8 + $0x38] sm:$0x3] }
 0x2e5   : > { %v18463_v11 = vcombine.low %v9467_v58, %v9470_v37  ;;  %v9477_v25 = vsel %vm23312_vm12, %v9475_v13, %v9476_v61  ;;  %v9481_v50 = vsel %vm23312_vm12, %v18448_v54, %v9480_v31  ;;  %v9482_v3 = vrot.slane %v9480_v31, 4  ;;  %v28873_v37 = vld [vmem:[#allocation25_spill] sm:$0xff] }
 0x2e6   : > { %v18464_v2 = vcombine.low %v9474_v18, %v9477_v25  ;;  %v26128_v45 = vsel %vm23312_vm12, %v18449_v29, %v9487_v9  ;;  %v9489_v63 = vrot.slane %v9487_v9, 4  ;;  %v18450_v32 = vrot.slane %v26116_v17, 9 }
 0x2e7   : > { %v9494_v47 = vrot.slane %v28871_v51, 5  ;;  %v9484_v27 = vsel %vm23312_vm12, %v9482_v3, %v9483_v28  ;;  %v9497_v15 = vrot.slane %v28872_v46, 5  ;;  %v9810_v26 = vshrl.u32 %v25844_v8, 16 }
 0x2e8   : > { %v9813_v30 = vshll.u32 %v25844_v8, 16  ;;  %v18465_v52 = vcombine.low %v9481_v50, %v9484_v27  ;;  %v9491_v58 = vsel %vm23312_vm12, %v9489_v63, %v9490_v6  ;;  %v28874_v54 = vshrl.u32 %v28873_v37, 16  ;;  %v28876_v27 = vld [vmem:[#allocation26_spill] sm:$0xff] }
 0x2e9   : > { %v26144_v49 = vsel %vm23312_vm12, %v18450_v32, %v9494_v47  ;;  %v9496_v62 = vrot.slane %v9494_v47, 4  ;;  %v18466_v18 = vcombine.low %v26128_v45, %v9491_v58  ;;  %v9812_v13 = vrot.slane %v9810_v26, 5 }
 0x2ea   : > { %v9815_v61 = vrot.slane %v9813_v30, 6  ;;  %v9818_v31 = vrot.slane %v28874_v54, 5  ;;  %v28875_v28 = vshll.u32 %v28873_v37, 16  ;;  %v9824_v29 = vshrl.u32 %v26136_v48, 16 }
 0x2eb   : > { %v26151_v8 = vsel %vm23312_vm12, %v9496_v62, %v9497_v15  ;;  %v9827_v9 = vshll.u32 %v26136_v48, 16  ;;  %20315 = vmatmul.mubr.msk.bf16.gmra.mrb[20].mxu0 %vm763_vm3, %v18463_v11  ;;  %v9833_v6 = vshrl.u32 %v25860_v39, 16  ;;  %v9836_v45 = vshll.u32 %v25860_v39, 16 }
 0x2ec   : > { %v9819_v25 = vrot.slane %v28875_v28, 6  ;;  %v18467_v50 = vcombine.low %v26144_v49, %v26151_v8  ;;  %v9816_v3 = vor.u32 %v9815_v61, %v9812_v13  ;;  %20318 = vmatprep.mubr.msk.bf16.mxu0 %vm763_vm3, %v18464_v2  ;;  %v9826_v32 = vrot.slane %v9824_v29, 5 }
 0x2ed   : > { %v9829_v47 = vrot.slane %v9827_v9, 6  ;;  %v28877_v46 = vshrl.u32 %v28876_v27, 16  ;;  %v9835_v26 = vrot.slane %v9833_v6, 5  ;;  %v9838_v30 = vrot.slane %v9836_v45, 6 }
 0x2ee   : > { %v9820_v63 = vor.u32 %v9819_v25, %v9818_v31  ;;  %v9817_v11 = vrot.slane %v9816_v3, 4  ;;  %v28878_v58 = vshll.u32 %v28876_v27, 16  ;;  %v9847_v37 = vshrl.u32 %v26161_v56, 16  ;;  %v26181_v3 = vld [vmem:[%s22455_s8 + $0x44] sm:$0x3] }
 0x2ef   : > { %v9841_v15 = vrot.slane %v28877_v46, 5  ;;  %v9830_v61 = vor.u32 %v9829_v47, %v9826_v32  ;;  %v9850_v39 = vshll.u32 %v26161_v56, 16  ;;  %v9839_v54 = vor.u32 %v9838_v30, %v9835_v26 }
 0x2f0   : > { %v9842_v62 = vrot.slane %v28878_v58, 6  ;;  %v9822_v13 = vrot.slane %v9820_v63, 4  ;;  %v9821_v2 = vsel %vm22489_vm4, %v9817_v11, %v9820_v63  ;;  %v26176_v28 = vsel %vm812_vm0, %v25942_v59, 0 }
 0x2f1   : > { %v9849_v29 = vrot.slane %v9847_v37, 5  ;;  %v9852_v9 = vrot.slane %v9850_v39, 6  ;;  %v9856_v6 = vshrl.u32 %v25889_v53, 16  ;;  %v9840_v32 = vrot.slane %v9839_v54, 4  ;;  %v26198_v37 = vld [vmem:[%s22455_s8 + $0x50] sm:$0x3] }
 0x2f2   : > { %v9843_v31 = vor.u32 %v9842_v62, %v9841_v15  ;;  %v9831_v25 = vsel %vm22489_vm4, %v9822_v13, %v9830_v61  ;;  %v9859_v63 = vshll.u32 %v25889_v53, 16  ;;  %v28879_v59 = vshrl.u32 %v25284_v7, 16 }
 0x2f3   : > { %v18501_v45 = vcombine.low %v9821_v2, %v9831_v25  ;;  %v9853_v27 = vor.u32 %v9852_v9, %v9849_v29  ;;  %v9858_v46 = vrot.slane %v9856_v6, 5  ;;  %v28880_v11 = vshll.u32 %v25284_v7, 16  ;;  %20319 = vmatmul.mubr.msk.bf16.gmra.mrb[24].mxu0 %vm763_vm3, %v18465_v52 }
 0x2f4   : > { %v9845_v47 = vrot.slane %v9843_v31, 4  ;;  %v9864_v15 = vrot.slane %v28879_v59, 5  ;;  %v9844_v30 = vsel %vm22489_vm4, %v9840_v32, %v9843_v31  ;;  %v9861_v58 = vrot.slane %v9859_v63, 6  ;;  %20322 = vmatprep.mubr.msk.bf16.mxu0 %vm763_vm3, %v18466_v18 }
 0x2f5   : > { %v9865_v26 = vrot.slane %v28880_v11, 6  ;;  %v9870_v62 = vshrl.u32 %v26181_v3, 16  ;;  %v9873_v13 = vshll.u32 %v26181_v3, 16  ;;  %v9879_v7 = vshrl.u32 %v25900_v21, 16 }
 0x2f6   : > { %v9854_v53 = vsel %vm22489_vm4, %v9845_v47, %v9853_v27  ;;  %v9882_v52 = vshll.u32 %v25900_v21, 16  ;;  %v9862_v2 = vor.u32 %v9861_v58, %v9858_v46  ;;  %v28881_v18 = vshrl.u32 %v25310_v10, 16 }
 0x2f7   : > { %v9866_v61 = vor.u32 %v9865_v26, %v9864_v15  ;;  %v18502_v39 = vcombine.low %v9844_v30, %v9854_v53  ;;  %v9872_v54 = vrot.slane %v9870_v62, 5  ;;  %v9875_v31 = vrot.slane %v9873_v13, 6  ;;  %v26215_v13 = vld [vmem:[%s22455_s8 + $0x5c] sm:$0x3] }
 0x2f8   : > { %v9881_v29 = vrot.slane %v9879_v7, 5  ;;  %v9884_v9 = vrot.slane %v9882_v52, 6  ;;  %v9887_v6 = vrot.slane %v28881_v18, 5  ;;  %v9863_v32 = vrot.slane %v9862_v2, 4 }
 0x2f9   : > { %v9868_v25 = vrot.slane %v9866_v61, 4  ;;  %v9876_v47 = vor.u32 %v9875_v31, %v9872_v54  ;;  %v28882_v63 = vshll.u32 %v25310_v10, 16  ;;  %v9893_v59 = vshrl.u32 %v26198_v37, 16 }
 0x2fa   : > { %v9885_v15 = vor.u32 %v9884_v9, %v9881_v29  ;;  %v9896_v21 = vshll.u32 %v26198_v37, 16  ;;  %v9902_v46 = vshrl.u32 %v25937_v12, 16  ;;  %v9905_v11 = vshll.u32 %v25937_v12, 16 }
 0x2fb   : > { %v9888_v27 = vrot.slane %v28882_v63, 6  ;;  %v9867_v26 = vsel %vm22489_vm4, %v9863_v32, %v9866_v61  ;;  %v9877_v30 = vsel %vm22489_vm4, %v9868_v25, %v9876_v47  ;;  %v9895_v62 = vrot.slane %v9893_v59, 5  ;;  %20323 = vmatmul.mubr.msk.bf16.gmra.mrb[28].mxu0 %vm763_vm3, %v18467_v50 }
 0x2fc   : > { %v18503_v10 = vcombine.low %v9867_v26, %v9877_v30  ;;  %v9886_v53 = vrot.slane %v9885_v15, 4  ;;  %v9898_v7 = vrot.slane %v9896_v21, 6  ;;  %v9904_v52 = vrot.slane %v9902_v46, 5  ;;  %20328 = vmatprep.mubr.msk.bf16.mxu0 %vm763_vm3, %v18501_v45 }
 0x2fd   : > { %v9889_v58 = vor.u32 %v9888_v27, %v9887_v6  ;;  %v9907_v2 = vrot.slane %v9905_v11, 6  ;;  %v28883_v61 = vshrl.u32 %v25364_v5, 16  ;;  %v28884_v31 = vshll.u32 %v25364_v5, 16  ;;  %v26231_v6 = vld [vmem:[%s22455_s8 + $0x68] sm:$0x3] }
 0x2fe   : > { %v9899_v9 = vor.u32 %v9898_v7, %v9895_v62  ;;  %v9916_v18 = vshrl.u32 %v26215_v13, 16  ;;  %v9919_v49 = vshll.u32 %v26215_v13, 16  ;;  %v9925_v32 = vshrl.u32 %v25946_v35, 16 }
 0x2ff   : > { %v9891_v12 = vrot.slane %v9889_v58, 4  ;;  %v9910_v54 = vrot.slane %v28883_v61, 5  ;;  %v9911_v25 = vrot.slane %v28884_v31, 6  ;;  %v9890_v29 = vsel %vm22489_vm4, %v9886_v53, %v9889_v58 }
 0x300   : > { %v9908_v8 = vor.u32 %v9907_v2, %v9904_v52  ;;  %v9928_v47 = vshll.u32 %v25946_v35, 16  ;;  %v9918_v45 = vrot.slane %v9916_v18, 5  ;;  %v9921_v63 = vrot.slane %v9919_v49, 6 }
 0x301   : > { %v9912_v50 = vor.u32 %v9911_v25, %v9910_v54  ;;  %v9900_v5 = vsel %vm22489_vm4, %v9891_v12, %v9899_v9  ;;  %v28885_v27 = vshrl.u32 %v25395_v41, 16  ;;  %v9927_v11 = vrot.slane %v9925_v32, 5  ;;  %v26250_v25 = vld [vmem:[%s22455_s8 + $0x74] sm:$0x3] }
 0x302   : > { %v18504_v15 = vcombine.low %v9890_v29, %v9900_v5  ;;  %v9909_v21 = vrot.slane %v9908_v8, 4  ;;  %v9922_v26 = vor.u32 %v9921_v63, %v9918_v45  ;;  %v9930_v30 = vrot.slane %v9928_v47, 6 }
 0x303   : > { %v9933_v59 = vrot.slane %v28885_v27, 5  ;;  %v9914_v46 = vrot.slane %v9912_v50, 4  ;;  %v28886_v58 = vshll.u32 %v25395_v41, 16  ;;  %v9939_v35 = vshrl.u32 %v26231_v6, 16  ;;  %v26255_v41 = vld [vmem:[%s28426_s1 + $0x28] sm:$0x3]  ;;  %20329 = vmatmul.mubr.msk.bf16.vlgmr.msra.gmra.mrb[0].mxu0 %vm763_vm3, %v18502_v39 }
 0x304   : > { %v9913_v53 = vsel %vm22489_vm4, %v9909_v21, %v9912_v50  ;;  %v9942_v7 = vshll.u32 %v26231_v6, 16  ;;  %v9948_v52 = vshrl.u32 %v25999_v42, 16  ;;  %v9951_v12 = vshll.u32 %v25999_v42, 16  ;;  %20361 = vmatpush3.bf16.msra.mxu0 %v26176_v28  ;;  %20332 = vmatprep.mubr.msk.bf16.mxu0 %vm763_vm3, %v18503_v10 }
 0x305   : > { %v9934_v62 = vrot.slane %v28886_v58, 6  ;;  %v9923_v2 = vsel %vm22489_vm4, %v9914_v46, %v9922_v26  ;;  %v9931_v61 = vor.u32 %v9930_v30, %v9927_v11  ;;  %v9941_v31 = vrot.slane %v9939_v35, 5  ;;  %21893 = vmatprep.subr.msk.bf16.mxu0 %vm812_vm0, %v26255_v41  ;;  %v26275_v30 = vld [vmem:[%s22455_s8 + $0x80] sm:$0x3] }
 0x306   : > { %v18505_v29 = vcombine.low %v9913_v53, %v9923_v2  ;;  %v9944_v9 = vrot.slane %v9942_v7, 6  ;;  %v9950_v18 = vrot.slane %v9948_v52, 5  ;;  %v9953_v49 = vrot.slane %v9951_v12, 6 }
 0x307   : > { %v9935_v54 = vor.u32 %v9934_v62, %v9933_v59  ;;  %v9932_v42 = vrot.slane %v9931_v61, 4  ;;  %v28887_v50 = vshrl.u32 %v25450_v14, 16  ;;  %v28888_v47 = vshll.u32 %v25450_v14, 16 }
 0x308   : > { %v9945_v45 = vor.u32 %v9944_v9, %v9941_v31  ;;  %v9954_v63 = vor.u32 %v9953_v49, %v9950_v18  ;;  %v9962_v39 = vshrl.u32 %v26250_v25, 16  ;;  %v9965_v27 = vshll.u32 %v26250_v25, 16 }
 0x309   : > { %v9937_v8 = vrot.slane %v9935_v54, 4  ;;  %v9956_v32 = vrot.slane %v28887_v50, 5  ;;  %v9957_v5 = vrot.slane %v28888_v47, 6  ;;  %v9936_v28 = vsel %vm22489_vm4, %v9932_v42, %v9935_v54 }
 0x30a   : > { %v9971_v59 = vshrl.u32 %v26007_v24, 16  ;;  %v9974_v21 = vshll.u32 %v26007_v24, 16  ;;  %v9955_v46 = vrot.slane %v9954_v63, 4  ;;  %v9964_v11 = vrot.slane %v9962_v39, 5 }
 0x30b   : > { %v9958_v10 = vor.u32 %v9957_v5, %v9956_v32  ;;  %v9946_v14 = vsel %vm22489_vm4, %v9937_v8, %v9945_v45  ;;  %v9967_v26 = vrot.slane %v9965_v27, 6  ;;  %v28889_v12 = vshrl.u32 %v25465_v40, 16  ;;  %20333 = vmatmul.mubr.msk.bf16.gmra.mrb[4].mxu0 %vm763_vm3, %v18504_v15  ;;  %v26290_v8 = vld [vmem:[%s22455_s8 + $0x8c] sm:$0x3] }
 0x30c   : > { %v18506_v58 = vcombine.low %v9936_v28, %v9946_v14  ;;  %v9973_v35 = vrot.slane %v9971_v59, 5  ;;  %v9976_v53 = vrot.slane %v9974_v21, 6  ;;  %v28890_v2 = vshll.u32 %v25465_v40, 16  ;;  %20336 = vmatprep.mubr.msk.bf16.mxu0 %vm763_vm3, %v18505_v29 }
 0x30d   : > { %v9960_v62 = vrot.slane %v9958_v10, 4  ;;  %v9959_v7 = vsel %vm22489_vm4, %v9955_v46, %v9958_v10  ;;  %v9968_v52 = vor.u32 %v9967_v26, %v9964_v11  ;;  %v9979_v24 = vrot.slane %v28889_v12, 5  ;;  %v26303_v11 = vld [vmem:[%s22455_s8 + $0x98] sm:$0x3] }
 0x30e   : > { %v9980_v61 = vrot.slane %v28890_v2, 6  ;;  %v9977_v54 = vor.u32 %v9976_v53, %v9973_v35  ;;  %v9985_v31 = vshrl.u32 %v26275_v30, 16  ;;  %v9988_v9 = vshll.u32 %v26275_v30, 16 }
 0x30f   : > { %v9994_v18 = vshrl.u32 %v26043_v55, 16  ;;  %v9969_v49 = vsel %vm22489_vm4, %v9960_v62, %v9968_v52  ;;  %v9997_v50 = vshll.u32 %v26043_v55, 16  ;;  %v28891_v40 = vshrl.u32 %v25519_v38, 16 }
 0x310   : > { %v9981_v42 = vor.u32 %v9980_v61, %v9979_v24  ;;  %v18507_v47 = vcombine.low %v9959_v7, %v9969_v49  ;;  %v9978_v5 = vrot.slane %v9977_v54, 4  ;;  %v9987_v45 = vrot.slane %v9985_v31, 5 }
 0x311   : > { %v10002_v32 = vrot.slane %v28891_v40, 5  ;;  %v9990_v63 = vrot.slane %v9988_v9, 6  ;;  %v9996_v15 = vrot.slane %v9994_v18, 5  ;;  %v9999_v27 = vrot.slane %v9997_v50, 6 }
 0x312   : > { %v9983_v39 = vrot.slane %v9981_v42, 4  ;;  %v28892_v28 = vshll.u32 %v25519_v38, 16  ;;  %v9982_v59 = vsel %vm22489_vm4, %v9978_v5, %v9981_v42  ;;  %v10008_v21 = vshrl.u32 %v26290_v8, 16 }
 0x313   : > { %v9991_v55 = vor.u32 %v9990_v63, %v9987_v45  ;;  %v10011_v14 = vshll.u32 %v26290_v8, 16  ;;  %v10000_v46 = vor.u32 %v9999_v27, %v9996_v15  ;;  %v10017_v26 = vshrl.u32 %v26053_v36, 16  ;;  %20337 = vmatmul.mubr.msk.bf16.gmra.mrb[8].mxu0 %vm763_vm3, %v18506_v58  ;;  %v26324_v63 = vld [vmem:[%s22455_s8 + $0xa4] sm:$0x3] }
 0x314   : > { %v10003_v10 = vrot.slane %v28892_v28, 6  ;;  %v10020_v62 = vshll.u32 %v26053_v36, 16  ;;  %v10010_v35 = vrot.slane %v10008_v21, 5  ;;  %v28893_v7 = vshrl.u32 %v25563_v22, 16  ;;  %20340 = vmatprep.mubr.msk.bf16.mxu0 %vm763_vm3, %v18507_v47 }
 0x315   : > { %v9992_v38 = vsel %vm22489_vm4, %v9983_v39, %v9991_v55  ;;  %v10013_v53 = vrot.slane %v10011_v14, 6  ;;  %v10001_v24 = vrot.slane %v10000_v46, 4  ;;  %v10019_v61 = vrot.slane %v10017_v26, 5 }
 0x316   : > { %v10004_v29 = vor.u32 %v10003_v10, %v10002_v32  ;;  %v10025_v52 = vrot.slane %v28893_v7, 5  ;;  %v18508_v12 = vcombine.low %v9982_v59, %v9992_v38  ;;  %v10022_v31 = vrot.slane %v10020_v62, 6 }
 0x317   : > { %v10014_v54 = vor.u32 %v10013_v53, %v10010_v35  ;;  %v28894_v9 = vshll.u32 %v25563_v22, 16  ;;  %v10031_v36 = vshrl.u32 %v26303_v11, 16  ;;  %v10034_v42 = vshll.u32 %v26303_v11, 16 }
 0x318   : > { %v10006_v2 = vrot.slane %v10004_v29, 4  ;;  %v10005_v49 = vsel %vm22489_vm4, %v10001_v24, %v10004_v29  ;;  %v10040_v50 = vshrl.u32 %v26059_v43, 16  ;;  %v10043_v40 = vshll.u32 %v26059_v43, 16  ;;  %v26339_v24 = vld [vmem:[%s22455_s8 + $0xb0] sm:$0x3] }
 0x319   : > { %v10026_v18 = vrot.slane %v28894_v9, 6  ;;  %v10023_v22 = vor.u32 %v10022_v31, %v10019_v61  ;;  %v10033_v45 = vrot.slane %v10031_v36, 5  ;;  %v10036_v39 = vrot.slane %v10034_v42, 6 }
 0x31a   : > { %v10015_v32 = vsel %vm22489_vm4, %v10006_v2, %v10014_v54  ;;  %v10042_v15 = vrot.slane %v10040_v50, 5  ;;  %v10045_v27 = vrot.slane %v10043_v40, 6  ;;  %v28895_v59 = vshrl.u32 %v25611_v19, 16 }
 0x31b   : > { %v10027_v5 = vor.u32 %v10026_v18, %v10025_v52  ;;  %v18509_v58 = vcombine.low %v10005_v49, %v10015_v32  ;;  %v10024_v28 = vrot.slane %v10023_v22, 4  ;;  %v28896_v47 = vshll.u32 %v25611_v19, 16  ;;  %20341 = vmatmul.mubr.msk.bf16.gmra.mrb[12].mxu0 %vm763_vm3, %v18508_v12 }
 0x31c   : > { %v10048_v43 = vrot.slane %v28895_v59, 5  ;;  %v10037_v21 = vor.u32 %v10036_v39, %v10033_v45  ;;  %v10046_v14 = vor.u32 %v10045_v27, %v10042_v15  ;;  %v10054_v46 = vshrl.u32 %v26324_v63, 16  ;;  %v26355_v45 = vld [vmem:[%s22455_s8 + $0xbc] sm:$0x3] }
 0x31d   : > { %v10029_v10 = vrot.slane %v10027_v5, 4  ;;  %v10049_v55 = vrot.slane %v28896_v47, 6  ;;  %v10057_v29 = vshll.u32 %v26324_v63, 16  ;;  %v10028_v26 = vsel %vm22489_vm4, %v10024_v28, %v10027_v5  ;;  %20344 = vmatprep.mubr.msk.bf16.mxu0 %vm763_vm3, %v18509_v58 }
 0x31e   : > { %v10063_v38 = vshrl.u32 %v26072_v1, 16  ;;  %v10066_v35 = vshll.u32 %v26072_v1, 16  ;;  %v10047_v7 = vrot.slane %v10046_v14, 4  ;;  %v10056_v19 = vrot.slane %v10054_v46, 5 }
 0x31f   : > { %v10050_v62 = vor.u32 %v10049_v55, %v10048_v43  ;;  %v10038_v53 = vsel %vm22489_vm4, %v10029_v10, %v10037_v21  ;;  %v10059_v52 = vrot.slane %v10057_v29, 6  ;;  %v28897_v1 = vshrl.u32 %v25640_v16, 16 }
 0x320   : > { %v18510_v2 = vcombine.low %v10028_v26, %v10038_v53  ;;  %v10065_v54 = vrot.slane %v10063_v38, 5  ;;  %v10068_v31 = vrot.slane %v10066_v35, 6  ;;  %v28898_v49 = vshll.u32 %v25640_v16, 16  ;;  %v26367_v38 = vld [vmem:[%s22455_s8 + $0xc8] sm:$0x3] }
 0x321   : > { %v10052_v61 = vrot.slane %v10050_v62, 4  ;;  %v10051_v9 = vsel %vm22489_vm4, %v10047_v7, %v10050_v62  ;;  %v10060_v18 = vor.u32 %v10059_v52, %v10056_v19  ;;  %v10071_v36 = vrot.slane %v28897_v1, 5 }
 0x322   : > { %v10072_v42 = vrot.slane %v28898_v49, 6  ;;  %v10069_v50 = vor.u32 %v10068_v31, %v10065_v54  ;;  %v10077_v40 = vshrl.u32 %v26339_v24, 16  ;;  %v10080_v32 = vshll.u32 %v26339_v24, 16 }
 0x323   : > { %v10086_v22 = vshrl.u32 %v26081_v20, 16  ;;  %v10061_v12 = vsel %vm22489_vm4, %v10052_v61, %v10060_v18  ;;  %v10089_v39 = vshll.u32 %v26081_v20, 16  ;;  %v28899_v16 = vshrl.u32 %v25694_v23, 16  ;;  %20345 = vmatmul.mubr.msk.bf16.gmra.mrb[16].mxu0 %vm763_vm3, %v18510_v2 }
 0x324   : > { %v10073_v5 = vor.u32 %v10072_v42, %v10071_v36  ;;  %v18511_v58 = vcombine.low %v10051_v9, %v10061_v12  ;;  %v10070_v27 = vrot.slane %v10069_v50, 4  ;;  %v10079_v28 = vrot.slane %v10077_v40, 5 }
 0x325   : > { %v10094_v15 = vrot.slane %v28899_v16, 5  ;;  %v10082_v10 = vrot.slane %v10080_v32, 6  ;;  %v10088_v43 = vrot.slane %v10086_v22, 5  ;;  %v10091_v47 = vrot.slane %v10089_v39, 6  ;;  %v26388_v16 = vld [vmem:[%s22455_s8 + $0xd4] sm:$0x3] }
 0x326   : > { %v10075_v59 = vrot.slane %v10073_v5, 4  ;;  %v28900_v55 = vshll.u32 %v25694_v23, 16  ;;  %v10074_v14 = vsel %vm22489_vm4, %v10070_v27, %v10073_v5  ;;  %v10100_v20 = vshrl.u32 %v26355_v45, 16  ;;  %20348 = vmatprep.mubr.msk.bf16.mxu0 %vm763_vm3, %v18511_v58 }
 0x327   : > { %v10083_v46 = vor.u32 %v10082_v10, %v10079_v28  ;;  %v10103_v29 = vshll.u32 %v26355_v45, 16  ;;  %v10092_v26 = vor.u32 %v10091_v47, %v10088_v43  ;;  %v10109_v35 = vshrl.u32 %v26097_v4, 16 }
 0x328   : > { %v10095_v21 = vrot.slane %v28900_v55, 6  ;;  %v10112_v53 = vshll.u32 %v26097_v4, 16  ;;  %v10102_v7 = vrot.slane %v10100_v20, 5  ;;  %v28901_v52 = vshrl.u32 %v25720_v33, 16 }
 0x329   : > { %v10084_v23 = vsel %vm22489_vm4, %v10075_v59, %v10083_v46  ;;  %v10105_v19 = vrot.slane %v10103_v29, 6  ;;  %v10093_v31 = vrot.slane %v10092_v26, 4  ;;  %v10111_v18 = vrot.slane %v10109_v35, 5 }
 0x32a   : > { %v10096_v62 = vor.u32 %v10095_v21, %v10094_v15  ;;  %v10117_v61 = vrot.slane %v28901_v52, 5  ;;  %v18512_v54 = vcombine.low %v10074_v14, %v10084_v23  ;;  %v10114_v36 = vrot.slane %v10112_v53, 6  ;;  %v26402_v23 = vld [vmem:[%s22455_s8 + $0xe0] sm:$0x3] }
 0x32b   : > { %v10106_v1 = vor.u32 %v10105_v19, %v10102_v7  ;;  %v28902_v4 = vshll.u32 %v25720_v33, 16  ;;  %v10123_v42 = vshrl.u32 %v26367_v38, 16  ;;  %v10126_v40 = vshll.u32 %v26367_v38, 16 }
 0x32c   : > { %v10098_v9 = vrot.slane %v10096_v62, 4  ;;  %v10097_v50 = vsel %vm22489_vm4, %v10093_v31, %v10096_v62  ;;  %v10132_v2 = vshrl.u32 %v26104_v60, 16  ;;  %v10135_v32 = vshll.u32 %v26104_v60, 16  ;;  %20349 = vmatmul.mubr.msk.bf16.gmra.mrb[20].mxu0 %vm763_vm3, %v18512_v54 }
 0x32d   : > { %v10118_v49 = vrot.slane %v28902_v4, 6  ;;  %v10115_v12 = vor.u32 %v10114_v36, %v10111_v18  ;;  %v10125_v39 = vrot.slane %v10123_v42, 5  ;;  %v10128_v15 = vrot.slane %v10126_v40, 6  ;;  %v18533_v42 = vld [vmem:[%s22455_s8 + $0x24] sm:$0xc] }
 0x32e   : > { %v10107_v22 = vsel %vm22489_vm4, %v10098_v9, %v10106_v1  ;;  %v10134_v58 = vrot.slane %v10132_v2, 5  ;;  %v10137_v27 = vrot.slane %v10135_v32, 6  ;;  %v28903_v59 = vshrl.u32 %v25781_v44, 16  ;;  %v22234_v32 = vld [vmem:[%s22455_s8 + $0x28] sm:$0xf] }
 0x32f   : > { %v10119_v5 = vor.u32 %v10118_v49, %v10117_v61  ;;  %v18513_v33 = vcombine.low %v10097_v50, %v10107_v22  ;;  %v10116_v28 = vrot.slane %v10115_v12, 4  ;;  %v28904_v60 = vshll.u32 %v25781_v44, 16 }
 0x330   : > { %v10140_v43 = vrot.slane %v28903_v59, 5  ;;  %v10129_v55 = vor.u32 %v10128_v15, %v10125_v39  ;;  %v10138_v21 = vor.u32 %v10137_v27, %v10134_v58  ;;  %v10146_v14 = vshrl.u32 %v26388_v16, 16 }
 0x331   : > { %v10121_v10 = vrot.slane %v10119_v5, 4  ;;  %v10141_v47 = vrot.slane %v28904_v60, 6  ;;  %v10149_v46 = vshll.u32 %v26388_v16, 16  ;;  %v10155_v29 = vshrl.u32 %v26116_v17, 16  ;;  %20352 = vmatprep.mubr.msk.bf16.mxu0 %vm763_vm3, %v18513_v33 }
 0x332   : > { %v10158_v26 = vshll.u32 %v26116_v17, 16  ;;  %v10120_v62 = vsel %vm22489_vm4, %v10116_v28, %v10119_v5  ;;  %v10139_v35 = vrot.slane %v10138_v21, 4  ;;  %v10148_v44 = vrot.slane %v10146_v14, 5  ;;  %v22236_v14 = vld [vmem:[%s22455_s8 + $0x40] sm:$0xf] }
 0x333   : > { %v10142_v20 = vor.u32 %v10141_v47, %v10140_v43  ;;  %v10151_v53 = vrot.slane %v10149_v46, 6  ;;  %v10130_v7 = vsel %vm22489_vm4, %v10121_v10, %v10129_v55  ;;  %v10157_v52 = vrot.slane %v10155_v29, 5  ;;  %v22235_v43 = vld [vmem:[%s22455_s8 + $0x34] sm:$0xf] }
 0x334   : > { %v10160_v17 = vrot.slane %v10158_v26, 6  ;;  %v28905_v31 = vshrl.u32 %v28871_v51, 16  ;;  %v28906_v18 = vshll.u32 %v28871_v51, 16  ;;  %v10169_v4 = vshrl.u32 %v26402_v23, 16 }
 0x335   : > { %v10144_v19 = vrot.slane %v10142_v20, 4  ;;  %v10143_v61 = vsel %vm22489_vm4, %v10139_v35, %v10142_v20  ;;  %v10152_v54 = vor.u32 %v10151_v53, %v10148_v44  ;;  %v10172_v49 = vshll.u32 %v26402_v23, 16  ;;  %v18535_v20 = vld [vmem:[%s22455_s8 + $0x3c] sm:$0xc] }
 0x336   : > { %v10163_v9 = vrot.slane %v28905_v31, 5  ;;  %v10164_v1 = vrot.slane %v28906_v18, 6  ;;  %v10161_v36 = vor.u32 %v10160_v17, %v10157_v52  ;;  %v18514_v50 = vcombine.low %v10120_v62, %v10130_v7 }
 0x337   : > { %v10153_v40 = vsel %vm22489_vm4, %v10144_v19, %v10152_v54  ;;  %v10521_v22 = vrot.slane %v22234_v32, 6  ;;  %v10171_v39 = vrot.slane %v10169_v4, 5  ;;  %v10174_v51 = vrot.slane %v10172_v49, 6 }
 0x338   : > { %v10165_v2 = vor.u32 %v10164_v1, %v10163_v9  ;;  %v18515_v12 = vcombine.low %v10143_v61, %v10153_v40  ;;  %v10162_v5 = vrot.slane %v10161_v36, 4  ;;  %v18549_v15 = vrot.slane %v18533_v42, 10  ;;  %20353 = vmatmul.mubr.msk.bf16.gmra.mrb[24].mxu0 %vm763_vm3, %v18514_v50  ;;  %v22237_v61 = vld [vmem:[%s22455_s8 + $0x4c] sm:$0xf]  ;;  %v18536_v9 = vld [vmem:[%s22455_s8 + $0x48] sm:$0xc] }
 0x339   : > { %v10523_v58 = vrot.slane %v10521_v22, 4  ;;  %v10524_v27 = vrot.slane %v26136_v48, 6  ;;  %v10175_v28 = vor.u32 %v10174_v51, %v10171_v39  ;;  %v10528_v60 = vrot.slane %v22235_v43, 6  ;;  %v18534_v48 = vld [vmem:[%s22455_s8 + $0x30] sm:$0xc] }
 0x33a   : > { %v10167_v33 = vrot.slane %v10165_v2, 4  ;;  %20356 = vmatprep.mubr.msk.bf16.mxu0 %vm763_vm3, %v18515_v12  ;;  %v10166_v10 = vsel %vm22489_vm4, %v10162_v5, %v10165_v2  ;;  %v10522_v55 = vsel %vm22671_vm6, %v18549_v15, %v10521_v22  ;;  %v10535_v46 = vrot.slane %v22236_v14, 6  ;;  %v18537_v1 = vld [vmem:[%s22455_s8 + $0x54] sm:$0xc]  ;;  %v26457_v12 = vld [vmem:[%s28426_s1 + $0x2a] sm:$0x3] }
 0x33b   : > { %v10525_v21 = vsel %vm22671_vm6, %v10523_v58, %v10524_v27  ;;  %v18550_v62 = vrot.slane %v18534_v48, 10  ;;  %v10530_v35 = vrot.slane %v10528_v60, 4  ;;  %v10531_v44 = vrot.slane %v26161_v56, 6  ;;  %v22239_v5 = vld [vmem:[%s22455_s8 + $0x64] sm:$0xf] }
 0x33c   : > { %v10176_v59 = vsel %vm22489_vm4, %v10167_v33, %v10175_v28  ;;  %v18566_v26 = vcombine.low %v10522_v55, %v10525_v21  ;;  %v18551_v53 = vrot.slane %v18535_v20, 10  ;;  %v10537_v7 = vrot.slane %v10535_v46, 4  ;;  %v18538_v33 = vld [vmem:[%s22455_s8 + $0x60] sm:$0xc]  ;;  %v22240_v15 = vld [vmem:[%s22455_s8 + $0x70] sm:$0xf] }
 0x33d   : > { %v18516_v29 = vcombine.low %v10166_v10, %v10176_v59  ;;  %v10538_v19 = vrot.slane %v26181_v3, 6  ;;  %v10529_v52 = vsel %vm22671_vm6, %v18550_v62, %v10528_v60  ;;  %v10532_v17 = vsel %vm22671_vm6, %v10530_v35, %v10531_v44  ;;  %v22238_v3 = vld [vmem:[%s22455_s8 + $0x58] sm:$0xf]  ;;  %v18539_v27 = vld [vmem:[%s22455_s8 + $0x6c] sm:$0xc] }
 0x33e   : > { %v10542_v54 = vrot.slane %v22237_v61, 6  ;;  %v10536_v31 = vsel %vm22671_vm6, %v18551_v53, %v10535_v46  ;;  %v10549_v18 = vrot.slane %v22238_v3, 6  ;;  %v18567_v36 = vcombine.low %v10529_v52, %v10532_v17  ;;  %v22241_v20 = vld [vmem:[%s22455_s8 + $0x7c] sm:$0xf]  ;;  %v18540_v62 = vld [vmem:[%s22455_s8 + $0x78] sm:$0xc] }
 0x33f   : > { %v10539_v56 = vsel %vm22671_vm6, %v10537_v7, %v10538_v19  ;;  %v18552_v49 = vrot.slane %v18536_v9, 10  ;;  %v10545_v50 = vrot.slane %v26198_v37, 6  ;;  %v11089_v40 = vsel %vm812_vm0, %v26255_v41, 0  ;;  %v18541_v44 = vld [vmem:[%s22455_s8 + $0x84] sm:$0xc] }
 0x340   : > { %20357 = vmatmul.mubr.msk.bf16.gmra.mrb[28].mxu0 %vm763_vm3, %v18516_v29  ;;  %v18568_v4 = vcombine.low %v10536_v31, %v10539_v56  ;;  %v10544_v42 = vrot.slane %v10542_v54, 4  ;;  %v18553_v2 = vrot.slane %v18537_v1, 10  ;;  %v10551_v32 = vrot.slane %v10549_v18, 4  ;;  %v22243_v3 = vld [vmem:[%s22455_s8 + $0x94] sm:$0xf] }
 0x341   : > { %20362 = vmatprep.mubr.msk.bf16.mxu0 %vm763_vm3, %v18566_v26  ;;  %v10552_v22 = vrot.slane %v26215_v13, 6  ;;  %v10543_v37 = vsel %vm22671_vm6, %v18552_v49, %v10542_v54  ;;  %v10556_v39 = vrot.slane %v22239_v5, 6  ;;  %v10563_v58 = vrot.slane %v22240_v15, 6  ;;  %v18543_v49 = vld [vmem:[%s22455_s8 + $0x9c] sm:$0xc] }
 0x342   : > { %v10546_v41 = vsel %vm22671_vm6, %v10544_v42, %v10545_v50  ;;  %v10550_v13 = vsel %vm22671_vm6, %v18553_v2, %v10549_v18  ;;  %v18554_v59 = vrot.slane %v18538_v33, 10  ;;  %v10559_v60 = vrot.slane %v26231_v6, 6  ;;  %v18544_v15 = vld [vmem:[%s22455_s8 + $0xa8] sm:$0xc] }
 0x343   : > { %v10553_v51 = vsel %vm22671_vm6, %v10551_v32, %v10552_v22  ;;  %v18569_v28 = vcombine.low %v10543_v37, %v10546_v41  ;;  %v10558_v43 = vrot.slane %v10556_v39, 4  ;;  %v18555_v55 = vrot.slane %v18539_v27, 10 }
 0x344   : > { %v18570_v10 = vcombine.low %v10550_v13, %v10553_v51  ;;  %v10565_v21 = vrot.slane %v10563_v58, 4  ;;  %v10566_v48 = vrot.slane %v26250_v25, 6  ;;  %v10557_v14 = vsel %vm22671_vm6, %v18554_v59, %v10556_v39  ;;  %v22242_v25 = vld [vmem:[%s22455_s8 + $0x88] sm:$0xf]  ;;  %v22245_v13 = vld [vmem:[%s22455_s8 + $0xac] sm:$0xf] }
 0x345   : > { %v10560_v46 = vsel %vm22671_vm6, %v10558_v43, %v10559_v60  ;;  %v10570_v29 = vrot.slane %v22241_v20, 6  ;;  %v10564_v26 = vsel %vm22671_vm6, %v18555_v55, %v10563_v58  ;;  %v10577_v35 = vrot.slane %v22242_v25, 6  ;;  %v22246_v58 = vld [vmem:[%s22455_s8 + $0xb8] sm:$0xf] }
 0x346   : > { %v10567_v6 = vsel %vm22671_vm6, %v10565_v21, %v10566_v48  ;;  %v18571_v53 = vcombine.low %v10557_v14, %v10560_v46  ;;  %v18556_v19 = vrot.slane %v18540_v62, 10  ;;  %v10573_v17 = vrot.slane %v26275_v30, 6  ;;  %v22247_v62 = vld [vmem:[%s22455_s8 + $0xc4] sm:$0xf] }
 0x347   : > { %v18572_v7 = vcombine.low %v10564_v26, %v10567_v6  ;;  %v10572_v52 = vrot.slane %v10570_v29, 4  ;;  %v18557_v61 = vrot.slane %v18541_v44, 10  ;;  %v10579_v54 = vrot.slane %v10577_v35, 4  ;;  %v18546_v44 = vld [vmem:[%s22455_s8 + $0xc0] sm:$0xc] }
 0x348   : > { %20363 = vmatmul.mubr.msk.bf16.vlgmr.msra.gmra.mrb[0].mxu0 %vm763_vm3, %v18567_v36  ;;  %v10580_v31 = vrot.slane %v26290_v8, 6  ;;  %v10571_v56 = vsel %vm22671_vm6, %v18556_v19, %v10570_v29  ;;  %v10584_v18 = vrot.slane %v22243_v3, 6  ;;  %v18542_v36 = vld [vmem:[%s22455_s8 + $0x90] sm:$0xc]  ;;  %v22244_v8 = vld [vmem:[%s22455_s8 + $0xa0] sm:$0xf] }
 0x349   : > { %20395 = vmatpush3.bf16.msra.mxu0 %v11089_v40  ;;  %20366 = vmatprep.mubr.msk.bf16.mxu0 %vm763_vm3, %v18568_v4  ;;  %v10574_v9 = vsel %vm22671_vm6, %v10572_v52, %v10573_v17  ;;  %v10578_v1 = vsel %vm22671_vm6, %v18557_v61, %v10577_v35  ;;  %v10591_v4 = vrot.slane %v22244_v8, 6  ;;  %v18558_v40 = vrot.slane %v18542_v36, 10  ;;  %v18547_v52 = vld [vmem:[%s22455_s8 + $0xcc] sm:$0xc] }
 0x34a   : > { %21894 = vmatprep.subr.msk.bf16.mxu0 %vm812_vm0, %v26457_v12  ;;  %v10581_v30 = vsel %vm22671_vm6, %v10579_v54, %v10580_v31  ;;  %v18573_v42 = vcombine.low %v10571_v56, %v10574_v9  ;;  %v10586_v2 = vrot.slane %v10584_v18, 4  ;;  %v10587_v32 = vrot.slane %v26303_v11, 6 }
 0x34b   : > { %v18574_v50 = vcombine.low %v10578_v1, %v10581_v30  ;;  %v18559_v22 = vrot.slane %v18543_v49, 10  ;;  %v10593_v37 = vrot.slane %v10591_v4, 4  ;;  %v10594_v41 = vrot.slane %v26324_v63, 6 }
 0x34c   : > { %v10585_v5 = vsel %vm22671_vm6, %v18558_v40, %v10584_v18  ;;  %v10588_v39 = vsel %vm22671_vm6, %v10586_v2, %v10587_v32  ;;  %v10598_v51 = vrot.slane %v22245_v13, 6  ;;  %v10605_v27 = vrot.slane %v22246_v58, 6 }
 0x34d   : > { %v10592_v11 = vsel %vm22671_vm6, %v18559_v22, %v10591_v4  ;;  %v10595_v63 = vsel %vm22671_vm6, %v10593_v37, %v10594_v41  ;;  %v18575_v43 = vcombine.low %v10585_v5, %v10588_v39  ;;  %v18560_v21 = vrot.slane %v18544_v15, 10  ;;  %v22249_v4 = vld [vmem:[%s22455_s8 + $0xdc] sm:$0xf] }
 0x34e   : > { %v18576_v55 = vcombine.low %v10592_v11, %v10595_v63  ;;  %v10600_v48 = vrot.slane %v10598_v51, 4  ;;  %v10601_v14 = vrot.slane %v26339_v24, 6  ;;  %v10607_v20 = vrot.slane %v10605_v27, 4 }
 0x34f   : > { %v10608_v29 = vrot.slane %v26355_v45, 6  ;;  %v10599_v26 = vsel %vm22671_vm6, %v18560_v21, %v10598_v51  ;;  %v10612_v25 = vrot.slane %v22247_v62, 6  ;;  %v18562_v56 = vrot.slane %v18546_v44, 10  ;;  %v22005_v21 = vld [vmem:[%s22455_s8 + $0x3c] sm:$0xff]   ;;  %v22011_v62 = vld [vmem:[%s22455_s8 + $0x84] sm:$0xff]  }
 0x350   : > { %20367 = vmatmul.mubr.msk.bf16.gmra.mrb[4].mxu0 %vm763_vm3, %v18569_v28  ;;  %v10602_v6 = vsel %vm22671_vm6, %v10600_v48, %v10601_v14  ;;  %v10615_v3 = vrot.slane %v26367_v38, 6  ;;  %v18563_v18 = vrot.slane %v18547_v52, 10  ;;  %v10622_v30 = vrot.slane %v26388_v16, 6  ;;  %v22006_v14 = vld [vmem:[%s22455_s8 + $0x48] sm:$0xff]   ;;  %v18663_v44 = vld [vmem:[%s22455_s8 + $0x30] sm:$0xf] }
 0x351   : > { %20370 = vmatprep.mubr.msk.bf16.mxu0 %vm763_vm3, %v18570_v10  ;;  %v18545_v10 = vld [vmem:[%s22455_s8 + $0xb4] sm:$0xc]  ;;  %v10609_v45 = vsel %vm22671_vm6, %v10607_v20, %v10608_v29  ;;  %v18577_v61 = vcombine.low %v10599_v26, %v10602_v6  ;;  %v10614_v9 = vrot.slane %v10612_v25, 4  ;;  %v10613_v36 = vsel %vm22671_vm6, %v18562_v56, %v10612_v25  ;;  %v26610_v20 = vld [vmem:[%s28426_s1 + $0x2c] sm:$0x3]  ;;  %v22008_v26 = vld [vmem:[%s22455_s8 + $0x60] sm:$0xff]  }
 0x352   : > { %v18561_v46 = vrot.slane %v18545_v10, 10  ;;  %v10626_v49 = vrot.slane %v22249_v4, 6  ;;  %v10629_v39 = vrot.slane %v26402_v23, 6  ;;  %v22007_v29 = vld [vmem:[%s22455_s8 + $0x54] sm:$0xff]   ;;  %v22013_v52 = vld [vmem:[%s22455_s8 + $0x9c] sm:$0xff]   ;;  %v11333_v56 = vshrl.u32 %v18663_v44, 16 }
 0x353   : > { %v10616_v8 = vsel %vm22671_vm6, %v10614_v9, %v10615_v3  ;;  %v22010_v6 = vld [vmem:[%s22455_s8 + $0x78] sm:$0xff]   ;;  %v22012_v25 = vld [vmem:[%s22455_s8 + $0x90] sm:$0xff]   ;;  %v11336_v9 = vshll.u32 %v18663_v44, 16 }
 0x354   : > { %v10606_v24 = vsel %vm22671_vm6, %v18561_v46, %v10605_v27  ;;  %v18579_v32 = vcombine.low %v10613_v36, %v10616_v8  ;;  %v10628_v5 = vrot.slane %v10626_v49, 4  ;;  %v22004_v27 = vld [vmem:[%s22455_s8 + $0x30] sm:$0xff]   ;;  %v11815_v46 = vsel %vm812_vm0, %v26457_v12, 0 }
 0x355   : > { %v18578_v31 = vcombine.low %v10606_v24, %v10609_v45  ;;  %v22009_v12 = vld [vmem:[%s22455_s8 + $0x6c] sm:$0xff]   ;;  %v11335_v36 = vrot.slane %v11333_v56, 4 }
 0x356   : > { %v10630_v51 = vsel %vm22671_vm6, %v10628_v5, %v10629_v39  ;;  %v18669_v5 = vld [vmem:[%s22455_s8 + $0x48] sm:$0xf] }
 0x357   : > { %v11381_v44 = vshrl.u32 %v18669_v5, 16  ;;  %v11384_v56 = vshll.u32 %v18669_v5, 16 }
 0x358   : > { %20371 = vmatmul.mubr.msk.bf16.gmra.mrb[8].mxu0 %vm763_vm3, %v18571_v53  ;;  %v22248_v53 = vld [vmem:[%s22455_s8 + $0xd0] sm:$0xf] }
 0x359   : > { %20374 = vmatprep.mubr.msk.bf16.mxu0 %vm763_vm3, %v18572_v7  ;;  %v10619_v7 = vrot.slane %v22248_v53, 6 }
 0x35a   : > { %v26516_v33 = vpop.f32.mrb[0].mxu1 }
 0x35b   : > { %28908 = vst [vmem:[#allocation33_spill] sm:$0xff] %v26516_v33  ;;  %v26524_v28 = vpop.f32.mrb[1].mxu1  ;;  %v10621_v1 = vrot.slane %v10619_v7, 4  ;;  %v10620_v38 = vsel %vm22671_vm6, %v18563_v18, %v10619_v7  ;;  %v26636_v7 = vld [vmem:[%s22455_s8 + $0x34] sm:$0xf] }
 0x35c   : > { %28909 = vst [vmem:[#allocation34_spill] sm:$0xff] %v26524_v28  ;;  %v26527_v59 = vpop.f32.mrb[2].mxu1  ;;  %v28624_v3 = vshll.u32 %v26636_v7, 16  ;;  %v28625_v18 = vshrl.u32 %v26636_v7, 16 }
 0x35d   : > { %28910 = vst [vmem:[#allocation35_spill] sm:$0xff] %v26527_v59  ;;  %v26529_v60 = vpop.f32.mrb[3].mxu1  ;;  %v10623_v16 = vsel %vm22671_vm6, %v10621_v1, %v10622_v30  ;;  %v18666_v1 = vld [vmem:[%s22455_s8 + $0x3c] sm:$0xf]  ;;  %v26646_v30 = vld [vmem:[%s22455_s8 + $0x40] sm:$0xf] }
 0x35e   : > { %28911 = vst [vmem:[#allocation36_spill] sm:$0xff] %v26529_v60  ;;  %v18580_v37 = vcombine.low %v10620_v38, %v10623_v16  ;;  %v11357_v8 = vshrl.u32 %v18666_v1, 16  ;;  %v11360_v4 = vshll.u32 %v18666_v1, 16  ;;  %v11338_v38 = vrot.slane %v11336_v9, 5  ;;  %v22018_v9 = vld [vmem:[%s22455_s8 + $0xd8] sm:$0xff]  }
 0x35f   : > { %v26655_v16 = vrot.slane %v28624_v3, 5  ;;  %v11383_v1 = vrot.slane %v11381_v44, 4  ;;  %v18705_v60 = vld [vmem:[%s22455_s8 + $0xd8] sm:$0xf] }
 0x360   : > { %20375 = vmatmul.mubr.msk.bf16.gmra.mrb[12].mxu0 %vm763_vm3, %v18573_v42 }
 0x361   : > { %20378 = vmatprep.mubr.msk.bf16.mxu0 %vm763_vm3, %v18574_v50  ;;  %v18548_v50 = vld [vmem:[%s22455_s8 + $0xd8] sm:$0xc] }
 0x362   : > { %v26540_v35 = vpop.f32.mrb[4].mxu1  ;;  %v18564_v41 = vrot.slane %v18548_v50, 10  ;;  %v11348_v50 = vrot.slane %v28625_v18, 4 }
 0x363   : > { %28912 = vst [vmem:[#allocation37_spill] sm:$0xff] %v26540_v35  ;;  %v26548_v19 = vpop.f32.mrb[5].mxu1 }
 0x364   : > { %28913 = vst [vmem:[#allocation38_spill] sm:$0xff] %v26548_v19  ;;  %v26551_v17 = vpop.f32.mrb[6].mxu1  ;;  %v10627_v13 = vsel %vm22671_vm6, %v18564_v41, %v10626_v49  ;;  %v26651_v49 = vld [vmem:[%s22455_s8 + $0x38] sm:$0x1]  ;;  %v28623_v41 = vshrl.u32 %v26646_v30, 16 }
 0x365   : > { %28914 = vst [vmem:[#allocation39_spill] sm:$0xff] %v26551_v17  ;;  %v26553_v54 = vpop.f32.mrb[7].mxu1  ;;  %v18581_v58 = vcombine.low %v10627_v13, %v10630_v51  ;;  %v22016_v13 = vld [vmem:[%s22455_s8 + $0xc0] sm:$0xff]   ;;  %v26667_v51 = vld [vmem:[%s22455_s8 + $0x4c] sm:$0xf] }
 0x366   : > { %28915 = vst [vmem:[#allocation40_spill] sm:$0xff] %v26553_v54 }
 0x368   : > { %20379 = vmatmul.mubr.msk.bf16.gmra.mrb[16].mxu0 %vm763_vm3, %v18575_v43 }
 0x369   : > { %20382 = vmatprep.mubr.msk.bf16.mxu0 %vm763_vm3, %v18576_v55 }
 0x36a   : > { %v26564_v42 = vpop.f32.mrb[8].mxu1 }
 0x36b   : > { %28916 = vst [vmem:[#allocation41_spill] sm:$0xff] %v26564_v42  ;;  %v26571_v40 = vpop.f32.mrb[9].mxu1  ;;  %v26905_v42 = vld [vmem:[%s22455_s8 + $0xb0] sm:$0x1] }
 0x36c   : > { %28917 = vst [vmem:[#allocation42_spill] sm:$0xff] %v26571_v40  ;;  %v26573_v2 = vpop.f32.mrb[10].mxu1 }
 0x36d   : > { %28918 = vst [vmem:[#allocation43_spill] sm:$0xff] %v26573_v2  ;;  %v26575_v22 = vpop.f32.mrb[11].mxu1 }
 0x36e   : > { %28919 = vst [vmem:[#allocation9_spill] sm:$0xff] %v26575_v22 }
 0x370   : > { %20383 = vmatmul.mubr.msk.bf16.gmra.mrb[20].mxu0 %vm763_vm3, %v18577_v61 }
 0x371   : > { %20386 = vmatprep.mubr.msk.bf16.mxu0 %vm763_vm3, %v18578_v31  ;;  %v22014_v31 = vld [vmem:[%s22455_s8 + $0xa8] sm:$0xff]  }
 0x372   : > { %v26584_v11 = vpop.f32.mrb[12].mxu1 }
 0x373   : > { %28920 = vst [vmem:[#allocation11_spill] sm:$0xff] %v26584_v11  ;;  %v26586_v63 = vpop.f32.mrb[13].mxu1 }
 0x374   : > { %28921 = vst [vmem:[#allocation14_spill] sm:$0xff] %v26586_v63  ;;  %v26588_v15 = vpop.f32.mrb[14].mxu1 }
 0x375   : > { %28922 = vst [vmem:[#allocation24_spill] sm:$0xff] %v26588_v15  ;;  %v26590_v23 = vpop.f32.mrb[15].mxu1 }
 0x376   : > { %28923 = vst [vmem:[#allocation15_spill] sm:$0xff] %v26590_v23 }
 0x378   : > { %20387 = vmatmul.mubr.msk.bf16.gmra.mrb[24].mxu0 %vm763_vm3, %v18579_v32  ;;  %v28622_v32 = vshll.u32 %v26646_v30, 16 }
 0x379   : > { %20390 = vmatprep.mubr.msk.bf16.mxu0 %vm763_vm3, %v18580_v37  ;;  %v22015_v37 = vld [vmem:[%s22455_s8 + $0xb4] sm:$0xff]  }
 0x37b   : > { %v26595_v10 = vpop.f32.mrb[16].mxu1 }
 0x37c   : > { %28924 = vst [vmem:[#allocation16_spill] sm:$0xff] %v26595_v10  ;;  %v26597_v43 = vpop.f32.mrb[17].mxu1  ;;  %v26769_v10 = vld [vmem:[%s22455_s8 + $0x7c] sm:$0xf] }
 0x37d   : > { %28925 = vst [vmem:[#allocation12_spill] sm:$0xff] %v26597_v43  ;;  %v26599_v55 = vpop.f32.mrb[18].mxu1 }
 0x37e   : > { %28926 = vst [vmem:[#allocation17_spill] sm:$0xff] %v26599_v55  ;;  %v26602_v48 = vpop.f32.mrb[19].mxu1 }
 0x37f   : > { %28927 = vst [vmem:[#allocation18_spill] sm:$0xff] %v26602_v48 }
 0x380   : > { %20391 = vmatmul.mubr.msk.bf16.gmra.mrb[28].mxu0 %vm763_vm3, %v18581_v58  ;;  %v18672_v58 = vld [vmem:[%s22455_s8 + $0x54] sm:$0xf] }
 0x381   : > { %20396 = vmatprep.mubr.msk.bf16.mxu0 %vm763_vm3, %v22004_v27 }
 0x388   : > { %20397 = vmatmul.mubr.msk.bf16.vlgmr.msra.gmra.mrb[0].mxu0 %vm763_vm3, %v22005_v21  ;;  %v11352_v21 = vshll.u32 %v26651_v49, 16 }
 0x389   : > { %20429 = vmatpush3.bf16.msra.mxu0 %v11815_v46  ;;  %20400 = vmatprep.mubr.msk.bf16.mxu0 %vm763_vm3, %v22006_v14  ;;  %v11359_v14 = vrot.slane %v11357_v8, 4  ;;  %v11362_v46 = vrot.slane %v11360_v4, 5  ;;  %v11408_v8 = vshll.u32 %v18672_v58, 16  ;;  %v11386_v4 = vrot.slane %v11384_v56, 5 }
 0x38a   : > { %21895 = vmatprep.subr.msk.bf16.mxu0 %vm812_vm0, %v26610_v20  ;;  %v11354_v18 = vrot.slane %v11352_v21, 5 }
 0x38b   : > { %v11410_v21 = vrot.slane %v11408_v8, 5 }
 0x390   : > { %20401 = vmatmul.mubr.msk.bf16.gmra.mrb[4].mxu0 %vm763_vm3, %v22007_v29  ;;  %v26674_v29 = vld [vmem:[%s22455_s8 + $0x58] sm:$0xf] }
 0x391   : > { %20404 = vmatprep.mubr.msk.bf16.mxu0 %vm763_vm3, %v22008_v26 }
 0x398   : > { %20405 = vmatmul.mubr.msk.bf16.gmra.mrb[8].mxu0 %vm763_vm3, %v22009_v12  ;;  %v11339_v12 = vor.u32 %v11338_v38, %v11335_v36  ;;  %v11405_v36 = vshrl.u32 %v18672_v58, 16 }
 0x399   : > { %20408 = vmatprep.mubr.msk.bf16.mxu0 %vm763_vm3, %v22010_v6  ;;  %v11349_v6 = vor.u32 %v11348_v50, %v26655_v16  ;;  %v11363_v50 = vor.u32 %v11362_v46, %v11359_v14  ;;  %v26708_v46 = vld [vmem:[%s22455_s8 + $0x64] sm:$0xf] }
 0x39b   : > { %v26628_v24 = vpop.f32.mrb[20].mxu1  ;;  %v11350_v3 = vrot.slane %v11349_v6, 4  ;;  %v28938_v6 = vshll.u32 %v26674_v29, 16 }
 0x39c   : > { %28928 = vst [vmem:[#allocation19_spill] sm:$0xff] %v26628_v24  ;;  %v26630_v45 = vpop.f32.mrb[21].mxu1 }
 0x39d   : > { %28929 = vst [vmem:[#allocation20_spill] sm:$0xff] %v26630_v45  ;;  %v26633_v53 = vpop.f32.mrb[22].mxu1  ;;  %v26715_v44 = vrot.slane %v28938_v6, 5  ;;  %v11355_v8 = vsel %vm22737_vm9, %v11350_v3, %v11354_v18  ;;  %v28626_v6 = vshll.u32 %v26708_v46, 16 }
 0x39e   : > { %28930 = vst [vmem:[#allocation21_spill] sm:$0xff] %v26633_v53  ;;  %v26639_v61 = vpop.f32.mrb[23].mxu1 }
 0x39f   : > { %28931 = vst [vmem:[#allocation22_spill] sm:$0xff] %v26639_v61  ;;  %v26758_v53 = vrot.slane %v28626_v6, 5 }
 0x3a0   : > { %20409 = vmatmul.mubr.msk.bf16.gmra.mrb[12].mxu0 %vm763_vm3, %v22011_v62  ;;  %v26680_v62 = vld [vmem:[%s22455_s8 + $0x44] sm:$0x1] }
 0x3a1   : > { %20412 = vmatprep.mubr.msk.bf16.mxu0 %vm763_vm3, %v22012_v25  ;;  %v26684_v25 = vrot.slane %v28622_v32, 5  ;;  %v11376_v5 = vshll.u32 %v26680_v62, 16  ;;  %v22017_v32 = vld [vmem:[%s22455_s8 + $0xcc] sm:$0xff]  }
 0x3a6   : > { %v26663_v39 = vpop.f32.mrb[24].mxu1 }
 0x3a7   : > { %28932 = vst [vmem:[#allocation10_spill] sm:$0xff] %v26663_v39  ;;  %v26670_v27 = vpop.f32.mrb[25].mxu1  ;;  %v26720_v39 = vld [vmem:[%s22455_s8 + $0x5c] sm:$0x1] }
 0x3a8   : > { %20413 = vmatmul.mubr.msk.bf16.gmra.mrb[16].mxu0 %vm763_vm3, %v22013_v52  ;;  %28933 = vst [vmem:[#allocation8_spill] sm:$0xff] %v26670_v27  ;;  %v26676_v26 = vpop.f32.mrb[26].mxu1  ;;  %v11364_v27 = vrot.slane %v11363_v50, 4  ;;  %v11387_v50 = vor.u32 %v11386_v4, %v11383_v1  ;;  %v26742_v1 = vld [vmem:[%s22455_s8 + $0x68] sm:$0x1] }
 0x3a9   : > { %20416 = vmatprep.mubr.msk.bf16.mxu0 %vm763_vm3, %v22014_v31  ;;  %28934 = vst [vmem:[#allocation29_spill] sm:$0xff] %v26676_v26  ;;  %v26686_v52 = vpop.f32.mrb[27].mxu1  ;;  %v11372_v31 = vrot.slane %v28623_v41, 4  ;;  %v11340_v41 = vrot.slane %v11339_v12, 4  ;;  %v26711_v26 = vld [vmem:[%s22455_s8 + $0x50] sm:$0x1] }
 0x3aa   : > { %28935 = vst [vmem:[#allocation28_spill] sm:$0xff] %v26686_v52  ;;  %v28936_v52 = vshll.u32 %v26667_v51, 16  ;;  %v11407_v12 = vrot.slane %v11405_v36, 4  ;;  %v11400_v45 = vshll.u32 %v26711_v26, 16  ;;  %v26745_v4 = vld [vmem:[%s22455_s8 + $0x70] sm:$0xf] }
 0x3ab   : > { %v11373_v58 = vor.u32 %v11372_v31, %v26684_v25  ;;  %v28939_v31 = vshrl.u32 %v26674_v29, 16  ;;  %v11345_v36 = vsel %vm22737_vm9, %v11340_v41, %v26655_v16  ;;  %v26737_v16 = vsel %vm812_vm0, %v26610_v20, 0 }
 0x3ac   : > { %v26703_v38 = vrot.slane %v28936_v52, 5  ;;  %v11378_v52 = vrot.slane %v11376_v5, 5  ;;  %v11411_v3 = vor.u32 %v11410_v21, %v11407_v12  ;;  %v11424_v41 = vshll.u32 %v26720_v39, 16  ;;  %v18681_v21 = vld [vmem:[%s22455_s8 + $0x78] sm:$0xf] }
 0x3ad   : > { %v11420_v56 = vrot.slane %v28939_v31, 4  ;;  %v11374_v31 = vrot.slane %v11373_v58, 4  ;;  %v11369_v20 = vsel %vm22737_vm9, %v11364_v27, %v26684_v25  ;;  %v11388_v27 = vrot.slane %v11387_v50, 4 }
 0x3ae   : > { %v11426_v43 = vrot.slane %v11424_v41, 5  ;;  %v11448_v6 = vshll.u32 %v26742_v1, 16  ;;  %v11480_v23 = vshll.u32 %v18681_v21, 16  ;;  %v28630_v41 = vshrl.u32 %v26769_v10, 16 }
 0x3af   : > { %v11421_v18 = vor.u32 %v11420_v56, %v26715_v44 }
 0x3b0   : > { %20417 = vmatmul.mubr.msk.bf16.gmra.mrb[20].mxu0 %vm763_vm3, %v22015_v37  ;;  %v18675_v37 = vld [vmem:[%s22455_s8 + $0x60] sm:$0xf] }
 0x3b1   : > { %20420 = vmatprep.mubr.msk.bf16.mxu0 %vm763_vm3, %v22016_v13  ;;  %v28937_v13 = vshrl.u32 %v26667_v51, 16  ;;  %v11429_v61 = vshrl.u32 %v18675_v37, 16  ;;  %v11422_v55 = vrot.slane %v11421_v18, 4  ;;  %v28628_v18 = vshll.u32 %v26769_v10, 16 }
 0x3b3   : > { %v11396_v14 = vrot.slane %v28937_v13, 4  ;;  %v11432_v13 = vshll.u32 %v18675_v37, 16  ;;  %v18678_v37 = vld [vmem:[%s22455_s8 + $0x6c] sm:$0xf] }
 0x3b4   : > { %v26732_v24 = vpop.f32.mrb[28].mxu1  ;;  %v11453_v48 = vshrl.u32 %v18678_v37, 16 }
 0x3b5   : > { %v11397_v5 = vor.u32 %v11396_v14, %v26703_v38  ;;  %28940 = vst [vmem:[#allocation27_spill] sm:$0xff] %v26732_v24  ;;  %v26747_v58 = vpop.f32.mrb[29].mxu1  ;;  %v18712_v14 = vcombine.low %v11345_v36, %v11355_v8  ;;  %v11434_v12 = vrot.slane %v11432_v13, 5  ;;  %v28943_v24 = vshrl.u32 %v26708_v46, 16  ;;  %v22019_v8 = vld [vmem:[%s22455_s8 + $0xe4] sm:$0xff]  }
 0x3b6   : > { %28941 = vst [vmem:[#allocation30_spill] sm:$0xff] %v26747_v58  ;;  %v26754_v56 = vpop.f32.mrb[30].mxu1  ;;  %v11402_v13 = vrot.slane %v11400_v45, 5 }
 0x3b7   : > { %28942 = vst [vmem:[#allocation31_spill] sm:$0xff] %v26754_v56  ;;  %v11444_v58 = vrot.slane %v28943_v24, 4  ;;  %v26762_v36 = vpop.f32.mrb[31].mxu1  ;;  %v11398_v25 = vrot.slane %v11397_v5, 4  ;;  %v11412_v56 = vrot.slane %v11411_v3, 4  ;;  %v28627_v24 = vshll.u32 %v26745_v4, 16 }
 0x3b8   : > { %20421 = vmatmul.mubr.msk.bf16.gmra.mrb[24].mxu0 %vm763_vm3, %v22017_v32  ;;  %v11431_v32 = vrot.slane %v11429_v61, 4  ;;  %28944 = vst [vmem:[#allocation32_spill] sm:$0xff] %v26762_v36  ;;  %v11379_v61 = vsel %vm22737_vm9, %v11374_v31, %v11378_v52  ;;  %v11477_v36 = vshrl.u32 %v18681_v21, 16  ;;  %v11455_v31 = vrot.slane %v11453_v48, 4  ;;  %v26778_v3 = vld [vmem:[%s22455_s8 + $0x74] sm:$0x1] }
 0x3b9   : > { %20424 = vmatprep.mubr.msk.bf16.mxu0 %vm763_vm3, %v22018_v9  ;;  %v11456_v9 = vshll.u32 %v18678_v37, 16  ;;  %v28629_v37 = vshrl.u32 %v26745_v4, 16  ;;  %v11445_v52 = vor.u32 %v11444_v58, %v26758_v53  ;;  %v18713_v50 = vcombine.low %v11369_v20, %v11379_v61  ;;  %v26799_v61 = vld [vmem:[%s22455_s8 + $0x88] sm:$0xf] }
 0x3ba   : > { %v11435_v15 = vor.u32 %v11434_v12, %v11431_v32  ;;  %v11393_v5 = vsel %vm22737_vm9, %v11388_v27, %v26703_v38  ;;  %v11403_v58 = vsel %vm22737_vm9, %v11398_v25, %v11402_v13  ;;  %v11417_v48 = vsel %vm22737_vm9, %v11412_v56, %v26715_v44  ;;  %v18684_v32 = vld [vmem:[%s22455_s8 + $0x84] sm:$0xf] }
 0x3bb   : > { %v11458_v45 = vrot.slane %v11456_v9, 5  ;;  %v11427_v20 = vsel %vm22737_vm9, %v11422_v55, %v11426_v43  ;;  %v11450_v38 = vrot.slane %v11448_v6, 5  ;;  %v26794_v12 = vrot.slane %v28627_v24, 5  ;;  %v18687_v6 = vld [vmem:[%s22455_s8 + $0x90] sm:$0xf] }
 0x3bc   : > { %v11468_v21 = vrot.slane %v28629_v37, 4  ;;  %v11479_v9 = vrot.slane %v11477_v36, 4  ;;  %v11436_v44 = vrot.slane %v11435_v15, 4  ;;  %v11446_v56 = vrot.slane %v11445_v52, 4  ;;  %v26810_v15 = vld [vmem:[%s22455_s8 + $0x80] sm:$0x1] }
 0x3bd   : > { %v11459_v43 = vor.u32 %v11458_v45, %v11455_v31  ;;  %v11472_v55 = vshll.u32 %v26778_v3, 16  ;;  %v11492_v27 = vrot.slane %v28630_v41, 4  ;;  %v11501_v25 = vshrl.u32 %v18684_v32, 16  ;;  %v26829_v31 = vld [vmem:[%s22455_s8 + $0xa0] sm:$0xf] }
 0x3be   : > { %v11504_v36 = vshll.u32 %v18684_v32, 16  ;;  %v18715_v13 = vcombine.low %v11417_v48, %v11427_v20  ;;  %v28631_v52 = vshll.u32 %v26799_v61, 16  ;;  %v11469_v45 = vor.u32 %v11468_v21, %v26794_v12  ;;  %v18690_v20 = vld [vmem:[%s22455_s8 + $0x9c] sm:$0xf] }
 0x3bf   : > { %v11525_v37 = vshrl.u32 %v18687_v6, 16  ;;  %v11528_v41 = vshll.u32 %v18687_v6, 16  ;;  %v11441_v32 = vsel %vm22737_vm9, %v11436_v44, %v26758_v53  ;;  %v26825_v48 = vrot.slane %v11472_v55, 5  ;;  %v26836_v53 = vld [vmem:[%s28426_s1 + $0x2e] sm:$0x3] }
 0x3c0   : > { %20425 = vmatmul.mubr.msk.bf16.gmra.mrb[28].mxu0 %vm763_vm3, %v22019_v8  ;;  %v11482_v8 = vrot.slane %v11480_v23, 5  ;;  %v18714_v23 = vcombine.low %v11393_v5, %v11403_v58  ;;  %v11451_v5 = vsel %vm22737_vm9, %v11446_v56, %v11450_v38  ;;  %v26823_v58 = vrot.slane %v11459_v43, 4  ;;  %v26840_v38 = vld [vmem:[%s22455_s8 + $0x8c] sm:$0x1] }
 0x3c1   : > { %20430 = vmatprep.mubr.msk.bf16.mxu0 %vm763_vm3, %v18712_v14  ;;  %v26805_v14 = vrot.slane %v28628_v18, 5  ;;  %v26816_v18 = vld [vmem:[%s22455_s8 + $0x94] sm:$0xf]  ;;  %v11506_v6 = vrot.slane %v11504_v36, 5  ;;  %v26844_v44 = vrot.slane %v28631_v52, 5  ;;  %v28945_v56 = vshrl.u32 %v26799_v61, 16 }
 0x3c2   : > { %v11483_v24 = vor.u32 %v11482_v8, %v11479_v9  ;;  %v11496_v9 = vshll.u32 %v26810_v15, 16  ;;  %v11503_v8 = vrot.slane %v11501_v25, 4  ;;  %v11470_v25 = vrot.slane %v11469_v45, 4 }
 0x3c3   : > { %v11493_v21 = vor.u32 %v11492_v27, %v26805_v14  ;;  %v11516_v43 = vrot.slane %v28945_v56, 4  ;;  %v11527_v36 = vrot.slane %v11525_v37, 4  ;;  %v11530_v63 = vrot.slane %v11528_v41, 5  ;;  %v26859_v37 = vld [vmem:[%s22455_s8 + $0x98] sm:$0x1] }
 0x3c4   : > { %v11549_v11 = vshrl.u32 %v18690_v20, 16  ;;  %v11552_v22 = vshll.u32 %v18690_v20, 16  ;;  %v11498_v55 = vrot.slane %v11496_v9, 5  ;;  %v18716_v45 = vcombine.low %v11441_v32, %v11451_v5 }
 0x3c5   : > { %v11494_v27 = vrot.slane %v11493_v21, 4  ;;  %v28946_v41 = vshll.u32 %v26816_v18, 16  ;;  %v28947_v56 = vshrl.u32 %v26816_v18, 16  ;;  %v11465_v21 = vsel %vm22737_vm9, %v26823_v58, %v26794_v12  ;;  %v26885_v12 = vld [vmem:[%s22455_s8 + $0xac] sm:$0xf] }
 0x3c6   : > { %v11475_v32 = vsel %vm22737_vm9, %v11470_v25, %v26825_v48  ;;  %v11531_v9 = vor.u32 %v11530_v63, %v11527_v36  ;;  %v28949_v2 = vshrl.u32 %v26829_v31, 16  ;;  %v11544_v63 = vshll.u32 %v26859_v37, 16 }
 0x3c7   : > { %v26863_v20 = vrot.slane %v28946_v41, 5  ;;  %v11540_v52 = vrot.slane %v28947_v56, 4  ;;  %v28948_v41 = vshll.u32 %v26829_v31, 16  ;;  %v11499_v58 = vsel %vm22737_vm9, %v11494_v27, %v11498_v55  ;;  %v26908_v55 = vld [vmem:[%s22455_s8 + $0xb8] sm:$0xf] }
 0x3c8   : > { %20431 = vmatmul.mubr.msk.bf16.vlgmr.msra.gmra.mrb[0].mxu0 %vm763_vm3, %v18713_v50  ;;  %v11484_v50 = vrot.slane %v11483_v24, 4  ;;  %v11517_v24 = vor.u32 %v11516_v43, %v26844_v44  ;;  %v11554_v43 = vrot.slane %v11552_v22, 5  ;;  %v11564_v40 = vrot.slane %v28949_v2, 4  ;;  %v18699_v27 = vld [vmem:[%s22455_s8 + $0xc0] sm:$0xf] }
 0x3c9   : > { %20463 = vmatpush3.bf16.msra.mxu0 %v26737_v16  ;;  %20434 = vmatprep.mubr.msk.bf16.mxu0 %vm763_vm3, %v18714_v23  ;;  %v11507_v16 = vor.u32 %v11506_v6, %v11503_v8  ;;  %v11520_v23 = vshll.u32 %v26840_v38, 16  ;;  %v18693_v8 = vld [vmem:[%s22455_s8 + $0xa8] sm:$0xf]  ;;  %v11551_v6 = vrot.slane %v11549_v11, 4  ;;  %v26880_v56 = vrot.slane %v28948_v41, 5 }
 0x3ca   : > { %21896 = vmatprep.subr.msk.bf16.mxu0 %vm812_vm0, %v26836_v53  ;;  %v11489_v5 = vsel %vm22737_vm9, %v11484_v50, %v26805_v14  ;;  %v26891_v14 = vld [vmem:[%s22455_s8 + $0xa4] sm:$0x1]  ;;  %v11518_v22 = vrot.slane %v11517_v24, 4  ;;  %v11541_v11 = vor.u32 %v11540_v52, %v26863_v20  ;;  %v11573_v2 = vshrl.u32 %v18693_v8, 16  ;;  %v18696_v24 = vld [vmem:[%s22455_s8 + $0xb4] sm:$0xf] }
 0x3cb   : > { %v11508_v48 = vrot.slane %v11507_v16, 4  ;;  %v11522_v25 = vrot.slane %v11520_v23, 5  ;;  %v11576_v50 = vshll.u32 %v18693_v8, 16  ;;  %v11532_v36 = vrot.slane %v11531_v9, 4 }
 0x3cc   : > { %v11555_v16 = vor.u32 %v11554_v43, %v11551_v6  ;;  %v11565_v23 = vor.u32 %v11564_v40, %v26880_v56  ;;  %v18717_v41 = vcombine.low %v11465_v21, %v11475_v32  ;;  %v18718_v52 = vcombine.low %v11489_v5, %v11499_v58 }
 0x3cd   : > { %v11513_v8 = vsel %vm22737_vm9, %v11508_v48, %v26844_v44  ;;  %v11523_v9 = vsel %vm22737_vm9, %v11518_v22, %v11522_v25  ;;  %v11542_v6 = vrot.slane %v11541_v11, 4  ;;  %v11575_v40 = vrot.slane %v11573_v2, 4  ;;  %v26920_v48 = vld [vmem:[%s22455_s8 + $0xc4] sm:$0xf] }
 0x3ce   : > { %v11578_v43 = vrot.slane %v11576_v50, 5  ;;  %v28950_v54 = vshll.u32 %v26885_v12, 16  ;;  %v28951_v32 = vshrl.u32 %v26885_v12, 16  ;;  %v11597_v44 = vshrl.u32 %v18696_v24, 16 }
 0x3cf   : > { %v11600_v58 = vshll.u32 %v18696_v24, 16  ;;  %v11556_v25 = vrot.slane %v11555_v16, 4  ;;  %v11566_v22 = vrot.slane %v11565_v23, 4  ;;  %v28632_v2 = vshll.u32 %v26908_v55, 16 }
 0x3d0   : > { %20435 = vmatmul.mubr.msk.bf16.gmra.mrb[4].mxu0 %vm763_vm3, %v18715_v13  ;;  %v11568_v13 = vshll.u32 %v26891_v14, 16  ;;  %v26915_v21 = vrot.slane %v28950_v54, 5  ;;  %v11588_v5 = vrot.slane %v28951_v32, 4  ;;  %v11621_v54 = vshrl.u32 %v18699_v27, 16 }
 0x3d1   : > { %20438 = vmatprep.mubr.msk.bf16.mxu0 %vm763_vm3, %v18716_v45  ;;  %v11546_v45 = vrot.slane %v11544_v63, 5  ;;  %v11537_v63 = vsel %vm22737_vm9, %v11532_v36, %v26863_v20  ;;  %v11624_v17 = vshll.u32 %v18699_v27, 16  ;;  %v11592_v32 = vshll.u32 %v26905_v42, 16 }
 0x3d2   : > { %v11570_v11 = vrot.slane %v11568_v13, 5  ;;  %v28633_v20 = vshll.u32 %v26920_v48, 16  ;;  %v28634_v36 = vshrl.u32 %v26920_v48, 16  ;;  %v11579_v16 = vor.u32 %v11578_v43, %v11575_v40 }
 0x3d3   : > { %v11547_v24 = vsel %vm22737_vm9, %v11542_v6, %v11546_v45  ;;  %v11589_v23 = vor.u32 %v11588_v5, %v26915_v21  ;;  %v11599_v13 = vrot.slane %v11597_v44, 4  ;;  %v11602_v27 = vrot.slane %v11600_v58, 5  ;;  %v26941_v6 = vld [vmem:[%s22455_s8 + $0xbc] sm:$0x1]  ;;  %v26951_v58 = vld [vmem:[%s22455_s8 + $0xc8] sm:$0x1] }
 0x3d4   : > { %v18719_v50 = vcombine.low %v11513_v8, %v11523_v9  ;;  %v11571_v45 = vsel %vm22737_vm9, %v11566_v22, %v11570_v11  ;;  %v28952_v40 = vshrl.u32 %v26908_v55, 16  ;;  %v11623_v5 = vrot.slane %v11621_v54, 4  ;;  %v18702_v8 = vld [vmem:[%s22455_s8 + $0xcc] sm:$0xf] }
 0x3d5   : > { %v11626_v44 = vrot.slane %v11624_v17, 5  ;;  %v18720_v9 = vcombine.low %v11537_v63, %v11547_v24  ;;  %v11636_v22 = vrot.slane %v28634_v36, 4  ;;  %v11580_v11 = vrot.slane %v11579_v16, 4  ;;  %v26961_v17 = vld [vmem:[%s22455_s8 + $0xd0] sm:$0xf] }
 0x3d6   : > { %v11612_v43 = vrot.slane %v28952_v40, 4  ;;  %v11603_v19 = vor.u32 %v11602_v27, %v11599_v13  ;;  %v11616_v54 = vshll.u32 %v26941_v6, 16  ;;  %v11645_v35 = vshrl.u32 %v18702_v8, 16 }
 0x3d7   : > { %v11627_v24 = vor.u32 %v11626_v44, %v11623_v5  ;;  %v11669_v5 = vshrl.u32 %v18705_v60, 16  ;;  %v11672_v44 = vshll.u32 %v18705_v60, 16 }
 0x3d8   : > { %20439 = vmatmul.mubr.msk.bf16.gmra.mrb[8].mxu0 %vm763_vm3, %v18717_v41  ;;  %v11561_v41 = vsel %vm22737_vm9, %v11556_v25, %v26880_v56  ;;  %v11594_v56 = vrot.slane %v11592_v32, 5  ;;  %v26955_v25 = vrot.slane %v28633_v20, 5  ;;  %v11640_v32 = vshll.u32 %v26951_v58, 16  ;;  %v26967_v20 = vld [vmem:[%s22455_s8 + $0xdc] sm:$0xf] }
 0x3d9   : > { %20442 = vmatprep.mubr.msk.bf16.mxu0 %vm763_vm3, %v18718_v52  ;;  %v26945_v52 = vrot.slane %v28632_v2, 5  ;;  %v11590_v2 = vrot.slane %v11589_v23, 4  ;;  %v18721_v40 = vcombine.low %v11561_v41, %v11571_v45  ;;  %v11648_v23 = vshll.u32 %v18702_v8, 16  ;;  %v18708_v8 = vld [vmem:[%s22455_s8 + $0xe4] sm:$0xf] }
 0x3da   : > { %v11637_v16 = vor.u32 %v11636_v22, %v26955_v25  ;;  %v11585_v41 = vsel %vm22737_vm9, %v11580_v11, %v26915_v21  ;;  %v11628_v27 = vrot.slane %v11627_v24, 4  ;;  %v11647_v13 = vrot.slane %v11645_v35, 4  ;;  %v26982_v21 = vld [vmem:[%s22455_s8 + $0xd4] sm:$0x1] }
 0x3db   : > { %v11613_v63 = vor.u32 %v11612_v43, %v26945_v52  ;;  %v11595_v45 = vsel %vm22737_vm9, %v11590_v2, %v11594_v56  ;;  %v11604_v43 = vrot.slane %v11603_v19, 4  ;;  %v11650_v11 = vrot.slane %v11648_v23, 5 }
 0x3dc   : > { %v11638_v59 = vrot.slane %v11637_v16, 4  ;;  %v28953_v19 = vshll.u32 %v26961_v17, 16  ;;  %v28954_v56 = vshrl.u32 %v26961_v17, 16  ;;  %v11671_v28 = vrot.slane %v11669_v5, 4  ;;  %v26994_v16 = vld [vmem:[%s22455_s8 + $0xe8] sm:$0xf] }
 0x3dd   : > { %v11614_v36 = vrot.slane %v11613_v63, 4  ;;  %v11674_v22 = vrot.slane %v11672_v44, 5  ;;  %v28955_v63 = vshll.u32 %v26967_v20, 16  ;;  %v28956_v35 = vshrl.u32 %v26967_v20, 16  ;;  %28957 = vst [vmem:[#allocation25_spill] sm:$0xff] %v26994_v16 }
 0x3de   : > { %v11656_v2 = vrot.slane %v28953_v19, 5  ;;  %v11660_v60 = vrot.slane %v28954_v56, 4  ;;  %v11609_v23 = vsel %vm22737_vm9, %v11604_v43, %v26945_v52  ;;  %v11633_v5 = vsel %vm22737_vm9, %v11628_v27, %v26955_v25 }
 0x3df   : > { %v11680_v24 = vrot.slane %v28955_v63, 5  ;;  %v11651_v56 = vor.u32 %v11650_v11, %v11647_v13  ;;  %v11693_v52 = vshrl.u32 %v18708_v8, 16  ;;  %v11696_v43 = vshll.u32 %v18708_v8, 16 }
 0x3e0   : > { %20443 = vmatmul.mubr.msk.bf16.gmra.mrb[12].mxu0 %vm763_vm3, %v18719_v50  ;;  %v11618_v50 = vrot.slane %v11616_v54, 5  ;;  %v18722_v54 = vcombine.low %v11585_v41, %v11595_v45  ;;  %v11664_v41 = vshll.u32 %v26982_v21, 16  ;;  %v27003_v45 = vld [vmem:[%s22455_s8 + $0xe0] sm:$0x1]  ;;  %v11661_v63 = vor.u32 %v11660_v60, %v11656_v2 }
 0x3e1   : > { %20446 = vmatprep.mubr.msk.bf16.mxu0 %vm763_vm3, %v18720_v9  ;;  %v11642_v9 = vrot.slane %v11640_v32, 5  ;;  %v11684_v32 = vrot.slane %v28956_v35, 4  ;;  %v11675_v35 = vor.u32 %v11674_v22, %v11671_v28  ;;  %v11688_v33 = vshll.u32 %v27003_v45, 16  ;;  %v27020_v22 = vld [vmem:[%s22455_s8 + $0xec] sm:$0x1] }
 0x3e2   : > { %v11619_v19 = vsel %vm22737_vm9, %v11614_v36, %v11618_v50  ;;  %v28638_v36 = vshll.u32 %v26994_v16, 16  ;;  %v28639_v50 = vshrl.u32 %v26994_v16, 16  ;;  %v11652_v27 = vrot.slane %v11651_v56, 4  ;;  %v27035_v56 = vld [vmem:[%s22455_s8 + $0x30] sm:$0xe] }
 0x3e3   : > { %v11643_v44 = vsel %vm22737_vm9, %v11638_v59, %v11642_v9  ;;  %v18723_v47 = vcombine.low %v11609_v23, %v11619_v19  ;;  %v11662_v34 = vrot.slane %v11661_v63, 4  ;;  %v11666_v59 = vrot.slane %v11664_v41, 5 }
 0x3e4   : > { %v18724_v25 = vcombine.low %v11633_v5, %v11643_v44  ;;  %v11695_v13 = vrot.slane %v11693_v52, 4  ;;  %v11698_v9 = vrot.slane %v11696_v43, 5  ;;  %v11704_v11 = vrot.slane %v28638_v36, 5 }
 0x3e5   : > { %v11708_v8 = vrot.slane %v28639_v50, 4  ;;  %v11676_v60 = vrot.slane %v11675_v35, 4  ;;  %v11690_v28 = vrot.slane %v11688_v33, 5  ;;  %v11667_v23 = vsel %vm22737_vm9, %v11662_v34, %v11666_v59 }
 0x3e6   : > { %v11699_v19 = vor.u32 %v11698_v9, %v11695_v13  ;;  %v11712_v5 = vshll.u32 %v27020_v22, 16  ;;  %v18760_v35 = vrot.slane %v27035_v56, 9  ;;  %v12083_v59 = vrot.slane %v26646_v30, 5 }
 0x3e7   : > { %v11709_v41 = vor.u32 %v11708_v8, %v11704_v11  ;;  %v11681_v44 = vsel %vm22737_vm9, %v11676_v60, %v11680_v24  ;;  %v27051_v8 = vld [vmem:[%s22455_s8 + $0x3c] sm:$0xe]  ;;  %v27055_v60 = vld [vmem:[%s22455_s8 + $0x48] sm:$0xe]  ;;  %v28963_v36 = vshrl.u32 %v26646_v30, 16 }
 0x3e8   : > { %20447 = vmatmul.mubr.msk.bf16.gmra.mrb[16].mxu0 %vm763_vm3, %v18721_v40  ;;  %v11685_v40 = vor.u32 %v11684_v32, %v11680_v24  ;;  %v11657_v32 = vsel %vm22737_vm9, %v11652_v27, %v11656_v2  ;;  %v11700_v52 = vrot.slane %v11699_v19, 4  ;;  %v11714_v43 = vrot.slane %v11712_v5, 5 }
 0x3e9   : > { %20450 = vmatprep.mubr.msk.bf16.mxu0 %vm763_vm3, %v18722_v54  ;;  %v18725_v2 = vcombine.low %v11657_v32, %v11667_v23  ;;  %v11710_v34 = vrot.slane %v11709_v41, 4  ;;  %v18761_v0 = vrot.slane %v27051_v8, 9  ;;  %v12086_v32 = vrot.slane %v26680_v62, 5 }
 0x3ea   : > { %v11686_v54 = vrot.slane %v11685_v40, 4  ;;  %v11705_v24 = vsel %vm22737_vm9, %v11700_v52, %v11704_v11  ;;  %v18762_v23 = vrot.slane %v27055_v60, 9  ;;  %v12093_v41 = vrot.slane %v26711_v26, 5 }
 0x3eb   : > { %v11715_v27 = vsel %vm22737_vm9, %v11710_v34, %v11714_v43  ;;  %v12084_v5 = vsel %vm23312_vm12, %v18761_v0, %v12083_v59  ;;  %v12104_v26 = vrot.slane %v26708_v46, 5  ;;  %v27108_v0 = vld [vmem:[%s22455_s8 + $0x78] sm:$0xe]  ;;  %v12528_v50 = vrot.slane %v28963_v36, 5 }
 0x3ec   : > { %v11691_v33 = vsel %vm22737_vm9, %v11686_v54, %v11690_v28  ;;  %v18727_v54 = vcombine.low %v11705_v24, %v11715_v27  ;;  %v12085_v28 = vrot.slane %v12083_v59, 4  ;;  %v12107_v59 = vrot.slane %v26742_v1, 5 }
 0x3ed   : > { %v18726_v63 = vcombine.low %v11681_v44, %v11691_v33  ;;  %v12097_v33 = vrot.slane %v26674_v29, 5  ;;  %v12106_v27 = vrot.slane %v12104_v26, 4 }
 0x3ee   : > { %v12087_v44 = vsel %vm23312_vm12, %v12085_v28, %v12086_v32 }
 0x3ef   : > { %v18778_v52 = vcombine.low %v12084_v5, %v12087_v44  ;;  %v18766_v5 = vrot.slane %v27108_v0, 9 }
 0x3f0   : > { %20451 = vmatmul.mubr.msk.bf16.gmra.mrb[20].mxu0 %vm763_vm3, %v18723_v47  ;;  %v12076_v47 = vrot.slane %v26636_v7, 5 }
 0x3f1   : > { %20454 = vmatprep.mubr.msk.bf16.mxu0 %vm763_vm3, %v18724_v25  ;;  %v12079_v25 = vrot.slane %v26651_v49, 5  ;;  %v12090_v49 = vrot.slane %v26667_v51, 5 }
 0x3f2   : > { %v12078_v40 = vrot.slane %v12076_v47, 4  ;;  %v12077_v13 = vsel %vm23312_vm12, %v18760_v35, %v12076_v47  ;;  %v12099_v35 = vrot.slane %v12097_v33, 4 }
 0x3f3   : > { %v12092_v19 = vrot.slane %v12090_v49, 4  ;;  %v12091_v62 = vsel %vm23312_vm12, %v18762_v23, %v12090_v49  ;;  %v12108_v49 = vsel %vm23312_vm12, %v12106_v27, %v12107_v59  ;;  %v12128_v27 = vrot.slane %v26840_v38, 5 }
 0x3f4   : > { %v12080_v9 = vsel %vm23312_vm12, %v12078_v40, %v12079_v25  ;;  %v12100_v40 = vrot.slane %v26720_v39, 5  ;;  %v12963_v25 = vsel %vm812_vm0, %v26836_v53, 0 }
 0x3f5   : > { %v18777_v11 = vcombine.low %v12077_v13, %v12080_v9  ;;  %v12094_v47 = vsel %vm23312_vm12, %v12092_v19, %v12093_v41  ;;  %v27088_v13 = vld [vmem:[%s28426_s1 + $0x30] sm:$0x3]  ;;  %v12111_v9 = vrot.slane %v26745_v4, 5  ;;  %v12114_v41 = vrot.slane %v26778_v3, 5 }
 0x3f6   : > { %v18779_v34 = vcombine.low %v12091_v62, %v12094_v47  ;;  %v12101_v53 = vsel %vm23312_vm12, %v12099_v35, %v12100_v40  ;;  %v12125_v3 = vrot.slane %v26799_v61, 5 }
 0x3f7   : > { %v12113_v19 = vrot.slane %v12111_v9, 4 }
 0x3f8   : > { %20455 = vmatmul.mubr.msk.bf16.gmra.mrb[24].mxu0 %vm763_vm3, %v18725_v2  ;;  %v27073_v2 = vld [vmem:[%s22455_s8 + $0x54] sm:$0xe] }
 0x3f9   : > { %20458 = vmatprep.mubr.msk.bf16.mxu0 %vm763_vm3, %v18726_v63  ;;  %v27077_v63 = vld [vmem:[%s22455_s8 + $0x60] sm:$0xe]  ;;  %v18763_v43 = vrot.slane %v27073_v2, 9  ;;  %v12115_v47 = vsel %vm23312_vm12, %v12113_v19, %v12114_v41  ;;  %v12142_v41 = vrot.slane %v26891_v14, 5 }
 0x3fa   : > { %v18764_v24 = vrot.slane %v27077_v63, 9 }
 0x3fb   : > { %v12098_v39 = vsel %vm23312_vm12, %v18763_v43, %v12097_v33  ;;  %v12121_v33 = vrot.slane %v26810_v15, 5  ;;  %v12132_v43 = vrot.slane %v26816_v18, 5 }
 0x3fc   : > { %v12105_v1 = vsel %vm23312_vm12, %v18764_v24, %v12104_v26  ;;  %v18780_v28 = vcombine.low %v12098_v39, %v12101_v53  ;;  %v27121_v26 = vld [vmem:[%s22455_s8 + $0x84] sm:$0xe]  ;;  %v12127_v24 = vrot.slane %v12125_v3, 4  ;;  %v12135_v53 = vrot.slane %v26859_v37, 5 }
 0x3fd   : > { %v18781_v32 = vcombine.low %v12105_v1, %v12108_v49  ;;  %v18767_v40 = vrot.slane %v27121_v26, 9  ;;  %v12134_v39 = vrot.slane %v12132_v43, 4  ;;  %v12139_v1 = vrot.slane %v26829_v31, 5  ;;  %v27141_v49 = vld [vmem:[%s22455_s8 + $0xa8] sm:$0xe] }
 0x3ff   : > { %v12126_v38 = vsel %vm23312_vm12, %v18767_v40, %v12125_v3  ;;  %v12141_v19 = vrot.slane %v12139_v1, 4  ;;  %v27170_v40 = vld [vmem:[%s22455_s8 + $0xcc] sm:$0xe] }
 0x400   : > { %20459 = vmatmul.mubr.msk.bf16.gmra.mrb[28].mxu0 %vm763_vm3, %v18727_v54  ;;  %v27102_v54 = vld [vmem:[%s22455_s8 + $0x6c] sm:$0xe] }
 0x401   : > { %20464 = vmatprep.mubr.msk.bf16.mxu0 %vm763_vm3, %v18777_v11  ;;  %v12118_v11 = vrot.slane %v26769_v10, 5  ;;  %v18765_v23 = vrot.slane %v27102_v54, 9 }
 0x403   : > { %v12120_v44 = vrot.slane %v12118_v11, 4  ;;  %v12112_v62 = vsel %vm23312_vm12, %v18765_v23, %v12111_v9  ;;  %v27137_v9 = vld [vmem:[%s22455_s8 + $0x9c] sm:$0xe]  ;;  %v12136_v23 = vsel %vm23312_vm12, %v12134_v39, %v12135_v53 }
 0x404   : > { %v18782_v35 = vcombine.low %v12112_v62, %v12115_v47  ;;  %v12160_v62 = vrot.slane %v26920_v48, 5 }
 0x405   : > { %v12122_v15 = vsel %vm23312_vm12, %v12120_v44, %v12121_v33  ;;  %v27158_v44 = vld [vmem:[%s22455_s8 + $0xb4] sm:$0xe]  ;;  %v12153_v33 = vrot.slane %v26908_v55, 5 }
 0x406   : > { %v12162_v53 = vrot.slane %v12160_v62, 4 }
 0x408   : > { %20465 = vmatmul.mubr.msk.bf16.vlgmr.msra.gmra.mrb[0].mxu0 %vm763_vm3, %v18778_v52  ;;  %v12119_v52 = vsel %vm23312_vm12, %v18766_v5, %v12118_v11  ;;  %v12146_v11 = vrot.slane %v26885_v12, 5  ;;  %v18770_v5 = vrot.slane %v27141_v49, 9 }
 0x409   : > { %20497 = vmatpush3.bf16.msra.mxu0 %v12963_v25  ;;  %20468 = vmatprep.mubr.msk.bf16.mxu0 %vm763_vm3, %v18779_v34  ;;  %v27129_v34 = vld [vmem:[%s22455_s8 + $0x90] sm:$0xe]  ;;  %v18783_v25 = vcombine.low %v12119_v52, %v12122_v15  ;;  %v12149_v52 = vrot.slane %v26905_v42, 5  ;;  %v27164_v15 = vld [vmem:[%s22455_s8 + $0xc0] sm:$0xe]  ;;  %v12156_v42 = vrot.slane %v26941_v6, 5 }
 0x40a   : > { %21897 = vmatprep.subr.msk.bf16.mxu0 %vm812_vm0, %v27088_v13  ;;  %v18768_v59 = vrot.slane %v27129_v34, 9  ;;  %v12148_v3 = vrot.slane %v12146_v11, 4  ;;  %v18772_v39 = vrot.slane %v27164_v15, 9  ;;  %v27187_v6 = vld [vmem:[%s22455_s8 + $0xd8] sm:$0xe] }
 0x40c   : > { %v12133_v37 = vsel %vm23312_vm12, %v18768_v59, %v12132_v43  ;;  %v12167_v43 = vrot.slane %v26961_v17, 5  ;;  %v12155_v59 = vrot.slane %v12153_v33, 4 }
 0x410   : > { %20469 = vmatmul.mubr.msk.bf16.gmra.mrb[4].mxu0 %vm763_vm3, %v18780_v28  ;;  %v12129_v28 = vsel %vm23312_vm12, %v12127_v24, %v12128_v27  ;;  %v12147_v24 = vsel %vm23312_vm12, %v18770_v5, %v12146_v11  ;;  %v18771_v27 = vrot.slane %v27158_v44, 9  ;;  %v12170_v11 = vrot.slane %v26982_v21, 5 }
 0x411   : > { %20472 = vmatprep.mubr.msk.bf16.mxu0 %vm763_vm3, %v18781_v32  ;;  %v18769_v32 = vrot.slane %v27137_v9, 9  ;;  %v18784_v47 = vcombine.low %v12126_v38, %v12129_v28  ;;  %v12163_v38 = vrot.slane %v26951_v58, 5  ;;  %v18773_v28 = vrot.slane %v27170_v40, 9 }
 0x412   : > { %v12497_v58 = vshrl.u32 %v27035_v56, 16  ;;  %v12157_v21 = vsel %vm23312_vm12, %v12155_v59, %v12156_v42  ;;  %v12520_v42 = vshrl.u32 %v27051_v8, 16  ;;  %v28960_v59 = vshrl.u32 %v26636_v7, 16 }
 0x413   : > { %v12140_v14 = vsel %vm23312_vm12, %v18769_v32, %v12139_v1  ;;  %v12150_v1 = vsel %vm23312_vm12, %v12148_v3, %v12149_v52  ;;  %v12174_v32 = vrot.slane %v26967_v20, 5  ;;  %v12164_v3 = vsel %vm23312_vm12, %v12162_v53, %v12163_v38 }
 0x414   : > { %v18787_v5 = vcombine.low %v12147_v24, %v12150_v1  ;;  %v27204_v52 = vsel %vm23312_vm12, %v18773_v28, %v12167_v43  ;;  %v12499_v24 = vrot.slane %v12497_v58, 5  ;;  %v28961_v53 = vshll.u32 %v26636_v7, 16  ;;  %v27233_v7 = vld [vmem:[%s22455_s8 + $0x44] sm:$0x3] }
 0x415   : > { %v12523_v1 = vshll.u32 %v27051_v8, 16  ;;  %28962 = vst [vmem:[#allocation45_spill] sm:$0xff] %v27233_v7  ;;  %v12543_v8 = vshrl.u32 %v27055_v60, 16 }
 0x416   : > { %v12506_v38 = vrot.slane %v28961_v53, 6 }
 0x417   : > { %v12525_v53 = vrot.slane %v12523_v1, 6 }
 0x418   : > { %20473 = vmatmul.mubr.msk.bf16.gmra.mrb[8].mxu0 %vm763_vm3, %v18782_v35  ;;  %v18785_v35 = vcombine.low %v12133_v37, %v12136_v23  ;;  %v12169_v37 = vrot.slane %v12167_v43, 4  ;;  %v12500_v23 = vshll.u32 %v27035_v56, 16 }
 0x419   : > { %20476 = vmatprep.mubr.msk.bf16.mxu0 %vm763_vm3, %v18783_v25  ;;  %v12143_v25 = vsel %vm23312_vm12, %v12141_v19, %v12142_v41  ;;  %v12154_v41 = vsel %vm23312_vm12, %v18771_v27, %v12153_v33  ;;  %v18774_v33 = vrot.slane %v27187_v6, 9 }
 0x41a   : > { %v18786_v19 = vcombine.low %v12140_v14, %v12143_v25  ;;  %v27208_v56 = vsel %vm23312_vm12, %v12169_v37, %v12170_v11  ;;  %v27213_v14 = vld [vmem:[%s22455_s8 + $0x38] sm:$0x3]  ;;  %v12176_v25 = vrot.slane %v12174_v32, 4  ;;  %v12502_v27 = vrot.slane %v12500_v23, 6 }
 0x41b   : > { %28958 = vst [vmem:[#allocation26_spill] sm:$0xff] %v27213_v14  ;;  %v18788_v43 = vcombine.low %v12154_v41, %v12157_v21  ;;  %v12511_v37 = vshrl.u32 %v27213_v14, 16  ;;  %v12514_v11 = vshll.u32 %v27213_v14, 16  ;;  %v12181_v23 = vrot.slane %v26994_v16, 5 }
 0x41c   : > { %v12546_v41 = vshll.u32 %v27055_v60, 16  ;;  %v27240_v21 = vsel %vm23312_vm12, %v18774_v33, %v12174_v32  ;;  %v28964_v60 = vshll.u32 %v26646_v30, 16  ;;  %v12534_v33 = vshrl.u32 %v27233_v7, 16 }
 0x41d   : > { %v12513_v14 = vrot.slane %v12511_v37, 5  ;;  %v12516_v32 = vrot.slane %v12514_v11, 6  ;;  %v12184_v30 = vrot.slane %v27020_v22, 5  ;;  %v27274_v22 = vld [vmem:[%s22455_s8 + $0x5c] sm:$0x3] }
 0x41e   : > { %v12529_v28 = vrot.slane %v28964_v60, 6 }
 0x420   : > { %20477 = vmatmul.mubr.msk.bf16.gmra.mrb[12].mxu0 %vm763_vm3, %v18784_v47  ;;  %v27198_v47 = vsel %vm23312_vm12, %v18772_v39, %v12160_v62  ;;  %v27216_v62 = vld [vmem:[%s22455_s8 + $0xe4] sm:$0xe]  ;;  %v12505_v39 = vrot.slane %v28960_v59, 5 }
 0x421   : > { %20480 = vmatprep.mubr.msk.bf16.mxu0 %vm763_vm3, %v18785_v35  ;;  %v12177_v35 = vrot.slane %v27003_v45, 5  ;;  %28959 = vst [vmem:[#allocation44_spill] sm:$0xff] %v27216_v62  ;;  %v18789_v45 = vcombine.low %v27198_v47, %v12164_v3  ;;  %v18775_v58 = vrot.slane %v27216_v62, 9  ;;  %v12522_v3 = vrot.slane %v12520_v42, 5 }
 0x422   : > { %v27246_v59 = vor.u32 %v12506_v38, %v12505_v39  ;;  %v28967_v39 = vshll.u32 %v26667_v51, 16  ;;  %v12183_v38 = vrot.slane %v12181_v23, 4 }
 0x423   : > { %v27244_v47 = vsel %vm23312_vm12, %v12176_v25, %v12177_v35  ;;  %v12537_v35 = vshll.u32 %v27233_v7, 16  ;;  %v12545_v25 = vrot.slane %v12543_v8, 5  ;;  %v27268_v8 = vsel %vm23312_vm12, %v18775_v58, %v12181_v23 }
 0x424   : > { %v12552_v36 = vrot.slane %v28967_v39, 6  ;;  %v18791_v11 = vcombine.low %v27240_v21, %v27244_v47  ;;  %v12526_v60 = vor.u32 %v12525_v53, %v12522_v3  ;;  %v27271_v39 = vor.u32 %v12529_v28, %v12528_v50 }
 0x425   : > { %v12536_v7 = vrot.slane %v12534_v33, 5  ;;  %v12566_v21 = vshrl.u32 %v27073_v2, 16  ;;  %v12569_v47 = vshll.u32 %v27073_v2, 16  ;;  %v28968_v50 = vshrl.u32 %v26674_v29, 16 }
 0x426   : > { %v28969_v28 = vshll.u32 %v26674_v29, 16  ;;  %v12583_v3 = vshll.u32 %v27274_v22, 16  ;;  %v12589_v53 = vshrl.u32 %v27077_v63, 16  ;;  %v12527_v2 = vrot.slane %v12526_v60, 4 }
 0x428   : > { %20481 = vmatmul.mubr.msk.bf16.gmra.mrb[16].mxu0 %vm763_vm3, %v18786_v19  ;;  %v12503_v19 = vor.u32 %v12502_v27, %v12499_v24  ;;  %v12548_v24 = vrot.slane %v12546_v41, 6  ;;  %v28966_v27 = vshrl.u32 %v26667_v51, 16  ;;  %v12517_v51 = vor.u32 %v12516_v32, %v12513_v14 }
 0x429   : > { %20484 = vmatprep.mubr.msk.bf16.mxu0 %vm763_vm3, %v18787_v5  ;;  %v27253_v5 = vld [vmem:[%s22455_s8 + $0x50] sm:$0x3]  ;;  %v12574_v14 = vrot.slane %v28968_v50, 5 }
 0x42a   : > { %28965 = vst [vmem:[#allocation46_spill] sm:$0xff] %v27253_v5  ;;  %v12551_v42 = vrot.slane %v28966_v27, 5  ;;  %v12557_v1 = vshrl.u32 %v27253_v5, 16  ;;  %v12560_v37 = vshll.u32 %v27253_v5, 16  ;;  %v12504_v41 = vrot.slane %v12503_v19, 4 }
 0x42b   : > { %v12509_v27 = vrot.slane %v27246_v59, 4  ;;  %v12539_v5 = vrot.slane %v12537_v35, 6  ;;  %v12549_v16 = vor.u32 %v12548_v24, %v12545_v25  ;;  %v12575_v19 = vrot.slane %v28969_v28, 6 }
 0x42c   : > { %v12553_v62 = vor.u32 %v12552_v36, %v12551_v42  ;;  %v12559_v58 = vrot.slane %v12557_v1, 5  ;;  %v12562_v23 = vrot.slane %v12560_v37, 6  ;;  %v12508_v33 = vsel %vm22489_vm4, %v12504_v41, %v27246_v59  ;;  %v27297_v36 = vld [vmem:[%s22455_s8 + $0x68] sm:$0x3] }
 0x42d   : > { %v12592_v35 = vshll.u32 %v27077_v63, 16  ;;  %v12518_v29 = vsel %vm22489_vm4, %v12509_v27, %v12517_v51  ;;  %v12532_v25 = vrot.slane %v27271_v39, 4  ;;  %v12540_v24 = vor.u32 %v12539_v5, %v12536_v7 }
 0x42e   : > { %v12568_v42 = vrot.slane %v12566_v21, 5  ;;  %v12550_v1 = vrot.slane %v12549_v16, 4  ;;  %v12555_v37 = vrot.slane %v12553_v62, 4  ;;  %v12563_v57 = vor.u32 %v12562_v23, %v12559_v58 }
 0x42f   : > { %v12585_v59 = vrot.slane %v12583_v3, 6  ;;  %v12591_v41 = vrot.slane %v12589_v53, 5  ;;  %v12594_v60 = vrot.slane %v12592_v35, 6  ;;  %v28971_v63 = vshrl.u32 %v26708_v46, 16 }
 0x430   : > { %20485 = vmatmul.mubr.msk.bf16.gmra.mrb[20].mxu0 %vm763_vm3, %v18788_v43  ;;  %v12580_v43 = vshrl.u32 %v27274_v22, 16  ;;  %v28972_v27 = vshll.u32 %v26708_v46, 16  ;;  %v12603_v5 = vshrl.u32 %v27297_v36, 16  ;;  %v28973_v16 = vcombine.low %v27204_v52, %v27208_v56 }
 0x431   : > { %20488 = vmatprep.mubr.msk.bf16.mxu0 %vm763_vm3, %v18789_v45  ;;  %v12185_v45 = vsel %vm23312_vm12, %v12183_v38, %v12184_v30  ;;  %v12571_v38 = vrot.slane %v12569_v47, 6  ;;  %v27299_v30 = vor.u32 %v12575_v19, %v12574_v14  ;;  %v12597_v28 = vrot.slane %v28971_v63, 5 }
 0x432   : > { %v12582_v50 = vrot.slane %v12580_v43, 5  ;;  %v12598_v7 = vrot.slane %v28972_v27, 6  ;;  %v12606_v51 = vshll.u32 %v27297_v36, 16  ;;  %v12612_v21 = vshrl.u32 %v27102_v54, 16 }
 0x433   : > { %v12615_v58 = vshll.u32 %v27102_v54, 16  ;;  %v18792_v23 = vcombine.low %v27268_v8, %v12185_v45  ;;  %v18826_v46 = vcombine.low %v12508_v33, %v12518_v29  ;;  %v12531_v47 = vsel %vm22489_vm4, %v12527_v2, %v27271_v39 }
 0x434   : > { %v12541_v52 = vsel %vm22489_vm4, %v12532_v25, %v12540_v24  ;;  %v12554_v56 = vsel %vm22489_vm4, %v12550_v1, %v12553_v62  ;;  %v12564_v14 = vsel %vm22489_vm4, %v12555_v37, %v12563_v57  ;;  %v12572_v19 = vor.u32 %v12571_v38, %v12568_v42 }
 0x435   : > { %v12578_v54 = vrot.slane %v27299_v30, 4  ;;  %v12586_v8 = vor.u32 %v12585_v59, %v12582_v50  ;;  %v12595_v43 = vor.u32 %v12594_v60, %v12591_v41  ;;  %v27328_v3 = vor.u32 %v12598_v7, %v12597_v28 }
 0x436   : > { %v12605_v39 = vrot.slane %v12603_v5, 5  ;;  %v12608_v53 = vrot.slane %v12606_v51, 6  ;;  %v12614_v45 = vrot.slane %v12612_v21, 5  ;;  %v12617_v33 = vrot.slane %v12615_v58, 6  ;;  %v27353_v51 = vld [vmem:[%s22455_s8 + $0x8c] sm:$0x3] }
 0x437   : > { %v28974_v2 = vshrl.u32 %v26745_v4, 16  ;;  %v28975_v35 = vshll.u32 %v26745_v4, 16  ;;  %v12635_v42 = vshrl.u32 %v27108_v0, 16  ;;  %v18827_v1 = vcombine.low %v12531_v47, %v12541_v52  ;;  %v27343_v4 = vld [vmem:[%s22455_s8 + $0x80] sm:$0x3] }
 0x438   : > { %20489 = vmatmul.mubr.msk.bf16.gmra.mrb[24].mxu0 %vm763_vm3, %v28973_v16  ;;  %v13417_v37 = vsel %vm812_vm0, %v27088_v13, 0  ;;  %v18828_v57 = vcombine.low %v12554_v56, %v12564_v14  ;;  %v12638_v38 = vshll.u32 %v27108_v0, 16  ;;  %v12573_v50 = vrot.slane %v12572_v19, 4 }
 0x439   : > { %20492 = vmatprep.mubr.msk.bf16.mxu0 %vm763_vm3, %v18791_v11  ;;  %v27326_v11 = vld [vmem:[%s22455_s8 + $0x74] sm:$0x3]  ;;  %v12620_v62 = vrot.slane %v28974_v2, 5  ;;  %v12621_v29 = vrot.slane %v28975_v35, 6  ;;  %v12587_v59 = vsel %vm22489_vm4, %v12578_v54, %v12586_v8  ;;  %v12658_v41 = vshrl.u32 %v27121_v26, 16 }
 0x43a   : > { %v12626_v25 = vshrl.u32 %v27326_v11, 16  ;;  %v12629_v24 = vshll.u32 %v27326_v11, 16  ;;  %v12661_v60 = vshll.u32 %v27121_v26, 16  ;;  %v12596_v63 = vrot.slane %v12595_v43, 4 }
 0x43b   : > { %v12601_v28 = vrot.slane %v27328_v3, 4  ;;  %v12609_v13 = vor.u32 %v12608_v53, %v12605_v39  ;;  %v12618_v27 = vor.u32 %v12617_v33, %v12614_v45  ;;  %v27350_v0 = vor.u32 %v12621_v29, %v12620_v62 }
 0x43c   : > { %v12628_v7 = vrot.slane %v12626_v25, 5  ;;  %v12631_v5 = vrot.slane %v12629_v24, 6  ;;  %v12637_v16 = vrot.slane %v12635_v42, 5  ;;  %v12640_v21 = vrot.slane %v12638_v38, 6  ;;  %v27379_v24 = vld [vmem:[%s22455_s8 + $0x98] sm:$0x3] }
 0x43d   : > { %v28976_v58 = vshrl.u32 %v26769_v10, 16  ;;  %v12649_v52 = vshrl.u32 %v27343_v4, 16  ;;  %v12652_v56 = vshll.u32 %v27343_v4, 16  ;;  %v12663_v14 = vrot.slane %v12661_v60, 6 }
 0x43e   : > { %v28978_v19 = vshrl.u32 %v26799_v61, 16  ;;  %v28979_v8 = vshll.u32 %v26799_v61, 16  ;;  %v12672_v39 = vshrl.u32 %v27353_v51, 16  ;;  %v12675_v53 = vshll.u32 %v27353_v51, 16 }
 0x43f   : > { %v12643_v26 = vrot.slane %v28976_v58, 5  ;;  %v12577_v45 = vsel %vm22489_vm4, %v12573_v50, %v27299_v30  ;;  %v12600_v33 = vsel %vm22489_vm4, %v12596_v63, %v27328_v3  ;;  %v12610_v2 = vsel %vm22489_vm4, %v12601_v28, %v12609_v13 }
 0x440   : > { %20493 = vmatmul.mubr.msk.bf16.gmra.mrb[28].mxu0 %vm763_vm3, %v18792_v23  ;;  %v28977_v23 = vshll.u32 %v26769_v10, 16  ;;  %v12666_v54 = vrot.slane %v28978_v19, 5  ;;  %v12667_v43 = vrot.slane %v28979_v8, 6  ;;  %v12681_v10 = vshrl.u32 %v27129_v34, 16 }
 0x441   : > { %20498 = vmatprep.mubr.msk.bf16.mxu0 %vm763_vm3, %v18826_v46  ;;  %v12660_v46 = vrot.slane %v12658_v41, 5  ;;  %v12684_v61 = vshll.u32 %v27129_v34, 16  ;;  %v12619_v62 = vrot.slane %v12618_v27, 4  ;;  %v12624_v35 = vrot.slane %v27350_v0, 4 }
 0x442   : > { %v12644_v47 = vrot.slane %v28977_v23, 6  ;;  %v12632_v29 = vor.u32 %v12631_v5, %v12628_v7  ;;  %v12641_v25 = vor.u32 %v12640_v21, %v12637_v16  ;;  %v12651_v38 = vrot.slane %v12649_v52, 5 }
 0x443   : > { %v12654_v41 = vrot.slane %v12652_v56, 6  ;;  %v12664_v30 = vor.u32 %v12663_v14, %v12660_v46  ;;  %v12668_v50 = vor.u32 %v12667_v43, %v12666_v54  ;;  %v12674_v3 = vrot.slane %v12672_v39, 5 }
 0x444   : > { %v12645_v42 = vor.u32 %v12644_v47, %v12643_v26  ;;  %v12677_v60 = vrot.slane %v12675_v53, 6  ;;  %v12683_v63 = vrot.slane %v12681_v10, 5  ;;  %v12686_v34 = vrot.slane %v12684_v61, 6 }
 0x445   : > { %v28980_v28 = vshrl.u32 %v26816_v18, 16  ;;  %v28981_v27 = vshll.u32 %v26816_v18, 16  ;;  %v12695_v5 = vshrl.u32 %v27379_v24, 16  ;;  %v18829_v16 = vcombine.low %v12577_v45, %v12587_v59  ;;  %v27397_v59 = vld [vmem:[%s22455_s8 + $0xa4] sm:$0x3] }
 0x446   : > { %v12704_v21 = vshrl.u32 %v27137_v9, 16  ;;  %v12707_v58 = vshll.u32 %v27137_v9, 16  ;;  %v12633_v26 = vsel %vm22489_vm4, %v12624_v35, %v12632_v29  ;;  %v12642_v23 = vrot.slane %v12641_v25, 4 }
 0x447   : > { %v12689_v13 = vrot.slane %v28980_v28, 5  ;;  %v12690_v7 = vrot.slane %v28981_v27, 6  ;;  %v12647_v18 = vrot.slane %v12645_v42, 4  ;;  %v12655_v47 = vor.u32 %v12654_v41, %v12651_v38  ;;  %v27420_v38 = vld [vmem:[%s22455_s8 + $0xb0] sm:$0x3] }
 0x448   : > { %20499 = vmatmul.mubr.msk.bf16.vlgmr.msra.gmra.mrb[0].mxu0 %vm763_vm3, %v18827_v1  ;;  %v12698_v1 = vshll.u32 %v27379_v24, 16  ;;  %v12665_v52 = vrot.slane %v12664_v30, 4  ;;  %v12670_v56 = vrot.slane %v12668_v50, 4  ;;  %v12678_v46 = vor.u32 %v12677_v60, %v12674_v3 }
 0x449   : > { %20531 = vmatpush3.bf16.msra.mxu0 %v13417_v37  ;;  %20502 = vmatprep.mubr.msk.bf16.mxu0 %vm763_vm3, %v18828_v57  ;;  %v18830_v37 = vcombine.low %v12600_v33, %v12610_v2  ;;  %v12623_v57 = vsel %vm22489_vm4, %v12619_v62, %v27350_v0  ;;  %v12687_v14 = vor.u32 %v12686_v34, %v12683_v63  ;;  %v12697_v9 = vrot.slane %v12695_v5, 5 }
 0x44a   : > { %v27399_v19 = vor.u32 %v12690_v7, %v12689_v13  ;;  %v12700_v54 = vrot.slane %v12698_v1, 6  ;;  %v12706_v8 = vrot.slane %v12704_v21, 5  ;;  %v12709_v43 = vrot.slane %v12707_v58, 6 }
 0x44b   : > { %v28982_v0 = vshrl.u32 %v26829_v31, 16  ;;  %v28983_v53 = vshll.u32 %v26829_v31, 16  ;;  %v12718_v45 = vshrl.u32 %v27397_v59, 16  ;;  %v12721_v33 = vshll.u32 %v27397_v59, 16 }
 0x44c   : > { %v12727_v2 = vshrl.u32 %v27141_v49, 16  ;;  %v18831_v61 = vcombine.low %v12623_v57, %v12633_v26  ;;  %v12730_v62 = vshll.u32 %v27141_v49, 16  ;;  %v12646_v35 = vsel %vm22489_vm4, %v12642_v23, %v12645_v42 }
 0x44d   : > { %v12712_v39 = vrot.slane %v28982_v0, 5  ;;  %v12713_v10 = vrot.slane %v28983_v53, 6  ;;  %v12656_v31 = vsel %vm22489_vm4, %v12647_v18, %v12655_v47  ;;  %v12669_v29 = vsel %vm22489_vm4, %v12665_v52, %v12668_v50 }
 0x44e   : > { %v12679_v25 = vsel %vm22489_vm4, %v12670_v56, %v12678_v46  ;;  %v12688_v41 = vrot.slane %v12687_v14, 4  ;;  %v12693_v30 = vrot.slane %v27399_v19, 4  ;;  %v12701_v49 = vor.u32 %v12700_v54, %v12697_v9  ;;  %v27439_v56 = vld [vmem:[%s22455_s8 + $0xbc] sm:$0x3]  ;;  %v27445_v54 = vld [vmem:[%s22455_s8 + $0xc8] sm:$0x3] }
 0x44f   : > { %v12710_v3 = vor.u32 %v12709_v43, %v12706_v8  ;;  %v12714_v60 = vor.u32 %v12713_v10, %v12712_v39  ;;  %v12720_v63 = vrot.slane %v12718_v45, 5  ;;  %v12723_v34 = vrot.slane %v12721_v33, 6 }
 0x450   : > { %20503 = vmatmul.mubr.msk.bf16.gmra.mrb[4].mxu0 %vm763_vm3, %v18829_v16  ;;  %v12729_v42 = vrot.slane %v12727_v2, 5  ;;  %v12732_v28 = vrot.slane %v12730_v62, 6  ;;  %v28984_v13 = vshrl.u32 %v26885_v12, 16  ;;  %v28985_v50 = vshll.u32 %v26885_v12, 16 }
 0x451   : > { %20506 = vmatprep.mubr.msk.bf16.mxu0 %vm763_vm3, %v18830_v37  ;;  %v12741_v5 = vshrl.u32 %v27420_v38, 16  ;;  %v18832_v16 = vcombine.low %v12646_v35, %v12656_v31  ;;  %v12744_v1 = vshll.u32 %v27420_v38, 16  ;;  %v12750_v21 = vshrl.u32 %v27158_v44, 16 }
 0x452   : > { %v12735_v27 = vrot.slane %v28984_v13, 5  ;;  %v12736_v7 = vrot.slane %v28985_v50, 6  ;;  %v12753_v58 = vshll.u32 %v27158_v44, 16  ;;  %v18833_v37 = vcombine.low %v12669_v29, %v12679_v25 }
 0x453   : > { %v12692_v57 = vsel %vm22489_vm4, %v12688_v41, %v27399_v19  ;;  %v12773_v26 = vshrl.u32 %v27164_v15, 16  ;;  %v12776_v12 = vshll.u32 %v27164_v15, 16  ;;  %v12702_v23 = vsel %vm22489_vm4, %v12693_v30, %v12701_v49 }
 0x454   : > { %v12711_v18 = vrot.slane %v12710_v3, 4  ;;  %v12716_v47 = vrot.slane %v12714_v60, 4  ;;  %v12724_v52 = vor.u32 %v12723_v34, %v12720_v63  ;;  %v12733_v44 = vor.u32 %v12732_v28, %v12729_v42 }
 0x455   : > { %v12737_v46 = vor.u32 %v12736_v7, %v12735_v27  ;;  %v12743_v14 = vrot.slane %v12741_v5, 5  ;;  %v28986_v9 = vshrl.u32 %v26908_v55, 16  ;;  %v12746_v15 = vrot.slane %v12744_v1, 6 }
 0x456   : > { %v12752_v8 = vrot.slane %v12750_v21, 5  ;;  %v12755_v43 = vrot.slane %v12753_v58, 6  ;;  %v28987_v0 = vshll.u32 %v26908_v55, 16  ;;  %v12764_v53 = vshrl.u32 %v27439_v56, 16  ;;  %v27469_v21 = vld [vmem:[%s22455_s8 + $0xd4] sm:$0x3] }
 0x457   : > { %v12758_v19 = vrot.slane %v28986_v9, 5  ;;  %v12767_v10 = vshll.u32 %v27439_v56, 16  ;;  %v12775_v45 = vrot.slane %v12773_v26, 5  ;;  %v12778_v33 = vrot.slane %v12776_v12, 6 }
 0x458   : > { %20507 = vmatmul.mubr.msk.bf16.gmra.mrb[8].mxu0 %vm763_vm3, %v18831_v61  ;;  %v12759_v39 = vrot.slane %v28987_v0, 6  ;;  %v28988_v2 = vshrl.u32 %v26920_v48, 16  ;;  %v28989_v62 = vshll.u32 %v26920_v48, 16  ;;  %v12787_v31 = vshrl.u32 %v27445_v54, 16 }
 0x459   : > { %20510 = vmatprep.mubr.msk.bf16.mxu0 %vm763_vm3, %v18832_v16  ;;  %v12790_v29 = vshll.u32 %v27445_v54, 16  ;;  %v18834_v25 = vcombine.low %v12692_v57, %v12702_v23  ;;  %v12715_v55 = vsel %vm22489_vm4, %v12711_v18, %v12714_v60  ;;  %v12725_v41 = vsel %vm22489_vm4, %v12716_v47, %v12724_v52 }
 0x45a   : > { %v12781_v61 = vrot.slane %v28988_v2, 5  ;;  %v12782_v35 = vrot.slane %v28989_v62, 6  ;;  %v12734_v30 = vrot.slane %v12733_v44, 4  ;;  %v12739_v49 = vrot.slane %v12737_v46, 4  ;;  %v27476_v44 = vld [vmem:[%s22455_s8 + $0xe0] sm:$0x3] }
 0x45b   : > { %v12747_v3 = vor.u32 %v12746_v15, %v12743_v14  ;;  %v12756_v63 = vor.u32 %v12755_v43, %v12752_v8  ;;  %v12760_v34 = vor.u32 %v12759_v39, %v12758_v19  ;;  %v12766_v42 = vrot.slane %v12764_v53, 5 }
 0x45c   : > { %v12769_v48 = vrot.slane %v12767_v10, 6  ;;  %v12779_v28 = vor.u32 %v12778_v33, %v12775_v45  ;;  %v12796_v13 = vshrl.u32 %v27170_v40, 16  ;;  %v12783_v27 = vor.u32 %v12782_v35, %v12781_v61 }
 0x45d   : > { %v12789_v50 = vrot.slane %v12787_v31, 5  ;;  %v12792_v7 = vrot.slane %v12790_v29, 6  ;;  %v12799_v5 = vshll.u32 %v27170_v40, 16  ;;  %v18835_v60 = vcombine.low %v12715_v55, %v12725_v41  ;;  %v28994_v55 = vld [vmem:[#allocation44_spill] sm:$0xff] }
 0x45e   : > { %v12738_v16 = vsel %vm22489_vm4, %v12734_v30, %v12737_v46  ;;  %v12757_v1 = vrot.slane %v12756_v63, 4  ;;  %v12819_v58 = vshrl.u32 %v27187_v6, 16  ;;  %v12822_v57 = vshll.u32 %v27187_v6, 16 }
 0x45f   : > { %v12748_v26 = vsel %vm22489_vm4, %v12739_v49, %v12747_v3  ;;  %v12762_v40 = vrot.slane %v12760_v34, 4  ;;  %v12770_v12 = vor.u32 %v12769_v48, %v12766_v42  ;;  %v12785_v23 = vrot.slane %v12783_v27, 4  ;;  %v27503_v42 = vld [vmem:[%s22455_s8 + $0xec] sm:$0x3] }
 0x460   : > { %20511 = vmatmul.mubr.msk.bf16.gmra.mrb[12].mxu0 %vm763_vm3, %v18833_v37  ;;  %v12780_v37 = vrot.slane %v12779_v28, 4  ;;  %v12793_v18 = vor.u32 %v12792_v7, %v12789_v50  ;;  %v12798_v47 = vrot.slane %v12796_v13, 5  ;;  %v12801_v52 = vrot.slane %v12799_v5, 6  ;;  %v28995_v5 = vld [vmem:[#allocation25_spill] sm:$0xff] }
 0x461   : > { %20514 = vmatprep.mubr.msk.bf16.mxu0 %vm763_vm3, %v18834_v25  ;;  %v28990_v46 = vshrl.u32 %v26961_v17, 16  ;;  %v28991_v9 = vshll.u32 %v26961_v17, 16  ;;  %v12810_v6 = vshrl.u32 %v27469_v21, 16  ;;  %v12813_v15 = vshll.u32 %v27469_v21, 16 }
 0x462   : > { %v18836_v8 = vcombine.low %v12738_v16, %v12748_v26  ;;  %v12761_v43 = vsel %vm22489_vm4, %v12757_v1, %v12760_v34  ;;  %v12821_v0 = vrot.slane %v12819_v58, 5  ;;  %v12824_v39 = vrot.slane %v12822_v57, 6 }
 0x463   : > { %v12804_v14 = vrot.slane %v28990_v46, 5  ;;  %v12805_v19 = vrot.slane %v28991_v9, 6  ;;  %v28992_v53 = vshrl.u32 %v26967_v20, 16  ;;  %v28993_v45 = vshll.u32 %v26967_v20, 16 }
 0x464   : > { %v12833_v2 = vshrl.u32 %v27476_v44, 16  ;;  %v12836_v17 = vshll.u32 %v27476_v44, 16  ;;  %v12771_v61 = vsel %vm22489_vm4, %v12762_v40, %v12770_v12  ;;  %v12784_v62 = vsel %vm22489_vm4, %v12780_v37, %v12783_v27 }
 0x465   : > { %v12827_v10 = vrot.slane %v28992_v53, 5  ;;  %v12828_v33 = vrot.slane %v28993_v45, 6  ;;  %v12794_v35 = vsel %vm22489_vm4, %v12785_v23, %v12793_v18  ;;  %v12802_v31 = vor.u32 %v12801_v52, %v12798_v47 }
 0x466   : > { %v12806_v29 = vor.u32 %v12805_v19, %v12804_v14  ;;  %v12812_v20 = vrot.slane %v12810_v6, 5  ;;  %v12815_v25 = vrot.slane %v12813_v15, 6  ;;  %v12842_v41 = vshrl.u32 %v28994_v55, 16  ;;  %v22250_v15 = vld [vmem:[%s22455_s8 + $0x34] sm:$0xf] }
 0x467   : > { %v12845_v30 = vshll.u32 %v28994_v55, 16  ;;  %v12825_v49 = vor.u32 %v12824_v39, %v12821_v0  ;;  %v12829_v3 = vor.u32 %v12828_v33, %v12827_v10  ;;  %v12835_v63 = vrot.slane %v12833_v2, 5 }
 0x468   : > { %20515 = vmatmul.mubr.msk.bf16.gmra.mrb[16].mxu0 %vm763_vm3, %v18835_v60  ;;  %v12838_v34 = vrot.slane %v12836_v17, 6  ;;  %v18837_v48 = vcombine.low %v12761_v43, %v12771_v61  ;;  %v18838_v28 = vcombine.low %v12784_v62, %v12794_v35  ;;  %v12803_v13 = vrot.slane %v12802_v31, 4  ;;  %v18858_v43 = vld [vmem:[%s22455_s8 + $0x30] sm:$0xc]  ;;  %v22251_v31 = vld [vmem:[%s22455_s8 + $0x40] sm:$0xf] }
 0x469   : > { %20518 = vmatprep.mubr.msk.bf16.mxu0 %vm763_vm3, %v18836_v8  ;;  %v12808_v27 = vrot.slane %v12806_v29, 4  ;;  %v12816_v50 = vor.u32 %v12815_v25, %v12812_v20  ;;  %v12844_v7 = vrot.slane %v12842_v41, 5  ;;  %v28996_v60 = vshrl.u32 %v28995_v5, 16  ;;  %v28998_v17 = vld [vmem:[#allocation26_spill] sm:$0xff]  ;;  %v18859_v41 = vld [vmem:[%s22455_s8 + $0x3c] sm:$0xc] }
 0x46a   : > { %v12847_v1 = vrot.slane %v12845_v30, 6  ;;  %v28997_v58 = vshll.u32 %v28995_v5, 16  ;;  %v12856_v26 = vshrl.u32 %v27503_v42, 16  ;;  %v12859_v40 = vshll.u32 %v27503_v42, 16  ;;  %v22252_v30 = vld [vmem:[%s22455_s8 + $0x4c] sm:$0xf] }
 0x46b   : > { %v12850_v16 = vrot.slane %v28996_v60, 5  ;;  %v12826_v12 = vrot.slane %v12825_v49, 4  ;;  %v12831_v37 = vrot.slane %v12829_v3, 4  ;;  %v12839_v23 = vor.u32 %v12838_v34, %v12835_v63 }
 0x46c   : > { %v12851_v57 = vrot.slane %v28997_v58, 6  ;;  %v12807_v18 = vsel %vm22489_vm4, %v12803_v13, %v12806_v29  ;;  %v12817_v47 = vsel %vm22489_vm4, %v12808_v27, %v12816_v50  ;;  %v12848_v52 = vor.u32 %v12847_v1, %v12844_v7  ;;  %v29001_v7 = vld [vmem:[#allocation46_spill] sm:$0xff] }
 0x46d   : > { %v12858_v14 = vrot.slane %v12856_v26, 5  ;;  %v12861_v9 = vrot.slane %v12859_v40, 6  ;;  %v12830_v19 = vsel %vm22489_vm4, %v12826_v12, %v12829_v3  ;;  %v12840_v6 = vsel %vm22489_vm4, %v12831_v37, %v12839_v23  ;;  %v18860_v3 = vld [vmem:[%s22455_s8 + $0x48] sm:$0xc]  ;;  %v22253_v1 = vld [vmem:[%s22455_s8 + $0x58] sm:$0xf] }
 0x46e   : > { %v12852_v46 = vor.u32 %v12851_v57, %v12850_v16  ;;  %v13208_v8 = vrot.slane %v22250_v15, 6  ;;  %v18839_v0 = vcombine.low %v12807_v18, %v12817_v47  ;;  %v18840_v39 = vcombine.low %v12830_v19, %v12840_v6  ;;  %v18861_v40 = vld [vmem:[%s22455_s8 + $0x54] sm:$0xc]  ;;  %v22254_v12 = vld [vmem:[%s22455_s8 + $0x64] sm:$0xf] }
 0x46f   : > { %v12849_v53 = vrot.slane %v12848_v52, 4  ;;  %v12862_v45 = vor.u32 %v12861_v9, %v12858_v14  ;;  %v18874_v33 = vrot.slane %v18858_v43, 10  ;;  %v13211_v61 = vrot.slane %v28998_v17, 6  ;;  %v18862_v23 = vld [vmem:[%s22455_s8 + $0x60] sm:$0xc] }
 0x470   : > { %20519 = vmatmul.mubr.msk.bf16.gmra.mrb[20].mxu0 %vm763_vm3, %v18837_v48  ;;  %v12854_v10 = vrot.slane %v12852_v46, 4  ;;  %v13210_v2 = vrot.slane %v13208_v8, 4  ;;  %v13215_v29 = vrot.slane %v22251_v31, 6  ;;  %v13222_v49 = vrot.slane %v22252_v30, 6  ;;  %v22255_v43 = vld [vmem:[%s22455_s8 + $0x70] sm:$0xf] }
 0x471   : > { %20522 = vmatprep.mubr.msk.bf16.mxu0 %vm763_vm3, %v18838_v28  ;;  %v12853_v62 = vsel %vm22489_vm4, %v12849_v53, %v12852_v46  ;;  %v13209_v25 = vsel %vm22671_vm6, %v18874_v33, %v13208_v8  ;;  %v18875_v48 = vrot.slane %v18859_v41, 10  ;;  %v29000_v28 = vld [vmem:[#allocation45_spill] sm:$0xff]  ;;  %v18876_v27 = vrot.slane %v18860_v3, 10  ;;  %v18865_v3 = vld [vmem:[%s22455_s8 + $0x84] sm:$0xc] }
 0x472   : > { %v12863_v35 = vsel %vm22489_vm4, %v12854_v10, %v12862_v45  ;;  %v13212_v55 = vsel %vm22671_vm6, %v13210_v2, %v13211_v61  ;;  %v13217_v32 = vrot.slane %v13215_v29, 4  ;;  %v13218_v13 = vrot.slane %v29000_v28, 6  ;;  %v18863_v53 = vld [vmem:[%s22455_s8 + $0x6c] sm:$0xc]  ;;  %v18864_v45 = vld [vmem:[%s22455_s8 + $0x78] sm:$0xc] }
 0x473   : > { %v18841_v63 = vcombine.low %v12853_v62, %v12863_v35  ;;  %v18891_v34 = vcombine.low %v13209_v25, %v13212_v55  ;;  %v13224_v50 = vrot.slane %v13222_v49, 4  ;;  %v13225_v5 = vrot.slane %v29001_v7, 6  ;;  %v22257_v41 = vld [vmem:[%s22455_s8 + $0x88] sm:$0xf] }
 0x474   : > { %v13216_v60 = vsel %vm22671_vm6, %v18875_v48, %v13215_v29  ;;  %v13219_v16 = vsel %vm22671_vm6, %v13217_v32, %v13218_v13  ;;  %v13229_v58 = vrot.slane %v22253_v1, 6  ;;  %v13223_v57 = vsel %vm22671_vm6, %v18876_v27, %v13222_v49  ;;  %v22259_v1 = vld [vmem:[%s22455_s8 + $0xa0] sm:$0xf] }
 0x475   : > { %v13226_v26 = vsel %vm22671_vm6, %v13224_v50, %v13225_v5  ;;  %v13236_v37 = vrot.slane %v22254_v12, 6  ;;  %v18892_v18 = vcombine.low %v13216_v60, %v13219_v16  ;;  %v18877_v52 = vrot.slane %v18861_v40, 10  ;;  %v18868_v12 = vld [vmem:[%s22455_s8 + $0xa8] sm:$0xc] }
 0x476   : > { %v18893_v47 = vcombine.low %v13223_v57, %v13226_v26  ;;  %v13231_v46 = vrot.slane %v13229_v58, 4  ;;  %v13232_v14 = vrot.slane %v27274_v22, 6  ;;  %v18878_v9 = vrot.slane %v18862_v23, 10  ;;  %v18867_v26 = vld [vmem:[%s22455_s8 + $0x9c] sm:$0xc] }
 0x477   : > { %v13238_v19 = vrot.slane %v13236_v37, 4  ;;  %v13239_v6 = vrot.slane %v27297_v36, 6  ;;  %v13230_v15 = vsel %vm22671_vm6, %v18877_v52, %v13229_v58  ;;  %v22256_v36 = vld [vmem:[%s22455_s8 + $0x7c] sm:$0xf]  ;;  %v18879_v17 = vrot.slane %v18863_v53, 10 }
 0x478   : > { %20523 = vmatmul.mubr.msk.bf16.gmra.mrb[24].mxu0 %vm763_vm3, %v18839_v0  ;;  %v13233_v8 = vsel %vm22671_vm6, %v13231_v46, %v13232_v14  ;;  %v13243_v0 = vrot.slane %v22255_v43, 6  ;;  %v13250_v10 = vrot.slane %v22256_v36, 6  ;;  %v13246_v62 = vrot.slane %v27326_v11, 6 }
 0x479   : > { %20526 = vmatprep.mubr.msk.bf16.mxu0 %vm763_vm3, %v18840_v39  ;;  %v13237_v39 = vsel %vm22671_vm6, %v18878_v9, %v13236_v37  ;;  %v13240_v22 = vsel %vm22671_vm6, %v13238_v19, %v13239_v6  ;;  %v18894_v33 = vcombine.low %v13230_v15, %v13233_v8  ;;  %v18880_v35 = vrot.slane %v18864_v45, 10  ;;  %v22261_v15 = vld [vmem:[%s22455_s8 + $0xb8] sm:$0xf] }
 0x47a   : > { %v18895_v2 = vcombine.low %v13237_v39, %v13240_v22  ;;  %v13245_v61 = vrot.slane %v13243_v0, 4  ;;  %v13252_v31 = vrot.slane %v13250_v10, 4  ;;  %v13253_v29 = vrot.slane %v27343_v4, 6  ;;  %v22258_v4 = vld [vmem:[%s22455_s8 + $0x94] sm:$0xf] }
 0x47b   : > { %v13244_v25 = vsel %vm22671_vm6, %v18879_v17, %v13243_v0  ;;  %v13257_v30 = vrot.slane %v22257_v41, 6  ;;  %v13251_v49 = vsel %vm22671_vm6, %v18880_v35, %v13250_v10  ;;  %v18881_v28 = vrot.slane %v18865_v3, 10  ;;  %v18869_v0 = vld [vmem:[%s22455_s8 + $0xb4] sm:$0xc]  ;;  %v18870_v22 = vld [vmem:[%s22455_s8 + $0xc0] sm:$0xc] }
 0x47c   : > { %v13247_v55 = vsel %vm22671_vm6, %v13245_v61, %v13246_v62  ;;  %v13254_v11 = vsel %vm22671_vm6, %v13252_v31, %v13253_v29  ;;  %v13260_v27 = vrot.slane %v27353_v51, 6  ;;  %v13267_v5 = vrot.slane %v27379_v24, 6  ;;  %v22260_v24 = vld [vmem:[%s22455_s8 + $0xac] sm:$0xf]  ;;  %v22263_v31 = vld [vmem:[%s22455_s8 + $0xd0] sm:$0xf] }
 0x47d   : > { %v18896_v48 = vcombine.low %v13244_v25, %v13247_v55  ;;  %v18897_v32 = vcombine.low %v13251_v49, %v13254_v11  ;;  %v13259_v13 = vrot.slane %v13257_v30, 4  ;;  %v13258_v60 = vsel %vm22671_vm6, %v18881_v28, %v13257_v30  ;;  %v18871_v55 = vld [vmem:[%s22455_s8 + $0xcc] sm:$0xc]  ;;  %v18872_v30 = vld [vmem:[%s22455_s8 + $0xd8] sm:$0xc] }
 0x47e   : > { %v13271_v58 = vrot.slane %v22259_v1, 6  ;;  %v13278_v40 = vrot.slane %v22260_v24, 6  ;;  %v13274_v52 = vrot.slane %v27397_v59, 6  ;;  %v18884_v46 = vrot.slane %v18868_v12, 10 }
 0x47f   : > { %v13261_v16 = vsel %vm22671_vm6, %v13259_v13, %v13260_v27  ;;  %v13281_v9 = vrot.slane %v27420_v38, 6  ;;  %v13285_v8 = vrot.slane %v22261_v15, 6  ;;  %v22262_v38 = vld [vmem:[%s22455_s8 + $0xc4] sm:$0xf]  ;;  %v18885_v10 = vrot.slane %v18869_v0, 10  ;;  %v29004_v15 = vld [vmem:[#allocation35_spill] sm:$0xff] }
 0x480   : > { %20527 = vmatmul.mubr.msk.bf16.gmra.mrb[28].mxu0 %vm763_vm3, %v18841_v63  ;;  %v13264_v63 = vrot.slane %v22258_v4, 6  ;;  %v18898_v37 = vcombine.low %v13258_v60, %v13261_v16  ;;  %v13280_v14 = vrot.slane %v13278_v40, 4  ;;  %v13279_v43 = vsel %vm22671_vm6, %v18884_v46, %v13278_v40  ;;  %v22265_v27 = vld [vmem:[%s22455_s8 + $0xe8] sm:$0xf] }
 0x481   : > { %20532 = vmatprep.mubr.msk.bf16.mxu0 %vm763_vm3, %v18891_v34  ;;  %v18866_v34 = vld [vmem:[%s22455_s8 + $0x90] sm:$0xc]  ;;  %v13292_v39 = vrot.slane %v22262_v38, 6  ;;  %v13287_v45 = vrot.slane %v13285_v8, 4  ;;  %v13295_v61 = vrot.slane %v27445_v54, 6  ;;  %v13286_v62 = vsel %vm22671_vm6, %v18885_v10, %v13285_v8  ;;  %v29005_v0 = vld [vmem:[#allocation36_spill] sm:$0xff] }
 0x482   : > { %v18882_v50 = vrot.slane %v18866_v34, 10  ;;  %v13266_v7 = vrot.slane %v13264_v63, 4  ;;  %v13282_v59 = vsel %vm22671_vm6, %v13280_v14, %v13281_v9  ;;  %v13299_v29 = vrot.slane %v22263_v31, 6  ;;  %v22264_v54 = vld [vmem:[%s22455_s8 + $0xdc] sm:$0xf]  ;;  %v29003_v14 = vld [vmem:[#allocation34_spill] sm:$0xff] }
 0x483   : > { %v18901_v36 = vcombine.low %v13279_v43, %v13282_v59  ;;  %v13294_v17 = vrot.slane %v13292_v39, 4  ;;  %v13306_v41 = vrot.slane %v22264_v54, 6  ;;  %v18887_v3 = vrot.slane %v18871_v55, 10 }
 0x484   : > { %v13265_v57 = vsel %vm22671_vm6, %v18882_v50, %v13264_v63  ;;  %v13268_v51 = vsel %vm22671_vm6, %v13266_v7, %v13267_v5  ;;  %v13301_v4 = vrot.slane %v13299_v29, 4  ;;  %v13302_v63 = vrot.slane %v27469_v21, 6  ;;  %v18873_v5 = vld [vmem:[%s22455_s8 + $0xe4] sm:$0xc]  ;;  %s22272_s8 = scalar_lea.vmem %s22271_s20, 32 }
 0x485   : > { %v18899_v23 = vcombine.low %v13265_v57, %v13268_v51  ;;  %v18888_v34 = vrot.slane %v18872_v30, 10  ;;  %v13300_v28 = vsel %vm22671_vm6, %v18887_v3, %v13299_v29  ;;  %v13313_v50 = vrot.slane %v22265_v27, 6  ;;  %p22274_p1 = scmp.lt.s32.totalorder %s22272_s8, %s22266_s28 }
 0x486   : > { %v13303_v13 = vsel %vm22671_vm6, %v13301_v4, %v13302_v63  ;;  %v18889_v16 = vrot.slane %v18873_v5, 10  ;;  %v22330_v24 = vmov 0.0   ;;  %vm22331_vm0 = vmmov 0  }
 0x487   : > { %v13307_v7 = vsel %vm22671_vm6, %v18888_v34, %v13306_v41  ;;  %v13315_v1 = vrot.slane %v13313_v50, 4  ;;  %13800 = vst.msk [vmem:[#allocation3 + $0x20] sm:$0xff] %vm13683_vm13, %v22330_v24  ;;  %13795 = vst.msk [vmem:[#allocation3] sm:$0xff] %vm13683_vm13, %v22330_v24  ;;  %p22275_p2 = por %p22274_p1, %p22273_p0 }
 0x488   : > { %20533 = vmatmul.mubr.msk.bf16.vlgmr.msra.gmra.mrb[0].mxu0 %vm763_vm3, %v18892_v18  ;;  %v18883_v18 = vrot.slane %v18867_v26, 10  ;;  %v13314_v57 = vsel %vm22671_vm6, %v18889_v16, %v13313_v50  ;;  %13801 = vst.msk [vmem:[#allocation3 + $0x28] sm:$0xf] %vm13796_vm14, %v22330_v24  ;;  %13797 = vst.msk [vmem:[#allocation3 + $0x8] sm:$0xf] %vm13796_vm14, %v22330_v24 }
 0x489   : > { %20536 = vmatprep.mubr.msk.bf16.mxu0 %vm763_vm3, %v18893_v47  ;;  %v13273_v47 = vrot.slane %v13271_v58, 4  ;;  %13798 = vst.msk [vmem:[#allocation3 + $0x10] sm:$0xff] %vm13683_vm13, %v22330_v24  ;;  %13802 = vst.msk [vmem:[#allocation3 + $0x30] sm:$0xff] %vm13683_vm13, %v22330_v24  ;;  %p22276_p3 = pnand %p22275_p2, %p22269_p13 }
 0x48a   : > { %v13272_v19 = vsel %vm22671_vm6, %v18883_v18, %v13271_v58  ;;  %v13316_v58 = vrot.slane %v27503_v42, 6  ;;  %13799 = vst.msk [vmem:[#allocation3 + $0x18] sm:$0xf] %vm13796_vm14, %v22330_v24  ;;  %13803 = vst.msk [vmem:[#allocation3 + $0x38] sm:$0xf] %vm13796_vm14, %v22330_v24  ;;  %v22020_v42 = vld [vmem:[%s28428_s3 + $0x8] sm:$0xff]  }
 0x48b   : > { %v13275_v6 = vsel %vm22671_vm6, %v13273_v47, %v13274_v52  ;;  %13804 = vst.msk [vmem:[#allocation3 + $0x40] sm:$0xff] %vm13683_vm13, %v22330_v24  ;;  %13806 = vst.msk [vmem:[#allocation3 + $0x50] sm:$0xff] %vm13683_vm13, %v22330_v24  ;;  %20564 = vmatprep.subr.bf16.mxu1 %v22020_v42  ;;  %v27720_v18 = vld [vmem:[%s28427_s2] ss:$0 sm:$0xff]  ;;  %v29002_v47 = vld [vmem:[#allocation33_spill] sm:$0xff] }
 0x48c   : > { %v18900_v53 = vcombine.low %v13272_v19, %v13275_v6  ;;  %v13317_v51 = vsel %vm22671_vm6, %v13315_v1, %v13316_v58  ;;  %13805 = vst.msk [vmem:[#allocation3 + $0x48] sm:$0xf] %vm13796_vm14, %v22330_v24  ;;  %13807 = vst.msk [vmem:[#allocation3 + $0x58] sm:$0xf] %vm13796_vm14, %v22330_v24  ;;  %20565 = vmatpush3.bf16.msra.mxu1 %v22020_v42 }
 0x48d   : > { %v18906_v26 = vcombine.low %v13314_v57, %v13317_v51  ;;  %13808 = vst.msk [vmem:[#allocation3 + $0x60] sm:$0xff] %vm13683_vm13, %v22330_v24  ;;  %13810 = vst.msk [vmem:[#allocation3 + $0x70] sm:$0xff] %vm13683_vm13, %v22330_v24  ;;  %v29012_v57 = vld [vmem:[#allocation43_spill] sm:$0xff] }
 0x48e   : > { %13809 = vst.msk [vmem:[#allocation3 + $0x68] sm:$0xf] %vm13796_vm14, %v22330_v24  ;;  %13811 = vst.msk [vmem:[#allocation3 + $0x78] sm:$0xf] %vm13796_vm14, %v22330_v24 }
 0x48f   : > { %13812 = vst.msk [vmem:[#allocation3 + $0x80] sm:$0xff] %vm13683_vm13, %v22330_v24  ;;  %13814 = vst.msk [vmem:[#allocation3 + $0x90] sm:$0xff] %vm13683_vm13, %v22330_v24  ;;  %v13858_v20 = vld [vmem:[#allocation3 + $0x1] sm:$0xff] }
 0x490   : > { %20537 = vmatmul.mubr.msk.bf16.gmra.mrb[4].mxu0 %vm763_vm3, %v18894_v33  ;;  %v13288_v33 = vrot.slane %v27439_v56, 6  ;;  %v13296_v56 = vsel %vm22671_vm6, %v13294_v17, %v13295_v61  ;;  %13813 = vst.msk [vmem:[#allocation3 + $0x88] sm:$0xf] %vm13796_vm14, %v22330_v24  ;;  %13815 = vst.msk [vmem:[#allocation3 + $0x98] sm:$0xf] %vm13796_vm14, %v22330_v24 }
 0x491   : > { %20540 = vmatprep.mubr.msk.bf16.mxu0 %vm763_vm3, %v18895_v2  ;;  %v18886_v2 = vrot.slane %v18870_v22, 10  ;;  %13816 = vst.msk [vmem:[#allocation3 + $0xa0] sm:$0xff] %vm13683_vm13, %v22330_v24  ;;  %13818 = vst.msk [vmem:[#allocation3 + $0xb0] sm:$0xff] %vm13683_vm13, %v22330_v24  ;;  %v27707_v40 = vld [vmem:[#allocation3 + $0x11] sm:$0xff] }
 0x492   : > { %v13289_v35 = vsel %vm22671_vm6, %v13287_v45, %v13288_v33  ;;  %13817 = vst.msk [vmem:[#allocation3 + $0xa8] sm:$0xf] %vm13796_vm14, %v22330_v24  ;;  %13819 = vst.msk [vmem:[#allocation3 + $0xb8] sm:$0xf] %vm13796_vm14, %v22330_v24  ;;  %v13866_v12 = vpack.c.bf16 %v27707_v40, %v13858_v20 }
 0x493   : > { %v13293_v25 = vsel %vm22671_vm6, %v18886_v2, %v13292_v39  ;;  %v18902_v49 = vcombine.low %v13286_v62, %v13289_v35  ;;  %v29006_v2 = vld [vmem:[#allocation37_spill] sm:$0xff]  ;;  %v29007_v62 = vld [vmem:[#allocation38_spill] sm:$0xff] }
 0x494   : > { %v18903_v11 = vcombine.low %v13293_v25, %v13296_v56  ;;  %20566 = vmatprep.mubr.msk.bf16.mxu1 %vm13683_vm13, %v13866_v12  ;;  %v29008_v25 = vld [vmem:[#allocation39_spill] sm:$0xff]  ;;  %v29013_v12 = vld [vmem:[#allocation9_spill] sm:$0xff] }
 0x498   : > { %20541 = vmatmul.mubr.msk.bf16.gmra.mrb[8].mxu0 %vm763_vm3, %v18896_v48  ;;  %v13308_v48 = vrot.slane %v13306_v41, 4  ;;  %v29009_v41 = vld [vmem:[#allocation40_spill] sm:$0xff] }
 0x499   : > { %20544 = vmatprep.mubr.msk.bf16.mxu0 %vm763_vm3, %v18897_v32  ;;  %v13309_v32 = vrot.slane %v27476_v44, 6  ;;  %v18904_v44 = vcombine.low %v13300_v28, %v13303_v13 }
 0x49b   : > { %v13310_v21 = vsel %vm22671_vm6, %v13308_v48, %v13309_v32 }
 0x49c   : > { %v18905_v60 = vcombine.low %v13307_v7, %v13310_v21  ;;  %v29010_v7 = vld [vmem:[#allocation41_spill] sm:$0xff] }
 0x4a0   : > { %20545 = vmatmul.mubr.msk.bf16.gmra.mrb[12].mxu0 %vm763_vm3, %v18898_v37  ;;  %v27714_v37 = vld [vmem:[%s28428_s3] sm:$0xff]  }
 0x4a1   : > { %20548 = vmatprep.mubr.msk.bf16.mxu0 %vm763_vm3, %v18899_v23  ;;  %20574 = vmatprep.subr.bf16.mxu1 %v27714_v37 }
 0x4a8   : > { %20549 = vmatmul.mubr.msk.bf16.gmra.mrb[16].mxu0 %vm763_vm3, %v18900_v53 }
 0x4a9   : > { %20552 = vmatprep.mubr.msk.bf16.mxu0 %vm763_vm3, %v18901_v36 }
 0x4b0   : > { %20553 = vmatmul.mubr.msk.bf16.gmra.mrb[20].mxu0 %vm763_vm3, %v18902_v49 }
 0x4b1   : > { %20556 = vmatprep.mubr.msk.bf16.mxu0 %vm763_vm3, %v18903_v11 }
 0x4b8   : > { %20557 = vmatmul.mubr.msk.bf16.gmra.mrb[24].mxu0 %vm763_vm3, %v18904_v44 }
 0x4b9   : > { %20560 = vmatprep.mubr.msk.bf16.mxu0 %vm763_vm3, %v18905_v60  ;;  %v29011_v60 = vld [vmem:[#allocation42_spill] sm:$0xff] }
 0x4c0   : > { %20561 = vmatmul.mubr.msk.bf16.gmra.mrb[28].mxu0 %vm763_vm3, %v18906_v26 }
 0x55b   : > { %v20534_v23 = vpop.f32.mrb[0].mxu0 }
 0x55c   : > { %v20912_v52 = vadd.f32 %v20534_v23, %v29002_v47  ;;  %v13453_v46 = vpop.f32.mrb[1].mxu0 }
 0x55d   : > { %v20913_v9 = vadd.f32 %v13453_v46, %v29003_v14  ;;  %v20535_v19 = vpop.f32.mrb[2].mxu0 }
 0x55e   : > { %v13621_v6 = vadd.f32 %v20912_v52, %v27720_v18  ;;  %v20914_v8 = vadd.f32 %v20535_v19, %v29004_v15  ;;  %v13456_v43 = vpop.f32.mrb[3].mxu0 }
 0x55f   : > { %v13619_v59 = vadd.f32 %v20913_v9, %v27720_v18  ;;  %v20915_v38 = vadd.f32 %v13456_v43, %v29005_v0 }
 0x560   : > { %v13653_v39 = vmax.f32 %v13621_v6, 0.0  ;;  %v13622_v22 = vadd.f32 %v20914_v8, %v27720_v18 }
 0x561   : > { %v13651_v53 = vmax.f32 %v13619_v59, 0.0  ;;  %v13620_v36 = vadd.f32 %v20915_v38, %v27720_v18  ;;  %v29014_v38 = vld [vmem:[#allocation11_spill] sm:$0xff] }
 0x562   : > { %13686 = vst.msk [vmem:[#allocation2 + $0x10] sm:$0xff] %vm13683_vm13, %v13653_v39  ;;  %v13654_v10 = vmax.f32 %v13622_v22, 0.0 }
 0x563   : > { %13684 = vst.msk [vmem:[#allocation2] sm:$0xff] %vm13683_vm13, %v13651_v53  ;;  %v13652_v45 = vmax.f32 %v13620_v36, 0.0  ;;  %v20538_v33 = vpop.f32.mrb[4].mxu0  ;;  %v29015_v36 = vld [vmem:[#allocation14_spill] sm:$0xff] }
 0x564   : > { %13687 = vst.msk [vmem:[#allocation2 + $0x18] sm:$0xff] %vm13683_vm13, %v13654_v10  ;;  %v20916_v17 = vadd.f32 %v20538_v33, %v29006_v2  ;;  %v13469_v61 = vpop.f32.mrb[5].mxu0  ;;  %v29016_v2 = vld [vmem:[#allocation24_spill] sm:$0xff] }
 0x565   : > { %13685 = vst.msk [vmem:[#allocation2 + $0x8] sm:$0xff] %vm13683_vm13, %v13652_v45  ;;  %v20917_v35 = vadd.f32 %v13469_v61, %v29007_v62  ;;  %v20539_v31 = vpop.f32.mrb[6].mxu0 }
 0x566   : > { %v13625_v29 = vadd.f32 %v20916_v17, %v27720_v18  ;;  %v20918_v56 = vadd.f32 %v20539_v31, %v29008_v25  ;;  %v13472_v55 = vpop.f32.mrb[7].mxu0  ;;  %v29017_v31 = vld [vmem:[#allocation15_spill] sm:$0xff] }
 0x567   : > { %v13623_v54 = vadd.f32 %v20917_v35, %v27720_v18  ;;  %v20919_v30 = vadd.f32 %v13472_v55, %v29009_v41  ;;  %v27765_v25 = vld [vmem:[#allocation3 + $0x13] sm:$0xff] }
 0x568   : > { %v13657_v49 = vmax.f32 %v13625_v29, 0.0  ;;  %v13626_v11 = vadd.f32 %v20918_v56, %v27720_v18  ;;  %v27767_v56 = vld [vmem:[#allocation3 + $0x14] sm:$0xff] }
 0x569   : > { %v13655_v3 = vmax.f32 %v13623_v54, 0.0  ;;  %v13624_v4 = vadd.f32 %v20919_v30, %v27720_v18 }
 0x56a   : > { %13690 = vst.msk [vmem:[#allocation2 + $0x30] sm:$0xff] %vm13683_vm13, %v13657_v49  ;;  %v13658_v63 = vmax.f32 %v13626_v11, 0.0 }
 0x56b   : > { %v13718_v34 = vld [vmem:[#allocation2 + $0x10] ss:$2 sm:$0xff]  ;;  %v13750_v48 = vld [vmem:[#allocation2 + $0x11] ss:$2 sm:$0xff]  ;;  %13688 = vst.msk [vmem:[#allocation2 + $0x20] sm:$0xff] %vm13683_vm13, %v13655_v3  ;;  %v13656_v32 = vmax.f32 %v13624_v4, 0.0 }
 0x56c   : > { %v20542_v28 = vpop.f32.mrb[8].mxu0  ;;  %v13780_v13 = vmax.f32 %v13718_v34, %v13750_v48  ;;  %v13716_v27 = vld [vmem:[#allocation2] ss:$2 sm:$0xff]  ;;  %v13748_v50 = vld [vmem:[#allocation2 + $0x1] ss:$2 sm:$0xff]  ;;  %13691 = vst.msk [vmem:[#allocation2 + $0x38] sm:$0xff] %vm13683_vm13, %v13658_v63 }
 0x56d   : > { %v20920_v21 = vadd.f32 %v20542_v28, %v29010_v7  ;;  %v13485_v5 = vpop.f32.mrb[9].mxu0  ;;  %v13779_v44 = vmax.f32 %v13716_v27, %v13748_v50  ;;  %13689 = vst.msk [vmem:[#allocation2 + $0x28] sm:$0xff] %vm13683_vm13, %v13656_v32  ;;  %v29018_v7 = vld [vmem:[#allocation16_spill] sm:$0xff] }
 0x56e   : > { %v20921_v16 = vadd.f32 %v13485_v5, %v29011_v60  ;;  %v20543_v1 = vpop.f32.mrb[10].mxu0  ;;  %v29019_v60 = vld [vmem:[#allocation12_spill] sm:$0xff] }
 0x56f   : > { %v13629_v58 = vadd.f32 %v20920_v21, %v27720_v18  ;;  %v20922_v51 = vadd.f32 %v20543_v1, %v29012_v57  ;;  %v13488_v26 = vpop.f32.mrb[11].mxu0  ;;  %v13820_v42 = vmax.f32 %v13779_v44, %v13780_v13  ;;  %v29020_v57 = vld [vmem:[#allocation17_spill] sm:$0xff] }
 0x570   : > { %v13627_v20 = vadd.f32 %v20921_v16, %v27720_v18  ;;  %v20923_v23 = vadd.f32 %v13488_v26, %v29013_v12  ;;  %v29021_v12 = vld [vmem:[#allocation18_spill] sm:$0xff] }
 0x571   : > { %v13661_v47 = vmax.f32 %v13629_v58, 0.0  ;;  %v13630_v52 = vadd.f32 %v20922_v51, %v27720_v18  ;;  %13822 = vst.msk [vmem:[#allocation3 + $0x22] sm:$0xff] %vm13683_vm13, %v13820_v42 }
 0x572   : > { %v13659_v46 = vmax.f32 %v13627_v20, 0.0  ;;  %v13628_v14 = vadd.f32 %v20923_v23, %v27720_v18 }
 0x573   : > { %13694 = vst.msk [vmem:[#allocation2 + $0x50] sm:$0xff] %vm13683_vm13, %v13661_v47  ;;  %v13662_v9 = vmax.f32 %v13630_v52, 0.0  ;;  %v13722_v19 = vld [vmem:[#allocation2 + $0x30] ss:$2 sm:$0xff]  ;;  %v13754_v6 = vld [vmem:[#allocation2 + $0x31] ss:$2 sm:$0xff] }
 0x574   : > { %13692 = vst.msk [vmem:[#allocation2 + $0x40] sm:$0xff] %vm13683_vm13, %v13659_v46  ;;  %v13660_v15 = vmax.f32 %v13628_v14, 0.0  ;;  %v20546_v8 = vpop.f32.mrb[12].mxu0  ;;  %v13782_v43 = vmax.f32 %v13722_v19, %v13754_v6  ;;  %v13720_v59 = vld [vmem:[#allocation2 + $0x20] ss:$2 sm:$0xff] }
 0x575   : > { %v13752_v0 = vld [vmem:[#allocation2 + $0x21] ss:$2 sm:$0xff]  ;;  %13695 = vst.msk [vmem:[#allocation2 + $0x58] sm:$0xff] %vm13683_vm13, %v13662_v9  ;;  %v20924_v39 = vadd.f32 %v20546_v8, %v29014_v38  ;;  %v13501_v22 = vpop.f32.mrb[13].mxu0 }
 0x576   : > { %v13781_v53 = vmax.f32 %v13720_v59, %v13752_v0  ;;  %13693 = vst.msk [vmem:[#allocation2 + $0x48] sm:$0xff] %vm13683_vm13, %v13660_v15  ;;  %v20925_v10 = vadd.f32 %v13501_v22, %v29015_v36  ;;  %v20547_v45 = vpop.f32.mrb[14].mxu0  ;;  %v27801_v15 = vld [vmem:[%s28428_s3 + $0x10] sm:$0xff]   ;;  %v29022_v36 = vld [vmem:[#allocation19_spill] sm:$0xff] }
 0x577   : > { %v13633_v33 = vadd.f32 %v20924_v39, %v27720_v18  ;;  %v20926_v17 = vadd.f32 %v20547_v45, %v29016_v2  ;;  %v13504_v61 = vpop.f32.mrb[15].mxu0  ;;  %v29023_v2 = vld [vmem:[#allocation20_spill] sm:$0xff] }
 0x578   : > { %v13823_v62 = vmax.f32 %v13781_v53, %v13782_v43  ;;  %v13631_v35 = vadd.f32 %v20925_v10, %v27720_v18  ;;  %v20927_v29 = vadd.f32 %v13504_v61, %v29017_v31  ;;  %v27772_v49 = vld [vmem:[#allocation3 + $0x23] sm:$0xff] }
 0x579   : > { %v13665_v55 = vmax.f32 %v13633_v33, 0.0  ;;  %v13634_v54 = vadd.f32 %v20926_v17, %v27720_v18  ;;  %v27774_v11 = vld [vmem:[#allocation3 + $0x24] sm:$0xff]  ;;  %v14684_v4 = vpack.c.bf16 %v27772_v49, %v27765_v25 }
 0x57a   : > { %13825 = vst.msk [vmem:[#allocation3 + $0x32] sm:$0xff] %vm13683_vm13, %v13823_v62  ;;  %v13663_v41 = vmax.f32 %v13631_v35, 0.0  ;;  %v13632_v30 = vadd.f32 %v20927_v29, %v27720_v18  ;;  %v14790_v63 = vpack.c.bf16 %v27774_v11, %v27767_v56  ;;  %v27791_v46 = vld [vmem:[#allocation3 + $0x21] sm:$0xff]  ;;  %v29024_v35 = vld [vmem:[#allocation21_spill] sm:$0xff] }
 0x57b   : > { %13698 = vst.msk [vmem:[#allocation2 + $0x70] sm:$0xff] %vm13683_vm13, %v13665_v55  ;;  %v13666_v3 = vmax.f32 %v13634_v54, 0.0  ;;  %v20550_v28 = vpop.f32.mrb[16].mxu0 }
 0x57c   : > { %v13726_v34 = vld [vmem:[#allocation2 + $0x50] ss:$2 sm:$0xff]  ;;  %v13758_v48 = vld [vmem:[#allocation2 + $0x51] ss:$2 sm:$0xff]  ;;  %13696 = vst.msk [vmem:[#allocation2 + $0x60] sm:$0xff] %vm13683_vm13, %v13663_v41  ;;  %v13664_v32 = vmax.f32 %v13632_v30, 0.0  ;;  %v20928_v21 = vadd.f32 %v20550_v28, %v29018_v7 }
 0x57d   : > { %v13784_v13 = vmax.f32 %v13726_v34, %v13758_v48  ;;  %v13724_v27 = vld [vmem:[#allocation2 + $0x40] ss:$2 sm:$0xff]  ;;  %v13756_v50 = vld [vmem:[#allocation2 + $0x41] ss:$2 sm:$0xff]  ;;  %13699 = vst.msk [vmem:[#allocation2 + $0x78] sm:$0xff] %vm13683_vm13, %v13666_v3  ;;  %v13517_v5 = vpop.f32.mrb[17].mxu0 }
 0x57e   : > { %v13783_v44 = vmax.f32 %v13724_v27, %v13756_v50  ;;  %13697 = vst.msk [vmem:[#allocation2 + $0x68] sm:$0xff] %vm13683_vm13, %v13664_v32  ;;  %v20929_v16 = vadd.f32 %v13517_v5, %v29019_v60  ;;  %v20551_v1 = vpop.f32.mrb[18].mxu0  ;;  %v13637_v58 = vadd.f32 %v20928_v21, %v27720_v18  ;;  %v29025_v41 = vld [vmem:[#allocation22_spill] sm:$0xff] }
 0x57f   : > { %v20930_v51 = vadd.f32 %v20551_v1, %v29020_v57  ;;  %v13520_v26 = vpop.f32.mrb[19].mxu0 }
 0x580   : > { %v13826_v42 = vmax.f32 %v13783_v44, %v13784_v13  ;;  %v13635_v20 = vadd.f32 %v20929_v16, %v27720_v18  ;;  %v20931_v23 = vadd.f32 %v13520_v26, %v29021_v12  ;;  %v13669_v47 = vmax.f32 %v13637_v58, 0.0 }
 0x581   : > { %v13638_v52 = vadd.f32 %v20930_v51, %v27720_v18  ;;  %v13861_v14 = vld [vmem:[#allocation3 + $0x31] sm:$0xff] }
 0x582   : > { %13828 = vst.msk [vmem:[#allocation3 + $0x42] sm:$0xff] %vm13683_vm13, %v13826_v42  ;;  %v13667_v9 = vmax.f32 %v13635_v20, 0.0  ;;  %v13636_v19 = vadd.f32 %v20931_v23, %v27720_v18  ;;  %v27796_v6 = vpack.c.bf16 %v13861_v14, %v27791_v46  ;;  %13702 = vst.msk [vmem:[#allocation2 + $0x90] sm:$0xff] %vm13683_vm13, %v13669_v47  ;;  %v27817_v3 = vld [vmem:[#allocation3 + $0x32] sm:$0xff] }
 0x583   : > { %v13670_v8 = vmax.f32 %v13638_v52, 0.0  ;;  %v20554_v38 = vpop.f32.mrb[20].mxu0  ;;  %v27822_v28 = vld [vmem:[#allocation3 + $0x33] sm:$0xff] }
 0x584   : > { %v13730_v43 = vld [vmem:[#allocation2 + $0x70] ss:$2 sm:$0xff]  ;;  %v13762_v59 = vld [vmem:[#allocation2 + $0x71] ss:$2 sm:$0xff]  ;;  %13700 = vst.msk [vmem:[#allocation2 + $0x80] sm:$0xff] %vm13683_vm13, %v13667_v9  ;;  %v13668_v0 = vmax.f32 %v13636_v19, 0.0  ;;  %20567 = vmatmul.mubr.msk.bf16.vlgmr.msra.gmra.mrb[32].mxu1 %vm13683_vm13, %v27796_v6  ;;  %v20932_v10 = vadd.f32 %v20554_v38, %v29022_v36 }
 0x585   : > { %v13786_v39 = vmax.f32 %v13730_v43, %v13762_v59  ;;  %v13728_v22 = vld [vmem:[#allocation2 + $0x60] ss:$2 sm:$0xff]  ;;  %v13760_v53 = vld [vmem:[#allocation2 + $0x61] ss:$2 sm:$0xff]  ;;  %13703 = vst.msk [vmem:[#allocation2 + $0x98] sm:$0xff] %vm13683_vm13, %v13670_v8  ;;  %v13533_v45 = vpop.f32.mrb[21].mxu0  ;;  %20575 = vmatpush3.bf16.msra.mxu1 %v27714_v37 }
 0x586   : > { %v13785_v33 = vmax.f32 %v13728_v22, %v13760_v53  ;;  %13701 = vst.msk [vmem:[#allocation2 + $0x88] sm:$0xff] %vm13683_vm13, %v13668_v0  ;;  %v20933_v17 = vadd.f32 %v13533_v45, %v29023_v2  ;;  %v20555_v61 = vpop.f32.mrb[22].mxu0  ;;  %20584 = vmatprep.subr.bf16.mxu1 %v27801_v15  ;;  %v13641_v62 = vadd.f32 %v20932_v10, %v27720_v18  ;;  %v27828_v7 = vld [vmem:[#allocation3 + $0x34] sm:$0xff]  ;;  %v29027_v9 = vld [vmem:[#allocation8_spill] sm:$0xff]  ;;  %v29028_v59 = vld [vmem:[#allocation29_spill] sm:$0xff] }
 0x587   : > { %v20934_v31 = vadd.f32 %v20555_v61, %v29024_v35  ;;  %v13536_v29 = vpop.f32.mrb[23].mxu0  ;;  %v29026_v23 = vld [vmem:[#allocation10_spill] sm:$0xff]  ;;  %v29029_v53 = vld [vmem:[#allocation28_spill] sm:$0xff] }
 0x588   : > { %v13829_v55 = vmax.f32 %v13785_v33, %v13786_v39  ;;  %v13639_v54 = vadd.f32 %v20933_v17, %v27720_v18  ;;  %v20935_v30 = vadd.f32 %v13536_v29, %v29025_v41  ;;  %v13673_v37 = vmax.f32 %v13641_v62, 0.0 }
 0x589   : > { %v13642_v34 = vadd.f32 %v20934_v31, %v27720_v18  ;;  %v13862_v48 = vld [vmem:[#allocation3 + $0x41] sm:$0xff] }
 0x58a   : > { %v27820_v32 = vld [vmem:[#allocation3 + $0x42] sm:$0xff]  ;;  %13831 = vst.msk [vmem:[#allocation3 + $0x52] sm:$0xff] %vm13683_vm13, %v13829_v55  ;;  %v13671_v13 = vmax.f32 %v13639_v54, 0.0  ;;  %v13640_v27 = vadd.f32 %v20935_v30, %v27720_v18  ;;  %v27832_v5 = vpack.c.bf16 %v13862_v48, %v13861_v14  ;;  %13706 = vst.msk [vmem:[#allocation2 + $0xb0] sm:$0xff] %vm13683_vm13, %v13673_v37  ;;  %v29030_v37 = vld [vmem:[#allocation27_spill] sm:$0xff] }
 0x58b   : > { %v27826_v50 = vld [vmem:[#allocation3 + $0x43] sm:$0xff]  ;;  %v13674_v44 = vmax.f32 %v13642_v34, 0.0  ;;  %v27837_v60 = vpack.c.bf16 %v27820_v32, %v27817_v3  ;;  %v20558_v26 = vpop.f32.mrb[24].mxu0 }
 0x58c   : > { %v27830_v21 = vld [vmem:[#allocation3 + $0x44] sm:$0xff]  ;;  %v27841_v16 = vpack.c.bf16 %v27826_v50, %v27822_v28  ;;  %v13734_v58 = vld [vmem:[#allocation2 + $0x90] ss:$2 sm:$0xff]  ;;  %v13766_v57 = vld [vmem:[#allocation2 + $0x91] ss:$2 sm:$0xff]  ;;  %13704 = vst.msk [vmem:[#allocation2 + $0xa0] sm:$0xff] %vm13683_vm13, %v13671_v13  ;;  %v20936_v47 = vadd.f32 %v20558_v26, %v29026_v23 }
 0x58d   : > { %v27845_v1 = vpack.c.bf16 %v27830_v21, %v27828_v7  ;;  %v13672_v51 = vmax.f32 %v13640_v27, 0.0  ;;  %v13788_v42 = vmax.f32 %v13734_v58, %v13766_v57  ;;  %v13732_v20 = vld [vmem:[#allocation2 + $0x80] ss:$2 sm:$0xff]  ;;  %v13764_v12 = vld [vmem:[#allocation2 + $0x81] ss:$2 sm:$0xff]  ;;  %13707 = vst.msk [vmem:[#allocation2 + $0xb8] sm:$0xff] %vm13683_vm13, %v13674_v44 }
 0x58e   : > { %v13549_v52 = vpop.f32.mrb[25].mxu0  ;;  %v13787_v14 = vmax.f32 %v13732_v20, %v13764_v12  ;;  %v13645_v43 = vadd.f32 %v20936_v47, %v27720_v18  ;;  %v29031_v27 = vld [vmem:[#allocation30_spill] sm:$0xff]  ;;  %v29033_v23 = vld [vmem:[#allocation32_spill] sm:$0xff] }
 0x58f   : > { %13705 = vst.msk [vmem:[#allocation2 + $0xa8] sm:$0xff] %vm13683_vm13, %v13672_v51  ;;  %v20937_v19 = vadd.f32 %v13549_v52, %v29027_v9  ;;  %v20559_v8 = vpop.f32.mrb[26].mxu0  ;;  %v29032_v51 = vld [vmem:[#allocation31_spill] sm:$0xff] }
 0x590   : > { %v20938_v0 = vadd.f32 %v20559_v8, %v29028_v59  ;;  %v13552_v38 = vpop.f32.mrb[27].mxu0  ;;  %v13832_v39 = vmax.f32 %v13787_v14, %v13788_v42  ;;  %v13677_v10 = vmax.f32 %v13645_v43, 0.0 }
 0x591   : > { %v13643_v22 = vadd.f32 %v20937_v19, %v27720_v18  ;;  %v20939_v36 = vadd.f32 %v13552_v38, %v29029_v53  ;;  %v13863_v33 = vld [vmem:[#allocation3 + $0x51] sm:$0xff] }
 0x592   : > { %v13646_v45 = vadd.f32 %v20938_v0, %v27720_v18  ;;  %13834 = vst.msk [vmem:[#allocation3 + $0x62] sm:$0xff] %vm13683_vm13, %v13832_v39  ;;  %v27859_v61 = vpack.c.bf16 %v13863_v33, %v13862_v48  ;;  %13710 = vst.msk [vmem:[#allocation2 + $0xd0] sm:$0xff] %vm13683_vm13, %v13677_v10  ;;  %v27873_v52 = vld [vmem:[#allocation3 + $0x52] sm:$0xff] }
 0x593   : > { %v13675_v2 = vmax.f32 %v13643_v22, 0.0  ;;  %v13644_v17 = vadd.f32 %v20939_v36, %v27720_v18  ;;  %v20562_v55 = vpop.f32.mrb[28].mxu0  ;;  %v27878_v43 = vld [vmem:[#allocation3 + $0x53] sm:$0xff] }
 0x594   : > { %v13678_v62 = vmax.f32 %v13646_v45, 0.0  ;;  %v13738_v35 = vld [vmem:[#allocation2 + $0xb0] ss:$2 sm:$0xff]  ;;  %v13770_v31 = vld [vmem:[#allocation2 + $0xb1] ss:$2 sm:$0xff]  ;;  %20570 = vmatprep.mubr.msk.bf16.mxu1 %vm13683_vm13, %v27859_v61  ;;  %v20940_v34 = vadd.f32 %v20562_v55, %v29030_v37  ;;  %v13565_v48 = vpop.f32.mrb[29].mxu0 }
 0x595   : > { %13708 = vst.msk [vmem:[#allocation2 + $0xc0] sm:$0xff] %vm13683_vm13, %v13675_v2  ;;  %v13676_v29 = vmax.f32 %v13644_v17, 0.0  ;;  %v13790_v54 = vmax.f32 %v13738_v35, %v13770_v31  ;;  %v20941_v44 = vadd.f32 %v13565_v48, %v29031_v27  ;;  %v20563_v58 = vpop.f32.mrb[30].mxu0  ;;  %v27884_v39 = vld [vmem:[#allocation3 + $0x54] sm:$0xff]  ;;  %v13844_v55 = vld [vmem:[#allocation3] sm:$0xff] }
 0x596   : > { %v13736_v41 = vld [vmem:[#allocation2 + $0xa0] ss:$2 sm:$0xff]  ;;  %v13768_v30 = vld [vmem:[#allocation2 + $0xa1] ss:$2 sm:$0xff]  ;;  %13711 = vst.msk [vmem:[#allocation2 + $0xd8] sm:$0xff] %vm13683_vm13, %v13678_v62  ;;  %v13649_v57 = vadd.f32 %v20940_v34, %v27720_v18  ;;  %v20942_v26 = vadd.f32 %v20563_v58, %v29032_v51  ;;  %v13568_v42 = vpop.f32.mrb[31].mxu0 }
 0x597   : > { %v13789_v13 = vmax.f32 %v13736_v41, %v13768_v30  ;;  %13709 = vst.msk [vmem:[#allocation2 + $0xc8] sm:$0xff] %vm13683_vm13, %v13676_v29  ;;  %v13647_v12 = vadd.f32 %v20941_v44, %v27720_v18  ;;  %v20943_v47 = vadd.f32 %v13568_v42, %v29033_v23  ;;  %v27906_v41 = vld [vmem:[#allocation3 + $0x10] sm:$0xff]  ;;  %v13848_v23 = vld [vmem:[#allocation3 + $0x40] sm:$0xff] }
 0x598   : > { %v13681_v14 = vmax.f32 %v13649_v57, 0.0  ;;  %v13650_v9 = vadd.f32 %v20942_v26, %v27720_v18  ;;  %v13852_v37 = vpack.c.bf16 %v27906_v41, %v13844_v55  ;;  %v13847_v51 = vld [vmem:[#allocation3 + $0x30] sm:$0xff]  ;;  %v27969_v55 = vpack.c.bf16 %v27878_v43, %v27826_v50 }
 0x599   : > { %v13835_v20 = vmax.f32 %v13789_v13, %v13790_v54  ;;  %v13864_v19 = vld [vmem:[#allocation3 + $0x61] sm:$0xff]  ;;  %v13679_v59 = vmax.f32 %v13647_v12, 0.0  ;;  %v13648_v0 = vadd.f32 %v20943_v47, %v27720_v18  ;;  %v13849_v42 = vld [vmem:[#allocation3 + $0x50] sm:$0xff]  ;;  %v22023_v47 = vld [vmem:[%s28428_s3 + $0x18] sm:$0xff]   ;;  %v27984_v50 = vpack.c.bf16 %v27828_v7, %v27774_v11 }
 0x59a   : > { %v27876_v8 = vld [vmem:[#allocation3 + $0x62] sm:$0xff]  ;;  %v27888_v53 = vpack.c.bf16 %v13864_v19, %v13863_v33  ;;  %13714 = vst.msk [vmem:[#allocation2 + $0xf0] sm:$0xff] %vm13683_vm13, %v13681_v14  ;;  %v13682_v36 = vmax.f32 %v13650_v9, 0.0  ;;  %v27924_v14 = vpack.c.bf16 %v13849_v42, %v13848_v23 }
 0x59b   : > { %13837 = vst.msk [vmem:[#allocation3 + $0x72] sm:$0xff] %vm13683_vm13, %v13835_v20  ;;  %v27882_v38 = vld [vmem:[#allocation3 + $0x63] sm:$0xff]  ;;  %v27893_v10 = vpack.c.bf16 %v27876_v8, %v27873_v52  ;;  %13712 = vst.msk [vmem:[#allocation2 + $0xe0] sm:$0xff] %vm13683_vm13, %v13679_v59  ;;  %v13680_v33 = vmax.f32 %v13648_v0, 0.0  ;;  %v27931_v59 = vld [vmem:[#allocation3 + $0x12] sm:$0xff] }
 0x59c   : > { %v27886_v22 = vld [vmem:[#allocation3 + $0x64] sm:$0xff]  ;;  %v27897_v45 = vpack.c.bf16 %v27882_v38, %v27878_v43  ;;  %13715 = vst.msk [vmem:[#allocation2 + $0xf8] sm:$0xff] %vm13683_vm13, %v13682_v36  ;;  %v22026_v43 = vld [vmem:[%s28428_s3 + $0x30] sm:$0xff]  }
 0x59d   : > { %v27901_v18 = vpack.c.bf16 %v27886_v22, %v27884_v39  ;;  %v13742_v2 = vld [vmem:[#allocation2 + $0xd0] ss:$2 sm:$0xff]  ;;  %v13774_v17 = vld [vmem:[#allocation2 + $0xd1] ss:$2 sm:$0xff]  ;;  %13713 = vst.msk [vmem:[#allocation2 + $0xe8] sm:$0xff] %vm13683_vm13, %v13680_v33  ;;  %v13846_v20 = vld [vmem:[#allocation3 + $0x20] sm:$0xff] }
 0x59e   : > { %v13792_v62 = vmax.f32 %v13742_v2, %v13774_v17  ;;  %v13740_v35 = vld [vmem:[#allocation2 + $0xc0] ss:$2 sm:$0xff]  ;;  %v13772_v31 = vld [vmem:[#allocation2 + $0xc1] ss:$2 sm:$0xff]  ;;  %v27919_v12 = vpack.c.bf16 %v13847_v51, %v13846_v20 }
 0x59f   : > { %v13791_v29 = vmax.f32 %v13740_v35, %v13772_v31  ;;  %v14039_v9 = vld [vmem:[#allocation3 + $0x2] sm:$0xff] }
 0x5a0   : > { %v13850_v0 = vld [vmem:[#allocation3 + $0x60] sm:$0xff]  ;;  %v14047_v36 = vpack.c.bf16 %v27931_v59, %v14039_v9 }
 0x5a1   : > { %v13838_v54 = vmax.f32 %v13791_v29, %v13792_v62  ;;  %v14041_v17 = vld [vmem:[#allocation3 + $0x22] sm:$0xff]  ;;  %v27947_v62 = vpack.c.bf16 %v27873_v52, %v27820_v32  ;;  %v27962_v32 = vpack.c.bf16 %v27822_v28, %v27772_v49 }
 0x5a2   : > { %v27908_v30 = vld [vmem:[#allocation3 + $0x71] sm:$0xff]  ;;  %v22024_v33 = vld [vmem:[%s28428_s3 + $0x20] sm:$0xff]   ;;  %v22025_v52 = vld [vmem:[%s28428_s3 + $0x28] sm:$0xff]  }
 0x5a3   : > { %13840 = vst.msk [vmem:[#allocation3 + $0x82] sm:$0xff] %vm13683_vm13, %v13838_v54  ;;  %v27913_v34 = vpack.c.bf16 %v27908_v30, %v13864_v19  ;;  %v13746_v48 = vld [vmem:[#allocation2 + $0xf0] ss:$2 sm:$0xff]  ;;  %v13778_v13 = vld [vmem:[#allocation2 + $0xf1] ss:$2 sm:$0xff]  ;;  %v14145_v35 = vld [vmem:[#allocation3 + $0x3] sm:$0xff] }
 0x5a4   : > { %v13794_v27 = vmax.f32 %v13746_v48, %v13778_v13  ;;  %v13744_v44 = vld [vmem:[#allocation2 + $0xe0] ss:$2 sm:$0xff]  ;;  %v13776_v58 = vld [vmem:[#allocation2 + $0xe1] ss:$2 sm:$0xff]  ;;  %v13851_v19 = vld [vmem:[#allocation3 + $0x70] sm:$0xff]  ;;  %v27991_v48 = vpack.c.bf16 %v27884_v39, %v27830_v21  ;;  %v14366_v13 = vpack.c.bf16 %v13846_v20, %v27906_v41  ;;  %v28004_v21 = vpack.c.bf16 %v13848_v23, %v13847_v51 }
 0x5a5   : > { %20571 = vmatmul.mubr.msk.bf16.gmra.mrb[36].mxu1 %vm13683_vm13, %v27913_v34  ;;  %v13793_v57 = vmax.f32 %v13744_v44, %v13776_v58  ;;  %v27934_v2 = vpack.c.bf16 %v13851_v19, %v13850_v0  ;;  %v14046_v31 = vld [vmem:[#allocation3 + $0x72] sm:$0xff]  ;;  %v14472_v44 = vpack.c.bf16 %v27791_v46, %v27707_v40  ;;  %v22028_v58 = vld [vmem:[%s28428_s3 + $0x40] sm:$0xff]   ;;  %v14578_v46 = vpack.c.bf16 %v14041_v17, %v27931_v59  ;;  %v22029_v51 = vld [vmem:[%s28428_s3 + $0x48] sm:$0xff]  }
 0x5a6   : > { %20576 = vmatprep.mubr.msk.bf16.mxu1 %vm13683_vm13, %v13852_v37  ;;  %v27955_v29 = vpack.c.bf16 %v14046_v31, %v27876_v8  ;;  %v14251_v8 = vld [vmem:[#allocation3 + $0x4] sm:$0xff]  ;;  %v14152_v54 = vld [vmem:[#allocation3 + $0x73] sm:$0xff] }
 0x5a7   : > { %v13841_v26 = vmax.f32 %v13793_v57, %v13794_v27  ;;  %v14259_v28 = vpack.c.bf16 %v27767_v56, %v14251_v8  ;;  %v27977_v37 = vpack.c.bf16 %v14152_v54, %v27882_v38  ;;  %v14258_v38 = vld [vmem:[#allocation3 + $0x74] sm:$0xff]  ;;  %v28009_v27 = vpack.c.bf16 %v13850_v0, %v13849_v42  ;;  %v22032_v56 = vld [vmem:[%s28428_s3 + $0x60] sm:$0xff]  }
 0x5a8   : > { %v27998_v7 = vpack.c.bf16 %v14258_v38, %v27886_v22  ;;  %v22027_v39 = vld [vmem:[%s28428_s3 + $0x38] sm:$0xff]   ;;  %v22030_v42 = vld [vmem:[%s28428_s3 + $0x50] sm:$0xff]   ;;  %v15531_v8 = vld [vmem:[#allocation3 + $0xa1] sm:$0xff] }
 0x5a9   : > { %13843 = vst.msk [vmem:[#allocation3 + $0x92] sm:$0xff] %vm13683_vm13, %v13841_v26  ;;  %v22035_v0 = vld [vmem:[%s28428_s3 + $0x78] sm:$0xff]  }
 0x5aa   : > { %v14365_v22 = vld [vmem:[#allocation3 + $0x80] sm:$0xff] }
 0x5ab   : > { %v28015_v41 = vpack.c.bf16 %v14365_v22, %v13851_v19  ;;  %v14471_v57 = vld [vmem:[#allocation3 + $0x81] sm:$0xff] }
 0x5ac   : > { %v28030_v40 = vpack.c.bf16 %v14471_v57, %v27908_v30  ;;  %v14577_v30 = vld [vmem:[#allocation3 + $0x82] sm:$0xff] }
 0x5ad   : > { %20577 = vmatmul.mubr.msk.bf16.vlgmr.msra.gmra.mrb[32].mxu1 %vm13683_vm13, %v27919_v12  ;;  %v28043_v26 = vpack.c.bf16 %v14577_v30, %v14046_v31  ;;  %v14683_v20 = vld [vmem:[#allocation3 + $0x83] sm:$0xff] }
 0x5ae   : > { %20585 = vmatpush3.bf16.msra.mxu1 %v27801_v15  ;;  %20580 = vmatprep.mubr.msk.bf16.mxu1 %vm13683_vm13, %v27924_v14  ;;  %v27940_v15 = vpack.c.bf16 %v27817_v3, %v14041_v17  ;;  %v14153_v3 = vpack.c.bf16 %v27765_v25, %v14145_v35  ;;  %v28058_v23 = vpack.c.bf16 %v14683_v20, %v14152_v54  ;;  %v22031_v25 = vld [vmem:[%s28428_s3 + $0x58] sm:$0xff]   ;;  %v14789_v49 = vld [vmem:[#allocation3 + $0x84] sm:$0xff] }
 0x5af   : > { %20594 = vmatprep.subr.bf16.mxu1 %v22023_v47  ;;  %v22037_v31 = vld [vmem:[%s28428_s3 + $0x88] sm:$0xff]  }
 0x5b0   : > { %v14895_v11 = vld [vmem:[#allocation3 + $0x90] sm:$0xff] }
 0x5b1   : > { %v15107_v19 = vld [vmem:[#allocation3 + $0x92] sm:$0xff] }
 0x5b2   : > { %v28112_v59 = vpack.c.bf16 %v15107_v19, %v14577_v30 }
 0x5b5   : > { %20581 = vmatmul.mubr.msk.bf16.gmra.mrb[36].mxu1 %vm13683_vm13, %v27934_v2 }
 0x5b6   : > { %20586 = vmatprep.mubr.msk.bf16.mxu1 %vm13683_vm13, %v14047_v36  ;;  %v15213_v36 = vld [vmem:[#allocation3 + $0x93] sm:$0xff] }
 0x5b7   : > { %v28125_v17 = vpack.c.bf16 %v15213_v36, %v14683_v20 }
 0x5bd   : > { %20587 = vmatmul.mubr.msk.bf16.vlgmr.msra.gmra.mrb[32].mxu1 %vm13683_vm13, %v27940_v15 }
 0x5be   : > { %20595 = vmatpush3.bf16.msra.mxu1 %v22023_v47  ;;  %20590 = vmatprep.mubr.msk.bf16.mxu1 %vm13683_vm13, %v27947_v62  ;;  %v15001_v47 = vld [vmem:[#allocation3 + $0x91] sm:$0xff] }
 0x5bf   : > { %20604 = vmatprep.subr.bf16.mxu1 %v22024_v33  ;;  %v28099_v9 = vpack.c.bf16 %v15001_v47, %v14471_v57  ;;  %v15535_v54 = vpack.c.bf16 %v15531_v8, %v15001_v47 }
 0x5c5   : > { %20591 = vmatmul.mubr.msk.bf16.gmra.mrb[36].mxu1 %vm13683_vm13, %v27955_v29 }
 0x5c6   : > { %20596 = vmatprep.mubr.msk.bf16.mxu1 %vm13683_vm13, %v14153_v3  ;;  %v15425_v3 = vld [vmem:[#allocation3 + $0xa0] sm:$0xff] }
 0x5cd   : > { %20597 = vmatmul.mubr.msk.bf16.vlgmr.msra.gmra.mrb[32].mxu1 %vm13683_vm13, %v27962_v32 }
 0x5ce   : > { %20605 = vmatpush3.bf16.msra.mxu1 %v22024_v33  ;;  %20600 = vmatprep.mubr.msk.bf16.mxu1 %vm13683_vm13, %v27969_v55  ;;  %v15319_v33 = vld [vmem:[#allocation3 + $0x94] sm:$0xff] }
 0x5cf   : > { %20614 = vmatprep.subr.bf16.mxu1 %v22025_v52  ;;  %v28138_v35 = vpack.c.bf16 %v15319_v33, %v14789_v49 }
 0x5d5   : > { %20601 = vmatmul.mubr.msk.bf16.gmra.mrb[36].mxu1 %vm13683_vm13, %v27977_v37 }
 0x5d6   : > { %20606 = vmatprep.mubr.msk.bf16.mxu1 %vm13683_vm13, %v14259_v28 }
 0x5dd   : > { %20607 = vmatmul.mubr.msk.bf16.vlgmr.msra.gmra.mrb[32].mxu1 %vm13683_vm13, %v27984_v50 }
 0x5de   : > { %20615 = vmatpush3.bf16.msra.mxu1 %v22025_v52  ;;  %20610 = vmatprep.mubr.msk.bf16.mxu1 %vm13683_vm13, %v27991_v48  ;;  %v22038_v52 = vld [vmem:[%s28428_s3 + $0x90] sm:$0xff]  }
 0x5df   : > { %20624 = vmatprep.subr.bf16.mxu1 %v22026_v43 }
 0x5e5   : > { %20611 = vmatmul.mubr.msk.bf16.gmra.mrb[36].mxu1 %vm13683_vm13, %v27998_v7 }
 0x5e6   : > { %20616 = vmatprep.mubr.msk.bf16.mxu1 %vm13683_vm13, %v14366_v13 }
 0x5ed   : > { %20617 = vmatmul.mubr.msk.bf16.vlgmr.msra.gmra.mrb[32].mxu1 %vm13683_vm13, %v28004_v21 }
 0x5ee   : > { %20625 = vmatpush3.bf16.msra.mxu1 %v22026_v43  ;;  %20620 = vmatprep.mubr.msk.bf16.mxu1 %vm13683_vm13, %v28009_v27 }
 0x5ef   : > { %20634 = vmatprep.subr.bf16.mxu1 %v22027_v39 }
 0x5f5   : > { %20621 = vmatmul.mubr.msk.bf16.gmra.mrb[36].mxu1 %vm13683_vm13, %v28015_v41 }
 0x5f6   : > { %20626 = vmatprep.mubr.msk.bf16.mxu1 %vm13683_vm13, %v14472_v44 }
 0x5fd   : > { %20627 = vmatmul.mubr.msk.bf16.vlgmr.msra.gmra.mrb[32].mxu1 %vm13683_vm13, %v27832_v5 }
 0x5fe   : > { %20635 = vmatpush3.bf16.msra.mxu1 %v22027_v39  ;;  %20630 = vmatprep.mubr.msk.bf16.mxu1 %vm13683_vm13, %v27888_v53  ;;  %v19098_v39 = vld [vmem:[%s28430_s5 + $0x4] sm:$0xf] }
 0x5ff   : > { %20644 = vmatprep.subr.bf16.mxu1 %v22028_v58 }
 0x605   : > { %20631 = vmatmul.mubr.msk.bf16.gmra.mrb[36].mxu1 %vm13683_vm13, %v28030_v40 }
 0x606   : > { %20636 = vmatprep.mubr.msk.bf16.mxu1 %vm13683_vm13, %v14578_v46 }
 0x60d   : > { %20637 = vmatmul.mubr.msk.bf16.vlgmr.msra.gmra.mrb[32].mxu1 %vm13683_vm13, %v27837_v60 }
 0x60e   : > { %20645 = vmatpush3.bf16.msra.mxu1 %v22028_v58  ;;  %20640 = vmatprep.mubr.msk.bf16.mxu1 %vm13683_vm13, %v27893_v10 }
 0x60f   : > { %20654 = vmatprep.subr.bf16.mxu1 %v22029_v51 }
 0x615   : > { %20641 = vmatmul.mubr.msk.bf16.gmra.mrb[36].mxu1 %vm13683_vm13, %v28043_v26 }
 0x616   : > { %20646 = vmatprep.mubr.msk.bf16.mxu1 %vm13683_vm13, %v14684_v4  ;;  %v28073_v4 = vpack.c.bf16 %v14789_v49, %v14258_v38 }
 0x61d   : > { %20647 = vmatmul.mubr.msk.bf16.vlgmr.msra.gmra.mrb[32].mxu1 %vm13683_vm13, %v27841_v16 }
 0x61e   : > { %20655 = vmatpush3.bf16.msra.mxu1 %v22029_v51  ;;  %20650 = vmatprep.mubr.msk.bf16.mxu1 %vm13683_vm13, %v27897_v45 }
 0x61f   : > { %20664 = vmatprep.subr.bf16.mxu1 %v22030_v42 }
 0x625   : > { %20651 = vmatmul.mubr.msk.bf16.gmra.mrb[36].mxu1 %vm13683_vm13, %v28058_v23 }
 0x626   : > { %20656 = vmatprep.mubr.msk.bf16.mxu1 %vm13683_vm13, %v14790_v63  ;;  %v28086_v63 = vpack.c.bf16 %v14895_v11, %v14365_v22 }
 0x62d   : > { %20657 = vmatmul.mubr.msk.bf16.vlgmr.msra.gmra.mrb[32].mxu1 %vm13683_vm13, %v27845_v1 }
 0x62e   : > { %20665 = vmatpush3.bf16.msra.mxu1 %v22030_v42  ;;  %20660 = vmatprep.mubr.msk.bf16.mxu1 %vm13683_vm13, %v27901_v18 }
 0x62f   : > { %20674 = vmatprep.subr.bf16.mxu1 %v22031_v25 }
 0x635   : > { %20661 = vmatmul.mubr.msk.bf16.gmra.mrb[36].mxu1 %vm13683_vm13, %v28073_v4 }
 0x636   : > { %20666 = vmatprep.mubr.msk.bf16.mxu1 %vm13683_vm13, %v27919_v12  ;;  %v22033_v12 = vld [vmem:[%s28428_s3 + $0x68] sm:$0xff]  }
 0x63d   : > { %20667 = vmatmul.mubr.msk.bf16.vlgmr.msra.gmra.mrb[32].mxu1 %vm13683_vm13, %v27924_v14 }
 0x63e   : > { %20675 = vmatpush3.bf16.msra.mxu1 %v22031_v25  ;;  %20670 = vmatprep.mubr.msk.bf16.mxu1 %vm13683_vm13, %v27934_v2 }
 0x63f   : > { %20684 = vmatprep.subr.bf16.mxu1 %v22032_v56 }
 0x645   : > { %20671 = vmatmul.mubr.msk.bf16.gmra.mrb[36].mxu1 %vm13683_vm13, %v28086_v63 }
 0x646   : > { %20676 = vmatprep.mubr.msk.bf16.mxu1 %vm13683_vm13, %v27796_v6  ;;  %v22034_v6 = vld [vmem:[%s28428_s3 + $0x70] sm:$0xff]  }
 0x64d   : > { %20677 = vmatmul.mubr.msk.bf16.vlgmr.msra.gmra.mrb[32].mxu1 %vm13683_vm13, %v27859_v61 }
 0x64e   : > { %20685 = vmatpush3.bf16.msra.mxu1 %v22032_v56  ;;  %20680 = vmatprep.mubr.msk.bf16.mxu1 %vm13683_vm13, %v27913_v34 }
 0x64f   : > { %20694 = vmatprep.subr.bf16.mxu1 %v22033_v12 }
 0x655   : > { %20681 = vmatmul.mubr.msk.bf16.gmra.mrb[36].mxu1 %vm13683_vm13, %v28099_v9 }
 0x656   : > { %20686 = vmatprep.mubr.msk.bf16.mxu1 %vm13683_vm13, %v27940_v15  ;;  %v22036_v15 = vld [vmem:[%s28428_s3 + $0x80] sm:$0xff]  }
 0x65d   : > { %20687 = vmatmul.mubr.msk.bf16.vlgmr.msra.gmra.mrb[32].mxu1 %vm13683_vm13, %v27947_v62 }
 0x65e   : > { %20695 = vmatpush3.bf16.msra.mxu1 %v22033_v12  ;;  %20690 = vmatprep.mubr.msk.bf16.mxu1 %vm13683_vm13, %v27955_v29 }
 0x65f   : > { %20704 = vmatprep.subr.bf16.mxu1 %v22034_v6 }
 0x665   : > { %20691 = vmatmul.mubr.msk.bf16.gmra.mrb[36].mxu1 %vm13683_vm13, %v28112_v59 }
 0x666   : > { %20696 = vmatprep.mubr.msk.bf16.mxu1 %vm13683_vm13, %v27962_v32  ;;  %v15429_v32 = vpack.c.bf16 %v15425_v3, %v14895_v11 }
 0x66d   : > { %20697 = vmatmul.mubr.msk.bf16.vlgmr.msra.gmra.mrb[32].mxu1 %vm13683_vm13, %v27969_v55 }
 0x66e   : > { %20705 = vmatpush3.bf16.msra.mxu1 %v22034_v6  ;;  %20700 = vmatprep.mubr.msk.bf16.mxu1 %vm13683_vm13, %v27977_v37 }
 0x66f   : > { %20714 = vmatprep.subr.bf16.mxu1 %v22035_v0 }
 0x675   : > { %20701 = vmatmul.mubr.msk.bf16.gmra.mrb[36].mxu1 %vm13683_vm13, %v28125_v17 }
 0x676   : > { %20706 = vmatprep.mubr.msk.bf16.mxu1 %vm13683_vm13, %v27984_v50 }
 0x67d   : > { %20707 = vmatmul.mubr.msk.bf16.vlgmr.msra.gmra.mrb[32].mxu1 %vm13683_vm13, %v27991_v48 }
 0x67e   : > { %20715 = vmatpush3.bf16.msra.mxu1 %v22035_v0  ;;  %20710 = vmatprep.mubr.msk.bf16.mxu1 %vm13683_vm13, %v27998_v7 }
 0x67f   : > { %20724 = vmatprep.subr.bf16.mxu1 %v22036_v15 }
 0x685   : > { %20711 = vmatmul.mubr.msk.bf16.gmra.mrb[36].mxu1 %vm13683_vm13, %v28138_v35 }
 0x686   : > { %20716 = vmatprep.mubr.msk.bf16.mxu1 %vm13683_vm13, %v28004_v21 }
 0x68d   : > { %20717 = vmatmul.mubr.msk.bf16.vlgmr.msra.gmra.mrb[32].mxu1 %vm13683_vm13, %v28009_v27  ;;  %v16545_v27 = vsel %vm16543_vm15, %v19098_v39, 0 }
 0x68e   : > { %20725 = vmatpush3.bf16.msra.mxu1 %v22036_v15  ;;  %20720 = vmatprep.mubr.msk.bf16.mxu1 %vm13683_vm13, %v28015_v41  ;;  %v16534_v15 = vld [vmem:[%s28430_s5] sm:$0xf] }
 0x68f   : > { %20734 = vmatprep.subr.bf16.mxu1 %v22037_v31 }
 0x695   : > { %20721 = vmatmul.mubr.msk.bf16.gmra.mrb[36].mxu1 %vm13683_vm13, %v15429_v32 }
 0x696   : > { %20726 = vmatprep.mubr.msk.bf16.mxu1 %vm13683_vm13, %v27832_v5  ;;  %v22039_v5 = vld [vmem:[%s28428_s3 + $0x98] sm:$0xff]  }
 0x69d   : > { %20727 = vmatmul.mubr.msk.bf16.vlgmr.msra.gmra.mrb[32].mxu1 %vm13683_vm13, %v27888_v53  ;;  %v15637_v53 = vld [vmem:[#allocation3 + $0xa2] sm:$0xff] }
 0x69e   : > { %20735 = vmatpush3.bf16.msra.mxu1 %v22037_v31  ;;  %20730 = vmatprep.mubr.msk.bf16.mxu1 %vm13683_vm13, %v28030_v40  ;;  %v15641_v28 = vpack.c.bf16 %v15637_v53, %v15107_v19  ;;  %v16590_v31 = vsel %vm16543_vm15, %v16534_v15, 0 }
 0x69f   : > { %20744 = vmatprep.subr.bf16.mxu1 %v22038_v52 }
 0x6a5   : > { %20731 = vmatmul.mubr.msk.bf16.gmra.mrb[36].mxu1 %vm13683_vm13, %v15535_v54 }
 0x6a6   : > { %20736 = vmatprep.mubr.msk.bf16.mxu1 %vm13683_vm13, %v27837_v60  ;;  %v22040_v60 = vld [vmem:[%s28428_s3 + $0xa0] sm:$0xff]  }
 0x6ad   : > { %20737 = vmatmul.mubr.msk.bf16.vlgmr.msra.gmra.mrb[32].mxu1 %vm13683_vm13, %v27893_v10  ;;  %v15743_v10 = vld [vmem:[#allocation3 + $0xa3] sm:$0xff] }
 0x6ae   : > { %20745 = vmatpush3.bf16.msra.mxu1 %v22038_v52  ;;  %20740 = vmatprep.mubr.msk.bf16.mxu1 %vm13683_vm13, %v28043_v26  ;;  %v15747_v50 = vpack.c.bf16 %v15743_v10, %v15213_v36  ;;  %v19103_v52 = vld [vmem:[%s28430_s5 + $0xc] sm:$0xf] }
 0x6af   : > { %20754 = vmatprep.subr.bf16.mxu1 %v22039_v5  ;;  %v16690_v54 = vsel %vm16543_vm15, %v19103_v52, 0 }
 0x6b5   : > { %20741 = vmatmul.mubr.msk.bf16.gmra.mrb[36].mxu1 %vm13683_vm13, %v15641_v28 }
 0x6b6   : > { %20746 = vmatprep.mubr.msk.bf16.mxu1 %vm13683_vm13, %v27841_v16  ;;  %v22041_v16 = vld [vmem:[%s28428_s3 + $0xa8] sm:$0xff]  }
 0x6bd   : > { %20747 = vmatmul.mubr.msk.bf16.vlgmr.msra.gmra.mrb[32].mxu1 %vm13683_vm13, %v27897_v45  ;;  %v15849_v45 = vld [vmem:[#allocation3 + $0xa4] sm:$0xff] }
 0x6be   : > { %20755 = vmatpush3.bf16.msra.mxu1 %v22039_v5  ;;  %20750 = vmatprep.mubr.msk.bf16.mxu1 %vm13683_vm13, %v28058_v23  ;;  %v15853_v43 = vpack.c.bf16 %v15849_v45, %v15319_v33 }
 0x6bf   : > { %20764 = vmatprep.subr.bf16.mxu1 %v22040_v60 }
 0x6c5   : > { %20751 = vmatmul.mubr.msk.bf16.gmra.mrb[36].mxu1 %vm13683_vm13, %v15747_v50 }
 0x6c6   : > { %20756 = vmatprep.mubr.msk.bf16.mxu1 %vm13683_vm13, %v27845_v1  ;;  %v22042_v1 = vld [vmem:[%s28428_s3 + $0xb0] sm:$0xff]  }
 0x6cd   : > { %20757 = vmatmul.mubr.msk.bf16.vlgmr.msra.gmra.mrb[32].mxu1 %vm13683_vm13, %v27901_v18  ;;  %v15955_v18 = vld [vmem:[#allocation3 + $0xb0] sm:$0xff] }
 0x6ce   : > { %20765 = vmatpush3.bf16.msra.mxu1 %v22040_v60  ;;  %20760 = vmatprep.mubr.msk.bf16.mxu1 %vm13683_vm13, %v28073_v4  ;;  %v15959_v38 = vpack.c.bf16 %v15955_v18, %v15425_v3  ;;  %v19101_v3 = vld [vmem:[%s28430_s5 + $0x8] sm:$0xf]  ;;  %v19105_v60 = vld [vmem:[%s28430_s5 + $0x10] sm:$0xf] }
 0x6cf   : > { %20774 = vmatprep.subr.bf16.mxu1 %v22041_v16  ;;  %v16640_v32 = vsel %vm16543_vm15, %v19101_v3, 0  ;;  %v16744_v50 = vsel %vm16543_vm15, %v19105_v60, 0 }
 0x6d5   : > { %20761 = vmatmul.mubr.msk.bf16.gmra.mrb[36].mxu1 %vm13683_vm13, %v15853_v43  ;;  %v19107_v43 = vld [vmem:[%s28430_s5 + $0x14] sm:$0xf] }
 0x6d6   : > { %20766 = vmatprep.mubr.msk.bf16.mxu1 %vm13683_vm13, %v27924_v14  ;;  %v22043_v14 = vld [vmem:[%s28428_s3 + $0xb8] sm:$0xff]   ;;  %v16795_v18 = vsel %vm16543_vm15, %v19107_v43, 0 }
 0x6dd   : > { %20767 = vmatmul.mubr.msk.bf16.vlgmr.msra.gmra.mrb[32].mxu1 %vm13683_vm13, %v27934_v2  ;;  %v16061_v2 = vld [vmem:[#allocation3 + $0xb1] sm:$0xff] }
 0x6de   : > { %20775 = vmatpush3.bf16.msra.mxu1 %v22041_v16  ;;  %20770 = vmatprep.mubr.msk.bf16.mxu1 %vm13683_vm13, %v28086_v63  ;;  %v16065_v13 = vpack.c.bf16 %v16061_v2, %v15531_v8 }
 0x6df   : > { %20784 = vmatprep.subr.bf16.mxu1 %v22042_v1 }
 0x6e5   : > { %20771 = vmatmul.mubr.msk.bf16.gmra.mrb[36].mxu1 %vm13683_vm13, %v15959_v38  ;;  %v19109_v38 = vld [vmem:[%s28430_s5 + $0x18] sm:$0xf] }
 0x6e6   : > { %20776 = vmatprep.mubr.msk.bf16.mxu1 %vm13683_vm13, %v27859_v61  ;;  %v22044_v61 = vld [vmem:[%s28428_s3 + $0xc0] sm:$0xff]   ;;  %v16846_v2 = vsel %vm16543_vm15, %v19109_v38, 0 }
 0x6ed   : > { %20777 = vmatmul.mubr.msk.bf16.vlgmr.msra.gmra.mrb[32].mxu1 %vm13683_vm13, %v27913_v34  ;;  %v16167_v34 = vld [vmem:[#allocation3 + $0xb2] sm:$0xff] }
 0x6ee   : > { %20785 = vmatpush3.bf16.msra.mxu1 %v22042_v1  ;;  %20780 = vmatprep.mubr.msk.bf16.mxu1 %vm13683_vm13, %v28099_v9  ;;  %v16171_v21 = vpack.c.bf16 %v16167_v34, %v15637_v53 }
 0x6ef   : > { %20794 = vmatprep.subr.bf16.mxu1 %v22043_v14 }
 0x6f5   : > { %20781 = vmatmul.mubr.msk.bf16.gmra.mrb[36].mxu1 %vm13683_vm13, %v16065_v13  ;;  %v19111_v13 = vld [vmem:[%s28430_s5 + $0x1c] sm:$0xf] }
 0x6f6   : > { %20786 = vmatprep.mubr.msk.bf16.mxu1 %vm13683_vm13, %v27947_v62  ;;  %v16273_v62 = vld [vmem:[#allocation3 + $0xb3] sm:$0xff]  ;;  %v16896_v34 = vsel %vm16543_vm15, %v19111_v13, 0 }
 0x6fd   : > { %20787 = vmatmul.mubr.msk.bf16.vlgmr.msra.gmra.mrb[32].mxu1 %vm13683_vm13, %v27955_v29  ;;  %v16277_v29 = vpack.c.bf16 %v16273_v62, %v15743_v10 }
 0x6fe   : > { %20795 = vmatpush3.bf16.msra.mxu1 %v22043_v14  ;;  %20790 = vmatprep.mubr.msk.bf16.mxu1 %vm13683_vm13, %v28112_v59 }
 0x6ff   : > { %20804 = vmatprep.subr.bf16.mxu1 %v22044_v61 }
 0x705   : > { %20791 = vmatmul.mubr.msk.bf16.gmra.mrb[36].mxu1 %vm13683_vm13, %v16171_v21 }
 0x706   : > { %20796 = vmatprep.mubr.msk.bf16.mxu1 %vm13683_vm13, %v27969_v55  ;;  %v16379_v55 = vld [vmem:[#allocation3 + $0xb4] sm:$0xff] }
 0x70d   : > { %20797 = vmatmul.mubr.msk.bf16.vlgmr.msra.gmra.mrb[32].mxu1 %vm13683_vm13, %v27977_v37  ;;  %v16383_v37 = vpack.c.bf16 %v16379_v55, %v15849_v45  ;;  %v19113_v55 = vld [vmem:[%s28430_s5 + $0x20] sm:$0xf] }
 0x70e   : > { %20805 = vmatpush3.bf16.msra.mxu1 %v22044_v61  ;;  %20800 = vmatprep.mubr.msk.bf16.mxu1 %vm13683_vm13, %v28125_v17  ;;  %v16950_v39 = vsel %vm16543_vm15, %v19113_v55, 0 }
 0x70f   : > { %20814 = vmatprep.subr.bf16.mxu1 %v22330_v24 }
 0x715   : > { %20801 = vmatmul.mubr.msk.bf16.gmra.mrb[36].mxu1 %vm13683_vm13, %v16277_v29 }
 0x716   : > { %20806 = vmatprep.mubr.msk.bf16.mxu1 %vm13683_vm13, %v27991_v48  ;;  %v19097_v48 = vld [vmem:[%s28429_s4] ss:$0 sm:$0xff] }
 0x71d   : > { %20807 = vmatmul.mubr.msk.bf16.vlgmr.msra.gmra.mrb[32].mxu1 %vm13683_vm13, %v27998_v7 }
 0x71e   : > { %20810 = vmatprep.mubr.msk.bf16.mxu1 %vm13683_vm13, %v28138_v35  ;;  %20815 = vmatpush3.bf16.msra.mxu1 %v16545_v27 }
 0x71f   : > { %20820 = vmatprep.subr.bf16.mxu1 %v22330_v24 }
 0x725   : > { %20811 = vmatmul.mubr.msk.bf16.gmra.mrb[36].mxu1 %vm13683_vm13, %v16383_v37 }
 0x726   : > { %20816 = vmatprep.mubr.msk.bf16.mxu1 %vm22331_vm0, %v22330_v24 }
 0x7f0   : > { %v20808_v7 = vpop.f32.mrb[32].mxu1 }
 0x7f1   : > { %v16487_v22 = vadd.f32 %v20808_v7, %v19097_v48  ;;  %v16439_v41 = vpop.f32.mrb[33].mxu1  ;;  %v19115_v7 = vld [vmem:[%s28430_s5 + $0x24] sm:$0xf] }
 0x7f2   : > { %v16485_v44 = vadd.f32 %v19097_v48, %v16439_v41  ;;  %v20809_v58 = vpop.f32.mrb[34].mxu1  ;;  %v17001_v41 = vsel %vm16543_vm15, %v19115_v7, 0 }
 0x7f3   : > { %v16495_v57 = vmax.f32 %v16487_v22, 0.0  ;;  %v16488_v40 = vadd.f32 %v20809_v58, %v19097_v48  ;;  %v16442_v46 = vpop.f32.mrb[35].mxu1 }
 0x7f4   : > { %v16493_v51 = vmax.f32 %v16485_v44, 0.0  ;;  %v16486_v30 = vadd.f32 %v19097_v48, %v16442_v46  ;;  %v19117_v44 = vld [vmem:[%s28430_s5 + $0x28] sm:$0xf] }
 0x7f5   : > { %16504 = vst.msk [vmem:[#allocation4 + $0x10] sm:$0xff] %vm16501_vm1, %v16495_v57  ;;  %v16496_v26 = vmax.f32 %v16488_v40, 0.0  ;;  %v17052_v57 = vsel %vm16543_vm15, %v19117_v44, 0  ;;  %v19119_v40 = vld [vmem:[%s28430_s5 + $0x2c] sm:$0xf] }
 0x7f6   : > { %16502 = vst.msk [vmem:[#allocation4] sm:$0xff] %vm16501_vm1, %v16493_v51  ;;  %v16494_v42 = vmax.f32 %v16486_v30, 0.0  ;;  %v17102_v51 = vsel %vm16543_vm15, %v19119_v40, 0 }
 0x7f7   : > { %16505 = vst.msk [vmem:[#allocation4 + $0x18] sm:$0xff] %vm16501_vm1, %v16496_v26 }
 0x7f8   : > { %16503 = vst.msk [vmem:[#allocation4 + $0x8] sm:$0xff] %vm16501_vm1, %v16494_v42  ;;  %v20812_v20 = vpop.f32.mrb[36].mxu1 }
 0x7f9   : > { %v16491_v23 = vadd.f32 %v20812_v20, %v19097_v48  ;;  %v16455_v25 = vpop.f32.mrb[37].mxu1  ;;  %v19121_v20 = vld [vmem:[%s28430_s5 + $0x30] sm:$0xf] }
 0x7fa   : > { %v16489_v49 = vadd.f32 %v19097_v48, %v16455_v25  ;;  %v20813_v4 = vpop.f32.mrb[38].mxu1  ;;  %v17156_v25 = vsel %vm16543_vm15, %v19121_v20, 0 }
 0x7fb   : > { %v16499_v56 = vmax.f32 %v16491_v23, 0.0  ;;  %v16492_v11 = vadd.f32 %v20813_v4, %v19097_v48  ;;  %v16458_v63 = vpop.f32.mrb[39].mxu1 }
 0x7fc   : > { %v16497_v12 = vmax.f32 %v16489_v49, 0.0  ;;  %v16490_v47 = vadd.f32 %v19097_v48, %v16458_v63 }
 0x7fd   : > { %16508 = vst.msk [vmem:[#allocation4 + $0x30] sm:$0xff] %vm16501_vm1, %v16499_v56  ;;  %v16500_v9 = vmax.f32 %v16492_v11, 0.0  ;;  %v19123_v56 = vld [vmem:[%s28430_s5 + $0x34] sm:$0xf] }
 0x7fe   : > { %16506 = vst.msk [vmem:[#allocation4 + $0x20] sm:$0xff] %vm16501_vm1, %v16497_v12  ;;  %v16498_v6 = vmax.f32 %v16490_v47, 0.0  ;;  %v16512_v5 = vld [vmem:[#allocation4 + $0x10] ss:$2 sm:$0xff]  ;;  %v16520_v53 = vld [vmem:[#allocation4 + $0x11] ss:$2 sm:$0xff] }
 0x7ff   : > { %16509 = vst.msk [vmem:[#allocation4 + $0x38] sm:$0xff] %vm16501_vm1, %v16500_v9  ;;  %v16510_v19 = vld [vmem:[#allocation4] ss:$2 sm:$0xff]  ;;  %v16518_v59 = vld [vmem:[#allocation4 + $0x1] ss:$2 sm:$0xff]  ;;  %v16526_v28 = vmax.f32 %v16512_v5, %v16520_v53  ;;  %v17207_v63 = vsel %vm16543_vm15, %v19123_v56, 0 }
 0x800   : > { %16507 = vst.msk [vmem:[#allocation4 + $0x28] sm:$0xff] %vm16501_vm1, %v16498_v6  ;;  %v16525_v0 = vmax.f32 %v16510_v19, %v16518_v59  ;;  %v19125_v12 = vld [vmem:[%s28430_s5 + $0x38] sm:$0xf]  ;;  %v19127_v6 = vld [vmem:[%s28430_s5 + $0x3c] sm:$0xf] }
 0x801   : > { %v16734_v16 = vrot.slane %v16526_v28, 4  ;;  %v17258_v9 = vsel %vm16543_vm15, %v19125_v12, 0  ;;  %v17308_v59 = vsel %vm16543_vm15, %v19127_v6, 0 }
 0x802   : > { %v16530_v36 = vrot.slane %v16525_v0, 4 }
 0x803   : > { %v16736_v45 = vmax.f32 %v16526_v28, %v16734_v16 }
 0x804   : > { %v16532_v17 = vmax.f32 %v16525_v0, %v16530_v36 }
 0x805   : > { %v16737_v1 = vpack.c.bf16 %v16736_v45, %v16736_v45 }
 0x806   : > { %v16533_v33 = vpack.c.bf16 %v16532_v17, %v16532_v17  ;;  %v16516_v30 = vld [vmem:[#allocation4 + $0x30] ss:$2 sm:$0xff]  ;;  %v16524_v26 = vld [vmem:[#allocation4 + $0x31] ss:$2 sm:$0xff] }
 0x807   : > { %v16789_v14 = vshrl.u32 %v16737_v1, 16  ;;  %v16841_v61 = vrot.slane %v16737_v1, 1  ;;  %v16514_v21 = vld [vmem:[#allocation4 + $0x20] ss:$2 sm:$0xff]  ;;  %v16522_v62 = vld [vmem:[#allocation4 + $0x21] ss:$2 sm:$0xff]  ;;  %v16528_v42 = vmax.f32 %v16516_v30, %v16524_v26 }
 0x808   : > { %v16538_v35 = vshrl.u32 %v16533_v33, 16  ;;  %v16635_v8 = vrot.slane %v16533_v33, 1  ;;  %v16527_v29 = vmax.f32 %v16514_v21, %v16522_v62 }
 0x809   : > { %v16891_v37 = vrot.slane %v16789_v14, 1  ;;  %v17146_v49 = vrot.slane %v16528_v42, 4 }
 0x80a   : > { %20817 = vmatmul.mubr.msk.bf16.vlgmr.msra.gmra.mrb[40].mxu1 %vm16501_vm1, %v16538_v35  ;;  %v16685_v10 = vrot.slane %v16538_v35, 1  ;;  %v16940_v27 = vrot.slane %v16527_v29, 4 }
 0x80b   : > { %20821 = vmatpush3.bf16.msra.mxu1 %v16590_v31  ;;  %20822 = vmatprep.mubr.msk.bf16.mxu1 %vm22331_vm0, %v22330_v24  ;;  %v17148_v4 = vmax.f32 %v16528_v42, %v17146_v49 }
 0x80c   : > { %20826 = vmatprep.subr.bf16.mxu1 %v22330_v24  ;;  %v16942_v48 = vmax.f32 %v16527_v29, %v16940_v27 }
 0x80d   : > { %v17149_v11 = vpack.c.bf16 %v17148_v4, %v17148_v4 }
 0x80e   : > { %v16943_v22 = vpack.c.bf16 %v16942_v48, %v16942_v48 }
 0x80f   : > { %v17201_v47 = vshrl.u32 %v17149_v11, 16  ;;  %v17253_v19 = vrot.slane %v17149_v11, 1 }
 0x810   : > { %v16995_v58 = vshrl.u32 %v16943_v22, 16  ;;  %v17047_v46 = vrot.slane %v16943_v22, 1 }
 0x811   : > { %v17303_v0 = vrot.slane %v17201_v47, 1 }
 0x812   : > { %20823 = vmatmul.mubr.msk.bf16.vlgmr.msra.gmra.mrb[44].mxu1 %vm16501_vm1, %v16533_v33  ;;  %v17097_v23 = vrot.slane %v16995_v58, 1 }
 0x813   : > { %20827 = vmatpush3.bf16.msra.mxu1 %v16640_v32  ;;  %20828 = vmatprep.mubr.msk.bf16.mxu1 %vm22331_vm0, %v22330_v24 }
 0x814   : > { %20832 = vmatprep.subr.bf16.mxu1 %v22330_v24 }
 0x81a   : > { %20829 = vmatmul.mubr.msk.bf16.vlgmr.msra.gmra.mrb[48].mxu1 %vm16501_vm1, %v16635_v8 }
 0x81b   : > { %20833 = vmatpush3.bf16.msra.mxu1 %v16690_v54  ;;  %20834 = vmatprep.mubr.msk.bf16.mxu1 %vm22331_vm0, %v22330_v24 }
 0x81c   : > { %20838 = vmatprep.subr.bf16.mxu1 %v22330_v24 }
 0x822   : > { %20835 = vmatmul.mubr.msk.bf16.vlgmr.msra.gmra.mrb[52].mxu1 %vm16501_vm1, %v16685_v10 }
 0x823   : > { %20839 = vmatpush3.bf16.msra.mxu1 %v16744_v50  ;;  %20840 = vmatprep.mubr.msk.bf16.mxu1 %vm22331_vm0, %v22330_v24 }
 0x824   : > { %20844 = vmatprep.subr.bf16.mxu1 %v22330_v24 }
 0x82a   : > { %20841 = vmatmul.mubr.msk.bf16.vlgmr.msra.gmra.mrb[56].mxu1 %vm16501_vm1, %v16737_v1 }
 0x82b   : > { %20845 = vmatpush3.bf16.msra.mxu1 %v16795_v18  ;;  %20846 = vmatprep.mubr.msk.bf16.mxu1 %vm22331_vm0, %v22330_v24 }
 0x82c   : > { %20850 = vmatprep.subr.bf16.mxu1 %v22330_v24 }
 0x832   : > { %20847 = vmatmul.mubr.msk.bf16.vlgmr.msra.gmra.mrb[60].mxu1 %vm16501_vm1, %v16789_v14 }
 0x833   : > { %20851 = vmatpush3.bf16.msra.mxu1 %v16846_v2  ;;  %20852 = vmatprep.mubr.msk.bf16.mxu1 %vm22331_vm0, %v22330_v24 }
 0x834   : > { %20856 = vmatprep.subr.bf16.mxu1 %v22330_v24 }
 0x83a   : > { %20853 = vmatmul.mubr.msk.bf16.vlgmr.msra.gmra.mrb[64].mxu1 %vm16501_vm1, %v16841_v61 }
 0x83b   : > { %20857 = vmatpush3.bf16.msra.mxu1 %v16896_v34  ;;  %20858 = vmatprep.mubr.msk.bf16.mxu1 %vm22331_vm0, %v22330_v24 }
 0x83c   : > { %20862 = vmatprep.subr.bf16.mxu1 %v22330_v24 }
 0x842   : > { %20859 = vmatmul.mubr.msk.bf16.vlgmr.msra.gmra.mrb[68].mxu1 %vm16501_vm1, %v16891_v37 }
 0x843   : > { %20863 = vmatpush3.bf16.msra.mxu1 %v16950_v39  ;;  %20864 = vmatprep.mubr.msk.bf16.mxu1 %vm22331_vm0, %v22330_v24 }
 0x844   : > { %20868 = vmatprep.subr.bf16.mxu1 %v22330_v24 }
 0x84a   : > { %20865 = vmatmul.mubr.msk.bf16.vlgmr.msra.gmra.mrb[72].mxu1 %vm16501_vm1, %v16943_v22 }
 0x84b   : > { %20869 = vmatpush3.bf16.msra.mxu1 %v17001_v41  ;;  %20870 = vmatprep.mubr.msk.bf16.mxu1 %vm22331_vm0, %v22330_v24 }
 0x84c   : > { %20874 = vmatprep.subr.bf16.mxu1 %v22330_v24 }
 0x852   : > { %20871 = vmatmul.mubr.msk.bf16.vlgmr.msra.gmra.mrb[76].mxu1 %vm16501_vm1, %v16995_v58 }
 0x853   : > { %20875 = vmatpush3.bf16.msra.mxu1 %v17052_v57  ;;  %20876 = vmatprep.mubr.msk.bf16.mxu1 %vm22331_vm0, %v22330_v24 }
 0x854   : > { %20880 = vmatprep.subr.bf16.mxu1 %v22330_v24 }
 0x85a   : > { %20877 = vmatmul.mubr.msk.bf16.vlgmr.msra.gmra.mrb[80].mxu1 %vm16501_vm1, %v17047_v46 }
 0x85b   : > { %20881 = vmatpush3.bf16.msra.mxu1 %v17102_v51  ;;  %20882 = vmatprep.mubr.msk.bf16.mxu1 %vm22331_vm0, %v22330_v24 }
 0x85c   : > { %20886 = vmatprep.subr.bf16.mxu1 %v22330_v24 }
 0x862   : > { %20883 = vmatmul.mubr.msk.bf16.vlgmr.msra.gmra.mrb[84].mxu1 %vm16501_vm1, %v17097_v23 }
 0x863   : > { %20887 = vmatpush3.bf16.msra.mxu1 %v17156_v25  ;;  %20888 = vmatprep.mubr.msk.bf16.mxu1 %vm22331_vm0, %v22330_v24 }
 0x864   : > { %20892 = vmatprep.subr.bf16.mxu1 %v22330_v24 }
 0x86a   : > { %20889 = vmatmul.mubr.msk.bf16.vlgmr.msra.gmra.mrb[88].mxu1 %vm16501_vm1, %v17149_v11 }
 0x86b   : > { %20893 = vmatpush3.bf16.msra.mxu1 %v17207_v63  ;;  %20894 = vmatprep.mubr.msk.bf16.mxu1 %vm22331_vm0, %v22330_v24 }
 0x86c   : > { %20898 = vmatprep.subr.bf16.mxu1 %v22330_v24 }
 0x872   : > { %20895 = vmatmul.mubr.msk.bf16.vlgmr.msra.gmra.mrb[92].mxu1 %vm16501_vm1, %v17201_v47 }
 0x873   : > { %20899 = vmatpush3.bf16.msra.mxu1 %v17258_v9  ;;  %20900 = vmatprep.mubr.msk.bf16.mxu1 %vm22331_vm0, %v22330_v24 }
 0x874   : > { %20904 = vmatprep.subr.bf16.mxu1 %v22330_v24 }
 0x87a   : > { %20901 = vmatmul.mubr.msk.bf16.vlgmr.msra.gmra.mrb[96].mxu1 %vm16501_vm1, %v17253_v19 }
 0x87b   : > { %20905 = vmatpush3.bf16.msra.mxu1 %v17308_v59  ;;  %20906 = vmatprep.mubr.msk.bf16.mxu1 %vm22331_vm0, %v22330_v24 }
 0x882   : > { %20907 = vmatmul.mubr.msk.bf16.vlgmr.msra.gmra.mrb[100].mxu1 %vm16501_vm1, %v17303_v0 }
 0x8dd   : > { %v16581_v36 = vpop.f32.mrb[40].mxu1 }
 0x8de   : > { %v20818_v17 = vpop.f32.mrb[41].mxu1 }
 0x8df   : > { %v16584_v15 = vpop.f32.mrb[42].mxu1 }
 0x8e0   : > { %v20819_v33 = vpop.f32.mrb[43].mxu1 }
 0x8e5   : > { %v16626_v35 = vpop.f32.mrb[44].mxu1 }
 0x8e6   : > { %v16627_v31 = vadd.f32 %v16626_v35, %v16581_v36  ;;  %v20824_v3 = vpop.f32.mrb[45].mxu1 }
 0x8e7   : > { %v16629_v32 = vpop.f32.mrb[46].mxu1 }
 0x8e8   : > { %v20825_v52 = vpop.f32.mrb[47].mxu1 }
 0x8ed   : > { %v16676_v8 = vpop.f32.mrb[48].mxu1 }
 0x8ee   : > { %v16682_v54 = vadd.f32 %v16676_v8, %v16627_v31  ;;  %v20830_v5 = vpop.f32.mrb[49].mxu1 }
 0x8ef   : > { %v16679_v53 = vpop.f32.mrb[50].mxu1  ;;  %v17351_v5 = vld [vmem:[%s28431_s6] sm:$0x1] }
 0x8f0   : > { %v20831_v28 = vpop.f32.mrb[51].mxu1 }
 0x8f5   : > { %v16726_v60 = vpop.f32.mrb[52].mxu1 }
 0x8f6   : > { %v16732_v10 = vadd.f32 %v16726_v60, %v16682_v54  ;;  %v20836_v24 = vpop.f32.mrb[53].mxu1 }
 0x8f7   : > { %v16729_v50 = vpop.f32.mrb[54].mxu1 }
 0x8f8   : > { %v20837_v16 = vpop.f32.mrb[55].mxu1 }
 0x8fd   : > { %v16780_v45 = vpop.f32.mrb[56].mxu1 }
 0x8fe   : > { %v16786_v43 = vadd.f32 %v16780_v45, %v16732_v10  ;;  %v20842_v1 = vpop.f32.mrb[57].mxu1 }
 0x8ff   : > { %v16783_v18 = vpop.f32.mrb[58].mxu1 }
 0x900   : > { %v20843_v38 = vpop.f32.mrb[59].mxu1 }
 0x905   : > { %v16831_v14 = vpop.f32.mrb[60].mxu1 }
 0x906   : > { %v16837_v2 = vadd.f32 %v16831_v14, %v16786_v43  ;;  %v20848_v13 = vpop.f32.mrb[61].mxu1 }
 0x907   : > { %v16834_v61 = vpop.f32.mrb[62].mxu1 }
 0x908   : > { %v20849_v34 = vpop.f32.mrb[63].mxu1 }
 0x90d   : > { %v16882_v21 = vpop.f32.mrb[64].mxu1 }
 0x90e   : > { %v16888_v62 = vadd.f32 %v16882_v21, %v16837_v2  ;;  %v20854_v29 = vpop.f32.mrb[65].mxu1 }
 0x90f   : > { %v16885_v55 = vpop.f32.mrb[66].mxu1 }
 0x910   : > { %v20855_v37 = vpop.f32.mrb[67].mxu1 }
 0x915   : > { %v16932_v39 = vpop.f32.mrb[68].mxu1 }
 0x916   : > { %v16938_v27 = vadd.f32 %v16932_v39, %v16888_v62  ;;  %v20860_v48 = vpop.f32.mrb[69].mxu1 }
 0x917   : > { %v16935_v7 = vpop.f32.mrb[70].mxu1 }
 0x918   : > { %v20861_v22 = vpop.f32.mrb[71].mxu1 }
 0x91d   : > { %v16986_v41 = vpop.f32.mrb[72].mxu1 }
 0x91e   : > { %v16992_v44 = vadd.f32 %v16986_v41, %v16938_v27  ;;  %v20866_v58 = vpop.f32.mrb[73].mxu1 }
 0x91f   : > { %v16989_v57 = vpop.f32.mrb[74].mxu1 }
 0x920   : > { %v20867_v40 = vpop.f32.mrb[75].mxu1 }
 0x925   : > { %v17037_v46 = vpop.f32.mrb[76].mxu1 }
 0x926   : > { %v17043_v51 = vadd.f32 %v17037_v46, %v16992_v44  ;;  %v20872_v30 = vpop.f32.mrb[77].mxu1 }
 0x927   : > { %v17040_v26 = vpop.f32.mrb[78].mxu1 }
 0x928   : > { %v20873_v42 = vpop.f32.mrb[79].mxu1 }
 0x92d   : > { %v17088_v20 = vpop.f32.mrb[80].mxu1 }
 0x92e   : > { %v17094_v23 = vadd.f32 %v17088_v20, %v17043_v51  ;;  %v20878_v25 = vpop.f32.mrb[81].mxu1 }
 0x92f   : > { %v17091_v49 = vpop.f32.mrb[82].mxu1 }
 0x930   : > { %v20879_v4 = vpop.f32.mrb[83].mxu1 }
 0x935   : > { %v17138_v56 = vpop.f32.mrb[84].mxu1 }
 0x936   : > { %v17144_v11 = vadd.f32 %v17138_v56, %v17094_v23  ;;  %v20884_v63 = vpop.f32.mrb[85].mxu1 }
 0x937   : > { %v17141_v12 = vpop.f32.mrb[86].mxu1 }
 0x938   : > { %v20885_v47 = vpop.f32.mrb[87].mxu1 }
 0x93d   : > { %v17192_v9 = vpop.f32.mrb[88].mxu1 }
 0x93e   : > { %v17198_v6 = vadd.f32 %v17192_v9, %v17144_v11  ;;  %v20890_v19 = vpop.f32.mrb[89].mxu1 }
 0x93f   : > { %v17195_v59 = vpop.f32.mrb[90].mxu1 }
 0x940   : > { %v20891_v0 = vpop.f32.mrb[91].mxu1 }
 0x945   : > { %v17243_v36 = vpop.f32.mrb[92].mxu1 }
 0x946   : > { %v17249_v17 = vadd.f32 %v17243_v36, %v17198_v6  ;;  %v20896_v15 = vpop.f32.mrb[93].mxu1 }
 0x947   : > { %v17246_v33 = vpop.f32.mrb[94].mxu1 }
 0x948   : > { %v20897_v35 = vpop.f32.mrb[95].mxu1 }
 0x94d   : > { %v17294_v31 = vpop.f32.mrb[96].mxu1 }
 0x94e   : > { %v17300_v3 = vadd.f32 %v17294_v31, %v17249_v17  ;;  %v20902_v32 = vpop.f32.mrb[97].mxu1 }
 0x94f   : > { %v17297_v52 = vpop.f32.mrb[98].mxu1 }
 0x950   : > { %v20903_v8 = vpop.f32.mrb[99].mxu1 }
 0x955   : > { %v17344_v54 = vpop.f32.mrb[100].mxu1 }
 0x956   : > { %v17350_v53 = vadd.f32 %v17344_v54, %v17300_v3  ;;  %v20908_v28 = vpop.f32.mrb[101].mxu1 }
 0x957   : > { %v17347_v60 = vpop.f32.mrb[102].mxu1 }
 0x958   : > { %v17352_v10 = vadd.f32 %v17351_v5, %v17350_v53  ;;  %v20909_v24 = vpop.f32.mrb[103].mxu1 }
 0x95a   : > { %17353 = vst [vmem:[%s270_s13] sm:$0x1] %v17352_v10 }
 0x95b   : > { %22279 = shalt.err (!%p22276_p3)
}
 0x95c   : > { %s22280_s21 = scalar_lea.hbm %s28383_s17, 16  ;;  %s22284_s29 = scalar_lea.hbm %s28432_s7, 32 }
 0x95d   : > { %p22281_p4 = scmp.ne.s32.totalorder %s28383_s17, %s22280_s21  ;;  %p22285_p9 = scmp.lt.u32.totalorder %s28383_s17, %s28432_s7 }
 0x95e   : > { %p22286_p10 = scmp.lt.u32.totalorder %s22284_s29, %s22280_s21  ;;  %p22288_p12 = scmp.lt.u32.totalorder %s22280_s21, %s28383_s17 }
 0x95f   : > { %p22282_p7 = pnand %p22281_p4, %p22411_p5 }
 0x960   : > { %p22287_p11 = por %p22286_p10, %p22285_p9 }
 0x961   : > { %p22283_p8 = pneg %p22282_p7 }
 0x962   : > { %p22289_p13 = por %p22288_p12, %p22287_p11 }
 0x964   : > { %p22290_p0 = pnand %p22289_p13, %p22283_p8 }
 0x966   : > { %22293 = shalt.err (!%p22290_p0)
}
 0x967   : > { %21899 = dma.vmem_to_hbm [thread:$0]  (%p22411_p5), %s28385_s14, 16, %s28383_s17, %s17355_s18  }
 0x968 PF: > { %p21905_p1 = scmp.ge.s32.totalorder %s22328_s27, 2  ;;  %s17379_s15 = sand.u32 1, %s22316_s24  }
 0x969   : > { %s17380_s16 = scalar_lea.sflag [#allocation6], %s17379_s15 }
 0x96a   : > { %p21902_p2 = pnand %p21905_p1, %p22415_p6 }
 0x96c   : > { %22311 = dma.done.wait (!%p21902_p2), %s17380_s16, 16  }
 0x96d   : > { %22313 = vsyncadd (!%p21902_p2), %s17380_s16, 4294967280  ;;  %p17_p3 = scmp.ge.s32.totalorder %s22398_s30, 4   ;;  %s29034_s24 = smov %s22320_s25 }
 0x96e   : > { %s29035_s25 = smov %s22324_s26  ;;  %s29036_s26 = smov %s22409_s10 }
 0x96f   : > { %s29037_s27 = smov %s22398_s30  ;;  %19 = sbr.rel (!%p17_p3) target bundleno = 3 (0x3), region = 197 }
 0x976   :  { %17384 = vsyncpa [#allocation6], 1 }
 0x977   :  { %17386 = vsyncpa [#allocation6 + $0x1], 1 }

</bundles_post_ra>
